<compile_context>
chip_gen: v5e
topology: v5e:2x2
jax: 0.10.0
libtpu: 0.0.40
codegen_flags: <defaults>
</compile_context>

<pallas_src>
import functools
import math

import jax
import jax.numpy as jnp
from jax.experimental import pallas as pl
from jax.experimental.pallas import tpu as pltpu


# ---------------------------------------------------------------------------
# Kernels
# ---------------------------------------------------------------------------

def _fused_gcn_kernel(x_ref, adj_ref, degm1_ref, w_ref, b_ref, out_ref, h_ref):
    """One grid step == one GCN layer; activations live in the bf16 h_ref scratch."""
    l = pl.program_id(0)

    @pl.when(l == 0)
    def _():
        h_ref[...] = x_ref[...]                      # layer-0 input features (bf16)

    # support = h @ (W_l / nfeat)   (W pre-scaled & bf16), f32 accumulation on the MXU.
    s = jnp.dot(h_ref[...], w_ref[0], preferred_element_type=jnp.float32)
    # L @ s = (deg - 1) * s - adj @ s       with L = diag(deg) - adj - I.
    t = jnp.dot(adj_ref[...], s.astype(jnp.bfloat16),
                preferred_element_type=jnp.float32)
    h = jnp.maximum(degm1_ref[...] * s - t + b_ref[0], 0.0)   # bias + ReLU, f32 VPU
    h_ref[...] = h.astype(jnp.bfloat16)              # next layer's MXU LHS (Dropout=id)
    out_ref[...] = h                                 # resident; flushed after last layer


def _agg_kernel(adj_ref, sup_ref, degm1_ref, b_ref, out_ref, *, tm):
    """Row-tiled aggregation + bias + ReLU (last layer of the tiled fallback)."""
    r = pl.multiple_of(pl.program_id(0) * tm, tm)
    s_rows = sup_ref[pl.ds(r, tm), :].astype(jnp.float32)        # rows already resident
    t = jnp.dot(adj_ref[...], sup_ref[...], preferred_element_type=jnp.float32)
    out_ref[...] = jnp.maximum(degm1_ref[...] * s_rows - t + b_ref[...], 0.0)


def _agg_next_support_kernel(adj_ref, sup_ref, degm1_ref, b_ref, w_next_ref, out_ref,
                             *, tm):
    """Row-tiled aggregation + ReLU fused with the NEXT layer's support (emitted bf16)."""
    r = pl.multiple_of(pl.program_id(0) * tm, tm)
    s_rows = sup_ref[pl.ds(r, tm), :].astype(jnp.float32)
    t = jnp.dot(adj_ref[...], sup_ref[...], preferred_element_type=jnp.float32)
    h = jnp.maximum(degm1_ref[...] * s_rows - t + b_ref[...], 0.0)
    out_ref[...] = jnp.dot(h.astype(jnp.bfloat16), w_next_ref[...],
                           preferred_element_type=jnp.float32).astype(jnp.bfloat16)


# ---------------------------------------------------------------------------
# Tiling / VMEM bookkeeping
# ---------------------------------------------------------------------------

def _vmem_budget():
    """Usable VMEM budget for this generation (v7x: 64 MiB/TC, v5e/v6e: 128 MiB)."""
    cap = 64 * 2**20                                  # conservative default (v7x per-TC)
    try:
        info = pltpu.get_tpu_info()
        cap = int(getattr(info, "vmem_capacity_bytes", cap)) or cap
    except Exception:
        pass
    return int(min(max(cap * 0.85, 32 * 2**20), 110 * 2**20))


def _const_spec(block_shape, index_map):
    """Constant-index block: single-buffered where the jax version supports it."""
    try:
        return pl.BlockSpec(block_shape, index_map, pipeline_mode=pl.Buffered(1))
    except Exception:
        return pl.BlockSpec(block_shape, index_map)


def _fused_vmem_bytes(n, nfeat):
    """Fused-kernel VMEM working set estimate, including in-kernel temporaries."""
    return (n * nfeat * 2                              # x (bf16, single buffered)
            + n * n * 2                                # adj (bf16, single buffered)
            + n * 128 * 4                              # deg-1 (f32, lane padded)
            + 2 * n * nfeat * 4                        # output block (f32)
            + n * nfeat * 2                            # h scratch (bf16)
            + 2 * (nfeat * nfeat * 2 + nfeat * 4)      # W_l / b_l (double buffered)
            + n * nfeat * (4 + 2 + 4 + 4)              # s f32, s bf16, t f32, h f32 temps
            + (4 << 20))                               # compiler-internal scratch margin


def _pick_row_tile(n, nfeat, budget, max_tm=512):
    """Largest row tile (multiple of 16, divides n) whose working set fits the budget."""
    fixed = (n * nfeat * 2                             # resident bf16 support (1 buffer)
             + nfeat * nfeat * 2 + nfeat * 4           # next-layer W, bias (1 buffer)
             + (2 << 20))                              # compiler margin
    per_row = (2 * n * 2                               # adj row tile (bf16, 2 buffers)
               + 2 * nfeat * 4                         # output tile (f32 worst, 2 buffers)
               + 2 * 4                                 # deg-1 tile
               + nfeat * 16)                           # in-kernel f32/bf16 temporaries
    avail = budget - fixed
    if avail < 16 * per_row:
        # TODO(synk): add the K-tiled aggregation fallback instead of giving up here.
        raise NotImplementedError("graph too large for the row-tiled GCN path")
    tm = min(n, max_tm, (avail // per_row) // 16 * 16)
    tm = max(16, tm)
    while n % tm:
        tm -= 16
    return tm


# ---------------------------------------------------------------------------
# Forward
# ---------------------------------------------------------------------------

def _fused_forward(x_bf16, adj_bf16, degm1, w_bf16, b_f32, budget):
    n, nfeat = x_bf16.shape
    layers = w_bf16.shape[0]
    const2 = lambda l: (0, 0)
    per_layer = lambda l: (l, 0, 0)
    return pl.pallas_call(
        _fused_gcn_kernel,
        out_shape=jax.ShapeDtypeStruct((n, nfeat), jnp.float32),
        grid=(layers,),
        in_specs=[
            _const_spec((n, nfeat), const2),           # x (bf16), VMEM resident
            _const_spec((n, n), const2),               # adj (bf16), VMEM resident
            _const_spec((n, 1), const2),               # deg - 1 (f32), VMEM resident
            pl.BlockSpec((1, nfeat, nfeat), per_layer),  # W_l (bf16), streamed per layer
            pl.BlockSpec((1, 1, nfeat), per_layer),      # b_l (f32), streamed per layer
        ],
        out_specs=pl.BlockSpec((n, nfeat), const2),
        scratch_shapes=[pltpu.VMEM((n, nfeat), jnp.bfloat16)],   # layer activations
        compiler_params=pltpu.CompilerParams(
            dimension_semantics=("arbitrary",),        # layers are sequentially dependent
            vmem_limit_bytes=budget),
    )(x_bf16, adj_bf16, degm1, w_bf16, b_f32)


def _tiled_forward(x_bf16, adj_bf16, degm1, w_bf16, b_f32, budget):
    """Row-tiled per-layer fallback for graphs whose adjacency does not fit VMEM."""
    n, nfeat = x_bf16.shape
    layers = w_bf16.shape[0]
    tm = _pick_row_tile(n, nfeat, budget)
    grid = (n // tm,)
    cp = pltpu.CompilerParams(dimension_semantics=("parallel",),
                              vmem_limit_bytes=budget)
    row2 = lambda i: (i, 0)
    const2 = lambda i: (0, 0)

    adj_spec = pl.BlockSpec((tm, n), row2)                 # streamed, double buffered
    sup_spec = _const_spec((n, nfeat), const2)             # full support, resident bf16
    deg_spec = pl.BlockSpec((tm, 1), row2)
    b_spec = _const_spec((1, nfeat), const2)
    w_spec = _const_spec((nfeat, nfeat), const2)
    out_spec = pl.BlockSpec((tm, nfeat), row2)

    # Layer-0 support: one small XLA matmul (no dedicated kernel launch), emitted bf16.
    sup = jnp.dot(x_bf16, w_bf16[0],
                  preferred_element_type=jnp.float32).astype(jnp.bfloat16)

    # Layers 0 .. layers-2: aggregation + ReLU fused with the NEXT layer's support.
    for l in range(layers - 1):
        sup = pl.pallas_call(
            functools.partial(_agg_next_support_kernel, tm=tm),
            out_shape=jax.ShapeDtypeStruct((n, nfeat), jnp.bfloat16),
            grid=grid,
            in_specs=[adj_spec, sup_spec, deg_spec, b_spec, w_spec],
            out_specs=out_spec,
            compiler_params=cp,
        )(adj_bf16, sup, degm1, b_f32[l], w_bf16[l + 1])

    # Final layer: aggregation + bias + ReLU only (f32 output).
    return pl.pallas_call(
        functools.partial(_agg_kernel, tm=tm),
        out_shape=jax.ShapeDtypeStruct((n, nfeat), jnp.float32),
        grid=grid,
        in_specs=[adj_spec, sup_spec, deg_spec, b_spec],
        out_specs=out_spec,
        compiler_params=cp,
    )(adj_bf16, sup, degm1, b_f32[layers - 1])


def gcn_forward(x, adj_bf16, w_scaled_bf16, biases_f32, *, force_tiled=False):
    """GCN forward: x (n, nfeat) f32, adj (n, n) bf16 0/1,
    w_scaled (layers, nfeat, nfeat) bf16 (already / nfeat), biases (layers, 1, nfeat) f32."""
    n, nfeat = x.shape
    assert adj_bf16.shape == (n, n)
    assert n % 16 == 0, "node count must be a multiple of 16 (bf16 sublane tiling)"
    assert nfeat % 128 == 0, "nfeat must be a multiple of 128 (lane-dense blocks)"

    budget = _vmem_budget()
    x_bf16 = x.astype(jnp.bfloat16)
    # Column sums of adj (torch.sum(adj, dim=0)); the "-1" folds the -I term of L.
    degm1 = (jnp.sum(adj_bf16, axis=0, dtype=jnp.float32) - 1.0).reshape(n, 1)

    if not force_tiled and _fused_vmem_bytes(n, nfeat) <= budget:
        return _fused_forward(x_bf16, adj_bf16, degm1, w_scaled_bf16, biases_f32, budget)
    return _tiled_forward(x_bf16, adj_bf16, degm1, w_scaled_bf16, biases_f32, budget)


# ---------------------------------------------------------------------------
# Parameters / reference
# ---------------------------------------------------------------------------

def init_gcn_params(key, nfeat, layers):
    """Matches GraphConvolution.reset_parameters: uniform(-stdv, stdv), stdv = 1/sqrt(out)."""
    stdv = 1.0 / math.sqrt(nfeat)
    kw, kb = jax.random.split(key)
    weights = jax.random.uniform(
        kw, (layers, nfeat, nfeat), minval=-stdv, maxval=stdv, dtype=jnp.float32)
    biases = jax.random.uniform(
        kb, (layers, 1, nfeat), minval=-stdv, maxval=stdv, dtype=jnp.float32)
    return weights, biases


def prepare_gcn_params(weights, biases, nfeat):
    """One-time prep (NOT per call): fold the 1/nfeat scale into W and cast to bf16."""
    w_scaled = (weights / float(nfeat)).astype(jnp.bfloat16)
    return w_scaled, biases.astype(jnp.float32)


def gcn_reference(x, adj, weights, biases):
    """Pure-JAX f32 reference of the PyTorch forward."""
    n = adj.shape[0]
    nfeat = x.shape[1]
    hi = jax.lax.Precision.HIGHEST
    L = jnp.diag(jnp.sum(adj, axis=0)) - adj - jnp.eye(n, dtype=adj.dtype)
    h = x
    for l in range(weights.shape[0]):
        support = jnp.dot(h, weights[l], precision=hi) / nfeat
        h = jnp.maximum(jnp.dot(L, support, precision=hi) + biases[l], 0.0)
    return h


if __name__ == "__main__":
    key = jax.random.PRNGKey(0)
    k_x, k_adj, k_p = jax.random.split(key, 3)

    # Sizes chosen so the fused path is exercised with a 3-step layer grid AND the
    # row-tiled fallback runs a genuine 2-tile grid (n=1024, max_tm=512).
    n_nodes = 1024
    nfeat = 128
    layers = 3

    x = jax.random.normal(k_x, (n_nodes, nfeat), dtype=jnp.float32)
    # sparse-ish symmetric 0/1 adjacency, no self loops (molecular-graph-like density)
    raw = jax.random.uniform(k_adj, (n_nodes, n_nodes))
    adj = (raw + raw.T > 1.5).astype(jnp.float32)
    adj = adj * (1.0 - jnp.eye(n_nodes, dtype=jnp.float32))

    weights, biases = init_gcn_params(k_p, nfeat, layers)

    # one-time data/parameter prep: bf16 adjacency (0/1 -> exact), scaled bf16 weights
    adj_bf16 = adj.astype(jnp.bfloat16)
    w_scaled, b_f32 = prepare_gcn_params(weights, biases, nfeat)

    ref = gcn_reference(x, adj, weights, biases)

    # Fused single-kernel path (auto-selected whenever everything fits VMEM).
    gcn_fused = jax.jit(gcn_forward)
    out = jax.block_until_ready(gcn_fused(x, adj_bf16, w_scaled, b_f32))
    assert out.shape == (n_nodes, nfeat)
    err = float(jnp.max(jnp.abs(out - ref)))
    assert jnp.allclose(out, ref, atol=5e-2, rtol=5e-2), (
        f"fused path mismatch vs reference (max abs err {err})")

    # Row-tiled fallback path (used for graphs whose adjacency does not fit VMEM).
    gcn_tiled = jax.jit(functools.partial(gcn_forward, force_tiled=True))
    out_t = jax.block_until_ready(gcn_tiled(x, adj_bf16, w_scaled, b_f32))
    err_t = float(jnp.max(jnp.abs(out_t - ref)))
    assert jnp.allclose(out_t, ref, atol=5e-2, rtol=5e-2), (
        f"tiled path mismatch vs reference (max abs err {err_t})")

    print("KERNEL_OK")
</pallas_src>

<mosaic_0001>
module attributes {stable_mosaic.version = 11 : i64} {
  func.func @_fused_gcn_kernel(%arg0: i32, %arg1: memref<1024x128xbf16, #tpu.memory_space<vmem>>, %arg2: memref<1024x1024xbf16, #tpu.memory_space<vmem>>, %arg3: memref<1024x1xf32, #tpu.memory_space<vmem>>, %arg4: memref<1x128x128xbf16, #tpu.memory_space<vmem>>, %arg5: memref<1x1x128xf32, #tpu.memory_space<vmem>>, %arg6: memref<1024x128xf32, #tpu.memory_space<vmem>>, %arg7: memref<1024x128xbf16, #tpu.memory_space<vmem>>) attributes {dimension_semantics = [#tpu.dimension_semantics<arbitrary>], iteration_bounds = array<i64: 3>, scalar_prefetch = 0 : i64, scratch_operands = 1 : i64, tpu.core_type = #tpu.core_type<tc>, window_params = [{pipeline_mode = #tpu.pipeline_mode<synchronous>, transform_indices = @transform_0, window_bounds = array<i64: 1024, 128>}, {pipeline_mode = #tpu.pipeline_mode<synchronous>, transform_indices = @transform_1, window_bounds = array<i64: 1024, 1024>}, {pipeline_mode = #tpu.pipeline_mode<synchronous>, transform_indices = @transform_2, window_bounds = array<i64: 1024, 1>}, {transform_indices = @transform_3, window_bounds = array<i64: 1, 128, 128>}, {transform_indices = @transform_4, window_bounds = array<i64: 1, 1, 128>}, {pipeline_mode = #tpu.pipeline_mode<synchronous>, transform_indices = @transform_5, window_bounds = array<i64: 1024, 128>}]} {
    %c0_i32 = arith.constant 0 : i32
    %0 = arith.cmpi eq, %arg0, %c0_i32 : i32
    %1 = arith.extui %0 : i1 to i32
    %c0_i32_0 = arith.constant 0 : i32
    %2 = arith.cmpi ne, %1, %c0_i32_0 : i32
    scf.if %2 {
      %c0_18 = arith.constant 0 : index
      %c0_19 = arith.constant 0 : index
      %23 = vector.load %arg1[%c0_18, %c0_19] : memref<1024x128xbf16, #tpu.memory_space<vmem>>, vector<1024x128xbf16>
      %c0_20 = arith.constant 0 : index
      %c0_21 = arith.constant 0 : index
      %24 = vector.load %arg7[%c0_20, %c0_21] : memref<1024x128xbf16, #tpu.memory_space<vmem>>, vector<1024x128xbf16>
      tpu.vector_store %arg7[%c0_20, %c0_21], %23 {strides = array<i32>} : memref<1024x128xbf16, #tpu.memory_space<vmem>>, vector<1024x128xbf16>,
    } else {
    }
    %c0 = arith.constant 0 : index
    %c0_1 = arith.constant 0 : index
    %3 = vector.load %arg7[%c0, %c0_1] : memref<1024x128xbf16, #tpu.memory_space<vmem>>, vector<1024x128xbf16>
    %c0_2 = arith.constant 0 : index
    %c0_3 = arith.constant 0 : index
    %c0_4 = arith.constant 0 : index
    %4 = vector.load %arg4[%c0_2, %c0_3, %c0_4] : memref<1x128x128xbf16, #tpu.memory_space<vmem>>, vector<1x128x128xbf16>
    %5 = vector.shape_cast %4 : vector<1x128x128xbf16> to vector<128x128xbf16>
    %cst = arith.constant dense<0.000000e+00> : vector<1024x128xf32>
    %6 = tpu.matmul %3, %5, %cst {dimension_numbers = #tpu.dot_dimension_numbers<[1], [0], [0], [1], [0, 0, 1, 1], [], []>} : vector<1024x128xbf16>, vector<128x128xbf16>, vector<1024x128xf32> -> vector<1024x128xf32>
    %c0_5 = arith.constant 0 : index
    %c0_6 = arith.constant 0 : index
    %7 = vector.load %arg2[%c0_5, %c0_6] : memref<1024x1024xbf16, #tpu.memory_space<vmem>>, vector<1024x1024xbf16>
    %8 = arith.truncf %6 : vector<1024x128xf32> to vector<1024x128xbf16>
    %cst_7 = arith.constant dense<0.000000e+00> : vector<1024x128xf32>
    %9 = tpu.matmul %7, %8, %cst_7 {dimension_numbers = #tpu.dot_dimension_numbers<[1], [0], [0], [1], [0, 0, 1, 1], [], []>} : vector<1024x1024xbf16>, vector<1024x128xbf16>, vector<1024x128xf32> -> vector<1024x128xf32>
    %c0_8 = arith.constant 0 : index
    %c0_9 = arith.constant 0 : index
    %10 = vector.load %arg3[%c0_8, %c0_9] : memref<1024x1xf32, #tpu.memory_space<vmem>>, vector<1024x1xf32>
    %11 = vector.broadcast %10 : vector<1024x1xf32> to vector<1024x128xf32>
    %12 = arith.mulf %11, %6 : vector<1024x128xf32>
    %13 = arith.subf %12, %9 : vector<1024x128xf32>
    %c0_10 = arith.constant 0 : index
    %c0_11 = arith.constant 0 : index
    %c0_12 = arith.constant 0 : index
    %14 = vector.load %arg5[%c0_10, %c0_11, %c0_12] : memref<1x1x128xf32, #tpu.memory_space<vmem>>, vector<1x1x128xf32>
    %15 = vector.shape_cast %14 : vector<1x1x128xf32> to vector<1x128xf32>
    %16 = vector.broadcast %15 : vector<1x128xf32> to vector<1024x128xf32>
    %17 = arith.addf %13, %16 : vector<1024x128xf32>
    %cst_13 = arith.constant 0.000000e+00 : f32
    %18 = vector.broadcast %cst_13 : f32 to vector<1024x128xf32>
    %19 = arith.maximumf %17, %18 : vector<1024x128xf32>
    %20 = arith.truncf %19 : vector<1024x128xf32> to vector<1024x128xbf16>
    %c0_14 = arith.constant 0 : index
    %c0_15 = arith.constant 0 : index
    %21 = vector.load %arg7[%c0_14, %c0_15] : memref<1024x128xbf16, #tpu.memory_space<vmem>>, vector<1024x128xbf16>
    tpu.vector_store %arg7[%c0_14, %c0_15], %20 {strides = array<i32>} : memref<1024x128xbf16, #tpu.memory_space<vmem>>, vector<1024x128xbf16>,
    %c0_16 = arith.constant 0 : index
    %c0_17 = arith.constant 0 : index
    %22 = vector.load %arg6[%c0_16, %c0_17] : memref<1024x128xf32, #tpu.memory_space<vmem>>, vector<1024x128xf32>
    tpu.vector_store %arg6[%c0_16, %c0_17], %19 {strides = array<i32>} : memref<1024x128xf32, #tpu.memory_space<vmem>>, vector<1024x128xf32>,
    return
  }
  func.func @transform_0(%arg0: i32) -> (i32, i32) {
    %c0_i32 = arith.constant 0 : i32
    %c0_i32_0 = arith.constant 0 : i32
    %c0_i32_1 = arith.constant 0 : i32
    return %c0_i32, %c0_i32_0 : i32, i32
  }
  func.func @transform_1(%arg0: i32) -> (i32, i32) {
    %c0_i32 = arith.constant 0 : i32
    %c0_i32_0 = arith.constant 0 : i32
    %c0_i32_1 = arith.constant 0 : i32
    return %c0_i32, %c0_i32_0 : i32, i32
  }
  func.func @transform_2(%arg0: i32) -> (i32, i32) {
    %c0_i32 = arith.constant 0 : i32
    %c0_i32_0 = arith.constant 0 : i32
    %c0_i32_1 = arith.constant 0 : i32
    return %c0_i32, %c0_i32_0 : i32, i32
  }
  func.func @transform_3(%arg0: i32) -> (i32, i32, i32) {
    %c0_i32 = arith.constant 0 : i32
    %c0_i32_0 = arith.constant 0 : i32
    %c0_i32_1 = arith.constant 0 : i32
    return %arg0, %c0_i32, %c0_i32_0 : i32, i32, i32
  }
  func.func @transform_4(%arg0: i32) -> (i32, i32, i32) {
    %c0_i32 = arith.constant 0 : i32
    %c0_i32_0 = arith.constant 0 : i32
    %c0_i32_1 = arith.constant 0 : i32
    return %arg0, %c0_i32, %c0_i32_0 : i32, i32, i32
  }
  func.func @transform_5(%arg0: i32) -> (i32, i32) {
    %c0_i32 = arith.constant 0 : i32
    %c0_i32_0 = arith.constant 0 : i32
    %c0_i32_1 = arith.constant 0 : i32
    return %c0_i32, %c0_i32_0 : i32, i32
  }
}

</mosaic_0001>

<bundles_post_ra>
// kernel: gcn_forward.1
= control target key start
LH: loop header
LB: loop body
LE: loop exit
PB: predicated region body
PF: predicated region fallthrough
CT: control target
= control target key end

     0   :  { %10 = vsyncpa [#allocation4], 0  ;;  %s12325_s18 = smov 0   ;;  %s18517_s0 = inlined_call_operand.vmem [shape: bf16[1024,128], index: 0, kind: input, shape index: {}]   ;;  %s18518_s1 = inlined_call_operand.vmem [shape: bf16[1024,1024], index: 1, kind: input, shape index: {}]   ;;  %s18519_s2 = inlined_call_operand.vmem [shape: f32[1024,1], index: 2, kind: input, shape index: {}]   ;;  %s18520_s3 = inlined_call_operand.vmem [shape: bf16[3,128,128], index: 3, kind: input, shape index: {}]   ;;  %s18521_s4 = inlined_call_operand.vmem [shape: f32[3,1,128], index: 4, kind: input, shape index: {}]   ;;  %s18522_s5 = inlined_call_operand.hbm [shape: f32[1024,128], index: 5, kind: output, shape index: {}]  }
   0x1 LB: > { %s12331_s19 = sadd.s32 4294967295, %s12289_s18   ;;  %p8888_p0 = scmp.ge.s32.totalorder %s12289_s18, 1  ;;  %s12289_s18 = sphi %s12325_s18, %s16_s18  }
   0x2   : > { %p191_p1 = scmp.lt.s32.totalorder %s12289_s18, 4 }
   0x4   : > { %p192_p2 = pnand %p8888_p0, %p191_p1 }
   0x6   : > { %195 = sbr.rel (%p192_p2) target bundleno = 2716 (0xa9c), region = 40 }
   0xb   : > { %p217_p3 = scmp.lt.s32.totalorder %s12331_s19, 2  ;;  %p8891_p4 = scmp.ne.s32.totalorder %s12331_s19, 0 }
   0xd   : > { %s218_s20 = scalar_select %p217_p3, %s12331_s19, 2 }
   0xe   : > { %228 = sbr.rel (%p8891_p4) target bundleno = 84 (0x54), region = 44 }
   0xf   : > { %s11232_s21 = sshll.u32 %s218_s20, 6  ;;  %s12340_s24 = scalar_lea.vmem %s18521_s4, %s218_s20 }
  0x10   : > { %s12345_s27 = scalar_lea.vmem %s18520_s3, %s11232_s21 }
  0x13   : > { %v229_v0 = vld [vmem:[%s18517_s0] sm:$0xff]   ;;  %v231_v1 = vld [vmem:[%s18517_s0 + $0x8] sm:$0xff]   ;;  %v233_v2 = vld [vmem:[%s18517_s0 + $0x10] sm:$0xff]  }
  0x14   : > { %357 = vst [vmem:[#allocation2] sm:$0xff] %v229_v0   ;;  %v235_v3 = vld [vmem:[%s18517_s0 + $0x18] sm:$0xff]   ;;  %v237_v4 = vld [vmem:[%s18517_s0 + $0x20] sm:$0xff]   ;;  %v239_v5 = vld [vmem:[%s18517_s0 + $0x28] sm:$0xff]  }
  0x15   : > { %359 = vst [vmem:[#allocation2 + $0x8] sm:$0xff] %v231_v1   ;;  %v241_v6 = vld [vmem:[%s18517_s0 + $0x30] sm:$0xff]   ;;  %v243_v7 = vld [vmem:[%s18517_s0 + $0x38] sm:$0xff]   ;;  %v245_v8 = vld [vmem:[%s18517_s0 + $0x40] sm:$0xff]  }
  0x16   : > { %361 = vst [vmem:[#allocation2 + $0x10] sm:$0xff] %v233_v2   ;;  %v247_v9 = vld [vmem:[%s18517_s0 + $0x48] sm:$0xff]   ;;  %v249_v10 = vld [vmem:[%s18517_s0 + $0x50] sm:$0xff]   ;;  %v251_v11 = vld [vmem:[%s18517_s0 + $0x58] sm:$0xff]  }
  0x17   : > { %363 = vst [vmem:[#allocation2 + $0x18] sm:$0xff] %v235_v3   ;;  %v253_v12 = vld [vmem:[%s18517_s0 + $0x60] sm:$0xff]   ;;  %v255_v13 = vld [vmem:[%s18517_s0 + $0x68] sm:$0xff]   ;;  %v257_v14 = vld [vmem:[%s18517_s0 + $0x70] sm:$0xff]  }
  0x18   : > { %365 = vst [vmem:[#allocation2 + $0x20] sm:$0xff] %v237_v4   ;;  %v259_v15 = vld [vmem:[%s18517_s0 + $0x78] sm:$0xff]   ;;  %v261_v16 = vld [vmem:[%s18517_s0 + $0x80] sm:$0xff]   ;;  %v263_v17 = vld [vmem:[%s18517_s0 + $0x88] sm:$0xff]  }
  0x19   : > { %367 = vst [vmem:[#allocation2 + $0x28] sm:$0xff] %v239_v5   ;;  %v265_v18 = vld [vmem:[%s18517_s0 + $0x90] sm:$0xff]   ;;  %v267_v19 = vld [vmem:[%s18517_s0 + $0x98] sm:$0xff]   ;;  %v269_v20 = vld [vmem:[%s18517_s0 + $0xa0] sm:$0xff]  }
  0x1a   : > { %369 = vst [vmem:[#allocation2 + $0x30] sm:$0xff] %v241_v6   ;;  %v271_v21 = vld [vmem:[%s18517_s0 + $0xa8] sm:$0xff]   ;;  %v273_v22 = vld [vmem:[%s18517_s0 + $0xb0] sm:$0xff]   ;;  %v275_v23 = vld [vmem:[%s18517_s0 + $0xb8] sm:$0xff]  }
  0x1b   : > { %371 = vst [vmem:[#allocation2 + $0x38] sm:$0xff] %v243_v7   ;;  %v277_v24 = vld [vmem:[%s18517_s0 + $0xc0] sm:$0xff]   ;;  %v279_v25 = vld [vmem:[%s18517_s0 + $0xc8] sm:$0xff]   ;;  %v281_v26 = vld [vmem:[%s18517_s0 + $0xd0] sm:$0xff]  }
  0x1c   : > { %373 = vst [vmem:[#allocation2 + $0x40] sm:$0xff] %v245_v8   ;;  %v283_v27 = vld [vmem:[%s18517_s0 + $0xd8] sm:$0xff]   ;;  %v285_v28 = vld [vmem:[%s18517_s0 + $0xe0] sm:$0xff]   ;;  %v287_v29 = vld [vmem:[%s18517_s0 + $0xe8] sm:$0xff]  }
  0x1d   : > { %375 = vst [vmem:[#allocation2 + $0x48] sm:$0xff] %v247_v9   ;;  %v289_v30 = vld [vmem:[%s18517_s0 + $0xf0] sm:$0xff]   ;;  %v291_v31 = vld [vmem:[%s18517_s0 + $0xf8] sm:$0xff]   ;;  %v293_v32 = vld [vmem:[%s18517_s0 + $0x100] sm:$0xff]  }
  0x1e   : > { %377 = vst [vmem:[#allocation2 + $0x50] sm:$0xff] %v249_v10   ;;  %v295_v33 = vld [vmem:[%s18517_s0 + $0x108] sm:$0xff]   ;;  %v297_v34 = vld [vmem:[%s18517_s0 + $0x110] sm:$0xff]   ;;  %v299_v35 = vld [vmem:[%s18517_s0 + $0x118] sm:$0xff]  }
  0x1f   : > { %379 = vst [vmem:[#allocation2 + $0x58] sm:$0xff] %v251_v11   ;;  %v301_v36 = vld [vmem:[%s18517_s0 + $0x120] sm:$0xff]   ;;  %v303_v37 = vld [vmem:[%s18517_s0 + $0x128] sm:$0xff]   ;;  %v305_v38 = vld [vmem:[%s18517_s0 + $0x130] sm:$0xff]  }
  0x20   : > { %381 = vst [vmem:[#allocation2 + $0x60] sm:$0xff] %v253_v12   ;;  %v307_v39 = vld [vmem:[%s18517_s0 + $0x138] sm:$0xff]   ;;  %v309_v40 = vld [vmem:[%s18517_s0 + $0x140] sm:$0xff]   ;;  %v311_v41 = vld [vmem:[%s18517_s0 + $0x148] sm:$0xff]  }
  0x21   : > { %383 = vst [vmem:[#allocation2 + $0x68] sm:$0xff] %v255_v13   ;;  %v313_v42 = vld [vmem:[%s18517_s0 + $0x150] sm:$0xff]   ;;  %v315_v43 = vld [vmem:[%s18517_s0 + $0x158] sm:$0xff]   ;;  %v317_v44 = vld [vmem:[%s18517_s0 + $0x160] sm:$0xff]  }
  0x22   : > { %385 = vst [vmem:[#allocation2 + $0x70] sm:$0xff] %v257_v14   ;;  %v319_v45 = vld [vmem:[%s18517_s0 + $0x168] sm:$0xff]   ;;  %v321_v46 = vld [vmem:[%s18517_s0 + $0x170] sm:$0xff]   ;;  %v323_v47 = vld [vmem:[%s18517_s0 + $0x178] sm:$0xff]  }
  0x23   : > { %387 = vst [vmem:[#allocation2 + $0x78] sm:$0xff] %v259_v15   ;;  %v325_v48 = vld [vmem:[%s18517_s0 + $0x180] sm:$0xff]   ;;  %v327_v49 = vld [vmem:[%s18517_s0 + $0x188] sm:$0xff]   ;;  %v329_v50 = vld [vmem:[%s18517_s0 + $0x190] sm:$0xff]  }
  0x24   : > { %389 = vst [vmem:[#allocation2 + $0x80] sm:$0xff] %v261_v16   ;;  %v331_v51 = vld [vmem:[%s18517_s0 + $0x198] sm:$0xff]   ;;  %v333_v52 = vld [vmem:[%s18517_s0 + $0x1a0] sm:$0xff]   ;;  %v335_v53 = vld [vmem:[%s18517_s0 + $0x1a8] sm:$0xff]  }
  0x25   : > { %391 = vst [vmem:[#allocation2 + $0x88] sm:$0xff] %v263_v17   ;;  %v337_v54 = vld [vmem:[%s18517_s0 + $0x1b0] sm:$0xff]   ;;  %v339_v55 = vld [vmem:[%s18517_s0 + $0x1b8] sm:$0xff]   ;;  %v341_v56 = vld [vmem:[%s18517_s0 + $0x1c0] sm:$0xff]  }
  0x26   : > { %393 = vst [vmem:[#allocation2 + $0x90] sm:$0xff] %v265_v18   ;;  %v343_v57 = vld [vmem:[%s18517_s0 + $0x1c8] sm:$0xff]   ;;  %v345_v58 = vld [vmem:[%s18517_s0 + $0x1d0] sm:$0xff]   ;;  %v347_v59 = vld [vmem:[%s18517_s0 + $0x1d8] sm:$0xff]  }
  0x27   : > { %395 = vst [vmem:[#allocation2 + $0x98] sm:$0xff] %v267_v19   ;;  %v349_v60 = vld [vmem:[%s18517_s0 + $0x1e0] sm:$0xff]   ;;  %v351_v61 = vld [vmem:[%s18517_s0 + $0x1e8] sm:$0xff]   ;;  %v353_v62 = vld [vmem:[%s18517_s0 + $0x1f0] sm:$0xff]  }
  0x28   : > { %397 = vst [vmem:[#allocation2 + $0xa0] sm:$0xff] %v269_v20   ;;  %v355_v63 = vld [vmem:[%s18517_s0 + $0x1f8] sm:$0xff]  }
  0x29   : > { %399 = vst [vmem:[#allocation2 + $0xa8] sm:$0xff] %v271_v21  }
  0x2a   : > { %401 = vst [vmem:[#allocation2 + $0xb0] sm:$0xff] %v273_v22  }
  0x2b   : > { %403 = vst [vmem:[#allocation2 + $0xb8] sm:$0xff] %v275_v23  }
  0x2c   : > { %405 = vst [vmem:[#allocation2 + $0xc0] sm:$0xff] %v277_v24  }
  0x2d   : > { %407 = vst [vmem:[#allocation2 + $0xc8] sm:$0xff] %v279_v25  }
  0x2e   : > { %409 = vst [vmem:[#allocation2 + $0xd0] sm:$0xff] %v281_v26  }
  0x2f   : > { %411 = vst [vmem:[#allocation2 + $0xd8] sm:$0xff] %v283_v27  }
  0x30   : > { %413 = vst [vmem:[#allocation2 + $0xe0] sm:$0xff] %v285_v28  }
  0x31   : > { %415 = vst [vmem:[#allocation2 + $0xe8] sm:$0xff] %v287_v29  }
  0x32   : > { %417 = vst [vmem:[#allocation2 + $0xf0] sm:$0xff] %v289_v30  }
  0x33   : > { %419 = vst [vmem:[#allocation2 + $0xf8] sm:$0xff] %v291_v31  }
  0x34   : > { %421 = vst [vmem:[#allocation2 + $0x100] sm:$0xff] %v293_v32  }
  0x35   : > { %423 = vst [vmem:[#allocation2 + $0x108] sm:$0xff] %v295_v33  }
  0x36   : > { %425 = vst [vmem:[#allocation2 + $0x110] sm:$0xff] %v297_v34  }
  0x37   : > { %427 = vst [vmem:[#allocation2 + $0x118] sm:$0xff] %v299_v35  }
  0x38   : > { %429 = vst [vmem:[#allocation2 + $0x120] sm:$0xff] %v301_v36  }
  0x39   : > { %431 = vst [vmem:[#allocation2 + $0x128] sm:$0xff] %v303_v37  }
  0x3a   : > { %433 = vst [vmem:[#allocation2 + $0x130] sm:$0xff] %v305_v38  }
  0x3b   : > { %435 = vst [vmem:[#allocation2 + $0x138] sm:$0xff] %v307_v39  }
  0x3c   : > { %437 = vst [vmem:[#allocation2 + $0x140] sm:$0xff] %v309_v40  }
  0x3d   : > { %439 = vst [vmem:[#allocation2 + $0x148] sm:$0xff] %v311_v41  }
  0x3e   : > { %441 = vst [vmem:[#allocation2 + $0x150] sm:$0xff] %v313_v42  }
  0x3f   : > { %443 = vst [vmem:[#allocation2 + $0x158] sm:$0xff] %v315_v43  }
  0x40   : > { %445 = vst [vmem:[#allocation2 + $0x160] sm:$0xff] %v317_v44  }
  0x41   : > { %447 = vst [vmem:[#allocation2 + $0x168] sm:$0xff] %v319_v45  }
  0x42   : > { %449 = vst [vmem:[#allocation2 + $0x170] sm:$0xff] %v321_v46  }
  0x43   : > { %451 = vst [vmem:[#allocation2 + $0x178] sm:$0xff] %v323_v47  }
  0x44   : > { %453 = vst [vmem:[#allocation2 + $0x180] sm:$0xff] %v325_v48  }
  0x45   : > { %455 = vst [vmem:[#allocation2 + $0x188] sm:$0xff] %v327_v49  }
  0x46   : > { %457 = vst [vmem:[#allocation2 + $0x190] sm:$0xff] %v329_v50  }
  0x47   : > { %459 = vst [vmem:[#allocation2 + $0x198] sm:$0xff] %v331_v51  }
  0x48   : > { %461 = vst [vmem:[#allocation2 + $0x1a0] sm:$0xff] %v333_v52  }
  0x49   : > { %463 = vst [vmem:[#allocation2 + $0x1a8] sm:$0xff] %v335_v53  }
  0x4a   : > { %465 = vst [vmem:[#allocation2 + $0x1b0] sm:$0xff] %v337_v54  }
  0x4b   : > { %467 = vst [vmem:[#allocation2 + $0x1b8] sm:$0xff] %v339_v55  }
  0x4c   : > { %469 = vst [vmem:[#allocation2 + $0x1c0] sm:$0xff] %v341_v56  }
  0x4d   : > { %471 = vst [vmem:[#allocation2 + $0x1c8] sm:$0xff] %v343_v57  }
  0x4e   : > { %473 = vst [vmem:[#allocation2 + $0x1d0] sm:$0xff] %v345_v58  }
  0x4f   : > { %475 = vst [vmem:[#allocation2 + $0x1d8] sm:$0xff] %v347_v59  }
  0x50   : > { %477 = vst [vmem:[#allocation2 + $0x1e0] sm:$0xff] %v349_v60  }
  0x51   : > { %479 = vst [vmem:[#allocation2 + $0x1e8] sm:$0xff] %v351_v61  }
  0x52   : > { %481 = vst [vmem:[#allocation2 + $0x1f0] sm:$0xff] %v353_v62  }
  0x53   : > { %483 = vst [vmem:[#allocation2 + $0x1f8] sm:$0xff] %v355_v63  }
  0x54 PF: > { %v7162_v0 = vld [vmem:[%s18519_s2 + $0x20] sm:$0xff]  ;;  %v7160_v1 = vld [vmem:[%s18519_s2 + $0x10] sm:$0xff]  ;;  %v12291_v3 = vmov 0   ;;  %v11304_v4 = vld [vmem:[%s12345_s27 + $0x38] sm:$0xff]  ;;  %s8833_s28 = sshll.u32 %s18522_s5, 4  ;;  %p12228_p5 = scmp.eq.s32.totalorder %s12331_s19, 2  ;;  %s8834_s28 = int_to_ptr.hbm [resolvable:$true] %s8833_s28 }
  0x55   : > { %v7158_v2 = vld [vmem:[%s18519_s2] sm:$0xff]  ;;  %12244 = vset.pattern.permute.xlu2 %v12291_v3  ;;  %12243 = vset.pattern.permute.xlu1 %v12291_v3  ;;  %v11303_v5 = vld [vmem:[%s12345_s27 + $0x30] sm:$0xff]  ;;  %v7163_v6 = vld [vmem:[%s18519_s2 + $0x28] sm:$0xff]  ;;  %s12293_s29 = smov 128   ;;  %s12294_s30 = smov 8  }
  0x56   : > { %12242 = vset.pattern.permute.xlu0 %v12291_v3  ;;  %7308 = vperm.xlu2 %12244, %v7162_v0   ;;  %v7161_v7 = vld [vmem:[%s18519_s2 + $0x18] sm:$0xff]  ;;  %v7159_v8 = vld [vmem:[%s18519_s2 + $0x8] sm:$0xff]  ;;  %v11301_v10 = vld [vmem:[%s12345_s27 + $0x20] sm:$0xff] }
  0x57   : > { %7298 = vperm.xlu1 %12243, %v7160_v1   ;;  %7288 = vperm.xlu0 %12242, %v7158_v2   ;;  %v11302_v9 = vld [vmem:[%s12345_s27 + $0x28] sm:$0xff]  ;;  %v7166_v11 = vld [vmem:[%s18519_s2 + $0x40] sm:$0xff]  ;;  %v7165_v12 = vld [vmem:[%s18519_s2 + $0x38] sm:$0xff] }
  0x58   : > { %1061 = vmatpush.bf16.msra.mxu0 %v11304_v4  ;;  %12200 = vmatpush.bf16.msra.mxu1 %v11304_v4  ;;  %v7164_v13 = vld [vmem:[%s18519_s2 + $0x30] sm:$0xff]  ;;  %v11300_v14 = vld [vmem:[%s12345_s27 + $0x18] sm:$0xff]  ;;  %v7167_v18 = vld [vmem:[%s18519_s2 + $0x48] sm:$0xff] }
  0x59   : > { %12201 = vmatpush.bf16.msra.mxu2 %v11304_v4  ;;  %12202 = vmatpush.bf16.msra.mxu3 %v11304_v4  ;;  %v11299_v15 = vld [vmem:[%s12345_s27 + $0x10] sm:$0xff]  ;;  %v7169_v16 = vld [vmem:[%s18519_s2 + $0x58] sm:$0xff]  ;;  %v11298_v19 = vld [vmem:[%s12345_s27 + $0x8] sm:$0xff] }
  0x5a   : > { %v7168_v17 = vld [vmem:[%s18519_s2 + $0x50] sm:$0xff]  ;;  %v11297_v20 = vld [vmem:[%s12345_s27] sm:$0xff]  ;;  %v7171_v22 = vld [vmem:[%s18519_s2 + $0x68] sm:$0xff] }
  0x5b   : > { %v7172_v21 = vld [vmem:[%s18519_s2 + $0x70] sm:$0xff]  ;;  %v7170_v23 = vld [vmem:[%s18519_s2 + $0x60] sm:$0xff]  ;;  %v7175_v28 = vld [vmem:[%s18519_s2 + $0x88] sm:$0xff] }
  0x5c   : > { %1062 = vmatpush.bf16.msra.mxu0 %v11303_v5  ;;  %12203 = vmatpush.bf16.msra.mxu1 %v11303_v5  ;;  %v11233_v24 = vld [vmem:[#allocation2] sm:$0xff]  ;;  %v7173_v30 = vld [vmem:[%s18519_s2 + $0x78] sm:$0xff]  ;;  %v7176_v33 = vld [vmem:[%s18519_s2 + $0x90] sm:$0xff] }
  0x5d   : > { %12204 = vmatpush.bf16.msra.mxu2 %v11303_v5  ;;  %12205 = vmatpush.bf16.msra.mxu3 %v11303_v5  ;;  %v11249_v25 = vld [vmem:[#allocation2 + $0x80] sm:$0xff]  ;;  %v7177_v32 = vld [vmem:[%s18519_s2 + $0x98] sm:$0xff]  ;;  %v11234_v34 = vld [vmem:[#allocation2 + $0x8] sm:$0xff] }
  0x5e   : > { %7313 = vperm.xlu2 %12244, %v7163_v6   ;;  %v11265_v26 = vld [vmem:[#allocation2 + $0x100] sm:$0xff]  ;;  %v11250_v35 = vld [vmem:[#allocation2 + $0x88] sm:$0xff]  ;;  %v7181_v38 = vld [vmem:[%s18519_s2 + $0xb8] sm:$0xff] }
  0x5f   : > { %7303 = vperm.xlu1 %12243, %v7161_v7   ;;  %7293 = vperm.xlu0 %12242, %v7159_v8   ;;  %v11281_v27 = vld [vmem:[#allocation2 + $0x180] sm:$0xff]  ;;  %v11266_v36 = vld [vmem:[#allocation2 + $0x108] sm:$0xff]  ;;  %v7180_v39 = vld [vmem:[%s18519_s2 + $0xb0] sm:$0xff] }
  0x60   : > { %1063 = vmatpush.bf16.msra.mxu0 %v11302_v9  ;;  %12206 = vmatpush.bf16.msra.mxu1 %v11302_v9  ;;  %v7174_v29 = vld [vmem:[%s18519_s2 + $0x80] sm:$0xff]  ;;  %v11282_v37 = vld [vmem:[#allocation2 + $0x188] sm:$0xff]  ;;  %v7184_v41 = vld [vmem:[%s18519_s2 + $0xd0] sm:$0xff] }
  0x61   : > { %12207 = vmatpush.bf16.msra.mxu2 %v11302_v9  ;;  %12208 = vmatpush.bf16.msra.mxu3 %v11302_v9  ;;  %v7178_v31 = vld [vmem:[%s18519_s2 + $0xa0] sm:$0xff]  ;;  %v7179_v40 = vld [vmem:[%s18519_s2 + $0xa8] sm:$0xff]  ;;  %v11235_v44 = vld [vmem:[#allocation2 + $0x10] sm:$0xff] }
  0x62   : > { %v7183_v42 = vld [vmem:[%s18519_s2 + $0xc8] sm:$0xff]  ;;  %v7182_v43 = vld [vmem:[%s18519_s2 + $0xc0] sm:$0xff]  ;;  %v11251_v45 = vld [vmem:[#allocation2 + $0x90] sm:$0xff] }
  0x63   : > { %v11267_v46 = vld [vmem:[#allocation2 + $0x110] sm:$0xff]  ;;  %v7187_v48 = vld [vmem:[%s18519_s2 + $0xe8] sm:$0xff]  ;;  %v7186_v49 = vld [vmem:[%s18519_s2 + $0xe0] sm:$0xff] }
  0x64   : > { %1064 = vmatpush.bf16.msra.mxu0 %v11301_v10  ;;  %12209 = vmatpush.bf16.msra.mxu1 %v11301_v10  ;;  %v11283_v47 = vld [vmem:[#allocation2 + $0x190] sm:$0xff]  ;;  %v7185_v50 = vld [vmem:[%s18519_s2 + $0xd8] sm:$0xff]  ;;  %v7190_v51 = vld [vmem:[%s18519_s2 + $0x100] sm:$0xff] }
  0x65   : > { %12210 = vmatpush.bf16.msra.mxu2 %v11301_v10  ;;  %12211 = vmatpush.bf16.msra.mxu3 %v11301_v10  ;;  %v7189_v52 = vld [vmem:[%s18519_s2 + $0xf8] sm:$0xff]  ;;  %v7188_v53 = vld [vmem:[%s18519_s2 + $0xf0] sm:$0xff]  ;;  %v7191_v60 = vld [vmem:[%s18519_s2 + $0x108] sm:$0xff] }
  0x66   : > { %7328 = vperm.xlu2 %12244, %v7166_v11   ;;  %v11236_v54 = vld [vmem:[#allocation2 + $0x18] sm:$0xff]  ;;  %v7192_v59 = vld [vmem:[%s18519_s2 + $0x110] sm:$0xff]  ;;  %v7195_v61 = vld [vmem:[%s18519_s2 + $0x128] sm:$0xff] }
  0x67   : > { %7323 = vperm.xlu1 %12243, %v7165_v12   ;;  %7318 = vperm.xlu0 %12242, %v7164_v13   ;;  %v11252_v55 = vld [vmem:[#allocation2 + $0x98] sm:$0xff]  ;;  %v7196_v62 = vld [vmem:[%s18519_s2 + $0x130] sm:$0xff]  ;;  %v7194_v63 = vld [vmem:[%s18519_s2 + $0x120] sm:$0xff] }
  0x68   : > { %1065 = vmatpush.bf16.msra.mxu0 %v11300_v14  ;;  %12212 = vmatpush.bf16.msra.mxu1 %v11300_v14  ;;  %v11268_v56 = vld [vmem:[#allocation2 + $0x118] sm:$0xff]  ;;  %v11237_v0 = vld [vmem:[#allocation2 + $0x20] sm:$0xff]  ;;  %v7199_v4 = vld [vmem:[%s18519_s2 + $0x148] sm:$0xff] }
  0x69   : > { %12213 = vmatpush.bf16.msra.mxu2 %v11300_v14  ;;  %12214 = vmatpush.bf16.msra.mxu3 %v11300_v14  ;;  %v11284_v57 = vld [vmem:[#allocation2 + $0x198] sm:$0xff]  ;;  %v11253_v1 = vld [vmem:[#allocation2 + $0xa0] sm:$0xff]  ;;  %v11238_v7 = vld [vmem:[#allocation2 + $0x28] sm:$0xff] }
  0x6a   : > { %v7193_v58 = vld [vmem:[%s18519_s2 + $0x118] sm:$0xff]  ;;  %v11269_v2 = vld [vmem:[#allocation2 + $0x120] sm:$0xff]  ;;  %v11254_v9 = vld [vmem:[#allocation2 + $0xa8] sm:$0xff] }
  0x6b   : > { %v11285_v3 = vld [vmem:[#allocation2 + $0x1a0] sm:$0xff]  ;;  %v7197_v5 = vld [vmem:[%s18519_s2 + $0x138] sm:$0xff]  ;;  %v7200_v11 = vld [vmem:[%s18519_s2 + $0x150] sm:$0xff] }
  0x6c   : > { %1066 = vmatpush.bf16.msra.mxu0 %v11299_v15  ;;  %12215 = vmatpush.bf16.msra.mxu1 %v11299_v15  ;;  %v7198_v6 = vld [vmem:[%s18519_s2 + $0x140] sm:$0xff]  ;;  %v7201_v10 = vld [vmem:[%s18519_s2 + $0x158] sm:$0xff]  ;;  %v11270_v12 = vld [vmem:[#allocation2 + $0x128] sm:$0xff] }
  0x6d   : > { %12216 = vmatpush.bf16.msra.mxu2 %v11299_v15  ;;  %12217 = vmatpush.bf16.msra.mxu3 %v11299_v15  ;;  %v7202_v8 = vld [vmem:[%s18519_s2 + $0x160] sm:$0xff]  ;;  %v11286_v13 = vld [vmem:[#allocation2 + $0x1a8] sm:$0xff]  ;;  %v7205_v14 = vld [vmem:[%s18519_s2 + $0x178] sm:$0xff] }
  0x6e   : > { %7343 = vperm.xlu2 %12244, %v7169_v16   ;;  %v7203_v15 = vld [vmem:[%s18519_s2 + $0x168] sm:$0xff]  ;;  %v7204_v16 = vld [vmem:[%s18519_s2 + $0x170] sm:$0xff] }
  0x6f   : > { %7338 = vperm.xlu1 %12243, %v7168_v17   ;;  %7333 = vperm.xlu0 %12242, %v7167_v18   ;;  %v11239_v17 = vld [vmem:[#allocation2 + $0x30] sm:$0xff] }
  0x70   : > { %1067 = vmatpush.bf16.msra.mxu0 %v11298_v19  ;;  %12218 = vmatpush.bf16.msra.mxu1 %v11298_v19  ;;  %v7208_v18 = vld [vmem:[%s18519_s2 + $0x190] sm:$0xff] }
  0x71   : > { %12219 = vmatpush.bf16.msra.mxu2 %v11298_v19  ;;  %12220 = vmatpush.bf16.msra.mxu3 %v11298_v19  ;;  %v11255_v19 = vld [vmem:[#allocation2 + $0xb0] sm:$0xff] }
  0x74   : > { %1068 = vmatpush.bf16.msra.mxu0 %v11297_v20  ;;  %12221 = vmatpush.bf16.msra.mxu1 %v11297_v20 }
  0x75   : > { %12222 = vmatpush.bf16.msra.mxu2 %v11297_v20  ;;  %12223 = vmatpush.bf16.msra.mxu3 %v11297_v20  ;;  %v7207_v20 = vld [vmem:[%s18519_s2 + $0x188] sm:$0xff] }
  0x76   : > { %7358 = vperm.xlu2 %12244, %v7172_v21   ;;  %v7206_v21 = vld [vmem:[%s18519_s2 + $0x180] sm:$0xff] }
  0x77   : > { %7353 = vperm.xlu1 %12243, %v7171_v22   ;;  %7348 = vperm.xlu0 %12242, %v7170_v23   ;;  %v11271_v22 = vld [vmem:[#allocation2 + $0x130] sm:$0xff] }
  0x78   : > { %1069 = vmatmul.bf16.vlgmr.msra.gmra.mxu0 %v11233_v24  ;;  %1149 = vmatmul.bf16.vlgmr.msra.gmra.mxu1 %v11249_v25  ;;  %v11287_v23 = vld [vmem:[#allocation2 + $0x1b0] sm:$0xff]  ;;  %v7211_v24 = vld [vmem:[%s18519_s2 + $0x1a8] sm:$0xff]  ;;  %v7210_v25 = vld [vmem:[%s18519_s2 + $0x1a0] sm:$0xff] }
  0x79   : > { %1229 = vmatmul.bf16.vlgmr.msra.gmra.mxu2 %v11265_v26  ;;  %1309 = vmatmul.bf16.vlgmr.msra.gmra.mxu3 %v11281_v27  ;;  %v7209_v26 = vld [vmem:[%s18519_s2 + $0x198] sm:$0xff] }
  0x7a   : > { %v11240_v27 = vld [vmem:[#allocation2 + $0x38] sm:$0xff] }
  0x7e   : > { %7373 = vperm.xlu2 %12244, %v7175_v28   ;;  %v7214_v28 = vld [vmem:[%s18519_s2 + $0x1c0] sm:$0xff] }
  0x7f   : > { %7368 = vperm.xlu1 %12243, %v7174_v29   ;;  %7363 = vperm.xlu0 %12242, %v7173_v30   ;;  %v11256_v29 = vld [vmem:[#allocation2 + $0xb8] sm:$0xff] }
  0x80   : > { %v7213_v30 = vld [vmem:[%s18519_s2 + $0x1b8] sm:$0xff] }
  0x86   : > { %7388 = vperm.xlu2 %12244, %v7178_v31   ;;  %v7212_v31 = vld [vmem:[%s18519_s2 + $0x1b0] sm:$0xff] }
  0x87   : > { %7383 = vperm.xlu1 %12243, %v7177_v32   ;;  %7378 = vperm.xlu0 %12242, %v7176_v33   ;;  %v11272_v32 = vld [vmem:[#allocation2 + $0x138] sm:$0xff] }
  0x88   : > { %1074 = vmatmul.bf16.gmra.mxu0 %v11234_v34  ;;  %1154 = vmatmul.bf16.gmra.mxu1 %v11250_v35  ;;  %v11288_v33 = vld [vmem:[#allocation2 + $0x1b8] sm:$0xff]  ;;  %v7216_v35 = vld [vmem:[%s18519_s2 + $0x1d0] sm:$0xff] }
  0x89   : > { %1234 = vmatmul.bf16.gmra.mxu2 %v11266_v36  ;;  %1314 = vmatmul.bf16.gmra.mxu3 %v11282_v37  ;;  %v7217_v34 = vld [vmem:[%s18519_s2 + $0x1d8] sm:$0xff]  ;;  %v7215_v36 = vld [vmem:[%s18519_s2 + $0x1c8] sm:$0xff]  ;;  %v11241_v37 = vld [vmem:[#allocation2 + $0x40] sm:$0xff] }
  0x8e   : > { %7403 = vperm.xlu2 %12244, %v7181_v38   ;;  %v7220_v38 = vld [vmem:[%s18519_s2 + $0x1f0] sm:$0xff] }
  0x8f   : > { %7398 = vperm.xlu1 %12243, %v7180_v39   ;;  %7393 = vperm.xlu0 %12242, %v7179_v40   ;;  %v11257_v39 = vld [vmem:[#allocation2 + $0xc0] sm:$0xff]  ;;  %v7219_v40 = vld [vmem:[%s18519_s2 + $0x1e8] sm:$0xff] }
  0x96   : > { %7418 = vperm.xlu2 %12244, %v7184_v41   ;;  %v7218_v41 = vld [vmem:[%s18519_s2 + $0x1e0] sm:$0xff] }
  0x97   : > { %7413 = vperm.xlu1 %12243, %v7183_v42   ;;  %7408 = vperm.xlu0 %12242, %v7182_v43  }
  0x98   : > { %1079 = vmatmul.bf16.gmra.mxu0 %v11235_v44  ;;  %1159 = vmatmul.bf16.gmra.mxu1 %v11251_v45  ;;  %v11273_v44 = vld [vmem:[#allocation2 + $0x140] sm:$0xff] }
  0x99   : > { %1239 = vmatmul.bf16.gmra.mxu2 %v11267_v46  ;;  %1319 = vmatmul.bf16.gmra.mxu3 %v11283_v47  ;;  %v11289_v45 = vld [vmem:[#allocation2 + $0x1c0] sm:$0xff]  ;;  %v7223_v46 = vld [vmem:[%s18519_s2 + $0x208] sm:$0xff] }
  0x9a   : > { %v7222_v47 = vld [vmem:[%s18519_s2 + $0x200] sm:$0xff] }
  0x9e   : > { %7433 = vperm.xlu2 %12244, %v7187_v48   ;;  %v7221_v48 = vld [vmem:[%s18519_s2 + $0x1f8] sm:$0xff] }
  0x9f   : > { %7428 = vperm.xlu1 %12243, %v7186_v49   ;;  %7423 = vperm.xlu0 %12242, %v7185_v50  }
  0xa6   : > { %7448 = vperm.xlu2 %12244, %v7190_v51  }
  0xa7   : > { %7443 = vperm.xlu1 %12243, %v7189_v52   ;;  %7438 = vperm.xlu0 %12242, %v7188_v53   ;;  %v7259_v53 = vld [vmem:[%s18519_s2 + $0x328] sm:$0xff] }
  0xa8   : > { %1084 = vmatmul.bf16.gmra.mxu0 %v11236_v54  ;;  %1164 = vmatmul.bf16.gmra.mxu1 %v11252_v55  ;;  %v11242_v55 = vld [vmem:[#allocation2 + $0x48] sm:$0xff]  ;;  %v11295_v54 = vld [vmem:[#allocation2 + $0x1f0] sm:$0xff] }
  0xa9   : > { %1244 = vmatmul.bf16.gmra.mxu2 %v11268_v56  ;;  %1324 = vmatmul.bf16.gmra.mxu3 %v11284_v57  ;;  %v7226_v56 = vld [vmem:[%s18519_s2 + $0x220] sm:$0xff]  ;;  %v11258_v57 = vld [vmem:[#allocation2 + $0xc8] sm:$0xff] }
  0xae   : > { %7463 = vperm.xlu2 %12244, %v7193_v58   ;;  %v7225_v58 = vld [vmem:[%s18519_s2 + $0x218] sm:$0xff] }
  0xaf   : > { %7458 = vperm.xlu1 %12243, %v7192_v59   ;;  %7453 = vperm.xlu0 %12242, %v7191_v60   ;;  %v7224_v59 = vld [vmem:[%s18519_s2 + $0x210] sm:$0xff] }
  0xb6   : > { %7478 = vperm.xlu2 %12244, %v7196_v62  }
  0xb7   : > { %7473 = vperm.xlu1 %12243, %v7195_v61   ;;  %7468 = vperm.xlu0 %12242, %v7194_v63  }
  0xb8   : > { %1089 = vmatmul.bf16.gmra.mxu0 %v11237_v0  ;;  %1169 = vmatmul.bf16.gmra.mxu1 %v11253_v1  ;;  %v11274_v0 = vld [vmem:[#allocation2 + $0x148] sm:$0xff] }
  0xb9   : > { %1249 = vmatmul.bf16.gmra.mxu2 %v11269_v2  ;;  %1329 = vmatmul.bf16.gmra.mxu3 %v11285_v3  ;;  %v11290_v1 = vld [vmem:[#allocation2 + $0x1c8] sm:$0xff]  ;;  %v7229_v2 = vld [vmem:[%s18519_s2 + $0x238] sm:$0xff]  ;;  %v7228_v3 = vld [vmem:[%s18519_s2 + $0x230] sm:$0xff] }
  0xbe   : > { %7493 = vperm.xlu2 %12244, %v7199_v4   ;;  %v7227_v4 = vld [vmem:[%s18519_s2 + $0x228] sm:$0xff] }
  0xbf   : > { %7483 = vperm.xlu0 %12242, %v7197_v5   ;;  %7488 = vperm.xlu1 %12243, %v7198_v6  }
  0xc6   : > { %7508 = vperm.xlu2 %12244, %v7202_v8  }
  0xc7   : > { %7503 = vperm.xlu1 %12243, %v7201_v10   ;;  %7498 = vperm.xlu0 %12242, %v7200_v11   ;;  %v11243_v11 = vld [vmem:[#allocation2 + $0x50] sm:$0xff]  ;;  %v7257_v10 = vld [vmem:[%s18519_s2 + $0x318] sm:$0xff] }
  0xc8   : > { %1094 = vmatmul.bf16.gmra.mxu0 %v11238_v7  ;;  %1174 = vmatmul.bf16.gmra.mxu1 %v11254_v9  ;;  %v7258_v9 = vld [vmem:[%s18519_s2 + $0x320] sm:$0xff] }
  0xc9   : > { %1254 = vmatmul.bf16.gmra.mxu2 %v11270_v12  ;;  %1334 = vmatmul.bf16.gmra.mxu3 %v11286_v13  ;;  %v7232_v12 = vld [vmem:[%s18519_s2 + $0x250] sm:$0xff] }
  0xca   : > { %v11259_v13 = vld [vmem:[#allocation2 + $0xd0] sm:$0xff] }
  0xce   : > { %7523 = vperm.xlu2 %12244, %v7205_v14   ;;  %v7231_v14 = vld [vmem:[%s18519_s2 + $0x248] sm:$0xff] }
  0xcf   : > { %7513 = vperm.xlu0 %12242, %v7203_v15   ;;  %7518 = vperm.xlu1 %12243, %v7204_v16   ;;  %v7230_v15 = vld [vmem:[%s18519_s2 + $0x240] sm:$0xff] }
  0xd6   : > { %7538 = vperm.xlu2 %12244, %v7208_v18  }
  0xd7   : > { %7533 = vperm.xlu1 %12243, %v7207_v20   ;;  %7528 = vperm.xlu0 %12242, %v7206_v21   ;;  %v11275_v20 = vld [vmem:[#allocation2 + $0x150] sm:$0xff] }
  0xd8   : > { %1099 = vmatmul.bf16.gmra.mxu0 %v11239_v17  ;;  %1179 = vmatmul.bf16.gmra.mxu1 %v11255_v19  ;;  %v11291_v21 = vld [vmem:[#allocation2 + $0x1d0] sm:$0xff] }
  0xd9   : > { %1259 = vmatmul.bf16.gmra.mxu2 %v11271_v22  ;;  %1339 = vmatmul.bf16.gmra.mxu3 %v11287_v23  ;;  %v7235_v22 = vld [vmem:[%s18519_s2 + $0x268] sm:$0xff]  ;;  %v7234_v23 = vld [vmem:[%s18519_s2 + $0x260] sm:$0xff] }
  0xde   : > { %7553 = vperm.xlu2 %12244, %v7211_v24   ;;  %v7233_v24 = vld [vmem:[%s18519_s2 + $0x258] sm:$0xff] }
  0xdf   : > { %7548 = vperm.xlu1 %12243, %v7210_v25   ;;  %7543 = vperm.xlu0 %12242, %v7209_v26  }
  0xe6   : > { %7568 = vperm.xlu2 %12244, %v7214_v28  }
  0xe7   : > { %7563 = vperm.xlu1 %12243, %v7213_v30   ;;  %7558 = vperm.xlu0 %12242, %v7212_v31   ;;  %v11244_v31 = vld [vmem:[#allocation2 + $0x58] sm:$0xff] }
  0xe8   : > { %1104 = vmatmul.bf16.gmra.mxu0 %v11240_v27  ;;  %1184 = vmatmul.bf16.gmra.mxu1 %v11256_v29  ;;  %v7260_v29 = vld [vmem:[%s18519_s2 + $0x330] sm:$0xff] }
  0xe9   : > { %1264 = vmatmul.bf16.gmra.mxu2 %v11272_v32  ;;  %1344 = vmatmul.bf16.gmra.mxu3 %v11288_v33  ;;  %v7238_v32 = vld [vmem:[%s18519_s2 + $0x280] sm:$0xff]  ;;  %v11260_v33 = vld [vmem:[#allocation2 + $0xd8] sm:$0xff] }
  0xee   : > { %7583 = vperm.xlu2 %12244, %v7217_v34   ;;  %v7237_v34 = vld [vmem:[%s18519_s2 + $0x278] sm:$0xff] }
  0xef   : > { %7578 = vperm.xlu1 %12243, %v7216_v35   ;;  %7573 = vperm.xlu0 %12242, %v7215_v36   ;;  %v7236_v35 = vld [vmem:[%s18519_s2 + $0x270] sm:$0xff] }
  0xf5   : > { %v12737_v42 = vpop.f32.mrf.mxu0  ;;  %v12739_v43 = vpop.f32.mrf.mxu1 }
  0xf6   : > { %18651 = vst [vmem:[#allocation6_spill] sm:$0xff] %v12737_v42  ;;  %7598 = vperm.xlu2 %12244, %v7220_v38  }
  0xf7   : > { %18652 = vst [vmem:[#allocation7_spill] sm:$0xff] %v12739_v43  ;;  %7593 = vperm.xlu1 %12243, %v7219_v40   ;;  %7588 = vperm.xlu0 %12242, %v7218_v41   ;;  %v11276_v40 = vld [vmem:[#allocation2 + $0x158] sm:$0xff] }
  0xf8   : > { %1109 = vmatmul.bf16.gmra.mxu0 %v11241_v37  ;;  %1189 = vmatmul.bf16.gmra.mxu1 %v11257_v39  ;;  %v11292_v41 = vld [vmem:[#allocation2 + $0x1d8] sm:$0xff] }
  0xf9   : > { %1269 = vmatmul.bf16.gmra.mxu2 %v11273_v44  ;;  %1349 = vmatmul.bf16.gmra.mxu3 %v11289_v45  ;;  %v7241_v44 = vld [vmem:[%s18519_s2 + $0x298] sm:$0xff]  ;;  %v7240_v45 = vld [vmem:[%s18519_s2 + $0x290] sm:$0xff] }
  0xfc   : > { %v12750_v49 = vpop.f32.mrf.mxu2  ;;  %v12752_v50 = vpop.f32.mrf.mxu3 }
  0xfd   : > { %18653 = vst [vmem:[#allocation8_spill] sm:$0xff] %v12750_v49  ;;  %v12754_v51 = vpop.f32.mrf.mxu0  ;;  %v12756_v52 = vpop.f32.mrf.mxu1 }
  0xfe   : > { %18654 = vst [vmem:[#allocation9_spill] sm:$0xff] %v12752_v50  ;;  %7613 = vperm.xlu2 %12244, %v7223_v46   ;;  %v7239_v46 = vld [vmem:[%s18519_s2 + $0x288] sm:$0xff]  ;;  %v7265_v50 = vld [vmem:[%s18519_s2 + $0x358] sm:$0xff] }
  0xff   : > { %18655 = vst [vmem:[#allocation10_spill] sm:$0xff] %v12754_v51  ;;  %7608 = vperm.xlu1 %12243, %v7222_v47   ;;  %7603 = vperm.xlu0 %12242, %v7221_v48  }
 0x100   : > { %18656 = vst [vmem:[#allocation11_spill] sm:$0xff] %v12756_v52 }
 0x104   : > { %v12771_v60 = vpop.f32.mrf.mxu2  ;;  %v12773_v61 = vpop.f32.mrf.mxu3 }
 0x105   : > { %18657 = vst [vmem:[#allocation12_spill] sm:$0xff] %v12771_v60  ;;  %v12775_v62 = vpop.f32.mrf.mxu0  ;;  %v12777_v63 = vpop.f32.mrf.mxu1  ;;  %v7263_v60 = vld [vmem:[%s18519_s2 + $0x348] sm:$0xff] }
 0x106   : > { %18658 = vst [vmem:[#allocation13_spill] sm:$0xff] %v12773_v61  ;;  %7628 = vperm.xlu2 %12244, %v7226_v56   ;;  %v11296_v61 = vld [vmem:[#allocation2 + $0x1f8] sm:$0xff] }
 0x107   : > { %18659 = vst [vmem:[#allocation14_spill] sm:$0xff] %v12775_v62  ;;  %7623 = vperm.xlu1 %12243, %v7225_v58   ;;  %7618 = vperm.xlu0 %12242, %v7224_v59   ;;  %v11245_v59 = vld [vmem:[#allocation2 + $0x60] sm:$0xff] }
 0x108   : > { %18660 = vst [vmem:[#allocation15_spill] sm:$0xff] %v12777_v63  ;;  %1114 = vmatmul.bf16.gmra.mxu0 %v11242_v55  ;;  %1194 = vmatmul.bf16.gmra.mxu1 %v11258_v57 }
 0x109   : > { %1274 = vmatmul.bf16.gmra.mxu2 %v11274_v0  ;;  %1354 = vmatmul.bf16.gmra.mxu3 %v11290_v1  ;;  %v7244_v0 = vld [vmem:[%s18519_s2 + $0x2b0] sm:$0xff]  ;;  %v11261_v1 = vld [vmem:[#allocation2 + $0xe0] sm:$0xff] }
 0x10c   : > { %v12788_v5 = vpop.f32.mrf.mxu2  ;;  %v12790_v6 = vpop.f32.mrf.mxu3 }
 0x10d   : > { %18661 = vst [vmem:[#allocation16_spill] sm:$0xff] %v12788_v5  ;;  %v12792_v7 = vpop.f32.mrf.mxu0  ;;  %v12794_v8 = vpop.f32.mrf.mxu1 }
 0x10e   : > { %18662 = vst [vmem:[#allocation17_spill] sm:$0xff] %v12790_v6  ;;  %7643 = vperm.xlu2 %12244, %v7229_v2   ;;  %v7243_v2 = vld [vmem:[%s18519_s2 + $0x2a8] sm:$0xff] }
 0x10f   : > { %18663 = vst [vmem:[#allocation18_spill] sm:$0xff] %v12792_v7  ;;  %7638 = vperm.xlu1 %12243, %v7228_v3   ;;  %7633 = vperm.xlu0 %12242, %v7227_v4   ;;  %v7242_v3 = vld [vmem:[%s18519_s2 + $0x2a0] sm:$0xff] }
 0x110   : > { %18664 = vst [vmem:[#allocation19_spill] sm:$0xff] %v12794_v8 }
 0x114   : > { %v12809_v16 = vpop.f32.mrf.mxu2  ;;  %v12811_v17 = vpop.f32.mrf.mxu3 }
 0x115   : > { %18665 = vst [vmem:[#allocation20_spill] sm:$0xff] %v12809_v16  ;;  %v12813_v18 = vpop.f32.mrf.mxu0  ;;  %v12815_v19 = vpop.f32.mrf.mxu1 }
 0x116   : > { %18666 = vst [vmem:[#allocation21_spill] sm:$0xff] %v12811_v17  ;;  %7658 = vperm.xlu2 %12244, %v7232_v12  }
 0x117   : > { %18667 = vst [vmem:[#allocation22_spill] sm:$0xff] %v12813_v18  ;;  %7653 = vperm.xlu1 %12243, %v7231_v14   ;;  %7648 = vperm.xlu0 %12242, %v7230_v15   ;;  %v11277_v14 = vld [vmem:[#allocation2 + $0x160] sm:$0xff] }
 0x118   : > { %18668 = vst [vmem:[#allocation23_spill] sm:$0xff] %v12815_v19  ;;  %1119 = vmatmul.bf16.gmra.mxu0 %v11243_v11  ;;  %1199 = vmatmul.bf16.gmra.mxu1 %v11259_v13  ;;  %v11293_v15 = vld [vmem:[#allocation2 + $0x1e0] sm:$0xff] }
 0x119   : > { %1279 = vmatmul.bf16.gmra.mxu2 %v11275_v20  ;;  %1359 = vmatmul.bf16.gmra.mxu3 %v11291_v21  ;;  %v7247_v20 = vld [vmem:[%s18519_s2 + $0x2c8] sm:$0xff]  ;;  %v7246_v21 = vld [vmem:[%s18519_s2 + $0x2c0] sm:$0xff] }
 0x11c   : > { %v12826_v25 = vpop.f32.mrf.mxu2  ;;  %v12828_v26 = vpop.f32.mrf.mxu3 }
 0x11d   : > { %18669 = vst [vmem:[#allocation24_spill] sm:$0xff] %v12826_v25  ;;  %v12830_v27 = vpop.f32.mrf.mxu0  ;;  %v12832_v28 = vpop.f32.mrf.mxu1 }
 0x11e   : > { %18670 = vst [vmem:[#allocation25_spill] sm:$0xff] %v12828_v26  ;;  %7673 = vperm.xlu2 %12244, %v7235_v22   ;;  %v7245_v22 = vld [vmem:[%s18519_s2 + $0x2b8] sm:$0xff] }
 0x11f   : > { %18671 = vst [vmem:[#allocation26_spill] sm:$0xff] %v12830_v27  ;;  %7668 = vperm.xlu1 %12243, %v7234_v23   ;;  %7663 = vperm.xlu0 %12242, %v7233_v24  }
 0x120   : > { %18672 = vst [vmem:[#allocation27_spill] sm:$0xff] %v12832_v28 }
 0x124   : > { %v12847_v36 = vpop.f32.mrf.mxu2  ;;  %v12849_v37 = vpop.f32.mrf.mxu3 }
 0x125   : > { %18673 = vst [vmem:[#allocation28_spill] sm:$0xff] %v12847_v36  ;;  %v12851_v38 = vpop.f32.mrf.mxu0  ;;  %v12853_v39 = vpop.f32.mrf.mxu1 }
 0x126   : > { %18674 = vst [vmem:[#allocation29_spill] sm:$0xff] %v12849_v37  ;;  %7688 = vperm.xlu2 %12244, %v7238_v32  }
 0x127   : > { %18675 = vst [vmem:[#allocation30_spill] sm:$0xff] %v12851_v38  ;;  %7683 = vperm.xlu1 %12243, %v7237_v34   ;;  %7678 = vperm.xlu0 %12242, %v7236_v35   ;;  %v7250_v34 = vld [vmem:[%s18519_s2 + $0x2e0] sm:$0xff]  ;;  %v11262_v35 = vld [vmem:[#allocation2 + $0xe8] sm:$0xff] }
 0x128   : > { %18676 = vst [vmem:[#allocation31_spill] sm:$0xff] %v12853_v39  ;;  %1124 = vmatmul.bf16.gmra.mxu0 %v11244_v31  ;;  %1204 = vmatmul.bf16.gmra.mxu1 %v11260_v33  ;;  %v11246_v33 = vld [vmem:[#allocation2 + $0x68] sm:$0xff] }
 0x129   : > { %1284 = vmatmul.bf16.gmra.mxu2 %v11276_v40  ;;  %1364 = vmatmul.bf16.gmra.mxu3 %v11292_v41  ;;  %v7249_v40 = vld [vmem:[%s18519_s2 + $0x2d8] sm:$0xff]  ;;  %v7248_v41 = vld [vmem:[%s18519_s2 + $0x2d0] sm:$0xff] }
 0x12c   : > { %v12864_v47 = vpop.f32.mrf.mxu2  ;;  %v12866_v48 = vpop.f32.mrf.mxu3 }
 0x12d   : > { %18677 = vst [vmem:[#allocation32_spill] sm:$0xff] %v12864_v47  ;;  %v12868_v55 = vpop.f32.mrf.mxu0  ;;  %v12870_v56 = vpop.f32.mrf.mxu1 }
 0x12e   : > { %18678 = vst [vmem:[#allocation33_spill] sm:$0xff] %v12866_v48  ;;  %7703 = vperm.xlu2 %12244, %v7241_v44  }
 0x12f   : > { %18679 = vst [vmem:[#allocation34_spill] sm:$0xff] %v12868_v55  ;;  %7698 = vperm.xlu1 %12243, %v7240_v45   ;;  %7693 = vperm.xlu0 %12242, %v7239_v46  }
 0x130   : > { %18680 = vst [vmem:[#allocation35_spill] sm:$0xff] %v12870_v56 }
 0x134   : > { %v12885_v4 = vpop.f32.mrf.mxu2  ;;  %v12887_v11 = vpop.f32.mrf.mxu3 }
 0x135   : > { %18681 = vst [vmem:[#allocation36_spill] sm:$0xff] %v12885_v4  ;;  %v12889_v12 = vpop.f32.mrf.mxu0  ;;  %v12891_v13 = vpop.f32.mrf.mxu1 }
 0x136   : > { %18682 = vst [vmem:[#allocation37_spill] sm:$0xff] %v12887_v11  ;;  %7718 = vperm.xlu2 %12244, %v7244_v0   ;;  %v11278_v0 = vld [vmem:[#allocation2 + $0x168] sm:$0xff] }
 0x137   : > { %18683 = vst [vmem:[#allocation38_spill] sm:$0xff] %v12889_v12  ;;  %7713 = vperm.xlu1 %12243, %v7243_v2   ;;  %7708 = vperm.xlu0 %12242, %v7242_v3   ;;  %v7253_v2 = vld [vmem:[%s18519_s2 + $0x2f8] sm:$0xff]  ;;  %v7252_v3 = vld [vmem:[%s18519_s2 + $0x2f0] sm:$0xff] }
 0x138   : > { %18684 = vst [vmem:[#allocation39_spill] sm:$0xff] %v12891_v13  ;;  %1129 = vmatmul.bf16.gmra.mxu0 %v11245_v59  ;;  %1209 = vmatmul.bf16.gmra.mxu1 %v11261_v1  ;;  %v11294_v1 = vld [vmem:[#allocation2 + $0x1e8] sm:$0xff] }
 0x139   : > { %1289 = vmatmul.bf16.gmra.mxu2 %v11277_v14  ;;  %1369 = vmatmul.bf16.gmra.mxu3 %v11293_v15  ;;  %v7251_v14 = vld [vmem:[%s18519_s2 + $0x2e8] sm:$0xff] }
 0x13c   : > { %v12902_v23 = vpop.f32.mrf.mxu2  ;;  %v12904_v24 = vpop.f32.mrf.mxu3 }
 0x13d   : > { %18685 = vst [vmem:[#allocation40_spill] sm:$0xff] %v12902_v23  ;;  %v12906_v31 = vpop.f32.mrf.mxu0  ;;  %v12908_v32 = vpop.f32.mrf.mxu1 }
 0x13e   : > { %18686 = vst [vmem:[#allocation41_spill] sm:$0xff] %v12904_v24  ;;  %7733 = vperm.xlu2 %12244, %v7247_v20  }
 0x13f   : > { %18687 = vst [vmem:[#allocation42_spill] sm:$0xff] %v12906_v31  ;;  %7728 = vperm.xlu1 %12243, %v7246_v21   ;;  %7723 = vperm.xlu0 %12242, %v7245_v22  }
 0x140   : > { %18688 = vst [vmem:[#allocation43_spill] sm:$0xff] %v12908_v32 }
 0x144   : > { %v12919_v44 = vpop.f32.mrf.mxu2  ;;  %v12921_v45 = vpop.f32.mrf.mxu3 }
 0x145   : > { %18689 = vst [vmem:[#allocation44_spill] sm:$0xff] %v12919_v44  ;;  %v12923_v46 = vpop.f32.mrf.mxu0  ;;  %v12925_v59 = vpop.f32.mrf.mxu1 }
 0x146   : > { %18690 = vst [vmem:[#allocation45_spill] sm:$0xff] %v12921_v45  ;;  %7748 = vperm.xlu2 %12244, %v7250_v34   ;;  %v7256_v34 = vld [vmem:[%s18519_s2 + $0x310] sm:$0xff] }
 0x147   : > { %18691 = vst [vmem:[#allocation46_spill] sm:$0xff] %v12923_v46  ;;  %7743 = vperm.xlu1 %12243, %v7249_v40   ;;  %7738 = vperm.xlu0 %12242, %v7248_v41   ;;  %v7255_v40 = vld [vmem:[%s18519_s2 + $0x308] sm:$0xff]  ;;  %v7254_v41 = vld [vmem:[%s18519_s2 + $0x300] sm:$0xff] }
 0x148   : > { %18692 = vst [vmem:[#allocation47_spill] sm:$0xff] %v12925_v59  ;;  %1134 = vmatmul.bf16.gmra.mxu0 %v11246_v33  ;;  %1214 = vmatmul.bf16.gmra.mxu1 %v11262_v35  ;;  %v11247_v33 = vld [vmem:[#allocation2 + $0x70] sm:$0xff] }
 0x149   : > { %1294 = vmatmul.bf16.gmra.mxu2 %v11278_v0  ;;  %1374 = vmatmul.bf16.gmra.mxu3 %v11294_v1  ;;  %v11263_v35 = vld [vmem:[#allocation2 + $0xf0] sm:$0xff] }
 0x14c   : > { %v12936_v15 = vpop.f32.mrf.mxu2  ;;  %v12938_v20 = vpop.f32.mrf.mxu3 }
 0x14d   : > { %18693 = vst [vmem:[#allocation48_spill] sm:$0xff] %v12936_v15  ;;  %v12940_v21 = vpop.f32.mrf.mxu0  ;;  %v12942_v22 = vpop.f32.mrf.mxu1 }
 0x14e   : > { %18694 = vst [vmem:[#allocation49_spill] sm:$0xff] %v12938_v20  ;;  %7763 = vperm.xlu2 %12244, %v7253_v2  }
 0x14f   : > { %18695 = vst [vmem:[#allocation50_spill] sm:$0xff] %v12940_v21  ;;  %7758 = vperm.xlu1 %12243, %v7252_v3   ;;  %7753 = vperm.xlu0 %12242, %v7251_v14   ;;  %v11279_v14 = vld [vmem:[#allocation2 + $0x170] sm:$0xff] }
 0x150   : > { %18696 = vst [vmem:[#allocation51_spill] sm:$0xff] %v12942_v22 }
 0x154   : > { %v12953_v0 = vpop.f32.mrf.mxu2  ;;  %v12955_v1 = vpop.f32.mrf.mxu3 }
 0x155   : > { %18697 = vst [vmem:[#allocation52_spill] sm:$0xff] %v12953_v0  ;;  %v12957_v2 = vpop.f32.mrf.mxu0  ;;  %v12959_v3 = vpop.f32.mrf.mxu1 }
 0x156   : > { %18698 = vst [vmem:[#allocation53_spill] sm:$0xff] %v12955_v1  ;;  %7778 = vperm.xlu2 %12244, %v7256_v34  }
 0x157   : > { %18699 = vst [vmem:[#allocation54_spill] sm:$0xff] %v12957_v2  ;;  %7773 = vperm.xlu1 %12243, %v7255_v40   ;;  %7768 = vperm.xlu0 %12242, %v7254_v41   ;;  %v7262_v40 = vld [vmem:[%s18519_s2 + $0x340] sm:$0xff]  ;;  %v11264_v41 = vld [vmem:[#allocation2 + $0xf8] sm:$0xff] }
 0x158   : > { %18700 = vst [vmem:[#allocation55_spill] sm:$0xff] %v12959_v3  ;;  %1139 = vmatmul.bf16.gmra.mxu0 %v11247_v33  ;;  %1219 = vmatmul.bf16.gmra.mxu1 %v11263_v35 }
 0x159   : > { %1299 = vmatmul.bf16.gmra.mxu2 %v11279_v14  ;;  %1379 = vmatmul.bf16.gmra.mxu3 %v11295_v54  ;;  %v11248_v54 = vld [vmem:[#allocation2 + $0x78] sm:$0xff] }
 0x15a   : > { %v7261_v14 = vld [vmem:[%s18519_s2 + $0x338] sm:$0xff] }
 0x15c   : > { %v12970_v30 = vpop.f32.mrf.mxu2  ;;  %v12972_v34 = vpop.f32.mrf.mxu3 }
 0x15d   : > { %18701 = vst [vmem:[#allocation56_spill] sm:$0xff] %v12970_v30  ;;  %v12974_v33 = vpop.f32.mrf.mxu0  ;;  %v12976_v35 = vpop.f32.mrf.mxu1 }
 0x15e   : > { %18702 = vst [vmem:[#allocation57_spill] sm:$0xff] %v12972_v34  ;;  %7793 = vperm.xlu2 %12244, %v7259_v53  }
 0x15f   : > { %18703 = vst [vmem:[#allocation58_spill] sm:$0xff] %v12974_v33  ;;  %7783 = vperm.xlu0 %12242, %v7257_v10   ;;  %7788 = vperm.xlu1 %12243, %v7258_v9   ;;  %v11280_v10 = vld [vmem:[#allocation2 + $0x178] sm:$0xff] }
 0x160   : > { %18704 = vst [vmem:[#allocation59_spill] sm:$0xff] %v12976_v35 }
 0x164   : > { %v12987_v58 = vpop.f32.mrf.mxu2  ;;  %v12989_v57 = vpop.f32.mrf.mxu3 }
 0x165   : > { %18705 = vst [vmem:[#allocation60_spill] sm:$0xff] %v12987_v58  ;;  %v12991_v53 = vpop.f32.mrf.mxu0  ;;  %v12993_v9 = vpop.f32.mrf.mxu1 }
 0x166   : > { %18706 = vst [vmem:[#allocation61_spill] sm:$0xff] %v12989_v57  ;;  %7808 = vperm.xlu2 %12244, %v7262_v40  }
 0x167   : > { %18707 = vst [vmem:[#allocation62_spill] sm:$0xff] %v12991_v53  ;;  %7803 = vperm.xlu1 %12243, %v7261_v14   ;;  %7798 = vperm.xlu0 %12242, %v7260_v29   ;;  %v7264_v29 = vld [vmem:[%s18519_s2 + $0x350] sm:$0xff]  ;;  %v1908_v14 = vpack.c.bf16 %v12974_v33, %v12957_v2 }
 0x168   : > { %18708 = vst [vmem:[#allocation63_spill] sm:$0xff] %v12993_v9  ;;  %1144 = vmatmul.bf16.gmra.mxu0 %v11248_v54  ;;  %1224 = vmatmul.bf16.gmra.mxu1 %v11264_v41 }
 0x169   : > { %1304 = vmatmul.bf16.gmra.mxu2 %v11280_v10  ;;  %1384 = vmatmul.bf16.gmra.mxu3 %v11296_v61  ;;  %v1924_v10 = vpack.c.bf16 %v12976_v35, %v12959_v3  ;;  %v7269_v3 = vld [vmem:[%s18519_s2 + $0x378] sm:$0xff] }
 0x16c   : > { %v13001_v49 = vpop.f32.mrf.mxu2  ;;  %v13003_v17 = vpop.f32.mrf.mxu3 }
 0x16d   : > { %18709 = vst [vmem:[#allocation64_spill] sm:$0xff] %v13001_v49  ;;  %v13008_v54 = vpop.f32.mrf.mxu0  ;;  %v13010_v40 = vpop.f32.mrf.mxu1 }
 0x16e   : > { %18710 = vst [vmem:[#allocation65_spill] sm:$0xff] %v13003_v17  ;;  %v1909_v61 = vpack.c.bf16 %v13008_v54, %v12991_v53  ;;  %v1925_v41 = vpack.c.bf16 %v13010_v40, %v12993_v9  ;;  %7823 = vperm.xlu2 %12244, %v7265_v50   ;;  %v7267_v50 = vld [vmem:[%s18519_s2 + $0x368] sm:$0xff] }
 0x16f   : > { %18711 = vst [vmem:[#allocation66_spill] sm:$0xff] %v13008_v54  ;;  %7813 = vperm.xlu0 %12242, %v7263_v60   ;;  %7818 = vperm.xlu1 %12243, %v7264_v29   ;;  %v7266_v60 = vld [vmem:[%s18519_s2 + $0x360] sm:$0xff]  ;;  %v7281_v54 = vld [vmem:[%s18519_s2 + $0x3d8] sm:$0xff] }
 0x170   : > { %18712 = vst [vmem:[#allocation67_spill] sm:$0xff] %v13010_v40  ;;  %4526 = vmatpush.bf16.msrb.mxu1 %v1909_v61  ;;  %5184 = vmatpush.bf16.msrb.mxu3 %v1925_v41  ;;  %v1907_v41 = vpack.c.bf16 %v12940_v21, %v12923_v46  ;;  %v1922_v40 = vpack.c.bf16 %v12908_v32, %v12891_v13 }
 0x171   : > { %v18729_v32 = vpack.c.bf16 %v12792_v7, %v12775_v62  ;;  %v7280_v62 = vld [vmem:[%s18519_s2 + $0x3d0] sm:$0xff] }
 0x174   : > { %4527 = vmatpush.bf16.msrb.mxu1 %v1908_v14  ;;  %5185 = vmatpush.bf16.msrb.mxu3 %v1924_v10  ;;  %v13020_v6 = vpop.f32.mrf.mxu2  ;;  %v13022_v16 = vpop.f32.mrf.mxu3  ;;  %v1923_v14 = vpack.c.bf16 %v12942_v22, %v12925_v59  ;;  %v1906_v10 = vpack.c.bf16 %v12906_v31, %v12889_v12  ;;  %v7282_v12 = vld [vmem:[%s18519_s2 + $0x3e0] sm:$0xff] }
 0x175   : > { %18713 = vst [vmem:[#allocation68_spill] sm:$0xff] %v13020_v6  ;;  %v13030_v29 = vpop.f32.mrf.mxu0  ;;  %v13032_v61 = vpop.f32.mrf.mxu1  ;;  %v1941_v13 = vpack.c.bf16 %v13020_v6, %v13001_v49 }
 0x176   : > { %18714 = vst [vmem:[#allocation69_spill] sm:$0xff] %v13022_v16 }
 0x177   : > { %18715 = vst [vmem:[#allocation70_spill] sm:$0xff] %v13030_v29  ;;  %7833 = vperm.xlu1 %12243, %v7267_v50   ;;  %7828 = vperm.xlu0 %12242, %v7266_v60  }
 0x178   : > { %18716 = vst [vmem:[#allocation71_spill] sm:$0xff] %v13032_v61  ;;  %4528 = vmatpush.bf16.msrb.mxu1 %v1907_v41  ;;  %5186 = vmatpush.bf16.msrb.mxu3 %v1923_v14  ;;  %v18721_v41 = vpack.c.bf16 %v12868_v55, %v12851_v38  ;;  %v7270_v14 = vld [vmem:[%s18519_s2 + $0x380] sm:$0xff] }
 0x17c   : > { %4529 = vmatpush.bf16.msrb.mxu1 %v1906_v10  ;;  %5187 = vmatpush.bf16.msrb.mxu3 %v1922_v40  ;;  %v13042_v9 = vpop.f32.mrf.mxu2  ;;  %v13044_v35 = vpop.f32.mrf.mxu3  ;;  %v18722_v40 = vpack.c.bf16 %v12870_v56, %v12853_v39  ;;  %v18723_v10 = vpack.c.bf16 %v12830_v27, %v12813_v18  ;;  %v1957_v56 = vpack.c.bf16 %v13022_v16, %v13003_v17  ;;  %v7272_v17 = vld [vmem:[%s18519_s2 + $0x390] sm:$0xff] }
 0x17d   : > { %18717 = vst [vmem:[#allocation72_spill] sm:$0xff] %v13042_v9  ;;  %v13049_v50 = vpop.f32.mrf.mxu0  ;;  %v13051_v60 = vpop.f32.mrf.mxu1 }
 0x17e   : > { %18718 = vst [vmem:[#allocation73_spill] sm:$0xff] %v13044_v35 }
 0x17f   : > { %18719 = vst [vmem:[#allocation74_spill] sm:$0xff] %v13049_v50  ;;  %7843 = vperm.xlu0 %12242, %v7269_v3   ;;  %7848 = vperm.xlu1 %12243, %v7270_v14   ;;  %v18724_v3 = vpack.c.bf16 %v12832_v28, %v12815_v19  ;;  %v18730_v14 = vpack.c.bf16 %v12794_v8, %v12777_v63 }
 0x180   : > { %18720 = vst [vmem:[#allocation75_spill] sm:$0xff] %v13051_v60  ;;  %4530 = vmatpush.bf16.msrb.mxu1 %v18721_v41  ;;  %5188 = vmatpush.bf16.msrb.mxu3 %v18722_v40  ;;  %v18732_v28 = vpack.c.bf16 %v12756_v52, %v12739_v43 }
 0x184   : > { %4531 = vmatpush.bf16.msrb.mxu1 %v18723_v10  ;;  %5189 = vmatpush.bf16.msrb.mxu3 %v18724_v3  ;;  %v13068_v22 = vpop.f32.mrf.mxu2  ;;  %v13070_v41 = vpop.f32.mrf.mxu3  ;;  %v9182_v10 = vld [vmem:[%s18518_s1] sm:$0xf] }
 0x185   : > { %18725 = vst [vmem:[#allocation76_spill] sm:$0xff] %v13068_v22  ;;  %v13072_v59 = vpop.f32.mrf.mxu0  ;;  %v13074_v40 = vpop.f32.mrf.mxu1  ;;  %v11309_v3 = vld [vmem:[%s18518_s1 + $0x1c] sm:$0xf0] }
 0x186   : > { %18726 = vst [vmem:[#allocation77_spill] sm:$0xff] %v13070_v41  ;;  %v9183_v39 = vor.u32 %v11309_v3, %v9182_v10  ;;  %v1940_v10 = vpack.c.bf16 %v12987_v58, %v12970_v30  ;;  %v1956_v3 = vpack.c.bf16 %v12989_v57, %v12972_v34  ;;  %v1937_v34 = vpack.c.bf16 %v12885_v4, %v12864_v47 }
 0x187   : > { %18727 = vst [vmem:[#allocation78_spill] sm:$0xff] %v13072_v59  ;;  %7858 = vperm.xlu0 %12242, %v7272_v17   ;;  %v9214_v17 = vld [vmem:[%s18518_s1 + $0x40] sm:$0xf]  ;;  %v1952_v58 = vpack.c.bf16 %v12849_v37, %v12828_v26 }
 0x188   : > { %18728 = vst [vmem:[#allocation79_spill] sm:$0xff] %v13074_v40  ;;  %4532 = vmatpush.bf16.msrb.mxu1 %v18729_v32  ;;  %5190 = vmatpush.bf16.msrb.mxu3 %v18730_v14  ;;  %v7268_v32 = vld [vmem:[%s18519_s2 + $0x370] sm:$0xff]  ;;  %v18731_v14 = vpack.c.bf16 %v12754_v51, %v12737_v42 }
 0x189   : > { %7838 = vperm.xlu2 %12244, %v7268_v32   ;;  %v1955_v32 = vpack.c.bf16 %v12955_v1, %v12938_v20  ;;  %v1953_v1 = vpack.c.bf16 %v12887_v11, %v12866_v48  ;;  %v7275_v48 = vld [vmem:[%s18519_s2 + $0x3a8] sm:$0xff] }
 0x18c   : > { %4533 = vmatpush.bf16.msrb.mxu1 %v18731_v14  ;;  %5191 = vmatpush.bf16.msrb.mxu3 %v18732_v28  ;;  %v13101_v19 = vpop.f32.mrf.mxu2  ;;  %v13103_v6 = vpop.f32.mrf.mxu3  ;;  %v1939_v28 = vpack.c.bf16 %v12953_v0, %v12936_v15  ;;  %v7273_v14 = vld [vmem:[%s18519_s2 + $0x398] sm:$0xff]  ;;  %v18753_v0 = vld [vmem:[#allocation12_spill] sm:$0xff]  ;;  %v11325_v15 = vld [vmem:[%s18518_s1 + $0x9c] sm:$0xf0] }
 0x18d   : > { %18733 = vst [vmem:[#allocation80_spill] sm:$0xff] %v13101_v19  ;;  %v13105_v49 = vpop.f32.mrf.mxu0  ;;  %v13107_v16 = vpop.f32.mrf.mxu1  ;;  %7863 = vperm.xlu1 %12243, %v7273_v14   ;;  %v11317_v14 = vld [vmem:[%s18518_s1 + $0x5c] sm:$0xf0] }
 0x18e   : > { %18734 = vst [vmem:[#allocation81_spill] sm:$0xff] %v13103_v6 }
 0x18f   : > { %18735 = vst [vmem:[#allocation82_spill] sm:$0xff] %v13105_v49  ;;  %4534 = vmatmul.bf16.vlgmr.msrb.gmra.mxu1 %v9183_v39  ;;  %7873 = vperm.xlu0 %12242, %v7275_v48   ;;  %v9246_v48 = vld [vmem:[%s18518_s1 + $0x80] sm:$0xf] }
 0x190   : > { %18736 = vst [vmem:[#allocation83_spill] sm:$0xff] %v13107_v16  ;;  %5842 = vmatpush.bf16.msra.mxu1 %v1941_v13  ;;  %6500 = vmatpush.bf16.msra.mxu3 %v1957_v56 }
 0x194   : > { %5843 = vmatpush.bf16.msra.mxu1 %v1940_v10  ;;  %6501 = vmatpush.bf16.msra.mxu3 %v1956_v3  ;;  %v13123_v56 = vpop.f32.mrf.mxu2  ;;  %v13125_v39 = vpop.f32.mrf.mxu3  ;;  %v1938_v10 = vpack.c.bf16 %v12919_v44, %v12902_v23  ;;  %v1954_v3 = vpack.c.bf16 %v12921_v45, %v12904_v24  ;;  %v1936_v24 = vpack.c.bf16 %v12847_v36, %v12826_v25 }
 0x195   : > { %18737 = vst [vmem:[#allocation84_spill] sm:$0xff] %v13123_v56  ;;  %v13127_v13 = vpop.f32.mrf.mxu0  ;;  %v13129_v57 = vpop.f32.mrf.mxu1  ;;  %v9247_v44 = vor.u32 %v11325_v15, %v9246_v48 }
 0x196   : > { %18738 = vst [vmem:[#allocation85_spill] sm:$0xff] %v13125_v39 }
 0x197   : > { %18739 = vst [vmem:[#allocation86_spill] sm:$0xff] %v13127_v13 }
 0x198   : > { %18740 = vst [vmem:[#allocation87_spill] sm:$0xff] %v13129_v57  ;;  %5844 = vmatpush.bf16.msra.mxu1 %v1939_v28  ;;  %6502 = vmatpush.bf16.msra.mxu3 %v1955_v32  ;;  %v7271_v28 = vld [vmem:[%s18519_s2 + $0x388] sm:$0xff]  ;;  %v9215_v32 = vor.u32 %v11317_v14, %v9214_v17  ;;  %v18746_v14 = vld [vmem:[#allocation17_spill] sm:$0xff] }
 0x199   : > { %7853 = vperm.xlu2 %12244, %v7271_v28   ;;  %v18747_v28 = vld [vmem:[#allocation21_spill] sm:$0xff] }
 0x19a   : > { %v1951_v11 = vpack.c.bf16 %v18747_v28, %v18746_v14 }
 0x19c   : > { %5845 = vmatpush.bf16.msra.mxu1 %v1938_v10  ;;  %6503 = vmatpush.bf16.msra.mxu3 %v1954_v3  ;;  %v13148_v20 = vpop.f32.mrf.mxu2  ;;  %v13150_v45 = vpop.f32.mrf.mxu3  ;;  %v18745_v3 = vld [vmem:[#allocation20_spill] sm:$0xff] }
 0x19d   : > { %18741 = vst [vmem:[#allocation88_spill] sm:$0xff] %v13148_v20  ;;  %v13156_v30 = vpop.f32.mrf.mxu0  ;;  %v13158_v10 = vpop.f32.mrf.mxu1  ;;  %v1935_v17 = vpack.c.bf16 %v18745_v3, %v12788_v5 }
 0x19e   : > { %18742 = vst [vmem:[#allocation89_spill] sm:$0xff] %v13150_v45 }
 0x19f   : > { %18743 = vst [vmem:[#allocation90_spill] sm:$0xff] %v13156_v30  ;;  %4539 = vmatmul.bf16.gmra.mxu1 %v9215_v32  ;;  %v18752_v32 = vld [vmem:[#allocation8_spill] sm:$0xff] }
 0x1a0   : > { %18744 = vst [vmem:[#allocation91_spill] sm:$0xff] %v13158_v10  ;;  %5846 = vmatpush.bf16.msra.mxu1 %v1937_v34  ;;  %6504 = vmatpush.bf16.msra.mxu3 %v1953_v1  ;;  %v1934_v28 = vpack.c.bf16 %v18753_v0, %v18752_v32  ;;  %v7279_v0 = vld [vmem:[%s18519_s2 + $0x3c8] sm:$0xff]  ;;  %v7278_v32 = vld [vmem:[%s18519_s2 + $0x3c0] sm:$0xff] }
 0x1a1   : > { %7888 = vperm.xlu0 %12242, %v7278_v32  }
 0x1a4   : > { %5847 = vmatpush.bf16.msra.mxu1 %v1936_v24  ;;  %6505 = vmatpush.bf16.msra.mxu3 %v1952_v58  ;;  %v13167_v37 = vpop.f32.mrf.mxu2  ;;  %v13169_v26 = vpop.f32.mrf.mxu3  ;;  %v18754_v24 = vld [vmem:[#allocation9_spill] sm:$0xff] }
 0x1a5   : > { %18748 = vst [vmem:[#allocation92_spill] sm:$0xff] %v13167_v37  ;;  %v13171_v34 = vpop.f32.mrf.mxu0  ;;  %v13173_v1 = vpop.f32.mrf.mxu1  ;;  %v18755_v58 = vld [vmem:[#allocation13_spill] sm:$0xff] }
 0x1a6   : > { %18749 = vst [vmem:[#allocation93_spill] sm:$0xff] %v13169_v26  ;;  %v1950_v14 = vpack.c.bf16 %v18755_v58, %v18754_v24  ;;  %v7276_v58 = vld [vmem:[%s18519_s2 + $0x3b0] sm:$0xff] }
 0x1a7   : > { %18750 = vst [vmem:[#allocation94_spill] sm:$0xff] %v13171_v34  ;;  %7878 = vperm.xlu1 %12243, %v7276_v58   ;;  %v7274_v58 = vld [vmem:[%s18519_s2 + $0x3a0] sm:$0xff] }
 0x1a8   : > { %18751 = vst [vmem:[#allocation95_spill] sm:$0xff] %v13173_v1  ;;  %5848 = vmatpush.bf16.msra.mxu1 %v1935_v17  ;;  %6506 = vmatpush.bf16.msra.mxu3 %v1951_v11 }
 0x1a9   : > { %7868 = vperm.xlu2 %12244, %v7274_v58   ;;  %v9310_v58 = vld [vmem:[%s18518_s1 + $0x100] sm:$0xf]  ;;  %7903 = vperm.xlu0 %12242, %v7281_v54  }
 0x1ac   : > { %5849 = vmatpush.bf16.msra.mxu1 %v1934_v28  ;;  %6507 = vmatpush.bf16.msra.mxu3 %v1950_v14  ;;  %v13185_v23 = vpop.f32.mrf.mxu2  ;;  %v13187_v11 = vpop.f32.mrf.mxu3  ;;  %v9278_v28 = vld [vmem:[%s18518_s1 + $0xc0] sm:$0xf] }
 0x1ad   : > { %18756 = vst [vmem:[#allocation96_spill] sm:$0xff] %v13185_v23  ;;  %v13189_v17 = vpop.f32.mrf.mxu0  ;;  %v13191_v4 = vpop.f32.mrf.mxu1 }
 0x1ae   : > { %18757 = vst [vmem:[#allocation97_spill] sm:$0xff] %v13187_v11 }
 0x1af   : > { %18758 = vst [vmem:[#allocation98_spill] sm:$0xff] %v13189_v17  ;;  %4544 = vmatmul.bf16.gmra.mxu1 %v9247_v44  ;;  %v11333_v44 = vld [vmem:[%s18518_s1 + $0xdc] sm:$0xf0]  ;;  %7893 = vperm.xlu1 %12243, %v7279_v0   ;;  %v7277_v0 = vld [vmem:[%s18519_s2 + $0x3b8] sm:$0xff] }
 0x1b0   : > { %18759 = vst [vmem:[#allocation99_spill] sm:$0xff] %v13191_v4  ;;  %v9279_v48 = vor.u32 %v11333_v44, %v9278_v28 }
 0x1b1   : > { %7883 = vperm.xlu2 %12244, %v7277_v0  }
 0x1b4   : > { %v13200_v14 = vpop.f32.mrf.mxu2  ;;  %v13202_v15 = vpop.f32.mrf.mxu3 }
 0x1b5   : > { %v13196_v24 = vpop.f32.mrf.mxu0  ;;  %v13198_v47 = vpop.f32.mrf.mxu1  ;;  %18762 = vst [vmem:[#allocation102_spill] sm:$0xff] %v13200_v14 }
 0x1b6   : > { %18760 = vst [vmem:[#allocation100_spill] sm:$0xff] %v13196_v24 }
 0x1b7   : > { %18761 = vst [vmem:[#allocation101_spill] sm:$0xff] %v13198_v47  ;;  %7908 = vperm.xlu1 %12243, %v7282_v12   ;;  %v11357_v12 = vld [vmem:[%s18518_s1 + $0x19c] sm:$0xf0] }
 0x1b8   : > { %18763 = vst [vmem:[#allocation103_spill] sm:$0xff] %v13202_v15 }
 0x1b9   : > { %7898 = vperm.xlu2 %12244, %v7280_v62  }
 0x1bc   : > { %v13217_v3 = vpop.f32.mrf.mxu2  ;;  %v13219_v5 = vpop.f32.mrf.mxu3 }
 0x1bd   : > { %v13213_v36 = vpop.f32.mrf.mxu0  ;;  %v13215_v25 = vpop.f32.mrf.mxu1  ;;  %18766 = vst [vmem:[#allocation106_spill] sm:$0xff] %v13217_v3 }
 0x1be   : > { %18764 = vst [vmem:[#allocation104_spill] sm:$0xff] %v13213_v36 }
 0x1bf   : > { %18765 = vst [vmem:[#allocation105_spill] sm:$0xff] %v13215_v25  ;;  %4549 = vmatmul.bf16.gmra.mxu1 %v9279_v48  ;;  %v11341_v48 = vld [vmem:[%s18518_s1 + $0x11c] sm:$0xf0] }
 0x1c0   : > { %18767 = vst [vmem:[#allocation107_spill] sm:$0xff] %v13219_v5  ;;  %v9311_v32 = vor.u32 %v11341_v48, %v9310_v58  ;;  %v9342_v58 = vld [vmem:[%s18518_s1 + $0x140] sm:$0xf] }
 0x1c1   : > { %v11349_v48 = vld [vmem:[%s18518_s1 + $0x15c] sm:$0xf0] }
 0x1c2   : > { %v9343_v0 = vor.u32 %v11349_v48, %v9342_v58  ;;  %v9190_v58 = vld [vmem:[%s18518_s1 + $0x8] sm:$0xf] }
 0x1c3   : > { %v11310_v48 = vld [vmem:[%s18518_s1 + $0x24] sm:$0xf0] }
 0x1c4   : > { %v13237_v8 = vpop.f32.mrf.mxu2  ;;  %v13239_v63 = vpop.f32.mrf.mxu3  ;;  %v9191_v27 = vor.u32 %v11310_v48, %v9190_v58 }
 0x1c5   : > { %v13227_v28 = vpop.f32.mrf.mxu0  ;;  %v13229_v44 = vpop.f32.mrf.mxu1  ;;  %18770 = vst [vmem:[#allocation110_spill] sm:$0xff] %v13237_v8 }
 0x1c6   : > { %18768 = vst [vmem:[#allocation108_spill] sm:$0xff] %v13227_v28  ;;  %5192 = vmatmul.bf16.vlgmr.msrb.gmra.mxu3 %v9191_v27 }
 0x1c7   : > { %18769 = vst [vmem:[#allocation109_spill] sm:$0xff] %v13229_v44 }
 0x1c8   : > { %18771 = vst [vmem:[#allocation111_spill] sm:$0xff] %v13239_v63 }
 0x1cc   : > { %v13251_v53 = vpop.f32.mrf.mxu2  ;;  %v13253_v33 = vpop.f32.mrf.mxu3 }
 0x1cd   : > { %v13244_v52 = vpop.f32.mrf.mxu0  ;;  %v13246_v43 = vpop.f32.mrf.mxu1  ;;  %18774 = vst [vmem:[#allocation114_spill] sm:$0xff] %v13251_v53 }
 0x1ce   : > { %18772 = vst [vmem:[#allocation112_spill] sm:$0xff] %v13244_v52 }
 0x1cf   : > { %18773 = vst [vmem:[#allocation113_spill] sm:$0xff] %v13246_v43  ;;  %4554 = vmatmul.bf16.gmra.mxu1 %v9311_v32 }
 0x1d0   : > { %18775 = vst [vmem:[#allocation115_spill] sm:$0xff] %v13253_v33 }
 0x1d4   : > { %v13269_v46 = vpop.f32.mrf.mxu2  ;;  %v13271_v31 = vpop.f32.mrf.mxu3 }
 0x1d5   : > { %v13255_v2 = vpop.f32.mrf.mxu0  ;;  %v13257_v21 = vpop.f32.mrf.mxu1  ;;  %18780 = vst [vmem:[#allocation120_spill] sm:$0xff] %v13269_v46 }
 0x1d6   : > { %18776 = vst [vmem:[#allocation116_spill] sm:$0xff] %v13255_v2 }
 0x1d7   : > { %18777 = vst [vmem:[#allocation117_spill] sm:$0xff] %v13257_v21 }
 0x1d8   : > { %18781 = vst [vmem:[#allocation121_spill] sm:$0xff] %v13271_v31 }
 0x1dc   : > { %v13292_v18 = vpop.f32.mrf.mxu2  ;;  %v13294_v7 = vpop.f32.mrf.mxu3 }
 0x1dd   : > { %v13265_v32 = vpop.f32.mrf.mxu0  ;;  %v13267_v54 = vpop.f32.mrf.mxu1  ;;  %18784 = vst [vmem:[#allocation124_spill] sm:$0xff] %v13292_v18 }
 0x1de   : > { %18778 = vst [vmem:[#allocation118_spill] sm:$0xff] %v13265_v32  ;;  %v1916_v27 = vpack.c.bf16 %v13265_v32, %v13255_v2  ;;  %v1932_v48 = vpack.c.bf16 %v13267_v54, %v13257_v21 }
 0x1df   : > { %18779 = vst [vmem:[#allocation119_spill] sm:$0xff] %v13267_v54  ;;  %4559 = vmatmul.bf16.gmra.mxu1 %v9343_v0  ;;  %v9374_v0 = vld [vmem:[%s18518_s1 + $0x180] sm:$0xf]  ;;  %v1930_v54 = vpack.c.bf16 %v13215_v25, %v13198_v47  ;;  %v11306_v47 = vld [vmem:[%s18518_s1 + $0xc] sm:$0xf] }
 0x1e0   : > { %18785 = vst [vmem:[#allocation125_spill] sm:$0xff] %v13294_v7  ;;  %v9375_v51 = vor.u32 %v11357_v12, %v9374_v0  ;;  %v7285_v12 = vld [vmem:[%s18519_s2 + $0x3f8] sm:$0xff] }
 0x1e1   : > { %7923 = vperm.xlu1 %12243, %v7285_v12  }
 0x1e4   : > { %v13311_v62 = vpop.f32.mrf.mxu2  ;;  %v13313_v0 = vpop.f32.mrf.mxu3 }
 0x1e5   : > { %v13276_v55 = vpop.f32.mrf.mxu0  ;;  %v13278_v38 = vpop.f32.mrf.mxu1  ;;  %18788 = vst [vmem:[#allocation128_spill] sm:$0xff] %v13311_v62 }
 0x1e6   : > { %18782 = vst [vmem:[#allocation122_spill] sm:$0xff] %v13276_v55 }
 0x1e7   : > { %18783 = vst [vmem:[#allocation123_spill] sm:$0xff] %v13278_v38 }
 0x1e8   : > { %18789 = vst [vmem:[#allocation129_spill] sm:$0xff] %v13313_v0 }
 0x1ec   : > { %v13344_v21 = vpop.f32.mrf.mxu2 }
 0x1ed   : > { %v13299_v42 = vpop.f32.mrf.mxu0  ;;  %v13301_v41 = vpop.f32.mrf.mxu1  ;;  %18790 = vst [vmem:[#allocation130_spill] sm:$0xff] %v13344_v21 }
 0x1ee   : > { %18786 = vst [vmem:[#allocation126_spill] sm:$0xff] %v13299_v42  ;;  %v1917_v35 = vpack.c.bf16 %v13299_v42, %v13276_v55  ;;  %v1933_v58 = vpack.c.bf16 %v13301_v41, %v13278_v38  ;;  %v11318_v38 = vld [vmem:[%s18518_s1 + $0x64] sm:$0xf0] }
 0x1ef   : > { %18787 = vst [vmem:[#allocation127_spill] sm:$0xff] %v13301_v41  ;;  %4564 = vmatmul.bf16.gmra.mxu1 %v9375_v51  ;;  %v7284_v51 = vld [vmem:[%s18519_s2 + $0x3f0] sm:$0xff]  ;;  %v9222_v41 = vld [vmem:[%s18518_s1 + $0x48] sm:$0xf] }
 0x1f0   : > { %4855 = vmatpush.bf16.msrb.mxu2 %v1917_v35  ;;  %5513 = vmatpush.bf16.msrb.mxu0 %v1933_v58  ;;  %v1915_v35 = vpack.c.bf16 %v13244_v52, %v13227_v28  ;;  %v1931_v58 = vpack.c.bf16 %v13246_v43, %v13229_v44  ;;  %v9223_v12 = vor.u32 %v11318_v38, %v9222_v41  ;;  %v13346_v43 = vpop.f32.mrf.mxu3  ;;  %v9184_v44 = vld [vmem:[%s18518_s1 + $0x20] sm:$0xf0] }
 0x1f1   : > { %7918 = vperm.xlu0 %12242, %v7284_v51   ;;  %v1914_v51 = vpack.c.bf16 %v13213_v36, %v13196_v24  ;;  %18791 = vst [vmem:[#allocation131_spill] sm:$0xff] %v13346_v43  ;;  %v1913_v38 = vpack.c.bf16 %v13189_v17, %v13171_v34  ;;  %v1929_v41 = vpack.c.bf16 %v13191_v4, %v13173_v1 }
 0x1f2   : > { %5197 = vmatmul.bf16.gmra.mxu3 %v9223_v12  ;;  %v1912_v12 = vpack.c.bf16 %v13156_v30, %v13127_v13  ;;  %v1910_v1 = vpack.c.bf16 %v13049_v50, %v13030_v29 }
 0x1f4   : > { %4856 = vmatpush.bf16.msrb.mxu2 %v1916_v27  ;;  %5514 = vmatpush.bf16.msrb.mxu0 %v1932_v48  ;;  %v9406_v27 = vld [vmem:[%s18518_s1 + $0x1c0] sm:$0xf] }
 0x1f5   : > { %v11365_v48 = vld [vmem:[%s18518_s1 + $0x1dc] sm:$0xf0] }
 0x1f8   : > { %4857 = vmatpush.bf16.msrb.mxu2 %v1915_v35  ;;  %5515 = vmatpush.bf16.msrb.mxu0 %v1931_v58  ;;  %v7283_v35 = vld [vmem:[%s18519_s2 + $0x3e8] sm:$0xff]  ;;  %v9407_v58 = vor.u32 %v11365_v48, %v9406_v27  ;;  %v1928_v27 = vpack.c.bf16 %v13158_v10, %v13129_v57  ;;  %v1927_v48 = vpack.c.bf16 %v13107_v16, %v13074_v40 }
 0x1f9   : > { %7913 = vperm.xlu2 %12244, %v7283_v35   ;;  %v13362_v35 = vpop.f32.mrf.mxu3 }
 0x1fa   : > { %18793 = vst [vmem:[#allocation133_spill] sm:$0xff] %v13362_v35  ;;  %v1965_v4 = vpack.c.bf16 %v13362_v35, %v13346_v43  ;;  %v1964_v35 = vpack.c.bf16 %v13313_v0, %v13294_v7  ;;  %v1944_v43 = vpack.c.bf16 %v13167_v37, %v13148_v20  ;;  %v1960_v0 = vpack.c.bf16 %v13169_v26, %v13150_v45 }
 0x1fc   : > { %4858 = vmatpush.bf16.msrb.mxu2 %v1914_v51  ;;  %5516 = vmatpush.bf16.msrb.mxu0 %v1930_v54  ;;  %v1911_v54 = vpack.c.bf16 %v13105_v49, %v13072_v59  ;;  %v13360_v51 = vpop.f32.mrf.mxu2 }
 0x1fd   : > { %18792 = vst [vmem:[#allocation132_spill] sm:$0xff] %v13360_v51 }
 0x1ff   : > { %4569 = vmatmul.bf16.gmra.mxu1 %v9407_v58  ;;  %v9438_v58 = vld [vmem:[%s18518_s1 + $0x200] sm:$0xf] }
 0x200   : > { %4859 = vmatpush.bf16.msrb.mxu2 %v1913_v38  ;;  %5517 = vmatpush.bf16.msrb.mxu0 %v1929_v41  ;;  %v9254_v38 = vld [vmem:[%s18518_s1 + $0x88] sm:$0xf] }
 0x201   : > { %v11326_v41 = vld [vmem:[%s18518_s1 + $0xa4] sm:$0xf0] }
 0x202   : > { %v9255_v25 = vor.u32 %v11326_v41, %v9254_v38  ;;  %v1926_v38 = vpack.c.bf16 %v13051_v60, %v13032_v61 }
 0x204   : > { %4860 = vmatpush.bf16.msrb.mxu2 %v1912_v12  ;;  %5518 = vmatpush.bf16.msrb.mxu0 %v1928_v27  ;;  %v11373_v12 = vld [vmem:[%s18518_s1 + $0x21c] sm:$0xf0]  ;;  %v11305_v27 = vld [vmem:[%s18518_s1 + $0x4] sm:$0xf] }
 0x205   : > { %5202 = vmatmul.bf16.gmra.mxu3 %v9255_v25  ;;  %v9439_v41 = vor.u32 %v11373_v12, %v9438_v58  ;;  %v9187_v10 = vor.u32 %v11305_v27, %v9184_v44  ;;  %v1947_v25 = vpack.c.bf16 %v13269_v46, %v13251_v53  ;;  %v1963_v44 = vpack.c.bf16 %v13271_v31, %v13253_v33  ;;  %v9216_v12 = vld [vmem:[%s18518_s1 + $0x60] sm:$0xf0] }
 0x206   : > { %v1962_v58 = vpack.c.bf16 %v13239_v63, %v13219_v5 }
 0x208   : > { %4861 = vmatpush.bf16.msrb.mxu2 %v1911_v54  ;;  %5519 = vmatpush.bf16.msrb.mxu0 %v1927_v48  ;;  %v9192_v54 = vld [vmem:[%s18518_s1 + $0x28] sm:$0xf0]  ;;  %v1949_v48 = vpack.c.bf16 %v13360_v51, %v13344_v21  ;;  %v1948_v51 = vpack.c.bf16 %v13311_v62, %v13292_v18 }
 0x209   : > { %v9195_v16 = vor.u32 %v11306_v47, %v9192_v54  ;;  %v1945_v54 = vpack.c.bf16 %v13200_v14, %v13185_v23 }
 0x20c   : > { %v13396_v57 = vpop.f32.mrf.mxu1  ;;  %4862 = vmatpush.bf16.msrb.mxu2 %v1910_v1  ;;  %5520 = vmatpush.bf16.msrb.mxu0 %v1926_v38  ;;  %v1946_v1 = vpack.c.bf16 %v13237_v8, %v13217_v3  ;;  %v11314_v38 = vld [vmem:[%s18518_s1 + $0x4c] sm:$0xf] }
 0x20f   : > { %4574 = vmatmul.bf16.gmra.mxu1 %v9439_v41  ;;  %4863 = vmatmul.bf16.vlgmr.msrb.gmra.mxu2 %v9187_v10  ;;  %v11334_v10 = vld [vmem:[%s18518_s1 + $0xe4] sm:$0xf0]  ;;  %v9224_v41 = vld [vmem:[%s18518_s1 + $0x68] sm:$0xf0] }
 0x210   : > { %6171 = vmatpush.bf16.msra.mxu2 %v1949_v48  ;;  %6829 = vmatpush.bf16.msra.mxu0 %v1965_v4  ;;  %v9286_v4 = vld [vmem:[%s18518_s1 + $0xc8] sm:$0xf]  ;;  %v1961_v48 = vpack.c.bf16 %v13202_v15, %v13187_v11 }
 0x211   : > { %5521 = vmatmul.bf16.vlgmr.msrb.gmra.mxu0 %v9195_v16  ;;  %v9470_v16 = vld [vmem:[%s18518_s1 + $0x240] sm:$0xf]  ;;  %v9287_v27 = vor.u32 %v11334_v10, %v9286_v4  ;;  %v9227_v10 = vor.u32 %v11314_v38, %v9224_v41  ;;  %v11321_v38 = vld [vmem:[%s18518_s1 + $0x84] sm:$0xf] }
 0x212   : > { %v9248_v41 = vld [vmem:[%s18518_s1 + $0xa0] sm:$0xf0] }
 0x214   : > { %6172 = vmatpush.bf16.msra.mxu2 %v1948_v51  ;;  %6830 = vmatpush.bf16.msra.mxu0 %v1964_v35  ;;  %v13406_v47 = vpop.f32.mrf.mxu1  ;;  %v11381_v51 = vld [vmem:[%s18518_s1 + $0x25c] sm:$0xf0]  ;;  %v11313_v35 = vld [vmem:[%s18518_s1 + $0x44] sm:$0xf] }
 0x215   : > { %5207 = vmatmul.bf16.gmra.mxu3 %v9287_v27 }
 0x218   : > { %6173 = vmatpush.bf16.msra.mxu2 %v1947_v25  ;;  %6831 = vmatpush.bf16.msra.mxu0 %v1963_v44  ;;  %v9471_v25 = vor.u32 %v11381_v51, %v9470_v16  ;;  %v9219_v44 = vor.u32 %v11313_v35, %v9216_v12  ;;  %v1942_v51 = vpack.c.bf16 %v13068_v22, %v13042_v9  ;;  %v18794_v35 = vld [vmem:[#allocation73_spill] sm:$0xff] }
 0x219   : > { %v18795_v12 = vld [vmem:[#allocation77_spill] sm:$0xff] }
 0x21a   : > { %v1958_v27 = vpack.c.bf16 %v18795_v12, %v18794_v35 }
 0x21c   : > { %6174 = vmatpush.bf16.msra.mxu2 %v1946_v1  ;;  %6832 = vmatpush.bf16.msra.mxu0 %v1962_v58  ;;  %v13440_v4 = vpop.f32.mrf.mxu1  ;;  %v1943_v1 = vpack.c.bf16 %v13123_v56, %v13101_v19  ;;  %v1959_v58 = vpack.c.bf16 %v13125_v39, %v13103_v6 }
 0x21f   : > { %4579 = vmatmul.bf16.gmra.mxu1 %v9471_v25  ;;  %4868 = vmatmul.bf16.gmra.mxu2 %v9219_v44  ;;  %v11322_v44 = vld [vmem:[%s18518_s1 + $0x8c] sm:$0xf] }
 0x220   : > { %6175 = vmatpush.bf16.msra.mxu2 %v1945_v54  ;;  %6833 = vmatpush.bf16.msra.mxu0 %v1961_v48  ;;  %v9502_v54 = vld [vmem:[%s18518_s1 + $0x280] sm:$0xf]  ;;  %v9318_v48 = vld [vmem:[%s18518_s1 + $0x108] sm:$0xf] }
 0x221   : > { %5526 = vmatmul.bf16.gmra.mxu0 %v9227_v10  ;;  %v9256_v10 = vld [vmem:[%s18518_s1 + $0xa8] sm:$0xf0] }
 0x222   : > { %v9259_v31 = vor.u32 %v11322_v44, %v9256_v10 }
 0x224   : > { %6176 = vmatpush.bf16.msra.mxu2 %v1944_v43  ;;  %6834 = vmatpush.bf16.msra.mxu0 %v1960_v0  ;;  %v13450_v16 = vpop.f32.mrf.mxu1  ;;  %v11342_v43 = vld [vmem:[%s18518_s1 + $0x124] sm:$0xf0]  ;;  %v11389_v0 = vld [vmem:[%s18518_s1 + $0x29c] sm:$0xf0] }
 0x225   : > { %v9319_v25 = vor.u32 %v11342_v43, %v9318_v48  ;;  %v9534_v43 = vld [vmem:[%s18518_s1 + $0x2c0] sm:$0xf] }
 0x227   : > { %5212 = vmatmul.bf16.gmra.mxu3 %v9319_v25  ;;  %v9288_v25 = vld [vmem:[%s18518_s1 + $0xe8] sm:$0xf0] }
 0x228   : > { %6177 = vmatpush.bf16.msra.mxu2 %v1943_v1  ;;  %6835 = vmatpush.bf16.msra.mxu0 %v1959_v58  ;;  %v9503_v1 = vor.u32 %v11389_v0, %v9502_v54  ;;  %v9251_v58 = vor.u32 %v11321_v38, %v9248_v41  ;;  %v11397_v54 = vld [vmem:[%s18518_s1 + $0x2dc] sm:$0xf0]  ;;  %v9280_v0 = vld [vmem:[%s18518_s1 + $0xe0] sm:$0xf0]  ;;  %v11330_v41 = vld [vmem:[%s18518_s1 + $0xcc] sm:$0xf] }
 0x229   : > { %v9535_v44 = vor.u32 %v11397_v54, %v9534_v43  ;;  %v11358_v43 = vld [vmem:[%s18518_s1 + $0x1a4] sm:$0xf0]  ;;  %v11405_v54 = vld [vmem:[%s18518_s1 + $0x31c] sm:$0xf0] }
 0x22c   : > { %6178 = vmatpush.bf16.msra.mxu2 %v1942_v51  ;;  %6836 = vmatpush.bf16.msra.mxu0 %v1958_v27  ;;  %v13480_v7 = vpop.f32.mrf.mxu1  ;;  %v9350_v51 = vld [vmem:[%s18518_s1 + $0x148] sm:$0xf] }
 0x22d   : > { %v11350_v27 = vld [vmem:[%s18518_s1 + $0x164] sm:$0xf0] }
 0x22e   : > { %v9351_v38 = vor.u32 %v11350_v27, %v9350_v51  ;;  %v9566_v51 = vld [vmem:[%s18518_s1 + $0x300] sm:$0xf]  ;;  %v9382_v27 = vld [vmem:[%s18518_s1 + $0x188] sm:$0xf] }
 0x22f   : > { %4584 = vmatmul.bf16.gmra.mxu1 %v9503_v1  ;;  %4873 = vmatmul.bf16.gmra.mxu2 %v9251_v58  ;;  %v9291_v58 = vor.u32 %v11330_v41, %v9288_v25  ;;  %v11338_v41 = vld [vmem:[%s18518_s1 + $0x10c] sm:$0xf] }
 0x230   : > { %v9320_v25 = vld [vmem:[%s18518_s1 + $0x128] sm:$0xf0] }
 0x231   : > { %5531 = vmatmul.bf16.gmra.mxu0 %v9259_v31  ;;  %v11329_v31 = vld [vmem:[%s18518_s1 + $0xc4] sm:$0xf]  ;;  %v9323_v63 = vor.u32 %v11338_v41, %v9320_v25  ;;  %v9352_v41 = vld [vmem:[%s18518_s1 + $0x168] sm:$0xf0] }
 0x232   : > { %v9283_v10 = vor.u32 %v11329_v31, %v9280_v0  ;;  %v11337_v31 = vld [vmem:[%s18518_s1 + $0x104] sm:$0xf] }
 0x233   : > { %v9312_v0 = vld [vmem:[%s18518_s1 + $0x120] sm:$0xf0] }
 0x234   : > { %v13482_v48 = vpop.f32.mrf.mxu1 }
 0x237   : > { %5217 = vmatmul.bf16.gmra.mxu3 %v9351_v38  ;;  %v9383_v38 = vor.u32 %v11358_v43, %v9382_v27  ;;  %v9598_v27 = vld [vmem:[%s18518_s1 + $0x340] sm:$0xf]  ;;  %v9414_v43 = vld [vmem:[%s18518_s1 + $0x1c8] sm:$0xf] }
 0x23c   : > { %v13508_v1 = vpop.f32.mrf.mxu1 }
 0x23f   : > { %4589 = vmatmul.bf16.gmra.mxu1 %v9535_v44  ;;  %4878 = vmatmul.bf16.gmra.mxu2 %v9283_v10  ;;  %v9567_v44 = vor.u32 %v11405_v54, %v9566_v51  ;;  %v9315_v10 = vor.u32 %v11337_v31, %v9312_v0  ;;  %v11366_v51 = vld [vmem:[%s18518_s1 + $0x1e4] sm:$0xf0]  ;;  %v11413_v54 = vld [vmem:[%s18518_s1 + $0x35c] sm:$0xf0]  ;;  %v9344_v31 = vld [vmem:[%s18518_s1 + $0x160] sm:$0xf0] }
 0x240   : > { %v9415_v0 = vor.u32 %v11366_v51, %v9414_v43  ;;  %v9599_v25 = vor.u32 %v11413_v54, %v9598_v27  ;;  %v9630_v43 = vld [vmem:[%s18518_s1 + $0x380] sm:$0xf]  ;;  %v9446_v51 = vld [vmem:[%s18518_s1 + $0x208] sm:$0xf] }
 0x241   : > { %5536 = vmatmul.bf16.gmra.mxu0 %v9291_v58  ;;  %v11374_v27 = vld [vmem:[%s18518_s1 + $0x224] sm:$0xf0]  ;;  %v11421_v54 = vld [vmem:[%s18518_s1 + $0x39c] sm:$0xf0] }
 0x244   : > { %v13510_v33 = vpop.f32.mrf.mxu1 }
 0x247   : > { %5222 = vmatmul.bf16.gmra.mxu3 %v9383_v38  ;;  %v11346_v38 = vld [vmem:[%s18518_s1 + $0x14c] sm:$0xf] }
 0x248   : > { %v9355_v15 = vor.u32 %v11346_v38, %v9352_v41  ;;  %v9384_v38 = vld [vmem:[%s18518_s1 + $0x1a8] sm:$0xf0]  ;;  %v9631_v41 = vor.u32 %v11421_v54, %v9630_v43  ;;  %v9478_v43 = vld [vmem:[%s18518_s1 + $0x248] sm:$0xf] }
 0x249   : > { %v5193_v45 = vpop.f32.mrf.mxu3  ;;  %v11382_v54 = vld [vmem:[%s18518_s1 + $0x264] sm:$0xf0] }
 0x24c   : > { %v13536_v58 = vpop.f32.mrf.mxu1 }
 0x24f   : > { %4594 = vmatmul.bf16.gmra.mxu1 %v9567_v44  ;;  %4883 = vmatmul.bf16.gmra.mxu2 %v9315_v10 }
 0x251   : > { %5541 = vmatmul.bf16.gmra.mxu0 %v9323_v63  ;;  %v11345_v63 = vld [vmem:[%s18518_s1 + $0x144] sm:$0xf] }
 0x252   : > { %v9347_v44 = vor.u32 %v11345_v63, %v9344_v31  ;;  %v9376_v63 = vld [vmem:[%s18518_s1 + $0x1a0] sm:$0xf0]  ;;  %v9447_v31 = vor.u32 %v11374_v27, %v9446_v51  ;;  %v13596_v51 = vpop.f32.mrf.mxu3  ;;  %v9662_v27 = vld [vmem:[%s18518_s1 + $0x3c0] sm:$0xf] }
 0x254   : > { %v13538_v5 = vpop.f32.mrf.mxu1 }
 0x257   : > { %5227 = vmatmul.bf16.gmra.mxu3 %v9415_v0  ;;  %v11354_v0 = vld [vmem:[%s18518_s1 + $0x18c] sm:$0xf] }
 0x258   : > { %v9387_v26 = vor.u32 %v11354_v0, %v9384_v38  ;;  %v11362_v0 = vld [vmem:[%s18518_s1 + $0x1cc] sm:$0xf] }
 0x259   : > { %v9416_v38 = vld [vmem:[%s18518_s1 + $0x1e8] sm:$0xf0] }
 0x25a   : > { %v9419_v12 = vor.u32 %v11362_v0, %v9416_v38  ;;  %v11370_v0 = vld [vmem:[%s18518_s1 + $0x20c] sm:$0xf] }
 0x25b   : > { %v9448_v38 = vld [vmem:[%s18518_s1 + $0x228] sm:$0xf0] }
 0x25c   : > { %v13564_v10 = vpop.f32.mrf.mxu1  ;;  %v9451_v18 = vor.u32 %v11370_v0, %v9448_v38 }
 0x25f   : > { %4599 = vmatmul.bf16.gmra.mxu1 %v9599_v25  ;;  %4888 = vmatmul.bf16.gmra.mxu2 %v9347_v44 }
 0x261   : > { %5546 = vmatmul.bf16.gmra.mxu0 %v9355_v15  ;;  %v11353_v15 = vld [vmem:[%s18518_s1 + $0x184] sm:$0xf] }
 0x262   : > { %v9379_v25 = vor.u32 %v11353_v15, %v9376_v63  ;;  %v11361_v15 = vld [vmem:[%s18518_s1 + $0x1c4] sm:$0xf] }
 0x263   : > { %v9408_v63 = vld [vmem:[%s18518_s1 + $0x1e0] sm:$0xf0] }
 0x264   : > { %v13566_v11 = vpop.f32.mrf.mxu1 }
 0x267   : > { %5232 = vmatmul.bf16.gmra.mxu3 %v9447_v31  ;;  %v9479_v31 = vor.u32 %v11382_v54, %v9478_v43  ;;  %v9694_v54 = vld [vmem:[%s18518_s1 + $0x400] sm:$0xf] }
 0x26c   : > { %v13592_v44 = vpop.f32.mrf.mxu1 }
 0x26f   : > { %4604 = vmatmul.bf16.gmra.mxu1 %v9631_v41  ;;  %4893 = vmatmul.bf16.gmra.mxu2 %v9379_v25  ;;  %v9411_v25 = vor.u32 %v11361_v15, %v9408_v63  ;;  %v11369_v15 = vld [vmem:[%s18518_s1 + $0x204] sm:$0xf] }
 0x270   : > { %v9440_v63 = vld [vmem:[%s18518_s1 + $0x220] sm:$0xf0] }
 0x271   : > { %5551 = vmatmul.bf16.gmra.mxu0 %v9387_v26  ;;  %v11429_v26 = vld [vmem:[%s18518_s1 + $0x3dc] sm:$0xf0] }
 0x272   : > { %v9663_v41 = vor.u32 %v11429_v26, %v9662_v27  ;;  %v9510_v27 = vld [vmem:[%s18518_s1 + $0x288] sm:$0xf] }
 0x273   : > { %v11390_v26 = vld [vmem:[%s18518_s1 + $0x2a4] sm:$0xf0] }
 0x274   : > { %v13594_v39 = vpop.f32.mrf.mxu1 }
 0x275   : > { %v5198_v35 = vpop.f32.mrf.mxu3 }
 0x277   : > { %5237 = vmatmul.bf16.gmra.mxu3 %v9479_v31  ;;  %v9511_v31 = vor.u32 %v11390_v26, %v9510_v27 }
 0x27c   : > { %v13622_v6 = vpop.f32.mrf.mxu1 }
 0x27d   : > { %v13626_v43 = vpop.f32.mrf.mxu3 }
 0x27f   : > { %4609 = vmatmul.bf16.gmra.mxu1 %v9663_v41  ;;  %4898 = vmatmul.bf16.gmra.mxu2 %v9411_v25  ;;  %v9443_v25 = vor.u32 %v11369_v15, %v9440_v63  ;;  %v9542_v15 = vld [vmem:[%s18518_s1 + $0x2c8] sm:$0xf]  ;;  %v11378_v63 = vld [vmem:[%s18518_s1 + $0x24c] sm:$0xf] }
 0x281   : > { %5556 = vmatmul.bf16.gmra.mxu0 %v9419_v12  ;;  %v11437_v12 = vld [vmem:[%s18518_s1 + $0x41c] sm:$0xf0] }
 0x282   : > { %v9695_v41 = vor.u32 %v11437_v12, %v9694_v54  ;;  %v9726_v12 = vld [vmem:[%s18518_s1 + $0x440] sm:$0xf] }
 0x284   : > { %v13624_v21 = vpop.f32.mrf.mxu1 }
 0x287   : > { %5242 = vmatmul.bf16.gmra.mxu3 %v9511_v31  ;;  %v9480_v31 = vld [vmem:[%s18518_s1 + $0x268] sm:$0xf0] }
 0x288   : > { %v13654_v53 = vpop.f32.mrf.mxu3 }
 0x28c   : > { %v13652_v62 = vpop.f32.mrf.mxu1 }
 0x28e   : > { %v5522_v46 = vpop.f32.mrf.mxu0 }
 0x28f   : > { %4614 = vmatmul.bf16.gmra.mxu1 %v9695_v41  ;;  %4903 = vmatmul.bf16.gmra.mxu2 %v9443_v25 }
 0x290   : > { %v13659_v23 = vpop.f32.mrf.mxu3 }
 0x291   : > { %5561 = vmatmul.bf16.gmra.mxu0 %v9451_v18  ;;  %v11398_v18 = vld [vmem:[%s18518_s1 + $0x2e4] sm:$0xf0] }
 0x292   : > { %v4864_v27 = vpop.f32.mrf.mxu2 }
 0x293   : > { %v4865_v26 = vadd.f32 %v4864_v27, %v13396_v57  ;;  %v11445_v57 = vld [vmem:[%s18518_s1 + $0x45c] sm:$0xf0] }
 0x294   : > { %v13657_v8 = vpop.f32.mrf.mxu1  ;;  %v9727_v41 = vor.u32 %v11445_v57, %v9726_v12 }
 0x295   : > { %v5194_v3 = vadd.f32 %v5193_v45, %v4865_v26  ;;  %v11377_v45 = vld [vmem:[%s18518_s1 + $0x244] sm:$0xf]  ;;  %v9483_v26 = vor.u32 %v11378_v63, %v9480_v31  ;;  %v11386_v63 = vld [vmem:[%s18518_s1 + $0x28c] sm:$0xf] }
 0x296   : > { %v5524_v14 = vpop.f32.mrf.mxu0  ;;  %v9512_v31 = vld [vmem:[%s18518_s1 + $0x2a8] sm:$0xf0] }
 0x297   : > { %v13661_v54 = vadd.f32 %v5522_v46, %v5194_v3  ;;  %v9472_v46 = vld [vmem:[%s18518_s1 + $0x260] sm:$0xf0]  ;;  %v9543_v3 = vor.u32 %v11398_v18, %v9542_v15 }
 0x298   : > { %v9475_v25 = vor.u32 %v11377_v45, %v9472_v46  ;;  %v13691_v18 = vpop.f32.mrf.mxu3 }
 0x299   : > { %5247 = vmatmul.bf16.gmra.mxu3 %v9543_v3 }
 0x29a   : > { %v4866_v0 = vpop.f32.mrf.mxu2 }
 0x29b   : > { %v4867_v38 = vadd.f32 %v4866_v0, %v13406_v47 }
 0x29c   : > { %v13688_v27 = vpop.f32.mrf.mxu1 }
 0x29d   : > { %v5196_v37 = vadd.f32 %v13596_v51, %v4867_v38  ;;  %v9758_v51 = vld [vmem:[%s18518_s1 + $0x480] sm:$0xf] }
 0x29e   : > { %v5527_v15 = vpop.f32.mrf.mxu0 }
 0x29f   : > { %v13693_v20 = vadd.f32 %v5524_v14, %v5196_v37  ;;  %4619 = vmatmul.bf16.gmra.mxu1 %v9727_v41  ;;  %4908 = vmatmul.bf16.gmra.mxu2 %v9475_v25  ;;  %v9574_v37 = vld [vmem:[%s18518_s1 + $0x308] sm:$0xf]  ;;  %v11453_v14 = vld [vmem:[%s18518_s1 + $0x49c] sm:$0xf0] }
 0x2a0   : > { %v13698_v57 = vpop.f32.mrf.mxu3  ;;  %v9759_v41 = vor.u32 %v11453_v14, %v9758_v51 }
 0x2a1   : > { %5566 = vmatmul.bf16.gmra.mxu0 %v9483_v26 }
 0x2a2   : > { %v4869_v56 = vpop.f32.mrf.mxu2 }
 0x2a3   : > { %v4870_v3 = vadd.f32 %v4869_v56, %v13440_v4  ;;  %v11406_v56 = vld [vmem:[%s18518_s1 + $0x324] sm:$0xf0]  ;;  %v11385_v4 = vld [vmem:[%s18518_s1 + $0x284] sm:$0xf] }
 0x2a4   : > { %v13696_v19 = vpop.f32.mrf.mxu1  ;;  %v9575_v46 = vor.u32 %v11406_v56, %v9574_v37 }
 0x2a5   : > { %v5199_v47 = vadd.f32 %v5198_v35, %v4870_v3  ;;  %v9504_v35 = vld [vmem:[%s18518_s1 + $0x2a0] sm:$0xf0] }
 0x2a6   : > { %v5529_v12 = vpop.f32.mrf.mxu0  ;;  %v9507_v25 = vor.u32 %v11385_v4, %v9504_v35  ;;  %v9536_v35 = vld [vmem:[%s18518_s1 + $0x2e0] sm:$0xf0] }
 0x2a7   : > { %v13700_v45 = vadd.f32 %v5527_v15, %v5199_v47  ;;  %v9515_v15 = vor.u32 %v11386_v63, %v9512_v31  ;;  %v11394_v31 = vld [vmem:[%s18518_s1 + $0x2cc] sm:$0xf] }
 0x2a9   : > { %5252 = vmatmul.bf16.gmra.mxu3 %v9575_v46 }
 0x2aa   : > { %v4871_v0 = vpop.f32.mrf.mxu2  ;;  %v13730_v37 = vpop.f32.mrf.mxu3 }
 0x2ab   : > { %v4872_v38 = vadd.f32 %v4871_v0, %v13450_v16  ;;  %v9544_v0 = vld [vmem:[%s18518_s1 + $0x2e8] sm:$0xf0] }
 0x2ac   : > { %v13727_v26 = vpop.f32.mrf.mxu1 }
 0x2ad   : > { %v5201_v3 = vadd.f32 %v13626_v43, %v4872_v38  ;;  %v9790_v43 = vld [vmem:[%s18518_s1 + $0x4c0] sm:$0xf] }
 0x2ae   : > { %v5532_v47 = vpop.f32.mrf.mxu0 }
 0x2af   : > { %v13732_v56 = vadd.f32 %v5529_v12, %v5201_v3  ;;  %4624 = vmatmul.bf16.gmra.mxu1 %v9759_v41  ;;  %4913 = vmatmul.bf16.gmra.mxu2 %v9507_v25  ;;  %v9606_v12 = vld [vmem:[%s18518_s1 + $0x348] sm:$0xf] }
 0x2b1   : > { %5571 = vmatmul.bf16.gmra.mxu0 %v9515_v15 }
 0x2b2   : > { %v4874_v22 = vpop.f32.mrf.mxu2  ;;  %v13738_v14 = vpop.f32.mrf.mxu3 }
 0x2b3   : > { %v4875_v46 = vadd.f32 %v4874_v22, %v13480_v7  ;;  %v11414_v7 = vld [vmem:[%s18518_s1 + $0x364] sm:$0xf0]  ;;  %v11461_v22 = vld [vmem:[%s18518_s1 + $0x4dc] sm:$0xf0] }
 0x2b4   : > { %v13735_v9 = vpop.f32.mrf.mxu1  ;;  %v9607_v63 = vor.u32 %v11414_v7, %v9606_v12  ;;  %v9791_v25 = vor.u32 %v11461_v22, %v9790_v43 }
 0x2b5   : > { %v5204_v16 = vadd.f32 %v13654_v53, %v4875_v46  ;;  %v11393_v53 = vld [vmem:[%s18518_s1 + $0x2c4] sm:$0xf] }
 0x2b6   : > { %v5534_v51 = vpop.f32.mrf.mxu0  ;;  %v9539_v15 = vor.u32 %v11393_v53, %v9536_v35  ;;  %v9568_v35 = vld [vmem:[%s18518_s1 + $0x320] sm:$0xf0] }
 0x2b7   : > { %v13740_v4 = vadd.f32 %v5532_v47, %v5204_v16  ;;  %v9547_v47 = vor.u32 %v11394_v31, %v9544_v0  ;;  %v11402_v0 = vld [vmem:[%s18518_s1 + $0x30c] sm:$0xf] }
 0x2b9   : > { %5257 = vmatmul.bf16.gmra.mxu3 %v9607_v63 }
 0x2ba   : > { %v4876_v38 = vpop.f32.mrf.mxu2  ;;  %v13770_v12 = vpop.f32.mrf.mxu3 }
 0x2bb   : > { %v4877_v41 = vadd.f32 %v4876_v38, %v13482_v48  ;;  %v9576_v38 = vld [vmem:[%s18518_s1 + $0x328] sm:$0xf0] }
 0x2bc   : > { %v13767_v3 = vpop.f32.mrf.mxu1 }
 0x2bd   : > { %v5206_v46 = vadd.f32 %v13659_v23, %v4877_v41  ;;  %v9822_v23 = vld [vmem:[%s18518_s1 + $0x500] sm:$0xf] }
 0x2be   : > { %v5537_v16 = vpop.f32.mrf.mxu0 }
 0x2bf   : > { %v13772_v7 = vadd.f32 %v5534_v51, %v5206_v46  ;;  %4629 = vmatmul.bf16.gmra.mxu1 %v9791_v25  ;;  %4918 = vmatmul.bf16.gmra.mxu2 %v9539_v15  ;;  %v9638_v51 = vld [vmem:[%s18518_s1 + $0x388] sm:$0xf] }
 0x2c1   : > { %5576 = vmatmul.bf16.gmra.mxu0 %v9547_v47 }
 0x2c2   : > { %v4879_v40 = vpop.f32.mrf.mxu2  ;;  %v13778_v22 = vpop.f32.mrf.mxu3 }
 0x2c3   : > { %v4880_v63 = vadd.f32 %v4879_v40, %v13508_v1  ;;  %v11422_v40 = vld [vmem:[%s18518_s1 + $0x3a4] sm:$0xf0]  ;;  %v11469_v1 = vld [vmem:[%s18518_s1 + $0x51c] sm:$0xf0] }
 0x2c4   : > { %v13775_v60 = vpop.f32.mrf.mxu1  ;;  %v9639_v31 = vor.u32 %v11422_v40, %v9638_v51  ;;  %v9823_v15 = vor.u32 %v11469_v1, %v9822_v23 }
 0x2c5   : > { %v5209_v48 = vadd.f32 %v13691_v18, %v4880_v63  ;;  %v11401_v18 = vld [vmem:[%s18518_s1 + $0x304] sm:$0xf] }
 0x2c6   : > { %v5539_v43 = vpop.f32.mrf.mxu0  ;;  %v9571_v47 = vor.u32 %v11401_v18, %v9568_v35  ;;  %v9600_v35 = vld [vmem:[%s18518_s1 + $0x360] sm:$0xf0] }
 0x2c7   : > { %v13780_v53 = vadd.f32 %v5537_v16, %v5209_v48  ;;  %v9579_v16 = vor.u32 %v11402_v0, %v9576_v38  ;;  %v11410_v38 = vld [vmem:[%s18518_s1 + $0x34c] sm:$0xf] }
 0x2c9   : > { %5262 = vmatmul.bf16.gmra.mxu3 %v9639_v31 }
 0x2ca   : > { %v4881_v41 = vpop.f32.mrf.mxu2  ;;  %v13810_v51 = vpop.f32.mrf.mxu3 }
 0x2cb   : > { %v4882_v25 = vadd.f32 %v4881_v41, %v13510_v33  ;;  %v9608_v41 = vld [vmem:[%s18518_s1 + $0x368] sm:$0xf0] }
 0x2cc   : > { %v13807_v46 = vpop.f32.mrf.mxu1 }
 0x2cd   : > { %v5211_v63 = vadd.f32 %v13698_v57, %v4882_v25  ;;  %v9854_v57 = vld [vmem:[%s18518_s1 + $0x540] sm:$0xf] }
 0x2ce   : > { %v5542_v48 = vpop.f32.mrf.mxu0 }
 0x2cf   : > { %v13812_v40 = vadd.f32 %v5539_v43, %v5211_v63  ;;  %4634 = vmatmul.bf16.gmra.mxu1 %v9823_v15  ;;  %4923 = vmatmul.bf16.gmra.mxu2 %v9571_v47  ;;  %v9670_v43 = vld [vmem:[%s18518_s1 + $0x3c8] sm:$0xf] }
 0x2d1   : > { %5581 = vmatmul.bf16.gmra.mxu0 %v9579_v16 }
 0x2d2   : > { %v4884_v61 = vpop.f32.mrf.mxu2  ;;  %v13818_v1 = vpop.f32.mrf.mxu3 }
 0x2d3   : > { %v4885_v31 = vadd.f32 %v4884_v61, %v13536_v58  ;;  %v11430_v61 = vld [vmem:[%s18518_s1 + $0x3e4] sm:$0xf0]  ;;  %v11477_v58 = vld [vmem:[%s18518_s1 + $0x55c] sm:$0xf0] }
 0x2d4   : > { %v13815_v42 = vpop.f32.mrf.mxu1  ;;  %v9671_v0 = vor.u32 %v11430_v61, %v9670_v43  ;;  %v9855_v47 = vor.u32 %v11477_v58, %v9854_v57 }
 0x2d5   : > { %v5214_v33 = vadd.f32 %v13730_v37, %v4885_v31  ;;  %v11409_v37 = vld [vmem:[%s18518_s1 + $0x344] sm:$0xf] }
 0x2d6   : > { %v5544_v23 = vpop.f32.mrf.mxu0  ;;  %v9603_v16 = vor.u32 %v11409_v37, %v9600_v35  ;;  %v9632_v35 = vld [vmem:[%s18518_s1 + $0x3a0] sm:$0xf0] }
 0x2d7   : > { %v13820_v18 = vadd.f32 %v5542_v48, %v5214_v33  ;;  %v9611_v48 = vor.u32 %v11410_v38, %v9608_v41  ;;  %v11418_v41 = vld [vmem:[%s18518_s1 + $0x38c] sm:$0xf] }
 0x2d9   : > { %5267 = vmatmul.bf16.gmra.mxu3 %v9671_v0 }
 0x2da   : > { %v4886_v25 = vpop.f32.mrf.mxu2  ;;  %v13850_v43 = vpop.f32.mrf.mxu3 }
 0x2db   : > { %v4887_v15 = vadd.f32 %v4886_v25, %v13538_v5  ;;  %v9640_v25 = vld [vmem:[%s18518_s1 + $0x3a8] sm:$0xf0] }
 0x2dc   : > { %v13847_v63 = vpop.f32.mrf.mxu1 }
 0x2dd   : > { %v5216_v31 = vadd.f32 %v13738_v14, %v4887_v15  ;;  %v9886_v14 = vld [vmem:[%s18518_s1 + $0x580] sm:$0xf] }
 0x2de   : > { %v5547_v33 = vpop.f32.mrf.mxu0 }
 0x2df   : > { %v13852_v61 = vadd.f32 %v5544_v23, %v5216_v31  ;;  %4639 = vmatmul.bf16.gmra.mxu1 %v9855_v47  ;;  %4928 = vmatmul.bf16.gmra.mxu2 %v9603_v16  ;;  %v9702_v23 = vld [vmem:[%s18518_s1 + $0x408] sm:$0xf] }
 0x2e1   : > { %5586 = vmatmul.bf16.gmra.mxu0 %v9611_v48 }
 0x2e2   : > { %v4889_v55 = vpop.f32.mrf.mxu2  ;;  %v13858_v58 = vpop.f32.mrf.mxu3 }
 0x2e3   : > { %v4890_v0 = vadd.f32 %v4889_v55, %v13564_v10  ;;  %v11438_v55 = vld [vmem:[%s18518_s1 + $0x424] sm:$0xf0]  ;;  %v11485_v10 = vld [vmem:[%s18518_s1 + $0x59c] sm:$0xf0] }
 0x2e4   : > { %v13855_v32 = vpop.f32.mrf.mxu1  ;;  %v9703_v38 = vor.u32 %v11438_v55, %v9702_v23  ;;  %v9887_v16 = vor.u32 %v11485_v10, %v9886_v14 }
 0x2e5   : > { %v5219_v5 = vadd.f32 %v13770_v12, %v4890_v0  ;;  %v11417_v12 = vld [vmem:[%s18518_s1 + $0x384] sm:$0xf] }
 0x2e6   : > { %v5549_v57 = vpop.f32.mrf.mxu0  ;;  %v9635_v48 = vor.u32 %v11417_v12, %v9632_v35  ;;  %v9664_v35 = vld [vmem:[%s18518_s1 + $0x3e0] sm:$0xf0] }
 0x2e7   : > { %v13860_v37 = vadd.f32 %v5547_v33, %v5219_v5  ;;  %v9643_v33 = vor.u32 %v11418_v41, %v9640_v25  ;;  %v11426_v25 = vld [vmem:[%s18518_s1 + $0x3cc] sm:$0xf] }
 0x2e9   : > { %5272 = vmatmul.bf16.gmra.mxu3 %v9703_v38 }
 0x2ea   : > { %v4891_v15 = vpop.f32.mrf.mxu2  ;;  %v13890_v23 = vpop.f32.mrf.mxu3 }
 0x2eb   : > { %v4892_v47 = vadd.f32 %v4891_v15, %v13566_v11  ;;  %v9672_v15 = vld [vmem:[%s18518_s1 + $0x3e8] sm:$0xf0] }
 0x2ec   : > { %v13887_v31 = vpop.f32.mrf.mxu1 }
 0x2ed   : > { %v5221_v0 = vadd.f32 %v13778_v22, %v4892_v47  ;;  %v9918_v22 = vld [vmem:[%s18518_s1 + $0x5c0] sm:$0xf] }
 0x2ee   : > { %v5552_v5 = vpop.f32.mrf.mxu0 }
 0x2ef   : > { %v13892_v55 = vadd.f32 %v5549_v57, %v5221_v0  ;;  %4644 = vmatmul.bf16.gmra.mxu1 %v9887_v16  ;;  %4933 = vmatmul.bf16.gmra.mxu2 %v9635_v48  ;;  %v9734_v57 = vld [vmem:[%s18518_s1 + $0x448] sm:$0xf] }
 0x2f1   : > { %5591 = vmatmul.bf16.gmra.mxu0 %v9643_v33 }
 0x2f2   : > { %v4894_v2 = vpop.f32.mrf.mxu2  ;;  %v13898_v10 = vpop.f32.mrf.mxu3 }
 0x2f3   : > { %v4895_v38 = vadd.f32 %v4894_v2, %v13592_v44  ;;  %v11446_v2 = vld [vmem:[%s18518_s1 + $0x464] sm:$0xf0]  ;;  %v11493_v44 = vld [vmem:[%s18518_s1 + $0x5dc] sm:$0xf0] }
 0x2f4   : > { %v13895_v52 = vpop.f32.mrf.mxu1  ;;  %v9735_v41 = vor.u32 %v11446_v2, %v9734_v57  ;;  %v9919_v48 = vor.u32 %v11493_v44, %v9918_v22 }
 0x2f5   : > { %v5224_v11 = vadd.f32 %v13810_v51, %v4895_v38  ;;  %v11425_v51 = vld [vmem:[%s18518_s1 + $0x3c4] sm:$0xf] }
 0x2f6   : > { %v5554_v14 = vpop.f32.mrf.mxu0  ;;  %v9667_v33 = vor.u32 %v11425_v51, %v9664_v35  ;;  %v9696_v35 = vld [vmem:[%s18518_s1 + $0x420] sm:$0xf0] }
 0x2f7   : > { %v13900_v12 = vadd.f32 %v5552_v5, %v5224_v11  ;;  %v9675_v5 = vor.u32 %v11426_v25, %v9672_v15  ;;  %v11434_v15 = vld [vmem:[%s18518_s1 + $0x40c] sm:$0xf] }
 0x2f9   : > { %5277 = vmatmul.bf16.gmra.mxu3 %v9735_v41 }
 0x2fa   : > { %v4896_v47 = vpop.f32.mrf.mxu2  ;;  %v13930_v57 = vpop.f32.mrf.mxu3 }
 0x2fb   : > { %v4897_v16 = vadd.f32 %v4896_v47, %v13594_v39  ;;  %v9704_v47 = vld [vmem:[%s18518_s1 + $0x428] sm:$0xf0] }
 0x2fc   : > { %v13927_v0 = vpop.f32.mrf.mxu1 }
 0x2fd   : > { %v5226_v38 = vadd.f32 %v13818_v1, %v4897_v16  ;;  %v9950_v1 = vld [vmem:[%s18518_s1 + $0x600] sm:$0xf] }
 0x2fe   : > { %v5557_v11 = vpop.f32.mrf.mxu0 }
 0x2ff   : > { %v13932_v2 = vadd.f32 %v5554_v14, %v5226_v38  ;;  %4649 = vmatmul.bf16.gmra.mxu1 %v9919_v48  ;;  %4938 = vmatmul.bf16.gmra.mxu2 %v9667_v33  ;;  %v9766_v14 = vld [vmem:[%s18518_s1 + $0x488] sm:$0xf] }
 0x301   : > { %5596 = vmatmul.bf16.gmra.mxu0 %v9675_v5 }
 0x302   : > { %v4899_v28 = vpop.f32.mrf.mxu2  ;;  %v13938_v44 = vpop.f32.mrf.mxu3 }
 0x303   : > { %v4900_v41 = vadd.f32 %v4899_v28, %v13622_v6  ;;  %v11454_v6 = vld [vmem:[%s18518_s1 + $0x4a4] sm:$0xf0]  ;;  %v11501_v28 = vld [vmem:[%s18518_s1 + $0x61c] sm:$0xf0] }
 0x304   : > { %v13935_v36 = vpop.f32.mrf.mxu1  ;;  %v9767_v25 = vor.u32 %v11454_v6, %v9766_v14  ;;  %v9951_v33 = vor.u32 %v11501_v28, %v9950_v1 }
 0x305   : > { %v5229_v39 = vadd.f32 %v13850_v43, %v4900_v41  ;;  %v11433_v43 = vld [vmem:[%s18518_s1 + $0x404] sm:$0xf] }
 0x306   : > { %v5559_v22 = vpop.f32.mrf.mxu0  ;;  %v9699_v5 = vor.u32 %v11433_v43, %v9696_v35  ;;  %v9728_v35 = vld [vmem:[%s18518_s1 + $0x460] sm:$0xf0] }
 0x307   : > { %v13940_v51 = vadd.f32 %v5557_v11, %v5229_v39  ;;  %v9707_v11 = vor.u32 %v11434_v15, %v9704_v47  ;;  %v11442_v47 = vld [vmem:[%s18518_s1 + $0x44c] sm:$0xf] }
 0x309   : > { %5282 = vmatmul.bf16.gmra.mxu3 %v9767_v25 }
 0x30a   : > { %v4901_v16 = vpop.f32.mrf.mxu2  ;;  %v13970_v14 = vpop.f32.mrf.mxu3 }
 0x30b   : > { %v4902_v48 = vadd.f32 %v4901_v16, %v13624_v21  ;;  %v9736_v16 = vld [vmem:[%s18518_s1 + $0x468] sm:$0xf0] }
 0x30c   : > { %v13967_v38 = vpop.f32.mrf.mxu1 }
 0x30d   : > { %v5231_v41 = vadd.f32 %v13858_v58, %v4902_v48  ;;  %v9982_v58 = vld [vmem:[%s18518_s1 + $0x640] sm:$0xf] }
 0x30e   : > { %v5562_v39 = vpop.f32.mrf.mxu0 }
 0x30f   : > { %v13972_v6 = vadd.f32 %v5559_v22, %v5231_v41  ;;  %4654 = vmatmul.bf16.gmra.mxu1 %v9951_v33  ;;  %4943 = vmatmul.bf16.gmra.mxu2 %v9699_v5  ;;  %v9798_v22 = vld [vmem:[%s18518_s1 + $0x4c8] sm:$0xf] }
 0x311   : > { %5601 = vmatmul.bf16.gmra.mxu0 %v9707_v11 }
 0x312   : > { %v4904_v24 = vpop.f32.mrf.mxu2  ;;  %v13978_v28 = vpop.f32.mrf.mxu3 }
 0x313   : > { %v4905_v25 = vadd.f32 %v4904_v24, %v13652_v62  ;;  %v11462_v24 = vld [vmem:[%s18518_s1 + $0x4e4] sm:$0xf0]  ;;  %v11509_v62 = vld [vmem:[%s18518_s1 + $0x65c] sm:$0xf0] }
 0x314   : > { %v13975_v17 = vpop.f32.mrf.mxu1  ;;  %v9799_v15 = vor.u32 %v11462_v24, %v9798_v22  ;;  %v9983_v5 = vor.u32 %v11509_v62, %v9982_v58 }
 0x315   : > { %v5234_v21 = vadd.f32 %v13890_v23, %v4905_v25  ;;  %v11441_v23 = vld [vmem:[%s18518_s1 + $0x444] sm:$0xf] }
 0x316   : > { %v5564_v1 = vpop.f32.mrf.mxu0  ;;  %v9731_v11 = vor.u32 %v11441_v23, %v9728_v35  ;;  %v9760_v35 = vld [vmem:[%s18518_s1 + $0x4a0] sm:$0xf0] }
 0x317   : > { %v13980_v43 = vadd.f32 %v5562_v39, %v5234_v21  ;;  %v9739_v39 = vor.u32 %v11442_v47, %v9736_v16  ;;  %v11450_v16 = vld [vmem:[%s18518_s1 + $0x48c] sm:$0xf] }
 0x319   : > { %5287 = vmatmul.bf16.gmra.mxu3 %v9799_v15 }
 0x31a   : > { %v4906_v48 = vpop.f32.mrf.mxu2 }
 0x31b   : > { %v4907_v33 = vadd.f32 %v4906_v48, %v13657_v8  ;;  %v9768_v48 = vld [vmem:[%s18518_s1 + $0x4a8] sm:$0xf0] }
 0x31c   : > { %v14007_v41 = vpop.f32.mrf.mxu1  ;;  %v14010_v22 = vpop.f32.mrf.mxu3 }
 0x31d   : > { %v5236_v25 = vadd.f32 %v13898_v10, %v4907_v33  ;;  %v10014_v10 = vld [vmem:[%s18518_s1 + $0x680] sm:$0xf] }
 0x31e   : > { %v5567_v21 = vpop.f32.mrf.mxu0 }
 0x31f   : > { %v14012_v24 = vadd.f32 %v5564_v1, %v5236_v25  ;;  %4659 = vmatmul.bf16.gmra.mxu1 %v9983_v5  ;;  %4948 = vmatmul.bf16.gmra.mxu2 %v9731_v11  ;;  %v9830_v1 = vld [vmem:[%s18518_s1 + $0x508] sm:$0xf] }
 0x321   : > { %5606 = vmatmul.bf16.gmra.mxu0 %v9739_v39 }
 0x322   : > { %v4909_v34 = vpop.f32.mrf.mxu2 }
 0x323   : > { %v4910_v15 = vadd.f32 %v4909_v34, %v13688_v27  ;;  %v11470_v34 = vld [vmem:[%s18518_s1 + $0x524] sm:$0xf0]  ;;  %v11517_v27 = vld [vmem:[%s18518_s1 + $0x69c] sm:$0xf0] }
 0x324   : > { %v14015_v30 = vpop.f32.mrf.mxu1  ;;  %v14018_v62 = vpop.f32.mrf.mxu3  ;;  %v9831_v47 = vor.u32 %v11470_v34, %v9830_v1  ;;  %v10015_v11 = vor.u32 %v11517_v27, %v10014_v10 }
 0x325   : > { %v5239_v8 = vadd.f32 %v13930_v57, %v4910_v15  ;;  %v11449_v57 = vld [vmem:[%s18518_s1 + $0x484] sm:$0xf] }
 0x326   : > { %v5569_v58 = vpop.f32.mrf.mxu0  ;;  %v9763_v39 = vor.u32 %v11449_v57, %v9760_v35  ;;  %v9792_v35 = vld [vmem:[%s18518_s1 + $0x4e0] sm:$0xf0] }
 0x327   : > { %v14020_v23 = vadd.f32 %v5567_v21, %v5239_v8  ;;  %v9771_v21 = vor.u32 %v11450_v16, %v9768_v48  ;;  %v11458_v48 = vld [vmem:[%s18518_s1 + $0x4cc] sm:$0xf] }
 0x329   : > { %5292 = vmatmul.bf16.gmra.mxu3 %v9831_v47 }
 0x32a   : > { %v4911_v33 = vpop.f32.mrf.mxu2 }
 0x32b   : > { %v4912_v5 = vadd.f32 %v4911_v33, %v13696_v19  ;;  %v9800_v33 = vld [vmem:[%s18518_s1 + $0x4e8] sm:$0xf0] }
 0x32c   : > { %v14047_v25 = vpop.f32.mrf.mxu1  ;;  %v14050_v1 = vpop.f32.mrf.mxu3 }
 0x32d   : > { %v5241_v15 = vadd.f32 %v13938_v44, %v4912_v5  ;;  %v10046_v44 = vld [vmem:[%s18518_s1 + $0x6c0] sm:$0xf] }
 0x32e   : > { %v5572_v8 = vpop.f32.mrf.mxu0 }
 0x32f   : > { %v14052_v34 = vadd.f32 %v5569_v58, %v5241_v15  ;;  %4664 = vmatmul.bf16.gmra.mxu1 %v10015_v11  ;;  %4953 = vmatmul.bf16.gmra.mxu2 %v9763_v39  ;;  %v9862_v58 = vld [vmem:[%s18518_s1 + $0x548] sm:$0xf] }
 0x331   : > { %5611 = vmatmul.bf16.gmra.mxu0 %v9771_v21 }
 0x332   : > { %v4914_v13 = vpop.f32.mrf.mxu2 }
 0x333   : > { %v4915_v47 = vadd.f32 %v4914_v13, %v13727_v26  ;;  %v11478_v13 = vld [vmem:[%s18518_s1 + $0x564] sm:$0xf0]  ;;  %v11525_v26 = vld [vmem:[%s18518_s1 + $0x6dc] sm:$0xf0] }
 0x334   : > { %v14055_v49 = vpop.f32.mrf.mxu1  ;;  %v14058_v27 = vpop.f32.mrf.mxu3  ;;  %v9863_v16 = vor.u32 %v11478_v13, %v9862_v58  ;;  %v10047_v39 = vor.u32 %v11525_v26, %v10046_v44 }
 0x335   : > { %v5244_v19 = vadd.f32 %v13970_v14, %v4915_v47  ;;  %v11457_v14 = vld [vmem:[%s18518_s1 + $0x4c4] sm:$0xf] }
 0x336   : > { %v5574_v10 = vpop.f32.mrf.mxu0  ;;  %v9795_v21 = vor.u32 %v11457_v14, %v9792_v35  ;;  %v9824_v35 = vld [vmem:[%s18518_s1 + $0x520] sm:$0xf0] }
 0x337   : > { %v14060_v57 = vadd.f32 %v5572_v8, %v5244_v19  ;;  %v9803_v8 = vor.u32 %v11458_v48, %v9800_v33  ;;  %v11466_v33 = vld [vmem:[%s18518_s1 + $0x50c] sm:$0xf] }
 0x339   : > { %5297 = vmatmul.bf16.gmra.mxu3 %v9863_v16 }
 0x33a   : > { %v4916_v5 = vpop.f32.mrf.mxu2 }
 0x33b   : > { %v4917_v11 = vadd.f32 %v4916_v5, %v13735_v9  ;;  %v9832_v5 = vld [vmem:[%s18518_s1 + $0x528] sm:$0xf0] }
 0x33c   : > { %v14087_v15 = vpop.f32.mrf.mxu1  ;;  %v14090_v58 = vpop.f32.mrf.mxu3 }
 0x33d   : > { %v5246_v47 = vadd.f32 %v13978_v28, %v4917_v11  ;;  %v10078_v28 = vld [vmem:[%s18518_s1 + $0x700] sm:$0xf] }
 0x33e   : > { %v5577_v19 = vpop.f32.mrf.mxu0 }
 0x33f   : > { %v14092_v13 = vadd.f32 %v5574_v10, %v5246_v47  ;;  %4669 = vmatmul.bf16.gmra.mxu1 %v10047_v39  ;;  %4958 = vmatmul.bf16.gmra.mxu2 %v9795_v21  ;;  %v9894_v10 = vld [vmem:[%s18518_s1 + $0x588] sm:$0xf] }
 0x341   : > { %5616 = vmatmul.bf16.gmra.mxu0 %v9803_v8 }
 0x342   : > { %v4919_v59 = vpop.f32.mrf.mxu2 }
 0x343   : > { %v4920_v16 = vadd.f32 %v4919_v59, %v13767_v3  ;;  %v11486_v59 = vld [vmem:[%s18518_s1 + $0x5a4] sm:$0xf0]  ;;  %v11533_v3 = vld [vmem:[%s18518_s1 + $0x71c] sm:$0xf0] }
 0x344   : > { %v14095_v50 = vpop.f32.mrf.mxu1  ;;  %v14098_v26 = vpop.f32.mrf.mxu3  ;;  %v9895_v48 = vor.u32 %v11486_v59, %v9894_v10  ;;  %v10079_v21 = vor.u32 %v11533_v3, %v10078_v28 }
 0x345   : > { %v5249_v9 = vadd.f32 %v14010_v22, %v4920_v16  ;;  %v11465_v22 = vld [vmem:[%s18518_s1 + $0x504] sm:$0xf] }
 0x346   : > { %v5579_v44 = vpop.f32.mrf.mxu0  ;;  %v9827_v8 = vor.u32 %v11465_v22, %v9824_v35  ;;  %v9856_v35 = vld [vmem:[%s18518_s1 + $0x560] sm:$0xf0] }
 0x347   : > { %v14100_v14 = vadd.f32 %v5577_v19, %v5249_v9  ;;  %v9835_v19 = vor.u32 %v11466_v33, %v9832_v5  ;;  %v11474_v5 = vld [vmem:[%s18518_s1 + $0x54c] sm:$0xf] }
 0x349   : > { %18796 = vst [vmem:[#allocation134_spill] sm:$0xff] %v14100_v14  ;;  %5302 = vmatmul.bf16.gmra.mxu3 %v9895_v48 }
 0x34a   : > { %v4921_v11 = vpop.f32.mrf.mxu2 }
 0x34b   : > { %v4922_v39 = vadd.f32 %v4921_v11, %v13775_v60  ;;  %v9864_v11 = vld [vmem:[%s18518_s1 + $0x568] sm:$0xf0] }
 0x34c   : > { %v14127_v47 = vpop.f32.mrf.mxu1  ;;  %v14130_v10 = vpop.f32.mrf.mxu3 }
 0x34d   : > { %v5251_v16 = vadd.f32 %v14018_v62, %v4922_v39  ;;  %v10110_v62 = vld [vmem:[%s18518_s1 + $0x740] sm:$0xf] }
 0x34e   : > { %v5582_v9 = vpop.f32.mrf.mxu0 }
 0x34f   : > { %v14132_v59 = vadd.f32 %v5579_v44, %v5251_v16  ;;  %4674 = vmatmul.bf16.gmra.mxu1 %v10079_v21  ;;  %4963 = vmatmul.bf16.gmra.mxu2 %v9827_v8  ;;  %v9926_v44 = vld [vmem:[%s18518_s1 + $0x5c8] sm:$0xf] }
 0x351   : > { %18797 = vst [vmem:[#allocation135_spill] sm:$0xff] %v14132_v59  ;;  %5621 = vmatmul.bf16.gmra.mxu0 %v9835_v19 }
 0x352   : > { %v4924_v29 = vpop.f32.mrf.mxu2 }
 0x353   : > { %v4925_v48 = vadd.f32 %v4924_v29, %v13807_v46  ;;  %v11494_v29 = vld [vmem:[%s18518_s1 + $0x5e4] sm:$0xf0]  ;;  %v11541_v46 = vld [vmem:[%s18518_s1 + $0x75c] sm:$0xf0] }
 0x354   : > { %v14135_v14 = vpop.f32.mrf.mxu1  ;;  %v14138_v3 = vpop.f32.mrf.mxu3  ;;  %v9927_v33 = vor.u32 %v11494_v29, %v9926_v44  ;;  %v10111_v8 = vor.u32 %v11541_v46, %v10110_v62 }
 0x355   : > { %v5254_v60 = vadd.f32 %v14050_v1, %v4925_v48  ;;  %v11473_v1 = vld [vmem:[%s18518_s1 + $0x544] sm:$0xf] }
 0x356   : > { %v5584_v28 = vpop.f32.mrf.mxu0  ;;  %v9859_v19 = vor.u32 %v11473_v1, %v9856_v35  ;;  %v9888_v35 = vld [vmem:[%s18518_s1 + $0x5a0] sm:$0xf0] }
 0x357   : > { %v14140_v22 = vadd.f32 %v5582_v9, %v5254_v60  ;;  %v9867_v9 = vor.u32 %v11474_v5, %v9864_v11  ;;  %v11482_v11 = vld [vmem:[%s18518_s1 + $0x58c] sm:$0xf] }
 0x359   : > { %18798 = vst [vmem:[#allocation136_spill] sm:$0xff] %v14140_v22  ;;  %5307 = vmatmul.bf16.gmra.mxu3 %v9927_v33 }
 0x35a   : > { %v4926_v39 = vpop.f32.mrf.mxu2 }
 0x35b   : > { %v4927_v21 = vadd.f32 %v4926_v39, %v13815_v42  ;;  %v9896_v39 = vld [vmem:[%s18518_s1 + $0x5a8] sm:$0xf0] }
 0x35c   : > { %v14167_v16 = vpop.f32.mrf.mxu1  ;;  %v14170_v44 = vpop.f32.mrf.mxu3 }
 0x35d   : > { %v5256_v48 = vadd.f32 %v14058_v27, %v4927_v21  ;;  %v10142_v27 = vld [vmem:[%s18518_s1 + $0x780] sm:$0xf] }
 0x35e   : > { %v5587_v60 = vpop.f32.mrf.mxu0 }
 0x35f   : > { %v14172_v29 = vadd.f32 %v5584_v28, %v5256_v48  ;;  %4679 = vmatmul.bf16.gmra.mxu1 %v10111_v8  ;;  %4968 = vmatmul.bf16.gmra.mxu2 %v9859_v19  ;;  %v9958_v28 = vld [vmem:[%s18518_s1 + $0x608] sm:$0xf] }
 0x361   : > { %18799 = vst [vmem:[#allocation137_spill] sm:$0xff] %v14172_v29  ;;  %5626 = vmatmul.bf16.gmra.mxu0 %v9867_v9 }
 0x362   : > { %v4929_v22 = vpop.f32.mrf.mxu2 }
 0x363   : > { %v4930_v33 = vadd.f32 %v4929_v22, %v13847_v63  ;;  %v11502_v63 = vld [vmem:[%s18518_s1 + $0x624] sm:$0xf0]  ;;  %v11481_v22 = vld [vmem:[%s18518_s1 + $0x584] sm:$0xf] }
 0x364   : > { %v14175_v59 = vpop.f32.mrf.mxu1  ;;  %v14178_v46 = vpop.f32.mrf.mxu3  ;;  %v9959_v5 = vor.u32 %v11502_v63, %v9958_v28  ;;  %v9891_v9 = vor.u32 %v11481_v22, %v9888_v35  ;;  %v9920_v35 = vld [vmem:[%s18518_s1 + $0x5e0] sm:$0xf0] }
 0x365   : > { %v5259_v42 = vadd.f32 %v14090_v58, %v4930_v33  ;;  %v11549_v58 = vld [vmem:[%s18518_s1 + $0x79c] sm:$0xf0] }
 0x366   : > { %v5589_v62 = vpop.f32.mrf.mxu0  ;;  %v10143_v19 = vor.u32 %v11549_v58, %v10142_v27 }
 0x367   : > { %v14180_v1 = vadd.f32 %v5587_v60, %v5259_v42  ;;  %v9899_v60 = vor.u32 %v11482_v11, %v9896_v39  ;;  %v11490_v39 = vld [vmem:[%s18518_s1 + $0x5cc] sm:$0xf] }
 0x369   : > { %18800 = vst [vmem:[#allocation138_spill] sm:$0xff] %v14180_v1  ;;  %5312 = vmatmul.bf16.gmra.mxu3 %v9959_v5 }
 0x36a   : > { %v4931_v21 = vpop.f32.mrf.mxu2 }
 0x36b   : > { %v4932_v8 = vadd.f32 %v4931_v21, %v13855_v32  ;;  %v9928_v21 = vld [vmem:[%s18518_s1 + $0x5e8] sm:$0xf0] }
 0x36c   : > { %v14207_v48 = vpop.f32.mrf.mxu1  ;;  %v14210_v28 = vpop.f32.mrf.mxu3 }
 0x36d   : > { %v5261_v33 = vadd.f32 %v14098_v26, %v4932_v8  ;;  %v10174_v26 = vld [vmem:[%s18518_s1 + $0x7c0] sm:$0xf] }
 0x36e   : > { %v5592_v42 = vpop.f32.mrf.mxu0 }
 0x36f   : > { %v14212_v63 = vadd.f32 %v5589_v62, %v5261_v33  ;;  %4684 = vmatmul.bf16.gmra.mxu1 %v10143_v19  ;;  %4973 = vmatmul.bf16.gmra.mxu2 %v9891_v9  ;;  %v9990_v62 = vld [vmem:[%s18518_s1 + $0x648] sm:$0xf] }
 0x371   : > { %18801 = vst [vmem:[#allocation139_spill] sm:$0xff] %v14212_v63  ;;  %5631 = vmatmul.bf16.gmra.mxu0 %v9899_v60 }
 0x372   : > { %v4934_v1 = vpop.f32.mrf.mxu2 }
 0x373   : > { %v4935_v5 = vadd.f32 %v4934_v1, %v13887_v31  ;;  %v11510_v31 = vld [vmem:[%s18518_s1 + $0x664] sm:$0xf0]  ;;  %v11489_v1 = vld [vmem:[%s18518_s1 + $0x5c4] sm:$0xf] }
 0x374   : > { %v14215_v29 = vpop.f32.mrf.mxu1  ;;  %v14218_v58 = vpop.f32.mrf.mxu3  ;;  %v9991_v11 = vor.u32 %v11510_v31, %v9990_v62  ;;  %v9923_v60 = vor.u32 %v11489_v1, %v9920_v35  ;;  %v9952_v35 = vld [vmem:[%s18518_s1 + $0x620] sm:$0xf0] }
 0x375   : > { %v5264_v32 = vadd.f32 %v14130_v10, %v4935_v5  ;;  %v11557_v10 = vld [vmem:[%s18518_s1 + $0x7dc] sm:$0xf0] }
 0x376   : > { %v5594_v27 = vpop.f32.mrf.mxu0  ;;  %v10175_v9 = vor.u32 %v11557_v10, %v10174_v26 }
 0x377   : > { %v14220_v22 = vadd.f32 %v5592_v42, %v5264_v32  ;;  %v9931_v42 = vor.u32 %v11490_v39, %v9928_v21  ;;  %v11498_v21 = vld [vmem:[%s18518_s1 + $0x60c] sm:$0xf] }
 0x379   : > { %18802 = vst [vmem:[#allocation140_spill] sm:$0xff] %v14220_v22  ;;  %5317 = vmatmul.bf16.gmra.mxu3 %v9991_v11 }
 0x37a   : > { %v4936_v8 = vpop.f32.mrf.mxu2 }
 0x37b   : > { %v4937_v19 = vadd.f32 %v4936_v8, %v13895_v52  ;;  %v9960_v8 = vld [vmem:[%s18518_s1 + $0x628] sm:$0xf0] }
 0x37c   : > { %v14247_v33 = vpop.f32.mrf.mxu1  ;;  %v14250_v62 = vpop.f32.mrf.mxu3 }
 0x37d   : > { %v5266_v5 = vadd.f32 %v14138_v3, %v4937_v19  ;;  %v10206_v3 = vld [vmem:[%s18518_s1 + $0x800] sm:$0xf] }
 0x37e   : > { %v5597_v32 = vpop.f32.mrf.mxu0 }
 0x37f   : > { %v14252_v31 = vadd.f32 %v5594_v27, %v5266_v5  ;;  %4689 = vmatmul.bf16.gmra.mxu1 %v10175_v9  ;;  %4978 = vmatmul.bf16.gmra.mxu2 %v9923_v60  ;;  %v10022_v27 = vld [vmem:[%s18518_s1 + $0x688] sm:$0xf] }
 0x381   : > { %18803 = vst [vmem:[#allocation141_spill] sm:$0xff] %v14252_v31  ;;  %5636 = vmatmul.bf16.gmra.mxu0 %v9931_v42 }
 0x382   : > { %v4939_v22 = vpop.f32.mrf.mxu2 }
 0x383   : > { %v4940_v11 = vadd.f32 %v4939_v22, %v13927_v0  ;;  %v11518_v0 = vld [vmem:[%s18518_s1 + $0x6a4] sm:$0xf0]  ;;  %v11497_v22 = vld [vmem:[%s18518_s1 + $0x604] sm:$0xf] }
 0x384   : > { %v14255_v63 = vpop.f32.mrf.mxu1  ;;  %v14258_v10 = vpop.f32.mrf.mxu3  ;;  %v10023_v39 = vor.u32 %v11518_v0, %v10022_v27  ;;  %v9955_v42 = vor.u32 %v11497_v22, %v9952_v35  ;;  %v9984_v35 = vld [vmem:[%s18518_s1 + $0x660] sm:$0xf0] }
 0x385   : > { %v5269_v52 = vadd.f32 %v14170_v44, %v4940_v11  ;;  %v11565_v44 = vld [vmem:[%s18518_s1 + $0x81c] sm:$0xf0] }
 0x386   : > { %v5599_v26 = vpop.f32.mrf.mxu0  ;;  %v10207_v60 = vor.u32 %v11565_v44, %v10206_v3 }
 0x387   : > { %v14260_v1 = vadd.f32 %v5597_v32, %v5269_v52  ;;  %v9963_v32 = vor.u32 %v11498_v21, %v9960_v8  ;;  %v11506_v8 = vld [vmem:[%s18518_s1 + $0x64c] sm:$0xf] }
 0x389   : > { %18804 = vst [vmem:[#allocation142_spill] sm:$0xff] %v14260_v1  ;;  %5322 = vmatmul.bf16.gmra.mxu3 %v10023_v39 }
 0x38a   : > { %v4941_v19 = vpop.f32.mrf.mxu2 }
 0x38b   : > { %v4942_v9 = vadd.f32 %v4941_v19, %v13935_v36  ;;  %v9992_v19 = vld [vmem:[%s18518_s1 + $0x668] sm:$0xf0] }
 0x38c   : > { %v14287_v5 = vpop.f32.mrf.mxu1  ;;  %v14290_v27 = vpop.f32.mrf.mxu3 }
 0x38d   : > { %v5271_v11 = vadd.f32 %v14178_v46, %v4942_v9  ;;  %v10238_v46 = vld [vmem:[%s18518_s1 + $0x840] sm:$0xf] }
 0x38e   : > { %v5602_v52 = vpop.f32.mrf.mxu0 }
 0x38f   : > { %v14292_v0 = vadd.f32 %v5599_v26, %v5271_v11  ;;  %4694 = vmatmul.bf16.gmra.mxu1 %v10207_v60  ;;  %4983 = vmatmul.bf16.gmra.mxu2 %v9955_v42  ;;  %v10054_v26 = vld [vmem:[%s18518_s1 + $0x6c8] sm:$0xf] }
 0x391   : > { %18805 = vst [vmem:[#allocation143_spill] sm:$0xff] %v14292_v0  ;;  %5641 = vmatmul.bf16.gmra.mxu0 %v9963_v32 }
 0x392   : > { %v4944_v1 = vpop.f32.mrf.mxu2 }
 0x393   : > { %v4945_v39 = vadd.f32 %v4944_v1, %v13967_v38  ;;  %v11526_v38 = vld [vmem:[%s18518_s1 + $0x6e4] sm:$0xf0]  ;;  %v11505_v1 = vld [vmem:[%s18518_s1 + $0x644] sm:$0xf] }
 0x394   : > { %v14295_v31 = vpop.f32.mrf.mxu1  ;;  %v14298_v44 = vpop.f32.mrf.mxu3  ;;  %v10055_v21 = vor.u32 %v11526_v38, %v10054_v26  ;;  %v9987_v32 = vor.u32 %v11505_v1, %v9984_v35  ;;  %v10016_v35 = vld [vmem:[%s18518_s1 + $0x6a0] sm:$0xf0] }
 0x395   : > { %v5274_v36 = vadd.f32 %v14210_v28, %v4945_v39  ;;  %v11573_v28 = vld [vmem:[%s18518_s1 + $0x85c] sm:$0xf0] }
 0x396   : > { %v5604_v3 = vpop.f32.mrf.mxu0  ;;  %v10239_v42 = vor.u32 %v11573_v28, %v10238_v46 }
 0x397   : > { %v14300_v22 = vadd.f32 %v5602_v52, %v5274_v36  ;;  %v9995_v52 = vor.u32 %v11506_v8, %v9992_v19  ;;  %v11514_v19 = vld [vmem:[%s18518_s1 + $0x68c] sm:$0xf] }
 0x399   : > { %18806 = vst [vmem:[#allocation144_spill] sm:$0xff] %v14300_v22  ;;  %5327 = vmatmul.bf16.gmra.mxu3 %v10055_v21 }
 0x39a   : > { %v4946_v9 = vpop.f32.mrf.mxu2 }
 0x39b   : > { %v4947_v60 = vadd.f32 %v4946_v9, %v13975_v17  ;;  %v10024_v9 = vld [vmem:[%s18518_s1 + $0x6a8] sm:$0xf0] }
 0x39c   : > { %v14327_v11 = vpop.f32.mrf.mxu1  ;;  %v14330_v26 = vpop.f32.mrf.mxu3 }
 0x39d   : > { %v5276_v39 = vadd.f32 %v14218_v58, %v4947_v60  ;;  %v10270_v58 = vld [vmem:[%s18518_s1 + $0x880] sm:$0xf] }
 0x39e   : > { %v5607_v36 = vpop.f32.mrf.mxu0 }
 0x39f   : > { %v14332_v38 = vadd.f32 %v5604_v3, %v5276_v39  ;;  %4699 = vmatmul.bf16.gmra.mxu1 %v10239_v42  ;;  %4988 = vmatmul.bf16.gmra.mxu2 %v9987_v32  ;;  %v10086_v3 = vld [vmem:[%s18518_s1 + $0x708] sm:$0xf] }
 0x3a1   : > { %18807 = vst [vmem:[#allocation145_spill] sm:$0xff] %v14332_v38  ;;  %5646 = vmatmul.bf16.gmra.mxu0 %v9995_v52 }
 0x3a2   : > { %v4949_v22 = vpop.f32.mrf.mxu2 }
 0x3a3   : > { %v4950_v21 = vadd.f32 %v4949_v22, %v14007_v41  ;;  %v11534_v41 = vld [vmem:[%s18518_s1 + $0x724] sm:$0xf0]  ;;  %v11513_v22 = vld [vmem:[%s18518_s1 + $0x684] sm:$0xf] }
 0x3a4   : > { %v14335_v0 = vpop.f32.mrf.mxu1  ;;  %v14338_v28 = vpop.f32.mrf.mxu3  ;;  %v10087_v8 = vor.u32 %v11534_v41, %v10086_v3  ;;  %v10019_v52 = vor.u32 %v11513_v22, %v10016_v35  ;;  %v10048_v35 = vld [vmem:[%s18518_s1 + $0x6e0] sm:$0xf0] }
 0x3a5   : > { %v5279_v17 = vadd.f32 %v14250_v62, %v4950_v21  ;;  %v11581_v62 = vld [vmem:[%s18518_s1 + $0x89c] sm:$0xf0] }
 0x3a6   : > { %v5609_v46 = vpop.f32.mrf.mxu0  ;;  %v10271_v32 = vor.u32 %v11581_v62, %v10270_v58 }
 0x3a7   : > { %v14340_v1 = vadd.f32 %v5607_v36, %v5279_v17  ;;  %v10027_v36 = vor.u32 %v11514_v19, %v10024_v9  ;;  %v11522_v9 = vld [vmem:[%s18518_s1 + $0x6cc] sm:$0xf] }
 0x3a9   : > { %18808 = vst [vmem:[#allocation146_spill] sm:$0xff] %v14340_v1  ;;  %5332 = vmatmul.bf16.gmra.mxu3 %v10087_v8 }
 0x3aa   : > { %v4951_v60 = vpop.f32.mrf.mxu2 }
 0x3ab   : > { %v4952_v42 = vadd.f32 %v4951_v60, %v14015_v30  ;;  %v10056_v60 = vld [vmem:[%s18518_s1 + $0x6e8] sm:$0xf0] }
 0x3ac   : > { %v14367_v39 = vpop.f32.mrf.mxu1  ;;  %v14370_v3 = vpop.f32.mrf.mxu3 }
 0x3ad   : > { %v5281_v21 = vadd.f32 %v14258_v10, %v4952_v42  ;;  %v10302_v10 = vld [vmem:[%s18518_s1 + $0x8c0] sm:$0xf] }
 0x3ae   : > { %v5612_v17 = vpop.f32.mrf.mxu0 }
 0x3af   : > { %v14372_v41 = vadd.f32 %v5609_v46, %v5281_v21  ;;  %4704 = vmatmul.bf16.gmra.mxu1 %v10271_v32  ;;  %4993 = vmatmul.bf16.gmra.mxu2 %v10019_v52  ;;  %v10118_v46 = vld [vmem:[%s18518_s1 + $0x748] sm:$0xf] }
 0x3b1   : > { %18809 = vst [vmem:[#allocation147_spill] sm:$0xff] %v14372_v41  ;;  %5651 = vmatmul.bf16.gmra.mxu0 %v10027_v36 }
 0x3b2   : > { %v4954_v1 = vpop.f32.mrf.mxu2 }
 0x3b3   : > { %v4955_v8 = vadd.f32 %v4954_v1, %v14047_v25  ;;  %v11542_v25 = vld [vmem:[%s18518_s1 + $0x764] sm:$0xf0]  ;;  %v11521_v1 = vld [vmem:[%s18518_s1 + $0x6c4] sm:$0xf] }
 0x3b4   : > { %v14375_v38 = vpop.f32.mrf.mxu1  ;;  %v14378_v62 = vpop.f32.mrf.mxu3  ;;  %v10119_v19 = vor.u32 %v11542_v25, %v10118_v46  ;;  %v10051_v36 = vor.u32 %v11521_v1, %v10048_v35  ;;  %v10080_v35 = vld [vmem:[%s18518_s1 + $0x720] sm:$0xf0] }
 0x3b5   : > { %v5284_v30 = vadd.f32 %v14290_v27, %v4955_v8  ;;  %v11589_v27 = vld [vmem:[%s18518_s1 + $0x8dc] sm:$0xf0] }
 0x3b6   : > { %v5614_v58 = vpop.f32.mrf.mxu0  ;;  %v10303_v52 = vor.u32 %v11589_v27, %v10302_v10 }
 0x3b7   : > { %v14380_v22 = vadd.f32 %v5612_v17, %v5284_v30  ;;  %v10059_v17 = vor.u32 %v11522_v9, %v10056_v60  ;;  %v11530_v60 = vld [vmem:[%s18518_s1 + $0x70c] sm:$0xf] }
 0x3b9   : > { %18810 = vst [vmem:[#allocation148_spill] sm:$0xff] %v14380_v22  ;;  %5337 = vmatmul.bf16.gmra.mxu3 %v10119_v19 }
 0x3ba   : > { %v4956_v42 = vpop.f32.mrf.mxu2 }
 0x3bb   : > { %v4957_v32 = vadd.f32 %v4956_v42, %v14055_v49  ;;  %v10088_v42 = vld [vmem:[%s18518_s1 + $0x728] sm:$0xf0] }
 0x3bc   : > { %v14407_v21 = vpop.f32.mrf.mxu1  ;;  %v14410_v46 = vpop.f32.mrf.mxu3 }
 0x3bd   : > { %v5286_v8 = vadd.f32 %v14298_v44, %v4957_v32  ;;  %v10334_v44 = vld [vmem:[%s18518_s1 + $0x900] sm:$0xf] }
 0x3be   : > { %v5617_v30 = vpop.f32.mrf.mxu0 }
 0x3bf   : > { %v14412_v25 = vadd.f32 %v5614_v58, %v5286_v8  ;;  %4709 = vmatmul.bf16.gmra.mxu1 %v10303_v52  ;;  %4998 = vmatmul.bf16.gmra.mxu2 %v10051_v36  ;;  %v10150_v58 = vld [vmem:[%s18518_s1 + $0x788] sm:$0xf] }
 0x3c1   : > { %18811 = vst [vmem:[#allocation149_spill] sm:$0xff] %v14412_v25  ;;  %5656 = vmatmul.bf16.gmra.mxu0 %v10059_v17 }
 0x3c2   : > { %v4959_v22 = vpop.f32.mrf.mxu2 }
 0x3c3   : > { %v4960_v19 = vadd.f32 %v4959_v22, %v14087_v15  ;;  %v11550_v15 = vld [vmem:[%s18518_s1 + $0x7a4] sm:$0xf0]  ;;  %v11529_v22 = vld [vmem:[%s18518_s1 + $0x704] sm:$0xf] }
 0x3c4   : > { %v14415_v41 = vpop.f32.mrf.mxu1  ;;  %v14418_v27 = vpop.f32.mrf.mxu3  ;;  %v10151_v9 = vor.u32 %v11550_v15, %v10150_v58  ;;  %v10083_v17 = vor.u32 %v11529_v22, %v10080_v35  ;;  %v10112_v35 = vld [vmem:[%s18518_s1 + $0x760] sm:$0xf0] }
 0x3c5   : > { %v5289_v49 = vadd.f32 %v14330_v26, %v4960_v19  ;;  %v11597_v26 = vld [vmem:[%s18518_s1 + $0x91c] sm:$0xf0] }
 0x3c6   : > { %v5619_v10 = vpop.f32.mrf.mxu0  ;;  %v10335_v36 = vor.u32 %v11597_v26, %v10334_v44 }
 0x3c7   : > { %v14420_v1 = vadd.f32 %v5617_v30, %v5289_v49  ;;  %v10091_v30 = vor.u32 %v11530_v60, %v10088_v42  ;;  %v11538_v42 = vld [vmem:[%s18518_s1 + $0x74c] sm:$0xf] }
 0x3c9   : > { %18812 = vst [vmem:[#allocation150_spill] sm:$0xff] %v14420_v1  ;;  %5342 = vmatmul.bf16.gmra.mxu3 %v10151_v9 }
 0x3ca   : > { %v4961_v32 = vpop.f32.mrf.mxu2 }
 0x3cb   : > { %v4962_v52 = vadd.f32 %v4961_v32, %v14095_v50  ;;  %v10120_v32 = vld [vmem:[%s18518_s1 + $0x768] sm:$0xf0] }
 0x3cc   : > { %v14447_v8 = vpop.f32.mrf.mxu1  ;;  %v14450_v58 = vpop.f32.mrf.mxu3 }
 0x3cd   : > { %v5291_v19 = vadd.f32 %v14338_v28, %v4962_v52  ;;  %v10366_v28 = vld [vmem:[%s18518_s1 + $0x940] sm:$0xf] }
 0x3ce   : > { %v5622_v49 = vpop.f32.mrf.mxu0 }
 0x3cf   : > { %v14452_v15 = vadd.f32 %v5619_v10, %v5291_v19  ;;  %4714 = vmatmul.bf16.gmra.mxu1 %v10335_v36  ;;  %5003 = vmatmul.bf16.gmra.mxu2 %v10083_v17  ;;  %v10182_v10 = vld [vmem:[%s18518_s1 + $0x7c8] sm:$0xf] }
 0x3d1   : > { %18813 = vst [vmem:[#allocation151_spill] sm:$0xff] %v14452_v15  ;;  %5661 = vmatmul.bf16.gmra.mxu0 %v10091_v30 }
 0x3d2   : > { %v4964_v1 = vpop.f32.mrf.mxu2 }
 0x3d3   : > { %v4965_v9 = vadd.f32 %v4964_v1, %v14127_v47  ;;  %v11558_v47 = vld [vmem:[%s18518_s1 + $0x7e4] sm:$0xf0]  ;;  %v11537_v1 = vld [vmem:[%s18518_s1 + $0x744] sm:$0xf] }
 0x3d4   : > { %v14455_v25 = vpop.f32.mrf.mxu1  ;;  %v14458_v26 = vpop.f32.mrf.mxu3  ;;  %v10183_v60 = vor.u32 %v11558_v47, %v10182_v10  ;;  %v10115_v30 = vor.u32 %v11537_v1, %v10112_v35  ;;  %v10144_v35 = vld [vmem:[%s18518_s1 + $0x7a0] sm:$0xf0] }
 0x3d5   : > { %v5294_v50 = vadd.f32 %v14370_v3, %v4965_v9  ;;  %v11605_v3 = vld [vmem:[%s18518_s1 + $0x95c] sm:$0xf0] }
 0x3d6   : > { %v5624_v44 = vpop.f32.mrf.mxu0  ;;  %v10367_v17 = vor.u32 %v11605_v3, %v10366_v28 }
 0x3d7   : > { %v14460_v22 = vadd.f32 %v5622_v49, %v5294_v50  ;;  %v10123_v49 = vor.u32 %v11538_v42, %v10120_v32  ;;  %v11546_v32 = vld [vmem:[%s18518_s1 + $0x78c] sm:$0xf] }
 0x3d9   : > { %18814 = vst [vmem:[#allocation152_spill] sm:$0xff] %v14460_v22  ;;  %5347 = vmatmul.bf16.gmra.mxu3 %v10183_v60 }
 0x3da   : > { %v4966_v52 = vpop.f32.mrf.mxu2 }
 0x3db   : > { %v4967_v36 = vadd.f32 %v4966_v52, %v14135_v14  ;;  %v10152_v52 = vld [vmem:[%s18518_s1 + $0x7a8] sm:$0xf0] }
 0x3dc   : > { %v14487_v19 = vpop.f32.mrf.mxu1  ;;  %v14490_v10 = vpop.f32.mrf.mxu3 }
 0x3dd   : > { %v5296_v9 = vadd.f32 %v14378_v62, %v4967_v36  ;;  %v10398_v62 = vld [vmem:[%s18518_s1 + $0x980] sm:$0xf] }
 0x3de   : > { %v5627_v50 = vpop.f32.mrf.mxu0 }
 0x3df   : > { %v14492_v47 = vadd.f32 %v5624_v44, %v5296_v9  ;;  %4719 = vmatmul.bf16.gmra.mxu1 %v10367_v17  ;;  %5008 = vmatmul.bf16.gmra.mxu2 %v10115_v30  ;;  %v10214_v44 = vld [vmem:[%s18518_s1 + $0x808] sm:$0xf] }
 0x3e1   : > { %18815 = vst [vmem:[#allocation153_spill] sm:$0xff] %v14492_v47  ;;  %5666 = vmatmul.bf16.gmra.mxu0 %v10123_v49 }
 0x3e2   : > { %v4969_v22 = vpop.f32.mrf.mxu2 }
 0x3e3   : > { %v4970_v60 = vadd.f32 %v4969_v22, %v14167_v16  ;;  %v11566_v16 = vld [vmem:[%s18518_s1 + $0x824] sm:$0xf0]  ;;  %v11545_v22 = vld [vmem:[%s18518_s1 + $0x784] sm:$0xf] }
 0x3e4   : > { %v14495_v15 = vpop.f32.mrf.mxu1  ;;  %v14498_v3 = vpop.f32.mrf.mxu3  ;;  %v10215_v42 = vor.u32 %v11566_v16, %v10214_v44  ;;  %v10147_v49 = vor.u32 %v11545_v22, %v10144_v35  ;;  %v10176_v35 = vld [vmem:[%s18518_s1 + $0x7e0] sm:$0xf0] }
 0x3e5   : > { %v5299_v14 = vadd.f32 %v14410_v46, %v4970_v60  ;;  %v11613_v46 = vld [vmem:[%s18518_s1 + $0x99c] sm:$0xf0] }
 0x3e6   : > { %v5629_v28 = vpop.f32.mrf.mxu0  ;;  %v10399_v30 = vor.u32 %v11613_v46, %v10398_v62 }
 0x3e7   : > { %v14500_v1 = vadd.f32 %v5627_v50, %v5299_v14  ;;  %v10155_v50 = vor.u32 %v11546_v32, %v10152_v52  ;;  %v11554_v52 = vld [vmem:[%s18518_s1 + $0x7cc] sm:$0xf] }
 0x3e9   : > { %18816 = vst [vmem:[#allocation154_spill] sm:$0xff] %v14500_v1  ;;  %5352 = vmatmul.bf16.gmra.mxu3 %v10215_v42 }
 0x3ea   : > { %v4971_v36 = vpop.f32.mrf.mxu2 }
 0x3eb   : > { %v4972_v17 = vadd.f32 %v4971_v36, %v14175_v59  ;;  %v10184_v36 = vld [vmem:[%s18518_s1 + $0x7e8] sm:$0xf0] }
 0x3ec   : > { %v14527_v9 = vpop.f32.mrf.mxu1  ;;  %v14530_v44 = vpop.f32.mrf.mxu3 }
 0x3ed   : > { %v5301_v60 = vadd.f32 %v14418_v27, %v4972_v17  ;;  %v10430_v27 = vld [vmem:[%s18518_s1 + $0x9c0] sm:$0xf] }
 0x3ee   : > { %v5632_v14 = vpop.f32.mrf.mxu0 }
 0x3ef   : > { %v14532_v16 = vadd.f32 %v5629_v28, %v5301_v60  ;;  %4724 = vmatmul.bf16.gmra.mxu1 %v10399_v30  ;;  %5013 = vmatmul.bf16.gmra.mxu2 %v10147_v49  ;;  %v10246_v28 = vld [vmem:[%s18518_s1 + $0x848] sm:$0xf] }
 0x3f1   : > { %18817 = vst [vmem:[#allocation155_spill] sm:$0xff] %v14532_v16  ;;  %5671 = vmatmul.bf16.gmra.mxu0 %v10155_v50 }
 0x3f2   : > { %v4974_v1 = vpop.f32.mrf.mxu2 }
 0x3f3   : > { %v4975_v42 = vadd.f32 %v4974_v1, %v14207_v48  ;;  %v11574_v48 = vld [vmem:[%s18518_s1 + $0x864] sm:$0xf0]  ;;  %v11553_v1 = vld [vmem:[%s18518_s1 + $0x7c4] sm:$0xf] }
 0x3f4   : > { %v14535_v47 = vpop.f32.mrf.mxu1  ;;  %v14538_v46 = vpop.f32.mrf.mxu3  ;;  %v10247_v32 = vor.u32 %v11574_v48, %v10246_v28  ;;  %v10179_v50 = vor.u32 %v11553_v1, %v10176_v35  ;;  %v10208_v35 = vld [vmem:[%s18518_s1 + $0x820] sm:$0xf0] }
 0x3f5   : > { %v5304_v59 = vadd.f32 %v14450_v58, %v4975_v42  ;;  %v11621_v58 = vld [vmem:[%s18518_s1 + $0x9dc] sm:$0xf0] }
 0x3f6   : > { %v5634_v62 = vpop.f32.mrf.mxu0  ;;  %v10431_v49 = vor.u32 %v11621_v58, %v10430_v27 }
 0x3f7   : > { %v14540_v22 = vadd.f32 %v5632_v14, %v5304_v59  ;;  %v10187_v14 = vor.u32 %v11554_v52, %v10184_v36  ;;  %v11562_v36 = vld [vmem:[%s18518_s1 + $0x80c] sm:$0xf] }
 0x3f9   : > { %18818 = vst [vmem:[#allocation156_spill] sm:$0xff] %v14540_v22  ;;  %5357 = vmatmul.bf16.gmra.mxu3 %v10247_v32 }
 0x3fa   : > { %v4976_v17 = vpop.f32.mrf.mxu2 }
 0x3fb   : > { %v4977_v30 = vadd.f32 %v4976_v17, %v14215_v29  ;;  %v10216_v17 = vld [vmem:[%s18518_s1 + $0x828] sm:$0xf0] }
 0x3fc   : > { %v14567_v60 = vpop.f32.mrf.mxu1  ;;  %v14570_v28 = vpop.f32.mrf.mxu3 }
 0x3fd   : > { %v5306_v42 = vadd.f32 %v14458_v26, %v4977_v30  ;;  %v10462_v26 = vld [vmem:[%s18518_s1 + $0xa00] sm:$0xf] }
 0x3fe   : > { %v5637_v59 = vpop.f32.mrf.mxu0 }
 0x3ff   : > { %v14572_v48 = vadd.f32 %v5634_v62, %v5306_v42  ;;  %4729 = vmatmul.bf16.gmra.mxu1 %v10431_v49  ;;  %5018 = vmatmul.bf16.gmra.mxu2 %v10179_v50  ;;  %v10278_v62 = vld [vmem:[%s18518_s1 + $0x888] sm:$0xf] }
 0x401   : > { %18819 = vst [vmem:[#allocation157_spill] sm:$0xff] %v14572_v48  ;;  %5676 = vmatmul.bf16.gmra.mxu0 %v10187_v14 }
 0x402   : > { %v4979_v22 = vpop.f32.mrf.mxu2 }
 0x403   : > { %v4980_v32 = vadd.f32 %v4979_v22, %v14247_v33  ;;  %v11582_v33 = vld [vmem:[%s18518_s1 + $0x8a4] sm:$0xf0]  ;;  %v11561_v22 = vld [vmem:[%s18518_s1 + $0x804] sm:$0xf] }
 0x404   : > { %v14575_v16 = vpop.f32.mrf.mxu1  ;;  %v14578_v58 = vpop.f32.mrf.mxu3  ;;  %v10279_v52 = vor.u32 %v11582_v33, %v10278_v62  ;;  %v10211_v14 = vor.u32 %v11561_v22, %v10208_v35  ;;  %v10240_v35 = vld [vmem:[%s18518_s1 + $0x860] sm:$0xf0] }
 0x405   : > { %v5309_v29 = vadd.f32 %v14490_v10, %v4980_v32  ;;  %v11629_v10 = vld [vmem:[%s18518_s1 + $0xa1c] sm:$0xf0] }
 0x406   : > { %v5639_v27 = vpop.f32.mrf.mxu0  ;;  %v10463_v50 = vor.u32 %v11629_v10, %v10462_v26 }
 0x407   : > { %v14580_v1 = vadd.f32 %v5637_v59, %v5309_v29  ;;  %v10219_v59 = vor.u32 %v11562_v36, %v10216_v17  ;;  %v11570_v17 = vld [vmem:[%s18518_s1 + $0x84c] sm:$0xf] }
 0x409   : > { %18820 = vst [vmem:[#allocation158_spill] sm:$0xff] %v14580_v1  ;;  %5362 = vmatmul.bf16.gmra.mxu3 %v10279_v52 }
 0x40a   : > { %v4981_v30 = vpop.f32.mrf.mxu2 }
 0x40b   : > { %v4982_v49 = vadd.f32 %v4981_v30, %v14255_v63  ;;  %v10248_v30 = vld [vmem:[%s18518_s1 + $0x868] sm:$0xf0] }
 0x40c   : > { %v14607_v42 = vpop.f32.mrf.mxu1  ;;  %v14610_v62 = vpop.f32.mrf.mxu3 }
 0x40d   : > { %v5311_v32 = vadd.f32 %v14498_v3, %v4982_v49  ;;  %v10494_v3 = vld [vmem:[%s18518_s1 + $0xa40] sm:$0xf] }
 0x40e   : > { %v5642_v29 = vpop.f32.mrf.mxu0 }
 0x40f   : > { %v14612_v33 = vadd.f32 %v5639_v27, %v5311_v32  ;;  %4734 = vmatmul.bf16.gmra.mxu1 %v10463_v50  ;;  %5023 = vmatmul.bf16.gmra.mxu2 %v10211_v14  ;;  %v10310_v27 = vld [vmem:[%s18518_s1 + $0x8c8] sm:$0xf] }
 0x411   : > { %18821 = vst [vmem:[#allocation159_spill] sm:$0xff] %v14612_v33  ;;  %5681 = vmatmul.bf16.gmra.mxu0 %v10219_v59 }
 0x412   : > { %v4984_v1 = vpop.f32.mrf.mxu2 }
 0x413   : > { %v4985_v52 = vadd.f32 %v4984_v1, %v14287_v5  ;;  %v11590_v5 = vld [vmem:[%s18518_s1 + $0x8e4] sm:$0xf0]  ;;  %v11569_v1 = vld [vmem:[%s18518_s1 + $0x844] sm:$0xf] }
 0x414   : > { %v14615_v48 = vpop.f32.mrf.mxu1  ;;  %v14618_v10 = vpop.f32.mrf.mxu3  ;;  %v10311_v36 = vor.u32 %v11590_v5, %v10310_v27  ;;  %v10243_v59 = vor.u32 %v11569_v1, %v10240_v35  ;;  %v10272_v35 = vld [vmem:[%s18518_s1 + $0x8a0] sm:$0xf0] }
 0x415   : > { %v5314_v63 = vadd.f32 %v14530_v44, %v4985_v52  ;;  %v11637_v44 = vld [vmem:[%s18518_s1 + $0xa5c] sm:$0xf0] }
 0x416   : > { %v5644_v26 = vpop.f32.mrf.mxu0  ;;  %v10495_v14 = vor.u32 %v11637_v44, %v10494_v3 }
 0x417   : > { %v14620_v22 = vadd.f32 %v5642_v29, %v5314_v63  ;;  %v10251_v29 = vor.u32 %v11570_v17, %v10248_v30  ;;  %v11578_v30 = vld [vmem:[%s18518_s1 + $0x88c] sm:$0xf] }
 0x419   : > { %18822 = vst [vmem:[#allocation160_spill] sm:$0xff] %v14620_v22  ;;  %5367 = vmatmul.bf16.gmra.mxu3 %v10311_v36 }
 0x41a   : > { %v4986_v49 = vpop.f32.mrf.mxu2 }
 0x41b   : > { %v4987_v50 = vadd.f32 %v4986_v49, %v14295_v31  ;;  %v10280_v49 = vld [vmem:[%s18518_s1 + $0x8a8] sm:$0xf0] }
 0x41c   : > { %v14647_v32 = vpop.f32.mrf.mxu1  ;;  %v14650_v27 = vpop.f32.mrf.mxu3 }
 0x41d   : > { %v5316_v52 = vadd.f32 %v14538_v46, %v4987_v50  ;;  %v10526_v46 = vld [vmem:[%s18518_s1 + $0xa80] sm:$0xf] }
 0x41e   : > { %v5647_v63 = vpop.f32.mrf.mxu0 }
 0x41f   : > { %v14652_v5 = vadd.f32 %v5644_v26, %v5316_v52  ;;  %4739 = vmatmul.bf16.gmra.mxu1 %v10495_v14  ;;  %5028 = vmatmul.bf16.gmra.mxu2 %v10243_v59  ;;  %v10342_v26 = vld [vmem:[%s18518_s1 + $0x908] sm:$0xf] }
 0x421   : > { %18823 = vst [vmem:[#allocation161_spill] sm:$0xff] %v14652_v5  ;;  %5686 = vmatmul.bf16.gmra.mxu0 %v10251_v29 }
 0x422   : > { %v4989_v22 = vpop.f32.mrf.mxu2 }
 0x423   : > { %v4990_v36 = vadd.f32 %v4989_v22, %v14327_v11  ;;  %v11598_v11 = vld [vmem:[%s18518_s1 + $0x924] sm:$0xf0]  ;;  %v11577_v22 = vld [vmem:[%s18518_s1 + $0x884] sm:$0xf] }
 0x424   : > { %v14655_v33 = vpop.f32.mrf.mxu1  ;;  %v14658_v44 = vpop.f32.mrf.mxu3  ;;  %v10343_v17 = vor.u32 %v11598_v11, %v10342_v26  ;;  %v10275_v29 = vor.u32 %v11577_v22, %v10272_v35  ;;  %v10304_v35 = vld [vmem:[%s18518_s1 + $0x8e0] sm:$0xf0] }
 0x425   : > { %v5319_v31 = vadd.f32 %v14570_v28, %v4990_v36  ;;  %v11645_v28 = vld [vmem:[%s18518_s1 + $0xa9c] sm:$0xf0] }
 0x426   : > { %v5649_v3 = vpop.f32.mrf.mxu0  ;;  %v10527_v59 = vor.u32 %v11645_v28, %v10526_v46 }
 0x427   : > { %v14660_v1 = vadd.f32 %v5647_v63, %v5319_v31  ;;  %v10283_v63 = vor.u32 %v11578_v30, %v10280_v49  ;;  %v11586_v49 = vld [vmem:[%s18518_s1 + $0x8cc] sm:$0xf] }
 0x429   : > { %18824 = vst [vmem:[#allocation162_spill] sm:$0xff] %v14660_v1  ;;  %5372 = vmatmul.bf16.gmra.mxu3 %v10343_v17 }
 0x42a   : > { %v4991_v50 = vpop.f32.mrf.mxu2 }
 0x42b   : > { %v4992_v14 = vadd.f32 %v4991_v50, %v14335_v0  ;;  %v10312_v50 = vld [vmem:[%s18518_s1 + $0x8e8] sm:$0xf0] }
 0x42c   : > { %v14687_v52 = vpop.f32.mrf.mxu1  ;;  %v14690_v26 = vpop.f32.mrf.mxu3 }
 0x42d   : > { %v5321_v36 = vadd.f32 %v14578_v58, %v4992_v14  ;;  %v10558_v58 = vld [vmem:[%s18518_s1 + $0xac0] sm:$0xf] }
 0x42e   : > { %v5652_v31 = vpop.f32.mrf.mxu0 }
 0x42f   : > { %v14692_v11 = vadd.f32 %v5649_v3, %v5321_v36  ;;  %4744 = vmatmul.bf16.gmra.mxu1 %v10527_v59  ;;  %5033 = vmatmul.bf16.gmra.mxu2 %v10275_v29  ;;  %v10374_v3 = vld [vmem:[%s18518_s1 + $0x948] sm:$0xf] }
 0x431   : > { %18825 = vst [vmem:[#allocation163_spill] sm:$0xff] %v14692_v11  ;;  %5691 = vmatmul.bf16.gmra.mxu0 %v10283_v63 }
 0x432   : > { %v4994_v1 = vpop.f32.mrf.mxu2 }
 0x433   : > { %v4995_v17 = vadd.f32 %v4994_v1, %v14367_v39  ;;  %v11606_v39 = vld [vmem:[%s18518_s1 + $0x964] sm:$0xf0]  ;;  %v11585_v1 = vld [vmem:[%s18518_s1 + $0x8c4] sm:$0xf] }
 0x434   : > { %v14695_v5 = vpop.f32.mrf.mxu1  ;;  %v14698_v28 = vpop.f32.mrf.mxu3  ;;  %v10375_v30 = vor.u32 %v11606_v39, %v10374_v3  ;;  %v10307_v63 = vor.u32 %v11585_v1, %v10304_v35  ;;  %v10336_v35 = vld [vmem:[%s18518_s1 + $0x920] sm:$0xf0] }
 0x435   : > { %v5324_v0 = vadd.f32 %v14610_v62, %v4995_v17  ;;  %v11653_v62 = vld [vmem:[%s18518_s1 + $0xadc] sm:$0xf0] }
 0x436   : > { %v5654_v46 = vpop.f32.mrf.mxu0  ;;  %v10559_v29 = vor.u32 %v11653_v62, %v10558_v58 }
 0x437   : > { %v14700_v22 = vadd.f32 %v5652_v31, %v5324_v0  ;;  %v10315_v31 = vor.u32 %v11586_v49, %v10312_v50  ;;  %v11594_v50 = vld [vmem:[%s18518_s1 + $0x90c] sm:$0xf] }
 0x439   : > { %18826 = vst [vmem:[#allocation164_spill] sm:$0xff] %v14700_v22  ;;  %5377 = vmatmul.bf16.gmra.mxu3 %v10375_v30 }
 0x43a   : > { %v4996_v14 = vpop.f32.mrf.mxu2 }
 0x43b   : > { %v4997_v59 = vadd.f32 %v4996_v14, %v14375_v38  ;;  %v10344_v14 = vld [vmem:[%s18518_s1 + $0x928] sm:$0xf0] }
 0x43c   : > { %v14727_v36 = vpop.f32.mrf.mxu1  ;;  %v14730_v3 = vpop.f32.mrf.mxu3 }
 0x43d   : > { %v5326_v17 = vadd.f32 %v14618_v10, %v4997_v59  ;;  %v10590_v10 = vld [vmem:[%s18518_s1 + $0xb00] sm:$0xf] }
 0x43e   : > { %v5657_v0 = vpop.f32.mrf.mxu0 }
 0x43f   : > { %v14732_v39 = vadd.f32 %v5654_v46, %v5326_v17  ;;  %4749 = vmatmul.bf16.gmra.mxu1 %v10559_v29  ;;  %5038 = vmatmul.bf16.gmra.mxu2 %v10307_v63  ;;  %v10406_v46 = vld [vmem:[%s18518_s1 + $0x988] sm:$0xf] }
 0x441   : > { %18827 = vst [vmem:[#allocation165_spill] sm:$0xff] %v14732_v39  ;;  %5696 = vmatmul.bf16.gmra.mxu0 %v10315_v31 }
 0x442   : > { %v4999_v22 = vpop.f32.mrf.mxu2 }
 0x443   : > { %v5000_v30 = vadd.f32 %v4999_v22, %v14407_v21  ;;  %v11614_v21 = vld [vmem:[%s18518_s1 + $0x9a4] sm:$0xf0]  ;;  %v11593_v22 = vld [vmem:[%s18518_s1 + $0x904] sm:$0xf] }
 0x444   : > { %v14735_v11 = vpop.f32.mrf.mxu1  ;;  %v14738_v62 = vpop.f32.mrf.mxu3  ;;  %v10407_v49 = vor.u32 %v11614_v21, %v10406_v46  ;;  %v10339_v31 = vor.u32 %v11593_v22, %v10336_v35  ;;  %v10368_v35 = vld [vmem:[%s18518_s1 + $0x960] sm:$0xf0] }
 0x445   : > { %v5329_v38 = vadd.f32 %v14650_v27, %v5000_v30  ;;  %v11661_v27 = vld [vmem:[%s18518_s1 + $0xb1c] sm:$0xf0] }
 0x446   : > { %v5659_v58 = vpop.f32.mrf.mxu0  ;;  %v10591_v63 = vor.u32 %v11661_v27, %v10590_v10 }
 0x447   : > { %v14740_v1 = vadd.f32 %v5657_v0, %v5329_v38  ;;  %v10347_v0 = vor.u32 %v11594_v50, %v10344_v14  ;;  %v11602_v14 = vld [vmem:[%s18518_s1 + $0x94c] sm:$0xf] }
 0x449   : > { %18828 = vst [vmem:[#allocation166_spill] sm:$0xff] %v14740_v1  ;;  %5382 = vmatmul.bf16.gmra.mxu3 %v10407_v49 }
 0x44a   : > { %v5001_v59 = vpop.f32.mrf.mxu2 }
 0x44b   : > { %v5002_v29 = vadd.f32 %v5001_v59, %v14415_v41  ;;  %v10376_v59 = vld [vmem:[%s18518_s1 + $0x968] sm:$0xf0] }
 0x44c   : > { %v14767_v17 = vpop.f32.mrf.mxu1  ;;  %v14770_v46 = vpop.f32.mrf.mxu3 }
 0x44d   : > { %v5331_v30 = vadd.f32 %v14658_v44, %v5002_v29  ;;  %v10622_v44 = vld [vmem:[%s18518_s1 + $0xb40] sm:$0xf] }
 0x44e   : > { %v5662_v38 = vpop.f32.mrf.mxu0 }
 0x44f   : > { %v14772_v21 = vadd.f32 %v5659_v58, %v5331_v30  ;;  %4754 = vmatmul.bf16.gmra.mxu1 %v10591_v63  ;;  %5043 = vmatmul.bf16.gmra.mxu2 %v10339_v31  ;;  %v10438_v58 = vld [vmem:[%s18518_s1 + $0x9c8] sm:$0xf] }
 0x451   : > { %18829 = vst [vmem:[#allocation167_spill] sm:$0xff] %v14772_v21  ;;  %5701 = vmatmul.bf16.gmra.mxu0 %v10347_v0 }
 0x452   : > { %v5004_v1 = vpop.f32.mrf.mxu2 }
 0x453   : > { %v5005_v49 = vadd.f32 %v5004_v1, %v14447_v8  ;;  %v11622_v8 = vld [vmem:[%s18518_s1 + $0x9e4] sm:$0xf0]  ;;  %v11601_v1 = vld [vmem:[%s18518_s1 + $0x944] sm:$0xf] }
 0x454   : > { %v14775_v39 = vpop.f32.mrf.mxu1  ;;  %v14778_v27 = vpop.f32.mrf.mxu3  ;;  %v10439_v50 = vor.u32 %v11622_v8, %v10438_v58  ;;  %v10371_v0 = vor.u32 %v11601_v1, %v10368_v35  ;;  %v10400_v35 = vld [vmem:[%s18518_s1 + $0x9a0] sm:$0xf0] }
 0x455   : > { %v5334_v41 = vadd.f32 %v14690_v26, %v5005_v49  ;;  %v11669_v26 = vld [vmem:[%s18518_s1 + $0xb5c] sm:$0xf0] }
 0x456   : > { %v5664_v10 = vpop.f32.mrf.mxu0  ;;  %v10623_v31 = vor.u32 %v11669_v26, %v10622_v44 }
 0x457   : > { %v14780_v22 = vadd.f32 %v5662_v38, %v5334_v41  ;;  %v10379_v38 = vor.u32 %v11602_v14, %v10376_v59  ;;  %v11610_v59 = vld [vmem:[%s18518_s1 + $0x98c] sm:$0xf] }
 0x459   : > { %18830 = vst [vmem:[#allocation168_spill] sm:$0xff] %v14780_v22  ;;  %5387 = vmatmul.bf16.gmra.mxu3 %v10439_v50 }
 0x45a   : > { %v5006_v29 = vpop.f32.mrf.mxu2 }
 0x45b   : > { %v5007_v63 = vadd.f32 %v5006_v29, %v14455_v25  ;;  %v10408_v29 = vld [vmem:[%s18518_s1 + $0x9a8] sm:$0xf0] }
 0x45c   : > { %v14807_v30 = vpop.f32.mrf.mxu1  ;;  %v14810_v58 = vpop.f32.mrf.mxu3 }
 0x45d   : > { %v5336_v49 = vadd.f32 %v14698_v28, %v5007_v63  ;;  %v10654_v28 = vld [vmem:[%s18518_s1 + $0xb80] sm:$0xf] }
 0x45e   : > { %v5667_v41 = vpop.f32.mrf.mxu0 }
 0x45f   : > { %v14812_v8 = vadd.f32 %v5664_v10, %v5336_v49  ;;  %4759 = vmatmul.bf16.gmra.mxu1 %v10623_v31  ;;  %5048 = vmatmul.bf16.gmra.mxu2 %v10371_v0  ;;  %v10470_v10 = vld [vmem:[%s18518_s1 + $0xa08] sm:$0xf] }
 0x461   : > { %18831 = vst [vmem:[#allocation169_spill] sm:$0xff] %v14812_v8  ;;  %5706 = vmatmul.bf16.gmra.mxu0 %v10379_v38 }
 0x462   : > { %v5009_v22 = vpop.f32.mrf.mxu2 }
 0x463   : > { %v5010_v50 = vadd.f32 %v5009_v22, %v14487_v19  ;;  %v11630_v19 = vld [vmem:[%s18518_s1 + $0xa24] sm:$0xf0]  ;;  %v11609_v22 = vld [vmem:[%s18518_s1 + $0x984] sm:$0xf] }
 0x464   : > { %v14815_v21 = vpop.f32.mrf.mxu1  ;;  %v14818_v26 = vpop.f32.mrf.mxu3  ;;  %v10471_v14 = vor.u32 %v11630_v19, %v10470_v10  ;;  %v10403_v38 = vor.u32 %v11609_v22, %v10400_v35  ;;  %v10432_v35 = vld [vmem:[%s18518_s1 + $0x9e0] sm:$0xf0] }
 0x465   : > { %v5339_v25 = vadd.f32 %v14730_v3, %v5010_v50  ;;  %v11677_v3 = vld [vmem:[%s18518_s1 + $0xb9c] sm:$0xf0] }
 0x466   : > { %v5669_v44 = vpop.f32.mrf.mxu0  ;;  %v10655_v0 = vor.u32 %v11677_v3, %v10654_v28 }
 0x467   : > { %v14820_v1 = vadd.f32 %v5667_v41, %v5339_v25  ;;  %v10411_v41 = vor.u32 %v11610_v59, %v10408_v29  ;;  %v11618_v29 = vld [vmem:[%s18518_s1 + $0x9cc] sm:$0xf] }
 0x469   : > { %18832 = vst [vmem:[#allocation170_spill] sm:$0xff] %v14820_v1  ;;  %5392 = vmatmul.bf16.gmra.mxu3 %v10471_v14 }
 0x46a   : > { %v5011_v63 = vpop.f32.mrf.mxu2 }
 0x46b   : > { %v5012_v31 = vadd.f32 %v5011_v63, %v14495_v15  ;;  %v10440_v63 = vld [vmem:[%s18518_s1 + $0x9e8] sm:$0xf0] }
 0x46c   : > { %v14847_v49 = vpop.f32.mrf.mxu1  ;;  %v14850_v10 = vpop.f32.mrf.mxu3 }
 0x46d   : > { %v5341_v50 = vadd.f32 %v14738_v62, %v5012_v31  ;;  %v10686_v62 = vld [vmem:[%s18518_s1 + $0xbc0] sm:$0xf] }
 0x46e   : > { %v5672_v25 = vpop.f32.mrf.mxu0 }
 0x46f   : > { %v14852_v19 = vadd.f32 %v5669_v44, %v5341_v50  ;;  %4764 = vmatmul.bf16.gmra.mxu1 %v10655_v0  ;;  %5053 = vmatmul.bf16.gmra.mxu2 %v10403_v38  ;;  %v10502_v44 = vld [vmem:[%s18518_s1 + $0xa48] sm:$0xf] }
 0x471   : > { %18833 = vst [vmem:[#allocation171_spill] sm:$0xff] %v14852_v19  ;;  %5711 = vmatmul.bf16.gmra.mxu0 %v10411_v41 }
 0x472   : > { %v5014_v1 = vpop.f32.mrf.mxu2 }
 0x473   : > { %v5015_v14 = vadd.f32 %v5014_v1, %v14527_v9  ;;  %v11638_v9 = vld [vmem:[%s18518_s1 + $0xa64] sm:$0xf0]  ;;  %v11617_v1 = vld [vmem:[%s18518_s1 + $0x9c4] sm:$0xf] }
 0x474   : > { %v14855_v8 = vpop.f32.mrf.mxu1  ;;  %v14858_v3 = vpop.f32.mrf.mxu3  ;;  %v10503_v59 = vor.u32 %v11638_v9, %v10502_v44  ;;  %v10435_v41 = vor.u32 %v11617_v1, %v10432_v35  ;;  %v10464_v35 = vld [vmem:[%s18518_s1 + $0xa20] sm:$0xf0] }
 0x475   : > { %v5344_v15 = vadd.f32 %v14770_v46, %v5015_v14  ;;  %v11685_v46 = vld [vmem:[%s18518_s1 + $0xbdc] sm:$0xf0] }
 0x476   : > { %v5674_v28 = vpop.f32.mrf.mxu0  ;;  %v10687_v38 = vor.u32 %v11685_v46, %v10686_v62 }
 0x477   : > { %v14860_v22 = vadd.f32 %v5672_v25, %v5344_v15  ;;  %v10443_v25 = vor.u32 %v11618_v29, %v10440_v63  ;;  %v11626_v63 = vld [vmem:[%s18518_s1 + $0xa0c] sm:$0xf] }
 0x479   : > { %18834 = vst [vmem:[#allocation172_spill] sm:$0xff] %v14860_v22  ;;  %5397 = vmatmul.bf16.gmra.mxu3 %v10503_v59 }
 0x47a   : > { %v5016_v31 = vpop.f32.mrf.mxu2 }
 0x47b   : > { %v5017_v0 = vadd.f32 %v5016_v31, %v14535_v47  ;;  %v10472_v31 = vld [vmem:[%s18518_s1 + $0xa28] sm:$0xf0] }
 0x47c   : > { %v14887_v50 = vpop.f32.mrf.mxu1  ;;  %v14890_v44 = vpop.f32.mrf.mxu3 }
 0x47d   : > { %v5346_v14 = vadd.f32 %v14778_v27, %v5017_v0  ;;  %v10718_v27 = vld [vmem:[%s18518_s1 + $0xc00] sm:$0xf] }
 0x47e   : > { %v5677_v15 = vpop.f32.mrf.mxu0 }
 0x47f   : > { %v14892_v9 = vadd.f32 %v5674_v28, %v5346_v14  ;;  %4769 = vmatmul.bf16.gmra.mxu1 %v10687_v38  ;;  %5058 = vmatmul.bf16.gmra.mxu2 %v10435_v41  ;;  %v10534_v28 = vld [vmem:[%s18518_s1 + $0xa88] sm:$0xf] }
 0x481   : > { %18835 = vst [vmem:[#allocation173_spill] sm:$0xff] %v14892_v9  ;;  %5716 = vmatmul.bf16.gmra.mxu0 %v10443_v25 }
 0x482   : > { %v5019_v22 = vpop.f32.mrf.mxu2 }
 0x483   : > { %v5020_v59 = vadd.f32 %v5019_v22, %v14567_v60  ;;  %v11646_v60 = vld [vmem:[%s18518_s1 + $0xaa4] sm:$0xf0]  ;;  %v11625_v22 = vld [vmem:[%s18518_s1 + $0xa04] sm:$0xf] }
 0x484   : > { %v14895_v19 = vpop.f32.mrf.mxu1  ;;  %v14898_v46 = vpop.f32.mrf.mxu3  ;;  %v10535_v29 = vor.u32 %v11646_v60, %v10534_v28  ;;  %v10467_v25 = vor.u32 %v11625_v22, %v10464_v35  ;;  %v10496_v35 = vld [vmem:[%s18518_s1 + $0xa60] sm:$0xf0] }
 0x485   : > { %v5349_v47 = vadd.f32 %v14810_v58, %v5020_v59  ;;  %v11693_v58 = vld [vmem:[%s18518_s1 + $0xc1c] sm:$0xf0] }
 0x486   : > { %v5679_v62 = vpop.f32.mrf.mxu0  ;;  %v10719_v41 = vor.u32 %v11693_v58, %v10718_v27 }
 0x487   : > { %v14900_v1 = vadd.f32 %v5677_v15, %v5349_v47  ;;  %v10475_v15 = vor.u32 %v11626_v63, %v10472_v31  ;;  %v11634_v31 = vld [vmem:[%s18518_s1 + $0xa4c] sm:$0xf] }
 0x489   : > { %18836 = vst [vmem:[#allocation174_spill] sm:$0xff] %v14900_v1  ;;  %5402 = vmatmul.bf16.gmra.mxu3 %v10535_v29 }
 0x48a   : > { %v5021_v0 = vpop.f32.mrf.mxu2 }
 0x48b   : > { %v5022_v38 = vadd.f32 %v5021_v0, %v14575_v16  ;;  %v10504_v0 = vld [vmem:[%s18518_s1 + $0xa68] sm:$0xf0] }
 0x48c   : > { %v14927_v14 = vpop.f32.mrf.mxu1  ;;  %v14930_v28 = vpop.f32.mrf.mxu3 }
 0x48d   : > { %v5351_v59 = vadd.f32 %v14818_v26, %v5022_v38  ;;  %v10750_v26 = vld [vmem:[%s18518_s1 + $0xc40] sm:$0xf] }
 0x48e   : > { %v5682_v47 = vpop.f32.mrf.mxu0 }
 0x48f   : > { %v14932_v60 = vadd.f32 %v5679_v62, %v5351_v59  ;;  %4774 = vmatmul.bf16.gmra.mxu1 %v10719_v41  ;;  %5063 = vmatmul.bf16.gmra.mxu2 %v10467_v25  ;;  %v10566_v62 = vld [vmem:[%s18518_s1 + $0xac8] sm:$0xf] }
 0x491   : > { %18837 = vst [vmem:[#allocation175_spill] sm:$0xff] %v14932_v60  ;;  %5721 = vmatmul.bf16.gmra.mxu0 %v10475_v15 }
 0x492   : > { %v5024_v1 = vpop.f32.mrf.mxu2 }
 0x493   : > { %v5025_v29 = vadd.f32 %v5024_v1, %v14607_v42  ;;  %v11654_v42 = vld [vmem:[%s18518_s1 + $0xae4] sm:$0xf0]  ;;  %v11633_v1 = vld [vmem:[%s18518_s1 + $0xa44] sm:$0xf] }
 0x494   : > { %v14935_v9 = vpop.f32.mrf.mxu1  ;;  %v14938_v58 = vpop.f32.mrf.mxu3  ;;  %v10567_v63 = vor.u32 %v11654_v42, %v10566_v62  ;;  %v10499_v15 = vor.u32 %v11633_v1, %v10496_v35  ;;  %v10528_v35 = vld [vmem:[%s18518_s1 + $0xaa0] sm:$0xf0] }
 0x495   : > { %v5354_v16 = vadd.f32 %v14850_v10, %v5025_v29  ;;  %v11701_v10 = vld [vmem:[%s18518_s1 + $0xc5c] sm:$0xf0] }
 0x496   : > { %v5684_v27 = vpop.f32.mrf.mxu0  ;;  %v10751_v25 = vor.u32 %v11701_v10, %v10750_v26 }
 0x497   : > { %v14940_v22 = vadd.f32 %v5682_v47, %v5354_v16  ;;  %v10507_v47 = vor.u32 %v11634_v31, %v10504_v0  ;;  %v11642_v0 = vld [vmem:[%s18518_s1 + $0xa8c] sm:$0xf] }
 0x499   : > { %18838 = vst [vmem:[#allocation176_spill] sm:$0xff] %v14940_v22  ;;  %5407 = vmatmul.bf16.gmra.mxu3 %v10567_v63 }
 0x49a   : > { %v5026_v38 = vpop.f32.mrf.mxu2 }
 0x49b   : > { %v5027_v41 = vadd.f32 %v5026_v38, %v14615_v48  ;;  %v10536_v38 = vld [vmem:[%s18518_s1 + $0xaa8] sm:$0xf0] }
 0x49c   : > { %v14967_v59 = vpop.f32.mrf.mxu1  ;;  %v14970_v62 = vpop.f32.mrf.mxu3 }
 0x49d   : > { %v5356_v29 = vadd.f32 %v14858_v3, %v5027_v41  ;;  %v10782_v3 = vld [vmem:[%s18518_s1 + $0xc80] sm:$0xf] }
 0x49e   : > { %v5687_v16 = vpop.f32.mrf.mxu0 }
 0x49f   : > { %v14972_v42 = vadd.f32 %v5684_v27, %v5356_v29  ;;  %4779 = vmatmul.bf16.gmra.mxu1 %v10751_v25  ;;  %5068 = vmatmul.bf16.gmra.mxu2 %v10499_v15  ;;  %v10598_v27 = vld [vmem:[%s18518_s1 + $0xb08] sm:$0xf] }
 0x4a1   : > { %18839 = vst [vmem:[#allocation177_spill] sm:$0xff] %v14972_v42  ;;  %5726 = vmatmul.bf16.gmra.mxu0 %v10507_v47 }
 0x4a2   : > { %v5029_v22 = vpop.f32.mrf.mxu2 }
 0x4a3   : > { %v5030_v63 = vadd.f32 %v5029_v22, %v14647_v32  ;;  %v11662_v32 = vld [vmem:[%s18518_s1 + $0xb24] sm:$0xf0]  ;;  %v11641_v22 = vld [vmem:[%s18518_s1 + $0xa84] sm:$0xf] }
 0x4a4   : > { %v14975_v60 = vpop.f32.mrf.mxu1  ;;  %v14978_v10 = vpop.f32.mrf.mxu3  ;;  %v10599_v31 = vor.u32 %v11662_v32, %v10598_v27  ;;  %v10531_v47 = vor.u32 %v11641_v22, %v10528_v35  ;;  %v10560_v35 = vld [vmem:[%s18518_s1 + $0xae0] sm:$0xf0] }
 0x4a5   : > { %v5359_v48 = vadd.f32 %v14890_v44, %v5030_v63  ;;  %v11709_v44 = vld [vmem:[%s18518_s1 + $0xc9c] sm:$0xf0] }
 0x4a6   : > { %v5689_v26 = vpop.f32.mrf.mxu0  ;;  %v10783_v15 = vor.u32 %v11709_v44, %v10782_v3 }
 0x4a7   : > { %v14980_v1 = vadd.f32 %v5687_v16, %v5359_v48  ;;  %v10539_v16 = vor.u32 %v11642_v0, %v10536_v38  ;;  %v11650_v38 = vld [vmem:[%s18518_s1 + $0xacc] sm:$0xf] }
 0x4a9   : > { %18840 = vst [vmem:[#allocation178_spill] sm:$0xff] %v14980_v1  ;;  %5412 = vmatmul.bf16.gmra.mxu3 %v10599_v31 }
 0x4aa   : > { %v5031_v41 = vpop.f32.mrf.mxu2 }
 0x4ab   : > { %v5032_v25 = vadd.f32 %v5031_v41, %v14655_v33  ;;  %v10568_v41 = vld [vmem:[%s18518_s1 + $0xae8] sm:$0xf0] }
 0x4ac   : > { %v15007_v29 = vpop.f32.mrf.mxu1  ;;  %v15010_v27 = vpop.f32.mrf.mxu3 }
 0x4ad   : > { %v5361_v63 = vadd.f32 %v14898_v46, %v5032_v25  ;;  %v10814_v46 = vld [vmem:[%s18518_s1 + $0xcc0] sm:$0xf] }
 0x4ae   : > { %v5692_v48 = vpop.f32.mrf.mxu0 }
 0x4af   : > { %v15012_v32 = vadd.f32 %v5689_v26, %v5361_v63  ;;  %4784 = vmatmul.bf16.gmra.mxu1 %v10783_v15  ;;  %5073 = vmatmul.bf16.gmra.mxu2 %v10531_v47  ;;  %v10630_v26 = vld [vmem:[%s18518_s1 + $0xb48] sm:$0xf] }
 0x4b1   : > { %18841 = vst [vmem:[#allocation179_spill] sm:$0xff] %v15012_v32  ;;  %5731 = vmatmul.bf16.gmra.mxu0 %v10539_v16 }
 0x4b2   : > { %v5034_v1 = vpop.f32.mrf.mxu2 }
 0x4b3   : > { %v5035_v31 = vadd.f32 %v5034_v1, %v14687_v52  ;;  %v11670_v52 = vld [vmem:[%s18518_s1 + $0xb64] sm:$0xf0]  ;;  %v11649_v1 = vld [vmem:[%s18518_s1 + $0xac4] sm:$0xf] }
 0x4b4   : > { %v15015_v42 = vpop.f32.mrf.mxu1  ;;  %v15018_v44 = vpop.f32.mrf.mxu3  ;;  %v10631_v0 = vor.u32 %v11670_v52, %v10630_v26  ;;  %v10563_v16 = vor.u32 %v11649_v1, %v10560_v35  ;;  %v10592_v35 = vld [vmem:[%s18518_s1 + $0xb20] sm:$0xf0] }
 0x4b5   : > { %v5364_v33 = vadd.f32 %v14930_v28, %v5035_v31  ;;  %v11717_v28 = vld [vmem:[%s18518_s1 + $0xcdc] sm:$0xf0] }
 0x4b6   : > { %v5694_v3 = vpop.f32.mrf.mxu0  ;;  %v10815_v47 = vor.u32 %v11717_v28, %v10814_v46 }
 0x4b7   : > { %v15020_v22 = vadd.f32 %v5692_v48, %v5364_v33  ;;  %v10571_v48 = vor.u32 %v11650_v38, %v10568_v41  ;;  %v11658_v41 = vld [vmem:[%s18518_s1 + $0xb0c] sm:$0xf] }
 0x4b9   : > { %18842 = vst [vmem:[#allocation180_spill] sm:$0xff] %v15020_v22  ;;  %5417 = vmatmul.bf16.gmra.mxu3 %v10631_v0 }
 0x4ba   : > { %v5036_v25 = vpop.f32.mrf.mxu2 }
 0x4bb   : > { %v5037_v15 = vadd.f32 %v5036_v25, %v14695_v5  ;;  %v10600_v25 = vld [vmem:[%s18518_s1 + $0xb28] sm:$0xf0] }
 0x4bc   : > { %v15047_v63 = vpop.f32.mrf.mxu1  ;;  %v15050_v26 = vpop.f32.mrf.mxu3 }
 0x4bd   : > { %v5366_v31 = vadd.f32 %v14938_v58, %v5037_v15  ;;  %v10846_v58 = vld [vmem:[%s18518_s1 + $0xd00] sm:$0xf] }
 0x4be   : > { %v5697_v33 = vpop.f32.mrf.mxu0 }
 0x4bf   : > { %v15052_v52 = vadd.f32 %v5694_v3, %v5366_v31  ;;  %4789 = vmatmul.bf16.gmra.mxu1 %v10815_v47  ;;  %5078 = vmatmul.bf16.gmra.mxu2 %v10563_v16  ;;  %v10662_v3 = vld [vmem:[%s18518_s1 + $0xb88] sm:$0xf] }
 0x4c1   : > { %18843 = vst [vmem:[#allocation181_spill] sm:$0xff] %v15052_v52  ;;  %5736 = vmatmul.bf16.gmra.mxu0 %v10571_v48 }
 0x4c2   : > { %v5039_v22 = vpop.f32.mrf.mxu2 }
 0x4c3   : > { %v5040_v0 = vadd.f32 %v5039_v22, %v14727_v36  ;;  %v11678_v36 = vld [vmem:[%s18518_s1 + $0xba4] sm:$0xf0]  ;;  %v11657_v22 = vld [vmem:[%s18518_s1 + $0xb04] sm:$0xf] }
 0x4c4   : > { %v15055_v32 = vpop.f32.mrf.mxu1  ;;  %v15058_v28 = vpop.f32.mrf.mxu3  ;;  %v10663_v38 = vor.u32 %v11678_v36, %v10662_v3  ;;  %v10595_v48 = vor.u32 %v11657_v22, %v10592_v35  ;;  %v10624_v35 = vld [vmem:[%s18518_s1 + $0xb60] sm:$0xf0] }
 0x4c5   : > { %v5369_v5 = vadd.f32 %v14970_v62, %v5040_v0  ;;  %v11725_v62 = vld [vmem:[%s18518_s1 + $0xd1c] sm:$0xf0] }
 0x4c6   : > { %v5699_v46 = vpop.f32.mrf.mxu0  ;;  %v10847_v16 = vor.u32 %v11725_v62, %v10846_v58 }
 0x4c7   : > { %v15060_v1 = vadd.f32 %v5697_v33, %v5369_v5  ;;  %v10603_v33 = vor.u32 %v11658_v41, %v10600_v25  ;;  %v11666_v25 = vld [vmem:[%s18518_s1 + $0xb4c] sm:$0xf] }
 0x4c9   : > { %18844 = vst [vmem:[#allocation182_spill] sm:$0xff] %v15060_v1  ;;  %5422 = vmatmul.bf16.gmra.mxu3 %v10663_v38 }
 0x4ca   : > { %v5041_v15 = vpop.f32.mrf.mxu2 }
 0x4cb   : > { %v5042_v47 = vadd.f32 %v5041_v15, %v14735_v11  ;;  %v10632_v15 = vld [vmem:[%s18518_s1 + $0xb68] sm:$0xf0] }
 0x4cc   : > { %v15087_v31 = vpop.f32.mrf.mxu1  ;;  %v15090_v3 = vpop.f32.mrf.mxu3 }
 0x4cd   : > { %v5371_v0 = vadd.f32 %v14978_v10, %v5042_v47  ;;  %v10878_v10 = vld [vmem:[%s18518_s1 + $0xd40] sm:$0xf] }
 0x4ce   : > { %v5702_v5 = vpop.f32.mrf.mxu0 }
 0x4cf   : > { %v15092_v36 = vadd.f32 %v5699_v46, %v5371_v0  ;;  %4794 = vmatmul.bf16.gmra.mxu1 %v10847_v16  ;;  %5083 = vmatmul.bf16.gmra.mxu2 %v10595_v48  ;;  %v10694_v46 = vld [vmem:[%s18518_s1 + $0xbc8] sm:$0xf] }
 0x4d1   : > { %18845 = vst [vmem:[#allocation183_spill] sm:$0xff] %v15092_v36  ;;  %5741 = vmatmul.bf16.gmra.mxu0 %v10603_v33 }
 0x4d2   : > { %v5044_v1 = vpop.f32.mrf.mxu2 }
 0x4d3   : > { %v5045_v38 = vadd.f32 %v5044_v1, %v14767_v17  ;;  %v11686_v17 = vld [vmem:[%s18518_s1 + $0xbe4] sm:$0xf0]  ;;  %v11665_v1 = vld [vmem:[%s18518_s1 + $0xb44] sm:$0xf] }
 0x4d4   : > { %v15095_v52 = vpop.f32.mrf.mxu1  ;;  %v15098_v62 = vpop.f32.mrf.mxu3  ;;  %v10695_v41 = vor.u32 %v11686_v17, %v10694_v46  ;;  %v10627_v33 = vor.u32 %v11665_v1, %v10624_v35  ;;  %v10656_v35 = vld [vmem:[%s18518_s1 + $0xba0] sm:$0xf0] }
 0x4d5   : > { %v5374_v11 = vadd.f32 %v15010_v27, %v5045_v38  ;;  %v11733_v27 = vld [vmem:[%s18518_s1 + $0xd5c] sm:$0xf0] }
 0x4d6   : > { %v5704_v58 = vpop.f32.mrf.mxu0  ;;  %v10879_v48 = vor.u32 %v11733_v27, %v10878_v10 }
 0x4d7   : > { %v15100_v22 = vadd.f32 %v5702_v5, %v5374_v11  ;;  %v10635_v5 = vor.u32 %v11666_v25, %v10632_v15  ;;  %v11674_v15 = vld [vmem:[%s18518_s1 + $0xb8c] sm:$0xf] }
 0x4d9   : > { %18846 = vst [vmem:[#allocation184_spill] sm:$0xff] %v15100_v22  ;;  %5427 = vmatmul.bf16.gmra.mxu3 %v10695_v41 }
 0x4da   : > { %v5046_v47 = vpop.f32.mrf.mxu2 }
 0x4db   : > { %v5047_v16 = vadd.f32 %v5046_v47, %v14775_v39  ;;  %v10664_v47 = vld [vmem:[%s18518_s1 + $0xba8] sm:$0xf0] }
 0x4dc   : > { %v15127_v0 = vpop.f32.mrf.mxu1  ;;  %v15130_v46 = vpop.f32.mrf.mxu3 }
 0x4dd   : > { %v5376_v38 = vadd.f32 %v15018_v44, %v5047_v16  ;;  %v10910_v44 = vld [vmem:[%s18518_s1 + $0xd80] sm:$0xf] }
 0x4de   : > { %v5707_v11 = vpop.f32.mrf.mxu0 }
 0x4df   : > { %v15132_v17 = vadd.f32 %v5704_v58, %v5376_v38  ;;  %4799 = vmatmul.bf16.gmra.mxu1 %v10879_v48  ;;  %5088 = vmatmul.bf16.gmra.mxu2 %v10627_v33  ;;  %v10726_v58 = vld [vmem:[%s18518_s1 + $0xc08] sm:$0xf] }
 0x4e1   : > { %18847 = vst [vmem:[#allocation185_spill] sm:$0xff] %v15132_v17  ;;  %5746 = vmatmul.bf16.gmra.mxu0 %v10635_v5 }
 0x4e2   : > { %v5049_v22 = vpop.f32.mrf.mxu2 }
 0x4e3   : > { %v5050_v41 = vadd.f32 %v5049_v22, %v14807_v30  ;;  %v11694_v30 = vld [vmem:[%s18518_s1 + $0xc24] sm:$0xf0]  ;;  %v11673_v22 = vld [vmem:[%s18518_s1 + $0xb84] sm:$0xf] }
 0x4e4   : > { %v15135_v36 = vpop.f32.mrf.mxu1  ;;  %v15138_v27 = vpop.f32.mrf.mxu3  ;;  %v10727_v25 = vor.u32 %v11694_v30, %v10726_v58  ;;  %v10659_v5 = vor.u32 %v11673_v22, %v10656_v35  ;;  %v10688_v35 = vld [vmem:[%s18518_s1 + $0xbe0] sm:$0xf0] }
 0x4e5   : > { %v5379_v39 = vadd.f32 %v15050_v26, %v5050_v41  ;;  %v11741_v26 = vld [vmem:[%s18518_s1 + $0xd9c] sm:$0xf0] }
 0x4e6   : > { %v5709_v10 = vpop.f32.mrf.mxu0  ;;  %v10911_v33 = vor.u32 %v11741_v26, %v10910_v44 }
 0x4e7   : > { %v15140_v1 = vadd.f32 %v5707_v11, %v5379_v39  ;;  %v10667_v11 = vor.u32 %v11674_v15, %v10664_v47  ;;  %v11682_v47 = vld [vmem:[%s18518_s1 + $0xbcc] sm:$0xf] }
 0x4e9   : > { %18848 = vst [vmem:[#allocation186_spill] sm:$0xff] %v15140_v1  ;;  %5432 = vmatmul.bf16.gmra.mxu3 %v10727_v25 }
 0x4ea   : > { %v5051_v16 = vpop.f32.mrf.mxu2 }
 0x4eb   : > { %v5052_v48 = vadd.f32 %v5051_v16, %v14815_v21  ;;  %v10696_v16 = vld [vmem:[%s18518_s1 + $0xbe8] sm:$0xf0] }
 0x4ec   : > { %v15167_v38 = vpop.f32.mrf.mxu1  ;;  %v15170_v58 = vpop.f32.mrf.mxu3 }
 0x4ed   : > { %v5381_v41 = vadd.f32 %v15058_v28, %v5052_v48  ;;  %v10942_v28 = vld [vmem:[%s18518_s1 + $0xdc0] sm:$0xf] }
 0x4ee   : > { %v5712_v39 = vpop.f32.mrf.mxu0 }
 0x4ef   : > { %v15172_v30 = vadd.f32 %v5709_v10, %v5381_v41  ;;  %4804 = vmatmul.bf16.gmra.mxu1 %v10911_v33  ;;  %5093 = vmatmul.bf16.gmra.mxu2 %v10659_v5  ;;  %v10758_v10 = vld [vmem:[%s18518_s1 + $0xc48] sm:$0xf] }
 0x4f1   : > { %18849 = vst [vmem:[#allocation187_spill] sm:$0xff] %v15172_v30  ;;  %5751 = vmatmul.bf16.gmra.mxu0 %v10667_v11 }
 0x4f2   : > { %v5054_v1 = vpop.f32.mrf.mxu2 }
 0x4f3   : > { %v5055_v25 = vadd.f32 %v5054_v1, %v14847_v49  ;;  %v11702_v49 = vld [vmem:[%s18518_s1 + $0xc64] sm:$0xf0]  ;;  %v11681_v1 = vld [vmem:[%s18518_s1 + $0xbc4] sm:$0xf] }
 0x4f4   : > { %v15175_v17 = vpop.f32.mrf.mxu1  ;;  %v15178_v26 = vpop.f32.mrf.mxu3  ;;  %v10759_v15 = vor.u32 %v11702_v49, %v10758_v10  ;;  %v10691_v11 = vor.u32 %v11681_v1, %v10688_v35  ;;  %v10720_v35 = vld [vmem:[%s18518_s1 + $0xc20] sm:$0xf0] }
 0x4f5   : > { %v5384_v21 = vadd.f32 %v15090_v3, %v5055_v25  ;;  %v11749_v3 = vld [vmem:[%s18518_s1 + $0xddc] sm:$0xf0] }
 0x4f6   : > { %v5714_v44 = vpop.f32.mrf.mxu0  ;;  %v10943_v5 = vor.u32 %v11749_v3, %v10942_v28 }
 0x4f7   : > { %v15180_v22 = vadd.f32 %v5712_v39, %v5384_v21  ;;  %v10699_v39 = vor.u32 %v11682_v47, %v10696_v16  ;;  %v11690_v16 = vld [vmem:[%s18518_s1 + $0xc0c] sm:$0xf] }
 0x4f9   : > { %18850 = vst [vmem:[#allocation188_spill] sm:$0xff] %v15180_v22  ;;  %5437 = vmatmul.bf16.gmra.mxu3 %v10759_v15 }
 0x4fa   : > { %v5056_v48 = vpop.f32.mrf.mxu2 }
 0x4fb   : > { %v5057_v33 = vadd.f32 %v5056_v48, %v14855_v8  ;;  %v10728_v48 = vld [vmem:[%s18518_s1 + $0xc28] sm:$0xf0] }
 0x4fc   : > { %v15207_v41 = vpop.f32.mrf.mxu1  ;;  %v15210_v10 = vpop.f32.mrf.mxu3 }
 0x4fd   : > { %v5386_v25 = vadd.f32 %v15098_v62, %v5057_v33  ;;  %v10974_v62 = vld [vmem:[%s18518_s1 + $0xe00] sm:$0xf] }
 0x4fe   : > { %v5717_v21 = vpop.f32.mrf.mxu0 }
 0x4ff   : > { %v15212_v49 = vadd.f32 %v5714_v44, %v5386_v25  ;;  %4809 = vmatmul.bf16.gmra.mxu1 %v10943_v5  ;;  %5098 = vmatmul.bf16.gmra.mxu2 %v10691_v11  ;;  %v10790_v44 = vld [vmem:[%s18518_s1 + $0xc88] sm:$0xf] }
 0x501   : > { %18851 = vst [vmem:[#allocation189_spill] sm:$0xff] %v15212_v49  ;;  %5756 = vmatmul.bf16.gmra.mxu0 %v10699_v39 }
 0x502   : > { %v5059_v22 = vpop.f32.mrf.mxu2 }
 0x503   : > { %v5060_v15 = vadd.f32 %v5059_v22, %v14887_v50  ;;  %v11710_v50 = vld [vmem:[%s18518_s1 + $0xca4] sm:$0xf0]  ;;  %v11689_v22 = vld [vmem:[%s18518_s1 + $0xc04] sm:$0xf] }
 0x504   : > { %v15215_v30 = vpop.f32.mrf.mxu1  ;;  %v15218_v3 = vpop.f32.mrf.mxu3  ;;  %v10791_v47 = vor.u32 %v11710_v50, %v10790_v44  ;;  %v10723_v39 = vor.u32 %v11689_v22, %v10720_v35  ;;  %v10752_v35 = vld [vmem:[%s18518_s1 + $0xc60] sm:$0xf0] }
 0x505   : > { %v5389_v8 = vadd.f32 %v15130_v46, %v5060_v15  ;;  %v11757_v46 = vld [vmem:[%s18518_s1 + $0xe1c] sm:$0xf0] }
 0x506   : > { %v5719_v28 = vpop.f32.mrf.mxu0  ;;  %v10975_v11 = vor.u32 %v11757_v46, %v10974_v62 }
 0x507   : > { %v15220_v1 = vadd.f32 %v5717_v21, %v5389_v8  ;;  %v10731_v21 = vor.u32 %v11690_v16, %v10728_v48  ;;  %v11698_v48 = vld [vmem:[%s18518_s1 + $0xc4c] sm:$0xf] }
 0x509   : > { %18852 = vst [vmem:[#allocation190_spill] sm:$0xff] %v15220_v1  ;;  %5442 = vmatmul.bf16.gmra.mxu3 %v10791_v47 }
 0x50a   : > { %v5061_v33 = vpop.f32.mrf.mxu2 }
 0x50b   : > { %v5062_v5 = vadd.f32 %v5061_v33, %v14895_v19  ;;  %v10760_v33 = vld [vmem:[%s18518_s1 + $0xc68] sm:$0xf0] }
 0x50c   : > { %v15247_v25 = vpop.f32.mrf.mxu1  ;;  %v15250_v44 = vpop.f32.mrf.mxu3 }
 0x50d   : > { %v5391_v15 = vadd.f32 %v15138_v27, %v5062_v5  ;;  %v11006_v27 = vld [vmem:[%s18518_s1 + $0xe40] sm:$0xf] }
 0x50e   : > { %v5722_v8 = vpop.f32.mrf.mxu0 }
 0x50f   : > { %v15252_v50 = vadd.f32 %v5719_v28, %v5391_v15  ;;  %4814 = vmatmul.bf16.gmra.mxu1 %v10975_v11  ;;  %5103 = vmatmul.bf16.gmra.mxu2 %v10723_v39  ;;  %v10822_v28 = vld [vmem:[%s18518_s1 + $0xcc8] sm:$0xf] }
 0x511   : > { %18853 = vst [vmem:[#allocation191_spill] sm:$0xff] %v15252_v50  ;;  %5761 = vmatmul.bf16.gmra.mxu0 %v10731_v21 }
 0x512   : > { %v5064_v1 = vpop.f32.mrf.mxu2 }
 0x513   : > { %v5065_v47 = vadd.f32 %v5064_v1, %v14927_v14  ;;  %v11718_v14 = vld [vmem:[%s18518_s1 + $0xce4] sm:$0xf0]  ;;  %v11697_v1 = vld [vmem:[%s18518_s1 + $0xc44] sm:$0xf] }
 0x514   : > { %v15255_v49 = vpop.f32.mrf.mxu1  ;;  %v15258_v46 = vpop.f32.mrf.mxu3  ;;  %v10823_v16 = vor.u32 %v11718_v14, %v10822_v28  ;;  %v10755_v21 = vor.u32 %v11697_v1, %v10752_v35  ;;  %v10784_v35 = vld [vmem:[%s18518_s1 + $0xca0] sm:$0xf0] }
 0x515   : > { %v5394_v19 = vadd.f32 %v15170_v58, %v5065_v47  ;;  %v11765_v58 = vld [vmem:[%s18518_s1 + $0xe5c] sm:$0xf0] }
 0x516   : > { %v5724_v62 = vpop.f32.mrf.mxu0  ;;  %v11007_v39 = vor.u32 %v11765_v58, %v11006_v27 }
 0x517   : > { %v15260_v22 = vadd.f32 %v5722_v8, %v5394_v19  ;;  %v10763_v8 = vor.u32 %v11698_v48, %v10760_v33  ;;  %v11706_v33 = vld [vmem:[%s18518_s1 + $0xc8c] sm:$0xf] }
 0x519   : > { %18854 = vst [vmem:[#allocation192_spill] sm:$0xff] %v15260_v22  ;;  %5447 = vmatmul.bf16.gmra.mxu3 %v10823_v16 }
 0x51a   : > { %v5066_v5 = vpop.f32.mrf.mxu2 }
 0x51b   : > { %v5067_v11 = vadd.f32 %v5066_v5, %v14935_v9  ;;  %v10792_v5 = vld [vmem:[%s18518_s1 + $0xca8] sm:$0xf0] }
 0x51c   : > { %v15287_v15 = vpop.f32.mrf.mxu1  ;;  %v15290_v28 = vpop.f32.mrf.mxu3 }
 0x51d   : > { %v5396_v47 = vadd.f32 %v15178_v26, %v5067_v11  ;;  %v11038_v26 = vld [vmem:[%s18518_s1 + $0xe80] sm:$0xf] }
 0x51e   : > { %v5727_v19 = vpop.f32.mrf.mxu0 }
 0x51f   : > { %v15292_v14 = vadd.f32 %v5724_v62, %v5396_v47  ;;  %4819 = vmatmul.bf16.gmra.mxu1 %v11007_v39  ;;  %5108 = vmatmul.bf16.gmra.mxu2 %v10755_v21  ;;  %v10854_v62 = vld [vmem:[%s18518_s1 + $0xd08] sm:$0xf] }
 0x521   : > { %18855 = vst [vmem:[#allocation193_spill] sm:$0xff] %v15292_v14  ;;  %5766 = vmatmul.bf16.gmra.mxu0 %v10763_v8 }
 0x522   : > { %v5069_v22 = vpop.f32.mrf.mxu2 }
 0x523   : > { %v5070_v16 = vadd.f32 %v5069_v22, %v14967_v59  ;;  %v11726_v59 = vld [vmem:[%s18518_s1 + $0xd24] sm:$0xf0]  ;;  %v11705_v22 = vld [vmem:[%s18518_s1 + $0xc84] sm:$0xf] }
 0x524   : > { %v15295_v50 = vpop.f32.mrf.mxu1  ;;  %v15298_v58 = vpop.f32.mrf.mxu3  ;;  %v10855_v48 = vor.u32 %v11726_v59, %v10854_v62  ;;  %v10787_v8 = vor.u32 %v11705_v22, %v10784_v35  ;;  %v10816_v35 = vld [vmem:[%s18518_s1 + $0xce0] sm:$0xf0] }
 0x525   : > { %v5399_v9 = vadd.f32 %v15210_v10, %v5070_v16  ;;  %v11773_v10 = vld [vmem:[%s18518_s1 + $0xe9c] sm:$0xf0] }
 0x526   : > { %v5729_v27 = vpop.f32.mrf.mxu0  ;;  %v11039_v21 = vor.u32 %v11773_v10, %v11038_v26 }
 0x527   : > { %v15300_v1 = vadd.f32 %v5727_v19, %v5399_v9  ;;  %v10795_v19 = vor.u32 %v11706_v33, %v10792_v5  ;;  %v11714_v5 = vld [vmem:[%s18518_s1 + $0xccc] sm:$0xf] }
 0x529   : > { %18856 = vst [vmem:[#allocation194_spill] sm:$0xff] %v15300_v1  ;;  %5452 = vmatmul.bf16.gmra.mxu3 %v10855_v48 }
 0x52a   : > { %v5071_v11 = vpop.f32.mrf.mxu2 }
 0x52b   : > { %v5072_v39 = vadd.f32 %v5071_v11, %v14975_v60  ;;  %v10824_v11 = vld [vmem:[%s18518_s1 + $0xce8] sm:$0xf0] }
 0x52c   : > { %v15327_v47 = vpop.f32.mrf.mxu1  ;;  %v15330_v62 = vpop.f32.mrf.mxu3 }
 0x52d   : > { %v5401_v16 = vadd.f32 %v15218_v3, %v5072_v39  ;;  %v11070_v3 = vld [vmem:[%s18518_s1 + $0xec0] sm:$0xf] }
 0x52e   : > { %v5732_v9 = vpop.f32.mrf.mxu0 }
 0x52f   : > { %v15332_v59 = vadd.f32 %v5729_v27, %v5401_v16  ;;  %4824 = vmatmul.bf16.gmra.mxu1 %v11039_v21  ;;  %5113 = vmatmul.bf16.gmra.mxu2 %v10787_v8  ;;  %v10886_v27 = vld [vmem:[%s18518_s1 + $0xd48] sm:$0xf] }
 0x531   : > { %18857 = vst [vmem:[#allocation195_spill] sm:$0xff] %v15332_v59  ;;  %5771 = vmatmul.bf16.gmra.mxu0 %v10795_v19 }
 0x532   : > { %v5074_v1 = vpop.f32.mrf.mxu2 }
 0x533   : > { %v5075_v48 = vadd.f32 %v5074_v1, %v15007_v29  ;;  %v11734_v29 = vld [vmem:[%s18518_s1 + $0xd64] sm:$0xf0]  ;;  %v11713_v1 = vld [vmem:[%s18518_s1 + $0xcc4] sm:$0xf] }
 0x534   : > { %v15335_v14 = vpop.f32.mrf.mxu1  ;;  %v15338_v10 = vpop.f32.mrf.mxu3  ;;  %v10887_v33 = vor.u32 %v11734_v29, %v10886_v27  ;;  %v10819_v19 = vor.u32 %v11713_v1, %v10816_v35  ;;  %v10848_v35 = vld [vmem:[%s18518_s1 + $0xd20] sm:$0xf0] }
 0x535   : > { %v5404_v60 = vadd.f32 %v15250_v44, %v5075_v48  ;;  %v11781_v44 = vld [vmem:[%s18518_s1 + $0xedc] sm:$0xf0] }
 0x536   : > { %v5734_v26 = vpop.f32.mrf.mxu0  ;;  %v11071_v8 = vor.u32 %v11781_v44, %v11070_v3 }
 0x537   : > { %v15340_v22 = vadd.f32 %v5732_v9, %v5404_v60  ;;  %v10827_v9 = vor.u32 %v11714_v5, %v10824_v11  ;;  %v11722_v11 = vld [vmem:[%s18518_s1 + $0xd0c] sm:$0xf] }
 0x539   : > { %18858 = vst [vmem:[#allocation196_spill] sm:$0xff] %v15340_v22  ;;  %5457 = vmatmul.bf16.gmra.mxu3 %v10887_v33 }
 0x53a   : > { %v5076_v39 = vpop.f32.mrf.mxu2 }
 0x53b   : > { %v5077_v21 = vadd.f32 %v5076_v39, %v15015_v42  ;;  %v10856_v39 = vld [vmem:[%s18518_s1 + $0xd28] sm:$0xf0] }
 0x53c   : > { %v15367_v16 = vpop.f32.mrf.mxu1  ;;  %v15370_v27 = vpop.f32.mrf.mxu3 }
 0x53d   : > { %v5406_v48 = vadd.f32 %v15258_v46, %v5077_v21  ;;  %v11102_v46 = vld [vmem:[%s18518_s1 + $0xf00] sm:$0xf] }
 0x53e   : > { %v5737_v60 = vpop.f32.mrf.mxu0 }
 0x53f   : > { %v15372_v29 = vadd.f32 %v5734_v26, %v5406_v48  ;;  %4829 = vmatmul.bf16.gmra.mxu1 %v11071_v8  ;;  %5118 = vmatmul.bf16.gmra.mxu2 %v10819_v19  ;;  %v10918_v26 = vld [vmem:[%s18518_s1 + $0xd88] sm:$0xf] }
 0x541   : > { %18859 = vst [vmem:[#allocation197_spill] sm:$0xff] %v15372_v29  ;;  %5776 = vmatmul.bf16.gmra.mxu0 %v10827_v9 }
 0x542   : > { %v5079_v22 = vpop.f32.mrf.mxu2 }
 0x543   : > { %v5080_v33 = vadd.f32 %v5079_v22, %v15047_v63  ;;  %v11742_v63 = vld [vmem:[%s18518_s1 + $0xda4] sm:$0xf0]  ;;  %v11721_v22 = vld [vmem:[%s18518_s1 + $0xd04] sm:$0xf] }
 0x544   : > { %v15375_v59 = vpop.f32.mrf.mxu1  ;;  %v15378_v44 = vpop.f32.mrf.mxu3  ;;  %v10919_v5 = vor.u32 %v11742_v63, %v10918_v26  ;;  %v10851_v9 = vor.u32 %v11721_v22, %v10848_v35  ;;  %v10880_v35 = vld [vmem:[%s18518_s1 + $0xd60] sm:$0xf0] }
 0x545   : > { %v5409_v42 = vadd.f32 %v15290_v28, %v5080_v33  ;;  %v11789_v28 = vld [vmem:[%s18518_s1 + $0xf1c] sm:$0xf0] }
 0x546   : > { %v5739_v3 = vpop.f32.mrf.mxu0  ;;  %v11103_v19 = vor.u32 %v11789_v28, %v11102_v46 }
 0x547   : > { %v15380_v1 = vadd.f32 %v5737_v60, %v5409_v42  ;;  %v10859_v60 = vor.u32 %v11722_v11, %v10856_v39  ;;  %v11730_v39 = vld [vmem:[%s18518_s1 + $0xd4c] sm:$0xf] }
 0x549   : > { %18860 = vst [vmem:[#allocation198_spill] sm:$0xff] %v15380_v1  ;;  %5462 = vmatmul.bf16.gmra.mxu3 %v10919_v5 }
 0x54a   : > { %v5081_v21 = vpop.f32.mrf.mxu2 }
 0x54b   : > { %v5082_v8 = vadd.f32 %v5081_v21, %v15055_v32  ;;  %v10888_v21 = vld [vmem:[%s18518_s1 + $0xd68] sm:$0xf0] }
 0x54c   : > { %v15407_v48 = vpop.f32.mrf.mxu1  ;;  %v15410_v26 = vpop.f32.mrf.mxu3 }
 0x54d   : > { %v5411_v33 = vadd.f32 %v15298_v58, %v5082_v8  ;;  %v11134_v58 = vld [vmem:[%s18518_s1 + $0xf40] sm:$0xf] }
 0x54e   : > { %v5742_v42 = vpop.f32.mrf.mxu0 }
 0x54f   : > { %v15412_v63 = vadd.f32 %v5739_v3, %v5411_v33  ;;  %4834 = vmatmul.bf16.gmra.mxu1 %v11103_v19  ;;  %5123 = vmatmul.bf16.gmra.mxu2 %v10851_v9  ;;  %v10950_v3 = vld [vmem:[%s18518_s1 + $0xdc8] sm:$0xf] }
 0x551   : > { %18861 = vst [vmem:[#allocation199_spill] sm:$0xff] %v15412_v63  ;;  %5781 = vmatmul.bf16.gmra.mxu0 %v10859_v60 }
 0x552   : > { %v5084_v1 = vpop.f32.mrf.mxu2 }
 0x553   : > { %v5085_v5 = vadd.f32 %v5084_v1, %v15087_v31  ;;  %v11750_v31 = vld [vmem:[%s18518_s1 + $0xde4] sm:$0xf0]  ;;  %v11729_v1 = vld [vmem:[%s18518_s1 + $0xd44] sm:$0xf] }
 0x554   : > { %v15415_v29 = vpop.f32.mrf.mxu1  ;;  %v15418_v28 = vpop.f32.mrf.mxu3  ;;  %v10951_v11 = vor.u32 %v11750_v31, %v10950_v3  ;;  %v10883_v60 = vor.u32 %v11729_v1, %v10880_v35  ;;  %v10912_v35 = vld [vmem:[%s18518_s1 + $0xda0] sm:$0xf0] }
 0x555   : > { %v5414_v32 = vadd.f32 %v15330_v62, %v5085_v5  ;;  %v11797_v62 = vld [vmem:[%s18518_s1 + $0xf5c] sm:$0xf0] }
 0x556   : > { %v5744_v46 = vpop.f32.mrf.mxu0  ;;  %v11135_v9 = vor.u32 %v11797_v62, %v11134_v58 }
 0x557   : > { %v15420_v22 = vadd.f32 %v5742_v42, %v5414_v32  ;;  %v10891_v42 = vor.u32 %v11730_v39, %v10888_v21  ;;  %v11738_v21 = vld [vmem:[%s18518_s1 + $0xd8c] sm:$0xf] }
 0x559   : > { %18862 = vst [vmem:[#allocation200_spill] sm:$0xff] %v15420_v22  ;;  %5467 = vmatmul.bf16.gmra.mxu3 %v10951_v11 }
 0x55a   : > { %v5086_v8 = vpop.f32.mrf.mxu2 }
 0x55b   : > { %v5087_v19 = vadd.f32 %v5086_v8, %v15095_v52  ;;  %v10920_v8 = vld [vmem:[%s18518_s1 + $0xda8] sm:$0xf0] }
 0x55c   : > { %v15447_v33 = vpop.f32.mrf.mxu1  ;;  %v15450_v3 = vpop.f32.mrf.mxu3 }
 0x55d   : > { %v5416_v5 = vadd.f32 %v15338_v10, %v5087_v19  ;;  %v11166_v10 = vld [vmem:[%s18518_s1 + $0xf80] sm:$0xf] }
 0x55e   : > { %v5747_v32 = vpop.f32.mrf.mxu0 }
 0x55f   : > { %v15452_v31 = vadd.f32 %v5744_v46, %v5416_v5  ;;  %4839 = vmatmul.bf16.gmra.mxu1 %v11135_v9  ;;  %5128 = vmatmul.bf16.gmra.mxu2 %v10883_v60  ;;  %v10982_v46 = vld [vmem:[%s18518_s1 + $0xe08] sm:$0xf] }
 0x561   : > { %18863 = vst [vmem:[#allocation201_spill] sm:$0xff] %v15452_v31  ;;  %5786 = vmatmul.bf16.gmra.mxu0 %v10891_v42 }
 0x562   : > { %v5089_v22 = vpop.f32.mrf.mxu2 }
 0x563   : > { %v5090_v11 = vadd.f32 %v5089_v22, %v15127_v0  ;;  %v11758_v0 = vld [vmem:[%s18518_s1 + $0xe24] sm:$0xf0]  ;;  %v11737_v22 = vld [vmem:[%s18518_s1 + $0xd84] sm:$0xf] }
 0x564   : > { %v15455_v63 = vpop.f32.mrf.mxu1  ;;  %v15458_v62 = vpop.f32.mrf.mxu3  ;;  %v10983_v39 = vor.u32 %v11758_v0, %v10982_v46  ;;  %v10915_v42 = vor.u32 %v11737_v22, %v10912_v35  ;;  %v10944_v35 = vld [vmem:[%s18518_s1 + $0xde0] sm:$0xf0] }
 0x565   : > { %v5419_v52 = vadd.f32 %v15370_v27, %v5090_v11  ;;  %v11805_v27 = vld [vmem:[%s18518_s1 + $0xf9c] sm:$0xf0] }
 0x566   : > { %v5749_v58 = vpop.f32.mrf.mxu0  ;;  %v11167_v60 = vor.u32 %v11805_v27, %v11166_v10 }
 0x567   : > { %v15460_v1 = vadd.f32 %v5747_v32, %v5419_v52  ;;  %v10923_v32 = vor.u32 %v11738_v21, %v10920_v8  ;;  %v11746_v8 = vld [vmem:[%s18518_s1 + $0xdcc] sm:$0xf] }
 0x569   : > { %18864 = vst [vmem:[#allocation202_spill] sm:$0xff] %v15460_v1  ;;  %5472 = vmatmul.bf16.gmra.mxu3 %v10983_v39 }
 0x56a   : > { %v5091_v19 = vpop.f32.mrf.mxu2 }
 0x56b   : > { %v5092_v9 = vadd.f32 %v5091_v19, %v15135_v36  ;;  %v10952_v19 = vld [vmem:[%s18518_s1 + $0xde8] sm:$0xf0] }
 0x56c   : > { %v15487_v5 = vpop.f32.mrf.mxu1  ;;  %v15490_v46 = vpop.f32.mrf.mxu3 }
 0x56d   : > { %v5421_v11 = vadd.f32 %v15378_v44, %v5092_v9  ;;  %v11198_v44 = vld [vmem:[%s18518_s1 + $0xfc0] sm:$0xf] }
 0x56e   : > { %v5752_v52 = vpop.f32.mrf.mxu0 }
 0x56f   : > { %v15492_v0 = vadd.f32 %v5749_v58, %v5421_v11  ;;  %4844 = vmatmul.bf16.gmra.mxu1 %v11167_v60  ;;  %5133 = vmatmul.bf16.gmra.mxu2 %v10915_v42  ;;  %v11014_v58 = vld [vmem:[%s18518_s1 + $0xe48] sm:$0xf] }
 0x571   : > { %18865 = vst [vmem:[#allocation203_spill] sm:$0xff] %v15492_v0  ;;  %5791 = vmatmul.bf16.gmra.mxu0 %v10923_v32 }
 0x572   : > { %v5094_v1 = vpop.f32.mrf.mxu2 }
 0x573   : > { %v5095_v39 = vadd.f32 %v5094_v1, %v15167_v38  ;;  %v11766_v38 = vld [vmem:[%s18518_s1 + $0xe64] sm:$0xf0]  ;;  %v11745_v1 = vld [vmem:[%s18518_s1 + $0xdc4] sm:$0xf] }
 0x574   : > { %v15495_v31 = vpop.f32.mrf.mxu1  ;;  %v15498_v27 = vpop.f32.mrf.mxu3  ;;  %v11015_v21 = vor.u32 %v11766_v38, %v11014_v58  ;;  %v10947_v32 = vor.u32 %v11745_v1, %v10944_v35  ;;  %v11311_v35 = vld [vmem:[%s18518_s1 + $0x2c] sm:$0xf0] }
 0x575   : > { %v5424_v36 = vadd.f32 %v15410_v26, %v5095_v39  ;;  %v11813_v26 = vld [vmem:[%s18518_s1 + $0xfdc] sm:$0xf0] }
 0x576   : > { %v5754_v10 = vpop.f32.mrf.mxu0  ;;  %v11199_v42 = vor.u32 %v11813_v26, %v11198_v44 }
 0x577   : > { %v15500_v22 = vadd.f32 %v5752_v52, %v5424_v36  ;;  %v10955_v52 = vor.u32 %v11746_v8, %v10952_v19  ;;  %v11754_v19 = vld [vmem:[%s18518_s1 + $0xe0c] sm:$0xf] }
 0x579   : > { %18866 = vst [vmem:[#allocation204_spill] sm:$0xff] %v15500_v22  ;;  %5477 = vmatmul.bf16.gmra.mxu3 %v11015_v21 }
 0x57a   : > { %v5096_v9 = vpop.f32.mrf.mxu2 }
 0x57b   : > { %v5097_v60 = vadd.f32 %v5096_v9, %v15175_v17  ;;  %v10984_v9 = vld [vmem:[%s18518_s1 + $0xe28] sm:$0xf0] }
 0x57c   : > { %v15527_v11 = vpop.f32.mrf.mxu1  ;;  %v15530_v58 = vpop.f32.mrf.mxu3 }
 0x57d   : > { %v5426_v39 = vadd.f32 %v15418_v28, %v5097_v60  ;;  %v11753_v28 = vld [vmem:[%s18518_s1 + $0xe04] sm:$0xf] }
 0x57e   : > { %v5757_v36 = vpop.f32.mrf.mxu0 }
 0x57f   : > { %v15532_v38 = vadd.f32 %v5754_v10, %v5426_v39  ;;  %4849 = vmatmul.bf16.gmra.mxu1 %v11199_v42  ;;  %5138 = vmatmul.bf16.gmra.mxu2 %v10947_v32  ;;  %v11046_v10 = vld [vmem:[%s18518_s1 + $0xe88] sm:$0xf] }
 0x581   : > { %18867 = vst [vmem:[#allocation205_spill] sm:$0xff] %v15532_v38  ;;  %5796 = vmatmul.bf16.gmra.mxu0 %v10955_v52 }
 0x582   : > { %v5099_v22 = vpop.f32.mrf.mxu2 }
 0x583   : > { %v5100_v21 = vadd.f32 %v5099_v22, %v15207_v41  ;;  %v11774_v41 = vld [vmem:[%s18518_s1 + $0xea4] sm:$0xf0]  ;;  %v9198_v22 = vld [vmem:[%s18518_s1 + $0x10] sm:$0xf] }
 0x584   : > { %v15535_v0 = vpop.f32.mrf.mxu1  ;;  %v15538_v26 = vpop.f32.mrf.mxu3  ;;  %v11047_v8 = vor.u32 %v11774_v41, %v11046_v10  ;;  %v9199_v52 = vor.u32 %v11311_v35, %v9198_v22  ;;  %v11319_v35 = vld [vmem:[%s18518_s1 + $0x6c] sm:$0xf0] }
 0x585   : > { %v5429_v17 = vadd.f32 %v15450_v3, %v5100_v21  ;;  %v10976_v3 = vld [vmem:[%s18518_s1 + $0xe20] sm:$0xf0] }
 0x586   : > { %v5759_v44 = vpop.f32.mrf.mxu0  ;;  %v10979_v32 = vor.u32 %v11753_v28, %v10976_v3 }
 0x587   : > { %v15540_v1 = vadd.f32 %v5757_v36, %v5429_v17  ;;  %v10987_v36 = vor.u32 %v11754_v19, %v10984_v9  ;;  %v11762_v9 = vld [vmem:[%s18518_s1 + $0xe4c] sm:$0xf] }
 0x589   : > { %18868 = vst [vmem:[#allocation206_spill] sm:$0xff] %v15540_v1  ;;  %5482 = vmatmul.bf16.gmra.mxu3 %v11047_v8 }
 0x58a   : > { %v5101_v60 = vpop.f32.mrf.mxu2 }
 0x58b   : > { %v5102_v42 = vadd.f32 %v5101_v60, %v15215_v30  ;;  %v11016_v60 = vld [vmem:[%s18518_s1 + $0xe68] sm:$0xf0] }
 0x58c   : > { %v15567_v39 = vpop.f32.mrf.mxu1  ;;  %v15570_v10 = vpop.f32.mrf.mxu3 }
 0x58d   : > { %v5431_v21 = vadd.f32 %v15458_v62, %v5102_v42  ;;  %v11761_v62 = vld [vmem:[%s18518_s1 + $0xe44] sm:$0xf] }
 0x58e   : > { %v5762_v17 = vpop.f32.mrf.mxu0 }
 0x58f   : > { %v15572_v41 = vadd.f32 %v5759_v44, %v5431_v21  ;;  %5143 = vmatmul.bf16.gmra.mxu2 %v10979_v32  ;;  %5850 = vmatmul.bf16.vlgmr.msra.gmra.mxu1 %v9199_v52  ;;  %v11078_v44 = vld [vmem:[%s18518_s1 + $0xec8] sm:$0xf] }
 0x591   : > { %18869 = vst [vmem:[#allocation207_spill] sm:$0xff] %v15572_v41  ;;  %5801 = vmatmul.bf16.gmra.mxu0 %v10987_v36 }
 0x592   : > { %v5104_v1 = vpop.f32.mrf.mxu2 }
 0x593   : > { %v5105_v8 = vadd.f32 %v5104_v1, %v15247_v25  ;;  %v11782_v25 = vld [vmem:[%s18518_s1 + $0xee4] sm:$0xf0]  ;;  %v9230_v1 = vld [vmem:[%s18518_s1 + $0x50] sm:$0xf] }
 0x594   : > { %v15575_v38 = vpop.f32.mrf.mxu1  ;;  %v15578_v3 = vpop.f32.mrf.mxu3  ;;  %v11079_v19 = vor.u32 %v11782_v25, %v11078_v44  ;;  %v9231_v36 = vor.u32 %v11319_v35, %v9230_v1  ;;  %v11327_v35 = vld [vmem:[%s18518_s1 + $0xac] sm:$0xf0] }
 0x595   : > { %v5434_v30 = vadd.f32 %v15490_v46, %v5105_v8  ;;  %v11008_v46 = vld [vmem:[%s18518_s1 + $0xe60] sm:$0xf0] }
 0x596   : > { %v5764_v28 = vpop.f32.mrf.mxu0  ;;  %v11011_v52 = vor.u32 %v11761_v62, %v11008_v46 }
 0x597   : > { %v15580_v22 = vadd.f32 %v5762_v17, %v5434_v30  ;;  %v11019_v17 = vor.u32 %v11762_v9, %v11016_v60  ;;  %v11770_v60 = vld [vmem:[%s18518_s1 + $0xe8c] sm:$0xf] }
 0x599   : > { %18870 = vst [vmem:[#allocation208_spill] sm:$0xff] %v15580_v22  ;;  %5487 = vmatmul.bf16.gmra.mxu3 %v11079_v19 }
 0x59a   : > { %v5106_v42 = vpop.f32.mrf.mxu2 }
 0x59b   : > { %v5107_v32 = vadd.f32 %v5106_v42, %v15255_v49  ;;  %v11048_v42 = vld [vmem:[%s18518_s1 + $0xea8] sm:$0xf0] }
 0x59c   : > { %v15607_v21 = vpop.f32.mrf.mxu1  ;;  %v15610_v44 = vpop.f32.mrf.mxu3 }
 0x59d   : > { %v5436_v8 = vadd.f32 %v15498_v27, %v5107_v32  ;;  %v11769_v27 = vld [vmem:[%s18518_s1 + $0xe84] sm:$0xf] }
 0x59e   : > { %v5767_v30 = vpop.f32.mrf.mxu0 }
 0x59f   : > { %v15612_v25 = vadd.f32 %v5764_v28, %v5436_v8  ;;  %5148 = vmatmul.bf16.gmra.mxu2 %v11011_v52  ;;  %5855 = vmatmul.bf16.gmra.mxu1 %v9231_v36  ;;  %v11110_v28 = vld [vmem:[%s18518_s1 + $0xf08] sm:$0xf] }
 0x5a1   : > { %18871 = vst [vmem:[#allocation209_spill] sm:$0xff] %v15612_v25  ;;  %5806 = vmatmul.bf16.gmra.mxu0 %v11019_v17 }
 0x5a2   : > { %v5109_v22 = vpop.f32.mrf.mxu2 }
 0x5a3   : > { %v5110_v19 = vadd.f32 %v5109_v22, %v15287_v15  ;;  %v11790_v15 = vld [vmem:[%s18518_s1 + $0xf24] sm:$0xf0]  ;;  %v9262_v22 = vld [vmem:[%s18518_s1 + $0x90] sm:$0xf] }
 0x5a4   : > { %v15615_v41 = vpop.f32.mrf.mxu1  ;;  %v15618_v46 = vpop.f32.mrf.mxu3  ;;  %v11111_v9 = vor.u32 %v11790_v15, %v11110_v28  ;;  %v9263_v17 = vor.u32 %v11327_v35, %v9262_v22  ;;  %v11335_v35 = vld [vmem:[%s18518_s1 + $0xec] sm:$0xf0] }
 0x5a5   : > { %v5439_v49 = vadd.f32 %v15530_v58, %v5110_v19  ;;  %v11040_v58 = vld [vmem:[%s18518_s1 + $0xea0] sm:$0xf0] }
 0x5a6   : > { %v5769_v62 = vpop.f32.mrf.mxu0  ;;  %v11043_v36 = vor.u32 %v11769_v27, %v11040_v58 }
 0x5a7   : > { %v15620_v1 = vadd.f32 %v5767_v30, %v5439_v49  ;;  %v11051_v30 = vor.u32 %v11770_v60, %v11048_v42  ;;  %v11778_v42 = vld [vmem:[%s18518_s1 + $0xecc] sm:$0xf] }
 0x5a9   : > { %18872 = vst [vmem:[#allocation210_spill] sm:$0xff] %v15620_v1  ;;  %5492 = vmatmul.bf16.gmra.mxu3 %v11111_v9 }
 0x5aa   : > { %v5111_v32 = vpop.f32.mrf.mxu2 }
 0x5ab   : > { %v5112_v52 = vadd.f32 %v5111_v32, %v15295_v50  ;;  %v11080_v32 = vld [vmem:[%s18518_s1 + $0xee8] sm:$0xf0] }
 0x5ac   : > { %v15647_v8 = vpop.f32.mrf.mxu1  ;;  %v15650_v28 = vpop.f32.mrf.mxu3 }
 0x5ad   : > { %v5441_v19 = vadd.f32 %v15538_v26, %v5112_v52  ;;  %v11777_v26 = vld [vmem:[%s18518_s1 + $0xec4] sm:$0xf] }
 0x5ae   : > { %v5772_v49 = vpop.f32.mrf.mxu0 }
 0x5af   : > { %v15652_v15 = vadd.f32 %v5769_v62, %v5441_v19  ;;  %5153 = vmatmul.bf16.gmra.mxu2 %v11043_v36  ;;  %5860 = vmatmul.bf16.gmra.mxu1 %v9263_v17  ;;  %v11142_v62 = vld [vmem:[%s18518_s1 + $0xf48] sm:$0xf] }
 0x5b1   : > { %18873 = vst [vmem:[#allocation211_spill] sm:$0xff] %v15652_v15  ;;  %5811 = vmatmul.bf16.gmra.mxu0 %v11051_v30 }
 0x5b2   : > { %v5114_v1 = vpop.f32.mrf.mxu2 }
 0x5b3   : > { %v5115_v9 = vadd.f32 %v5114_v1, %v15327_v47  ;;  %v11798_v47 = vld [vmem:[%s18518_s1 + $0xf64] sm:$0xf0]  ;;  %v9294_v1 = vld [vmem:[%s18518_s1 + $0xd0] sm:$0xf] }
 0x5b4   : > { %v15655_v25 = vpop.f32.mrf.mxu1  ;;  %v15658_v58 = vpop.f32.mrf.mxu3  ;;  %v11143_v60 = vor.u32 %v11798_v47, %v11142_v62  ;;  %v9295_v30 = vor.u32 %v11335_v35, %v9294_v1  ;;  %v11343_v35 = vld [vmem:[%s18518_s1 + $0x12c] sm:$0xf0] }
 0x5b5   : > { %v5444_v50 = vadd.f32 %v15570_v10, %v5115_v9  ;;  %v11072_v10 = vld [vmem:[%s18518_s1 + $0xee0] sm:$0xf0] }
 0x5b6   : > { %v5774_v27 = vpop.f32.mrf.mxu0  ;;  %v11075_v17 = vor.u32 %v11777_v26, %v11072_v10 }
 0x5b7   : > { %v15660_v22 = vadd.f32 %v5772_v49, %v5444_v50  ;;  %v11083_v49 = vor.u32 %v11778_v42, %v11080_v32  ;;  %v11786_v32 = vld [vmem:[%s18518_s1 + $0xf0c] sm:$0xf] }
 0x5b9   : > { %18874 = vst [vmem:[#allocation212_spill] sm:$0xff] %v15660_v22  ;;  %5497 = vmatmul.bf16.gmra.mxu3 %v11143_v60 }
 0x5ba   : > { %v5116_v52 = vpop.f32.mrf.mxu2 }
 0x5bb   : > { %v5117_v36 = vadd.f32 %v5116_v52, %v15335_v14  ;;  %v11112_v52 = vld [vmem:[%s18518_s1 + $0xf28] sm:$0xf0] }
 0x5bc   : > { %v15687_v19 = vpop.f32.mrf.mxu1  ;;  %v15690_v62 = vpop.f32.mrf.mxu3 }
 0x5bd   : > { %v5446_v9 = vadd.f32 %v15578_v3, %v5117_v36  ;;  %v11785_v3 = vld [vmem:[%s18518_s1 + $0xf04] sm:$0xf] }
 0x5be   : > { %v5777_v50 = vpop.f32.mrf.mxu0 }
 0x5bf   : > { %v15692_v47 = vadd.f32 %v5774_v27, %v5446_v9  ;;  %5158 = vmatmul.bf16.gmra.mxu2 %v11075_v17  ;;  %5865 = vmatmul.bf16.gmra.mxu1 %v9295_v30  ;;  %v11174_v27 = vld [vmem:[%s18518_s1 + $0xf88] sm:$0xf] }
 0x5c1   : > { %18875 = vst [vmem:[#allocation213_spill] sm:$0xff] %v15692_v47  ;;  %5816 = vmatmul.bf16.gmra.mxu0 %v11083_v49 }
 0x5c2   : > { %v5119_v22 = vpop.f32.mrf.mxu2 }
 0x5c3   : > { %v5120_v60 = vadd.f32 %v5119_v22, %v15367_v16  ;;  %v11806_v16 = vld [vmem:[%s18518_s1 + $0xfa4] sm:$0xf0]  ;;  %v9326_v22 = vld [vmem:[%s18518_s1 + $0x110] sm:$0xf] }
 0x5c4   : > { %v15695_v15 = vpop.f32.mrf.mxu1  ;;  %v15698_v10 = vpop.f32.mrf.mxu3  ;;  %v11175_v42 = vor.u32 %v11806_v16, %v11174_v27  ;;  %v9327_v49 = vor.u32 %v11343_v35, %v9326_v22  ;;  %v11351_v35 = vld [vmem:[%s18518_s1 + $0x16c] sm:$0xf0] }
 0x5c5   : > { %v5449_v14 = vadd.f32 %v15610_v44, %v5120_v60  ;;  %v11104_v44 = vld [vmem:[%s18518_s1 + $0xf20] sm:$0xf0] }
 0x5c6   : > { %v5779_v26 = vpop.f32.mrf.mxu0  ;;  %v11107_v30 = vor.u32 %v11785_v3, %v11104_v44 }
 0x5c7   : > { %v15700_v1 = vadd.f32 %v5777_v50, %v5449_v14  ;;  %v11115_v50 = vor.u32 %v11786_v32, %v11112_v52  ;;  %v11794_v52 = vld [vmem:[%s18518_s1 + $0xf4c] sm:$0xf] }
 0x5c9   : > { %18876 = vst [vmem:[#allocation214_spill] sm:$0xff] %v15700_v1  ;;  %5502 = vmatmul.bf16.gmra.mxu3 %v11175_v42 }
 0x5ca   : > { %v5121_v36 = vpop.f32.mrf.mxu2 }
 0x5cb   : > { %v5122_v17 = vadd.f32 %v5121_v36, %v15375_v59  ;;  %v11144_v36 = vld [vmem:[%s18518_s1 + $0xf68] sm:$0xf0] }
 0x5cc   : > { %v15727_v9 = vpop.f32.mrf.mxu1  ;;  %v15730_v27 = vpop.f32.mrf.mxu3 }
 0x5cd   : > { %v5451_v60 = vadd.f32 %v15618_v46, %v5122_v17  ;;  %v11793_v46 = vld [vmem:[%s18518_s1 + $0xf44] sm:$0xf] }
 0x5ce   : > { %v5782_v14 = vpop.f32.mrf.mxu0 }
 0x5cf   : > { %v15732_v16 = vadd.f32 %v5779_v26, %v5451_v60  ;;  %5163 = vmatmul.bf16.gmra.mxu2 %v11107_v30  ;;  %5870 = vmatmul.bf16.gmra.mxu1 %v9327_v49  ;;  %v11206_v26 = vld [vmem:[%s18518_s1 + $0xfc8] sm:$0xf] }
 0x5d1   : > { %18877 = vst [vmem:[#allocation215_spill] sm:$0xff] %v15732_v16  ;;  %5821 = vmatmul.bf16.gmra.mxu0 %v11115_v50 }
 0x5d2   : > { %v5124_v1 = vpop.f32.mrf.mxu2 }
 0x5d3   : > { %v5125_v42 = vadd.f32 %v5124_v1, %v15407_v48  ;;  %v11814_v48 = vld [vmem:[%s18518_s1 + $0xfe4] sm:$0xf0]  ;;  %v9358_v1 = vld [vmem:[%s18518_s1 + $0x150] sm:$0xf] }
 0x5d4   : > { %v15735_v47 = vpop.f32.mrf.mxu1  ;;  %v15738_v44 = vpop.f32.mrf.mxu3  ;;  %v11207_v32 = vor.u32 %v11814_v48, %v11206_v26  ;;  %v9359_v50 = vor.u32 %v11351_v35, %v9358_v1  ;;  %v11359_v35 = vld [vmem:[%s18518_s1 + $0x1ac] sm:$0xf0] }
 0x5d5   : > { %v5454_v59 = vadd.f32 %v15650_v28, %v5125_v42  ;;  %v11136_v28 = vld [vmem:[%s18518_s1 + $0xf60] sm:$0xf0] }
 0x5d6   : > { %v5784_v3 = vpop.f32.mrf.mxu0  ;;  %v11139_v49 = vor.u32 %v11793_v46, %v11136_v28 }
 0x5d7   : > { %v15740_v22 = vadd.f32 %v5782_v14, %v5454_v59  ;;  %v11147_v14 = vor.u32 %v11794_v52, %v11144_v36  ;;  %v11802_v36 = vld [vmem:[%s18518_s1 + $0xf8c] sm:$0xf] }
 0x5d9   : > { %18878 = vst [vmem:[#allocation216_spill] sm:$0xff] %v15740_v22  ;;  %5507 = vmatmul.bf16.gmra.mxu3 %v11207_v32 }
 0x5da   : > { %v5126_v17 = vpop.f32.mrf.mxu2 }
 0x5db   : > { %v5127_v30 = vadd.f32 %v5126_v17, %v15415_v29  ;;  %v11176_v17 = vld [vmem:[%s18518_s1 + $0xfa8] sm:$0xf0] }
 0x5dc   : > { %v15767_v60 = vpop.f32.mrf.mxu1  ;;  %v15770_v26 = vpop.f32.mrf.mxu3 }
 0x5dd   : > { %v5456_v42 = vadd.f32 %v15658_v58, %v5127_v30  ;;  %v11801_v58 = vld [vmem:[%s18518_s1 + $0xf84] sm:$0xf] }
 0x5de   : > { %v5787_v59 = vpop.f32.mrf.mxu0 }
 0x5df   : > { %v15772_v48 = vadd.f32 %v5784_v3, %v5456_v42  ;;  %5168 = vmatmul.bf16.gmra.mxu2 %v11139_v49  ;;  %5875 = vmatmul.bf16.gmra.mxu1 %v9359_v50  ;;  %v9206_v3 = vld [vmem:[%s18518_s1 + $0x18] sm:$0xf] }
 0x5e1   : > { %18879 = vst [vmem:[#allocation217_spill] sm:$0xff] %v15772_v48  ;;  %5826 = vmatmul.bf16.gmra.mxu0 %v11147_v14 }
 0x5e2   : > { %v5129_v22 = vpop.f32.mrf.mxu2 }
 0x5e3   : > { %v5130_v32 = vadd.f32 %v5129_v22, %v15447_v33  ;;  %v11312_v33 = vld [vmem:[%s18518_s1 + $0x34] sm:$0xf0]  ;;  %v9390_v22 = vld [vmem:[%s18518_s1 + $0x190] sm:$0xf] }
 0x5e4   : > { %v15775_v16 = vpop.f32.mrf.mxu1  ;;  %v15778_v28 = vpop.f32.mrf.mxu3  ;;  %v9207_v52 = vor.u32 %v11312_v33, %v9206_v3  ;;  %v9391_v14 = vor.u32 %v11359_v35, %v9390_v22  ;;  %v11367_v35 = vld [vmem:[%s18518_s1 + $0x1ec] sm:$0xf0] }
 0x5e5   : > { %v5459_v29 = vadd.f32 %v15690_v62, %v5130_v32  ;;  %v11168_v62 = vld [vmem:[%s18518_s1 + $0xfa0] sm:$0xf0] }
 0x5e6   : > { %v5789_v46 = vpop.f32.mrf.mxu0  ;;  %v11171_v50 = vor.u32 %v11801_v58, %v11168_v62 }
 0x5e7   : > { %v15780_v1 = vadd.f32 %v5787_v59, %v5459_v29  ;;  %v11179_v59 = vor.u32 %v11802_v36, %v11176_v17  ;;  %v11810_v17 = vld [vmem:[%s18518_s1 + $0xfcc] sm:$0xf] }
 0x5e9   : > { %18880 = vst [vmem:[#allocation218_spill] sm:$0xff] %v15780_v1  ;;  %6508 = vmatmul.bf16.vlgmr.msra.gmra.mxu3 %v9207_v52 }
 0x5ea   : > { %v5131_v30 = vpop.f32.mrf.mxu2 }
 0x5eb   : > { %v5132_v49 = vadd.f32 %v5131_v30, %v15455_v63  ;;  %v11208_v30 = vld [vmem:[%s18518_s1 + $0xfe8] sm:$0xf0] }
 0x5ec   : > { %v15807_v42 = vpop.f32.mrf.mxu1  ;;  %v15810_v3 = vpop.f32.mrf.mxu3 }
 0x5ed   : > { %v5461_v32 = vadd.f32 %v15698_v10, %v5132_v49  ;;  %v11809_v10 = vld [vmem:[%s18518_s1 + $0xfc4] sm:$0xf] }
 0x5ee   : > { %v5792_v29 = vpop.f32.mrf.mxu0 }
 0x5ef   : > { %v15812_v33 = vadd.f32 %v5789_v46, %v5461_v32  ;;  %5173 = vmatmul.bf16.gmra.mxu2 %v11171_v50  ;;  %5880 = vmatmul.bf16.gmra.mxu1 %v9391_v14  ;;  %v9238_v46 = vld [vmem:[%s18518_s1 + $0x58] sm:$0xf] }
 0x5f1   : > { %18881 = vst [vmem:[#allocation219_spill] sm:$0xff] %v15812_v33  ;;  %5831 = vmatmul.bf16.gmra.mxu0 %v11179_v59 }
 0x5f2   : > { %v5134_v1 = vpop.f32.mrf.mxu2 }
 0x5f3   : > { %v5135_v52 = vadd.f32 %v5134_v1, %v15487_v5  ;;  %v11320_v5 = vld [vmem:[%s18518_s1 + $0x74] sm:$0xf0]  ;;  %v9422_v1 = vld [vmem:[%s18518_s1 + $0x1d0] sm:$0xf] }
 0x5f4   : > { %v15815_v48 = vpop.f32.mrf.mxu1  ;;  %v15818_v62 = vpop.f32.mrf.mxu3  ;;  %v9239_v36 = vor.u32 %v11320_v5, %v9238_v46  ;;  %v9423_v59 = vor.u32 %v11367_v35, %v9422_v1  ;;  %v9200_v35 = vld [vmem:[%s18518_s1 + $0x30] sm:$0xf0] }
 0x5f5   : > { %v5464_v63 = vadd.f32 %v15730_v27, %v5135_v52  ;;  %v11200_v27 = vld [vmem:[%s18518_s1 + $0xfe0] sm:$0xf0] }
 0x5f6   : > { %v5794_v58 = vpop.f32.mrf.mxu0  ;;  %v11203_v14 = vor.u32 %v11809_v10, %v11200_v27 }
 0x5f7   : > { %v15820_v22 = vadd.f32 %v5792_v29, %v5464_v63  ;;  %v11211_v29 = vor.u32 %v11810_v17, %v11208_v30  ;;  %v11308_v30 = vld [vmem:[%s18518_s1 + $0x1c] sm:$0xf] }
 0x5f9   : > { %18882 = vst [vmem:[#allocation220_spill] sm:$0xff] %v15820_v22  ;;  %6513 = vmatmul.bf16.gmra.mxu3 %v9239_v36 }
 0x5fa   : > { %v5136_v49 = vpop.f32.mrf.mxu2 }
 0x5fb   : > { %v5137_v50 = vadd.f32 %v5136_v49, %v15495_v31  ;;  %v9208_v49 = vld [vmem:[%s18518_s1 + $0x38] sm:$0xf0] }
 0x5fc   : > { %v15847_v32 = vpop.f32.mrf.mxu1  ;;  %v15850_v46 = vpop.f32.mrf.mxu3 }
 0x5fd   : > { %v5466_v52 = vadd.f32 %v15738_v44, %v5137_v50  ;;  %v9454_v44 = vld [vmem:[%s18518_s1 + $0x210] sm:$0xf] }
 0x5fe   : > { %v5797_v63 = vpop.f32.mrf.mxu0 }
 0x5ff   : > { %v15852_v5 = vadd.f32 %v5794_v58, %v5466_v52  ;;  %5178 = vmatmul.bf16.gmra.mxu2 %v11203_v14  ;;  %5885 = vmatmul.bf16.gmra.mxu1 %v9423_v59  ;;  %v9270_v58 = vld [vmem:[%s18518_s1 + $0x98] sm:$0xf] }
 0x601   : > { %5836 = vmatmul.bf16.gmra.mxu0 %v11211_v29 }
 0x602   : > { %v5139_v22 = vpop.f32.mrf.mxu2 }
 0x603   : > { %v5140_v36 = vadd.f32 %v5139_v22, %v15527_v11  ;;  %v11328_v11 = vld [vmem:[%s18518_s1 + $0xb4] sm:$0xf0]  ;;  %v11307_v22 = vld [vmem:[%s18518_s1 + $0x14] sm:$0xf] }
 0x604   : > { %v15855_v33 = vpop.f32.mrf.mxu1  ;;  %v15858_v27 = vpop.f32.mrf.mxu3  ;;  %v9271_v17 = vor.u32 %v11328_v11, %v9270_v58  ;;  %v9203_v29 = vor.u32 %v11307_v22, %v9200_v35 }
 0x605   : > { %v5469_v31 = vadd.f32 %v15770_v26, %v5140_v36  ;;  %v11375_v26 = vld [vmem:[%s18518_s1 + $0x22c] sm:$0xf0] }
 0x606   : > { %v5799_v10 = vpop.f32.mrf.mxu0  ;;  %v9455_v59 = vor.u32 %v11375_v26, %v9454_v44 }
 0x607   : > { %v15860_v1 = vadd.f32 %v5797_v63, %v5469_v31  ;;  %v9211_v63 = vor.u32 %v11308_v30, %v9208_v49  ;;  %v9302_v30 = vld [vmem:[%s18518_s1 + $0xd8] sm:$0xf]  ;;  %v9232_v49 = vld [vmem:[%s18518_s1 + $0x70] sm:$0xf0] }
 0x609   : > { %18883 = vst [vmem:[#allocation221_spill] sm:$0xff] %v15860_v1  ;;  %6518 = vmatmul.bf16.gmra.mxu3 %v9271_v17 }
 0x60a   : > { %v5141_v50 = vpop.f32.mrf.mxu2 }
 0x60b   : > { %v5142_v14 = vadd.f32 %v5141_v50, %v15535_v0 }
 0x60c   : > { %v5851_v52 = vpop.f32.mrf.mxu1  ;;  %v15891_v11 = vpop.f32.mrf.mxu3 }
 0x60d   : > { %v5471_v36 = vadd.f32 %v15778_v28, %v5142_v14  ;;  %v15889_v31 = vadd.f32 %v5851_v52, %v13661_v54  ;;  %v11316_v14 = vld [vmem:[%s18518_s1 + $0x5c] sm:$0xf] }
 0x60e   : > { %v5802_v58 = vpop.f32.mrf.mxu0 }
 0x60f   : > { %v15893_v1 = vadd.f32 %v5799_v10, %v5471_v36  ;;  %5890 = vmatmul.bf16.gmra.mxu1 %v9455_v59  ;;  %6179 = vmatmul.bf16.vlgmr.msra.gmra.mxu2 %v9203_v29  ;;  %v9486_v10 = vld [vmem:[%s18518_s1 + $0x250] sm:$0xf]  ;;  %v9240_v59 = vld [vmem:[%s18518_s1 + $0x78] sm:$0xf0] }
 0x611   : > { %6837 = vmatmul.bf16.vlgmr.msra.gmra.mxu0 %v9211_v63 }
 0x612   : > { %v5144_v17 = vpop.f32.mrf.mxu2 }
 0x613   : > { %v5145_v0 = vadd.f32 %v5144_v17, %v15567_v39  ;;  %v11336_v39 = vld [vmem:[%s18518_s1 + $0xf4] sm:$0xf0]  ;;  %v9243_v17 = vor.u32 %v11316_v14, %v9240_v59  ;;  %v9264_v59 = vld [vmem:[%s18518_s1 + $0xb0] sm:$0xf0] }
 0x614   : > { %v5853_v44 = vpop.f32.mrf.mxu1  ;;  %v15900_v54 = vpop.f32.mrf.mxu3  ;;  %v9303_v50 = vor.u32 %v11336_v39, %v9302_v30  ;;  %v9334_v14 = vld [vmem:[%s18518_s1 + $0x118] sm:$0xf] }
 0x615   : > { %v5474_v26 = vadd.f32 %v15810_v3, %v5145_v0  ;;  %v15898_v22 = vadd.f32 %v5853_v44, %v13693_v20  ;;  %v11383_v20 = vld [vmem:[%s18518_s1 + $0x26c] sm:$0xf0]  ;;  %v11315_v3 = vld [vmem:[%s18518_s1 + $0x54] sm:$0xf] }
 0x616   : > { %v5804_v28 = vpop.f32.mrf.mxu0  ;;  %v9487_v63 = vor.u32 %v11383_v20, %v9486_v10  ;;  %v9235_v36 = vor.u32 %v11315_v3, %v9232_v49 }
 0x617   : > { %v15902_v35 = vadd.f32 %v5802_v58, %v5474_v26 }
 0x619   : > { %6523 = vmatmul.bf16.gmra.mxu3 %v9303_v50 }
 0x61a   : > { %v5146_v29 = vpop.f32.mrf.mxu2 }
 0x61b   : > { %v5147_v52 = vadd.f32 %v5146_v29, %v15575_v38 }
 0x61c   : > { %v5856_v58 = vpop.f32.mrf.mxu1  ;;  %v15933_v30 = vpop.f32.mrf.mxu3 }
 0x61d   : > { %v5476_v0 = vadd.f32 %v15818_v62, %v5147_v52  ;;  %v15931_v44 = vadd.f32 %v5856_v58, %v13700_v45  ;;  %v11324_v52 = vld [vmem:[%s18518_s1 + $0x9c] sm:$0xf] }
 0x61e   : > { %v5807_v26 = vpop.f32.mrf.mxu0 }
 0x61f   : > { %v15935_v39 = vadd.f32 %v5804_v28, %v5476_v0  ;;  %5895 = vmatmul.bf16.gmra.mxu1 %v9487_v63  ;;  %6184 = vmatmul.bf16.gmra.mxu2 %v9235_v36  ;;  %v9518_v28 = vld [vmem:[%s18518_s1 + $0x290] sm:$0xf]  ;;  %v9272_v63 = vld [vmem:[%s18518_s1 + $0xb8] sm:$0xf0] }
 0x621   : > { %6842 = vmatmul.bf16.gmra.mxu0 %v9243_v17 }
 0x622   : > { %v5149_v50 = vpop.f32.mrf.mxu2 }
 0x623   : > { %v5150_v38 = vadd.f32 %v5149_v50, %v15607_v21  ;;  %v11344_v21 = vld [vmem:[%s18518_s1 + $0x134] sm:$0xf0]  ;;  %v9275_v50 = vor.u32 %v11324_v52, %v9272_v63  ;;  %v9296_v63 = vld [vmem:[%s18518_s1 + $0xf0] sm:$0xf0] }
 0x624   : > { %v5858_v10 = vpop.f32.mrf.mxu1  ;;  %v15942_v45 = vpop.f32.mrf.mxu3  ;;  %v9335_v29 = vor.u32 %v11344_v21, %v9334_v14  ;;  %v9366_v52 = vld [vmem:[%s18518_s1 + $0x158] sm:$0xf] }
 0x625   : > { %v5479_v20 = vadd.f32 %v15850_v46, %v5150_v38  ;;  %v15940_v3 = vadd.f32 %v5858_v10, %v13732_v56  ;;  %v11391_v56 = vld [vmem:[%s18518_s1 + $0x2ac] sm:$0xf0]  ;;  %v11323_v46 = vld [vmem:[%s18518_s1 + $0x94] sm:$0xf] }
 0x626   : > { %v5809_v62 = vpop.f32.mrf.mxu0  ;;  %v9519_v17 = vor.u32 %v11391_v56, %v9518_v28  ;;  %v9267_v0 = vor.u32 %v11323_v46, %v9264_v59 }
 0x627   : > { %v15944_v49 = vadd.f32 %v5807_v26, %v5479_v20 }
 0x629   : > { %6528 = vmatmul.bf16.gmra.mxu3 %v9335_v29 }
 0x62a   : > { %v5151_v36 = vpop.f32.mrf.mxu2 }
 0x62b   : > { %v5152_v58 = vadd.f32 %v5151_v36, %v15615_v41 }
 0x62c   : > { %v5861_v26 = vpop.f32.mrf.mxu1  ;;  %v15975_v14 = vpop.f32.mrf.mxu3 }
 0x62d   : > { %v5481_v38 = vadd.f32 %v15858_v27, %v5152_v58  ;;  %v15973_v10 = vadd.f32 %v5861_v26, %v13740_v4  ;;  %v11332_v58 = vld [vmem:[%s18518_s1 + $0xdc] sm:$0xf] }
 0x62e   : > { %v5812_v20 = vpop.f32.mrf.mxu0 }
 0x62f   : > { %v15977_v21 = vadd.f32 %v5809_v62, %v5481_v38  ;;  %5900 = vmatmul.bf16.gmra.mxu1 %v9519_v17  ;;  %6189 = vmatmul.bf16.gmra.mxu2 %v9267_v0  ;;  %v9550_v62 = vld [vmem:[%s18518_s1 + $0x2d0] sm:$0xf]  ;;  %v9304_v17 = vld [vmem:[%s18518_s1 + $0xf8] sm:$0xf0] }
 0x631   : > { %6847 = vmatmul.bf16.gmra.mxu0 %v9275_v50 }
 0x632   : > { %v5154_v29 = vpop.f32.mrf.mxu2 }
 0x633   : > { %v5155_v41 = vadd.f32 %v5154_v29, %v15647_v8  ;;  %v11352_v8 = vld [vmem:[%s18518_s1 + $0x174] sm:$0xf0]  ;;  %v9307_v29 = vor.u32 %v11332_v58, %v9304_v17  ;;  %v9328_v17 = vld [vmem:[%s18518_s1 + $0x130] sm:$0xf0] }
 0x634   : > { %v5863_v28 = vpop.f32.mrf.mxu1  ;;  %v15984_v4 = vpop.f32.mrf.mxu3  ;;  %v9367_v36 = vor.u32 %v11352_v8, %v9366_v52  ;;  %v9398_v58 = vld [vmem:[%s18518_s1 + $0x198] sm:$0xf] }
 0x635   : > { %v5484_v56 = vadd.f32 %v15891_v11, %v5155_v41  ;;  %v15982_v46 = vadd.f32 %v5863_v28, %v13772_v7  ;;  %v11399_v7 = vld [vmem:[%s18518_s1 + $0x2ec] sm:$0xf0]  ;;  %v11331_v11 = vld [vmem:[%s18518_s1 + $0xd4] sm:$0xf] }
 0x636   : > { %v5814_v27 = vpop.f32.mrf.mxu0  ;;  %v9551_v50 = vor.u32 %v11399_v7, %v9550_v62  ;;  %v9299_v38 = vor.u32 %v11331_v11, %v9296_v63 }
 0x637   : > { %v15986_v59 = vadd.f32 %v5812_v20, %v5484_v56 }
 0x639   : > { %6533 = vmatmul.bf16.gmra.mxu3 %v9367_v36 }
 0x63a   : > { %v5156_v0 = vpop.f32.mrf.mxu2 }
 0x63b   : > { %v5157_v26 = vadd.f32 %v5156_v0, %v15655_v25 }
 0x63c   : > { %v5866_v20 = vpop.f32.mrf.mxu1  ;;  %v16017_v52 = vpop.f32.mrf.mxu3 }
 0x63d   : > { %v5486_v41 = vadd.f32 %v15900_v54, %v5157_v26  ;;  %v16015_v28 = vadd.f32 %v5866_v20, %v13780_v53  ;;  %v11340_v26 = vld [vmem:[%s18518_s1 + $0x11c] sm:$0xf] }
 0x63e   : > { %v5817_v56 = vpop.f32.mrf.mxu0 }
 0x63f   : > { %v16019_v8 = vadd.f32 %v5814_v27, %v5486_v41  ;;  %5905 = vmatmul.bf16.gmra.mxu1 %v9551_v50  ;;  %6194 = vmatmul.bf16.gmra.mxu2 %v9299_v38  ;;  %v9582_v27 = vld [vmem:[%s18518_s1 + $0x310] sm:$0xf]  ;;  %v9336_v50 = vld [vmem:[%s18518_s1 + $0x138] sm:$0xf0] }
 0x641   : > { %6852 = vmatmul.bf16.gmra.mxu0 %v9307_v29 }
 0x642   : > { %v5159_v36 = vpop.f32.mrf.mxu2 }
 0x643   : > { %v5160_v25 = vadd.f32 %v5159_v36, %v15687_v19  ;;  %v11360_v19 = vld [vmem:[%s18518_s1 + $0x1b4] sm:$0xf0]  ;;  %v9339_v36 = vor.u32 %v11340_v26, %v9336_v50  ;;  %v9360_v50 = vld [vmem:[%s18518_s1 + $0x170] sm:$0xf0] }
 0x644   : > { %v5868_v62 = vpop.f32.mrf.mxu1  ;;  %v16026_v53 = vpop.f32.mrf.mxu3  ;;  %v9399_v0 = vor.u32 %v11360_v19, %v9398_v58  ;;  %v9430_v26 = vld [vmem:[%s18518_s1 + $0x1d8] sm:$0xf] }
 0x645   : > { %v5489_v7 = vadd.f32 %v15933_v30, %v5160_v25  ;;  %v16024_v11 = vadd.f32 %v5868_v62, %v13812_v40  ;;  %v11407_v40 = vld [vmem:[%s18518_s1 + $0x32c] sm:$0xf0]  ;;  %v11339_v30 = vld [vmem:[%s18518_s1 + $0x114] sm:$0xf] }
 0x646   : > { %v5819_v54 = vpop.f32.mrf.mxu0  ;;  %v9583_v29 = vor.u32 %v11407_v40, %v9582_v27  ;;  %v9331_v41 = vor.u32 %v11339_v30, %v9328_v17 }
 0x647   : > { %v16028_v63 = vadd.f32 %v5817_v56, %v5489_v7 }
 0x649   : > { %6538 = vmatmul.bf16.gmra.mxu3 %v9399_v0 }
 0x64a   : > { %v5161_v38 = vpop.f32.mrf.mxu2 }
 0x64b   : > { %v5162_v20 = vadd.f32 %v5161_v38, %v15695_v15 }
 0x64c   : > { %v5871_v56 = vpop.f32.mrf.mxu1  ;;  %v16059_v58 = vpop.f32.mrf.mxu3 }
 0x64d   : > { %v5491_v25 = vadd.f32 %v15942_v45, %v5162_v20  ;;  %v16057_v62 = vadd.f32 %v5871_v56, %v13820_v18  ;;  %v11348_v20 = vld [vmem:[%s18518_s1 + $0x15c] sm:$0xf] }
 0x64e   : > { %v5822_v7 = vpop.f32.mrf.mxu0 }
 0x64f   : > { %v16061_v19 = vadd.f32 %v5819_v54, %v5491_v25  ;;  %5910 = vmatmul.bf16.gmra.mxu1 %v9583_v29  ;;  %6199 = vmatmul.bf16.gmra.mxu2 %v9331_v41  ;;  %v9614_v54 = vld [vmem:[%s18518_s1 + $0x350] sm:$0xf]  ;;  %v9368_v29 = vld [vmem:[%s18518_s1 + $0x178] sm:$0xf0] }
 0x651   : > { %6857 = vmatmul.bf16.gmra.mxu0 %v9339_v36 }
 0x652   : > { %v5164_v0 = vpop.f32.mrf.mxu2 }
 0x653   : > { %v5165_v15 = vadd.f32 %v5164_v0, %v15727_v9  ;;  %v11368_v9 = vld [vmem:[%s18518_s1 + $0x1f4] sm:$0xf0]  ;;  %v9371_v0 = vor.u32 %v11348_v20, %v9368_v29  ;;  %v9392_v29 = vld [vmem:[%s18518_s1 + $0x1b0] sm:$0xf0] }
 0x654   : > { %v5873_v27 = vpop.f32.mrf.mxu1  ;;  %v16068_v18 = vpop.f32.mrf.mxu3  ;;  %v9431_v38 = vor.u32 %v11368_v9, %v9430_v26  ;;  %v9462_v20 = vld [vmem:[%s18518_s1 + $0x218] sm:$0xf] }
 0x655   : > { %v5494_v40 = vadd.f32 %v15975_v14, %v5165_v15  ;;  %v16066_v30 = vadd.f32 %v5873_v27, %v13852_v61  ;;  %v11415_v61 = vld [vmem:[%s18518_s1 + $0x36c] sm:$0xf0]  ;;  %v11347_v14 = vld [vmem:[%s18518_s1 + $0x154] sm:$0xf] }
 0x656   : > { %v5824_v45 = vpop.f32.mrf.mxu0  ;;  %v9615_v36 = vor.u32 %v11415_v61, %v9614_v54  ;;  %v9363_v25 = vor.u32 %v11347_v14, %v9360_v50 }
 0x657   : > { %v16070_v17 = vadd.f32 %v5822_v7, %v5494_v40 }
 0x659   : > { %6543 = vmatmul.bf16.gmra.mxu3 %v9431_v38 }
 0x65a   : > { %v5166_v41 = vpop.f32.mrf.mxu2 }
 0x65b   : > { %v5167_v56 = vadd.f32 %v5166_v41, %v15735_v47 }
 0x65c   : > { %v5876_v7 = vpop.f32.mrf.mxu1  ;;  %v16101_v26 = vpop.f32.mrf.mxu3 }
 0x65d   : > { %v5496_v15 = vadd.f32 %v15984_v4, %v5167_v56  ;;  %v16099_v27 = vadd.f32 %v5876_v7, %v13860_v37  ;;  %v11356_v56 = vld [vmem:[%s18518_s1 + $0x19c] sm:$0xf] }
 0x65e   : > { %v5827_v40 = vpop.f32.mrf.mxu0 }
 0x65f   : > { %v16103_v9 = vadd.f32 %v5824_v45, %v5496_v15  ;;  %5915 = vmatmul.bf16.gmra.mxu1 %v9615_v36  ;;  %6204 = vmatmul.bf16.gmra.mxu2 %v9363_v25  ;;  %v9646_v45 = vld [vmem:[%s18518_s1 + $0x390] sm:$0xf]  ;;  %v9400_v36 = vld [vmem:[%s18518_s1 + $0x1b8] sm:$0xf0] }
 0x661   : > { %6862 = vmatmul.bf16.gmra.mxu0 %v9371_v0 }
 0x662   : > { %v5169_v38 = vpop.f32.mrf.mxu2 }
 0x663   : > { %v5170_v47 = vadd.f32 %v5169_v38, %v15767_v60  ;;  %v11376_v60 = vld [vmem:[%s18518_s1 + $0x234] sm:$0xf0]  ;;  %v9403_v38 = vor.u32 %v11356_v56, %v9400_v36  ;;  %v9424_v36 = vld [vmem:[%s18518_s1 + $0x1f0] sm:$0xf0] }
 0x664   : > { %v5878_v54 = vpop.f32.mrf.mxu1  ;;  %v16110_v37 = vpop.f32.mrf.mxu3  ;;  %v9463_v41 = vor.u32 %v11376_v60, %v9462_v20  ;;  %v9494_v56 = vld [vmem:[%s18518_s1 + $0x258] sm:$0xf] }
 0x665   : > { %v5499_v61 = vadd.f32 %v16017_v52, %v5170_v47  ;;  %v16108_v14 = vadd.f32 %v5878_v54, %v13892_v55  ;;  %v11423_v55 = vld [vmem:[%s18518_s1 + $0x3ac] sm:$0xf0]  ;;  %v11355_v52 = vld [vmem:[%s18518_s1 + $0x194] sm:$0xf] }
 0x666   : > { %v5829_v4 = vpop.f32.mrf.mxu0  ;;  %v9647_v0 = vor.u32 %v11423_v55, %v9646_v45  ;;  %v9395_v15 = vor.u32 %v11355_v52, %v9392_v29 }
 0x667   : > { %v16112_v50 = vadd.f32 %v5827_v40, %v5499_v61 }
 0x669   : > { %6548 = vmatmul.bf16.gmra.mxu3 %v9463_v41 }
 0x66a   : > { %v5171_v25 = vpop.f32.mrf.mxu2 }
 0x66b   : > { %v5172_v7 = vadd.f32 %v5171_v25, %v15775_v16 }
 0x66c   : > { %v5881_v40 = vpop.f32.mrf.mxu1  ;;  %v16143_v20 = vpop.f32.mrf.mxu3 }
 0x66d   : > { %v5501_v47 = vadd.f32 %v16026_v53, %v5172_v7  ;;  %v16141_v54 = vadd.f32 %v5881_v40, %v13900_v12  ;;  %v11364_v7 = vld [vmem:[%s18518_s1 + $0x1dc] sm:$0xf] }
 0x66e   : > { %v5832_v61 = vpop.f32.mrf.mxu0 }
 0x66f   : > { %v16145_v60 = vadd.f32 %v5829_v4, %v5501_v47  ;;  %5920 = vmatmul.bf16.gmra.mxu1 %v9647_v0  ;;  %6209 = vmatmul.bf16.gmra.mxu2 %v9395_v15  ;;  %v9678_v4 = vld [vmem:[%s18518_s1 + $0x3d0] sm:$0xf]  ;;  %v9432_v0 = vld [vmem:[%s18518_s1 + $0x1f8] sm:$0xf0] }
 0x671   : > { %6867 = vmatmul.bf16.gmra.mxu0 %v9403_v38 }
 0x672   : > { %v5174_v41 = vpop.f32.mrf.mxu2 }
 0x673   : > { %v5175_v16 = vadd.f32 %v5174_v41, %v15807_v42  ;;  %v11384_v42 = vld [vmem:[%s18518_s1 + $0x274] sm:$0xf0]  ;;  %v9435_v41 = vor.u32 %v11364_v7, %v9432_v0  ;;  %v9456_v0 = vld [vmem:[%s18518_s1 + $0x230] sm:$0xf0] }
 0x674   : > { %v5883_v45 = vpop.f32.mrf.mxu1  ;;  %v16152_v12 = vpop.f32.mrf.mxu3  ;;  %v9495_v25 = vor.u32 %v11384_v42, %v9494_v56  ;;  %v9526_v7 = vld [vmem:[%s18518_s1 + $0x298] sm:$0xf] }
 0x675   : > { %v5504_v55 = vadd.f32 %v16059_v58, %v5175_v16  ;;  %v16150_v52 = vadd.f32 %v5883_v45, %v13932_v2  ;;  %v11431_v2 = vld [vmem:[%s18518_s1 + $0x3ec] sm:$0xf0]  ;;  %v11363_v58 = vld [vmem:[%s18518_s1 + $0x1d4] sm:$0xf] }
 0x676   : > { %v5834_v53 = vpop.f32.mrf.mxu0  ;;  %v9679_v38 = vor.u32 %v11431_v2, %v9678_v4  ;;  %v9427_v47 = vor.u32 %v11363_v58, %v9424_v36 }
 0x677   : > { %v16154_v29 = vadd.f32 %v5832_v61, %v5504_v55 }
 0x679   : > { %18884 = vst [vmem:[#allocation222_spill] sm:$0xff] %v16154_v29  ;;  %6553 = vmatmul.bf16.gmra.mxu3 %v9495_v25  ;;  %v18889_v29 = vld [vmem:[#allocation10_spill] sm:$0xff] }
 0x67a   : > { %v5176_v15 = vpop.f32.mrf.mxu2 }
 0x67b   : > { %v5177_v40 = vadd.f32 %v5176_v15, %v15815_v48 }
 0x67c   : > { %v5886_v61 = vpop.f32.mrf.mxu1  ;;  %v16185_v56 = vpop.f32.mrf.mxu3 }
 0x67d   : > { %v5506_v16 = vadd.f32 %v16068_v18, %v5177_v40  ;;  %v16183_v45 = vadd.f32 %v5886_v61, %v13940_v51  ;;  %v11372_v40 = vld [vmem:[%s18518_s1 + $0x21c] sm:$0xf] }
 0x67e   : > { %v5837_v55 = vpop.f32.mrf.mxu0 }
 0x67f   : > { %v16187_v42 = vadd.f32 %v5834_v53, %v5506_v16  ;;  %5925 = vmatmul.bf16.gmra.mxu1 %v9679_v38  ;;  %6214 = vmatmul.bf16.gmra.mxu2 %v9427_v47  ;;  %v9710_v53 = vld [vmem:[%s18518_s1 + $0x410] sm:$0xf]  ;;  %v9464_v38 = vld [vmem:[%s18518_s1 + $0x238] sm:$0xf0] }
 0x681   : > { %18885 = vst [vmem:[#allocation223_spill] sm:$0xff] %v16187_v42  ;;  %6872 = vmatmul.bf16.gmra.mxu0 %v9435_v41 }
 0x682   : > { %v5179_v25 = vpop.f32.mrf.mxu2 }
 0x683   : > { %v5180_v48 = vadd.f32 %v5179_v25, %v15847_v32  ;;  %v11392_v32 = vld [vmem:[%s18518_s1 + $0x2b4] sm:$0xf0]  ;;  %v9467_v25 = vor.u32 %v11372_v40, %v9464_v38  ;;  %v16239_v40 = vld [vmem:[%s12340_s24] ss:$0 sm:$0xff] }
 0x684   : > { %v5888_v4 = vpop.f32.mrf.mxu1  ;;  %v16194_v51 = vpop.f32.mrf.mxu3  ;;  %v9527_v15 = vor.u32 %v11392_v32, %v9526_v7 }
 0x685   : > { %v5509_v2 = vadd.f32 %v16101_v26, %v5180_v48  ;;  %v16192_v58 = vadd.f32 %v5888_v4, %v13972_v6  ;;  %v11439_v6 = vld [vmem:[%s18518_s1 + $0x42c] sm:$0xf0]  ;;  %v11371_v26 = vld [vmem:[%s18518_s1 + $0x214] sm:$0xf] }
 0x686   : > { %v5839_v18 = vpop.f32.mrf.mxu0  ;;  %v9711_v41 = vor.u32 %v11439_v6, %v9710_v53  ;;  %v9459_v16 = vor.u32 %v11371_v26, %v9456_v0  ;;  %v7289_v53 = vpop.permute.xlu0 %7288 }
 0x687   : > { %v16196_v36 = vadd.f32 %v5837_v55, %v5509_v2 }
 0x689   : > { %18886 = vst [vmem:[#allocation224_spill] sm:$0xff] %v16196_v36  ;;  %6558 = vmatmul.bf16.gmra.mxu3 %v9527_v15 }
 0x68a   : > { %v5181_v47 = vpop.f32.mrf.mxu2 }
 0x68b   : > { %v5182_v61 = vadd.f32 %v5181_v47, %v15855_v33 }
 0x68c   : > { %v5891_v55 = vpop.f32.mrf.mxu1  ;;  %v16227_v7 = vpop.f32.mrf.mxu3 }
 0x68d   : > { %v5511_v48 = vadd.f32 %v16110_v37, %v5182_v61  ;;  %v16225_v4 = vadd.f32 %v5891_v55, %v13980_v43  ;;  %v9742_v61 = vld [vmem:[%s18518_s1 + $0x450] sm:$0xf] }
 0x68e   : > { %v6838_v2 = vpop.f32.mrf.mxu0  ;;  %v7294_v42 = vpop.permute.xlu0 %7293 }
 0x68f   : > { %v16229_v32 = vadd.f32 %v5839_v18, %v5511_v48  ;;  %5930 = vmatmul.bf16.gmra.mxu1 %v9711_v41  ;;  %6219 = vmatmul.bf16.gmra.mxu2 %v9459_v16  ;;  %v18888_v18 = vld [vmem:[#allocation6_spill] sm:$0xff]  ;;  %v11379_v41 = vld [vmem:[%s18518_s1 + $0x254] sm:$0xf]  ;;  %v11380_v48 = vld [vmem:[%s18518_s1 + $0x25c] sm:$0xf] }
 0x690   : > { %v7926_v38 = vmul.f32 %v7289_v53, %v18888_v18  ;;  %v9488_v16 = vld [vmem:[%s18518_s1 + $0x270] sm:$0xf0] }
 0x691   : > { %18887 = vst [vmem:[#allocation225_spill] sm:$0xff] %v16229_v32  ;;  %6877 = vmatmul.bf16.gmra.mxu0 %v9467_v25 }
 0x692   : > { %v6180_v15 = vpop.f32.mrf.mxu2 }
 0x693   : > { %v6181_v33 = vadd.f32 %v6180_v15, %v15889_v31  ;;  %v9558_v31 = vld [vmem:[%s18518_s1 + $0x2d8] sm:$0xf] }
 0x694   : > { %v5893_v6 = vpop.f32.mrf.mxu1  ;;  %v16236_v0 = vpop.f32.mrf.mxu3 }
 0x695   : > { %v16233_v26 = vadd.f32 %v5893_v6, %v14012_v24  ;;  %v6510_v37 = vadd.f32 %v16143_v20, %v6181_v33  ;;  %v11400_v24 = vld [vmem:[%s18518_s1 + $0x2f4] sm:$0xf0]  ;;  %v11447_v20 = vld [vmem:[%s18518_s1 + $0x46c] sm:$0xf0] }
 0x696   : > { %v6840_v43 = vpop.f32.mrf.mxu0  ;;  %v9559_v55 = vor.u32 %v11400_v24, %v9558_v31  ;;  %v9743_v6 = vor.u32 %v11447_v20, %v9742_v61 }
 0x697   : > { %v6839_v47 = vadd.f32 %v6838_v2, %v6510_v37  ;;  %v9496_v2 = vld [vmem:[%s18518_s1 + $0x278] sm:$0xf0]  ;;  %v9491_v37 = vor.u32 %v11379_v41, %v9488_v16  ;;  %v7299_v41 = vpop.permute.xlu1 %7298 }
 0x698   : > { %v9499_v32 = vor.u32 %v11380_v48, %v9496_v2 }
 0x699   : > { %v8054_v25 = vsub.f32 %v7926_v38, %v6839_v47  ;;  %6563 = vmatmul.bf16.gmra.mxu3 %v9559_v55  ;;  %v7927_v55 = vmul.f32 %v7294_v42, %v18889_v29 }
 0x69a   : > { %v6182_v15 = vpop.f32.mrf.mxu2 }
 0x69b   : > { %v8186_v33 = vadd.f32 %v16239_v40, %v8054_v25  ;;  %v6183_v53 = vadd.f32 %v6182_v15, %v15898_v22 }
 0x69c   : > { %v5896_v18 = vpop.f32.mrf.mxu1  ;;  %v16272_v36 = vpop.f32.mrf.mxu3 }
 0x69d   : > { %v8314_v31 = vmax.f32 %v8186_v33, 0.0  ;;  %v16269_v38 = vadd.f32 %v5896_v18, %v14020_v23  ;;  %v6512_v47 = vadd.f32 %v16152_v12, %v6183_v53  ;;  %v9590_v53 = vld [vmem:[%s18518_s1 + $0x318] sm:$0xf] }
 0x69e   : > { %v6843_v24 = vpop.f32.mrf.mxu0 }
 0x69f   : > { %8698 = vst [vmem:[#allocation3] sm:$0xff] %v8314_v31  ;;  %v6841_v25 = vadd.f32 %v6840_v43, %v6512_v47  ;;  %5935 = vmatmul.bf16.gmra.mxu1 %v9743_v6  ;;  %6224 = vmatmul.bf16.gmra.mxu2 %v9491_v37  ;;  %v18890_v43 = vld [vmem:[#allocation14_spill] sm:$0xff]  ;;  %v11387_v6 = vld [vmem:[%s18518_s1 + $0x294] sm:$0xf]  ;;  %v11388_v47 = vld [vmem:[%s18518_s1 + $0x29c] sm:$0xf] }
 0x6a0   : > { %v7928_v15 = vmul.f32 %v7299_v41, %v18890_v43  ;;  %v9520_v37 = vld [vmem:[%s18518_s1 + $0x2b0] sm:$0xf0] }
 0x6a1   : > { %6882 = vmatmul.bf16.gmra.mxu0 %v9499_v32  ;;  %v8055_v22 = vsub.f32 %v7927_v55, %v6841_v25  ;;  %v9774_v32 = vld [vmem:[%s18518_s1 + $0x490] sm:$0xf] }
 0x6a2   : > { %v6185_v61 = vpop.f32.mrf.mxu2 }
 0x6a3   : > { %v8187_v20 = vadd.f32 %v16239_v40, %v8055_v22  ;;  %v6186_v23 = vadd.f32 %v6185_v61, %v15931_v44 }
 0x6a4   : > { %v5898_v16 = vpop.f32.mrf.mxu1  ;;  %v16281_v42 = vpop.f32.mrf.mxu3 }
 0x6a5   : > { %v8315_v12 = vmax.f32 %v8187_v20, 0.0  ;;  %v16278_v48 = vadd.f32 %v5898_v16, %v14052_v34  ;;  %v6515_v2 = vadd.f32 %v16185_v56, %v6186_v23  ;;  %v11408_v34 = vld [vmem:[%s18518_s1 + $0x334] sm:$0xf0]  ;;  %v11455_v56 = vld [vmem:[%s18518_s1 + $0x4ac] sm:$0xf0]  ;;  %v9523_v20 = vor.u32 %v11387_v6, %v9520_v37  ;;  %v7309_v6 = vpop.permute.xlu2 %7308 }
 0x6a6   : > { %v6845_v29 = vpop.f32.mrf.mxu0  ;;  %v9591_v18 = vor.u32 %v11408_v34, %v9590_v53  ;;  %v9775_v61 = vor.u32 %v11455_v56, %v9774_v32 }
 0x6a7   : > { %v11820_v33 = vpack.c.bf16 %v8315_v12, %v8314_v31  ;;  %8699 = vst [vmem:[#allocation3 + $0x8] sm:$0xff] %v8315_v12  ;;  %v6844_v44 = vadd.f32 %v6843_v24, %v6515_v2  ;;  %v9528_v24 = vld [vmem:[%s18518_s1 + $0x2b8] sm:$0xf0] }
 0x6a8   : > { %v9531_v41 = vor.u32 %v11388_v47, %v9528_v24 }
 0x6a9   : > { %11821 = vst [vmem:[#allocation2] sm:$0xff] %v11820_v33   ;;  %v8056_v31 = vsub.f32 %v7928_v15, %v6844_v44  ;;  %6568 = vmatmul.bf16.gmra.mxu3 %v9591_v18  ;;  %v7304_v33 = vpop.permute.xlu1 %7303  ;;  %v18891_v44 = vld [vmem:[#allocation18_spill] sm:$0xff] }
 0x6aa   : > { %v6187_v55 = vpop.f32.mrf.mxu2  ;;  %v7929_v53 = vmul.f32 %v7304_v33, %v18891_v44 }
 0x6ab   : > { %v8188_v25 = vadd.f32 %v16239_v40, %v8056_v31  ;;  %v6188_v22 = vadd.f32 %v6187_v55, %v15940_v3  ;;  %v18892_v55 = vld [vmem:[#allocation22_spill] sm:$0xff] }
 0x6ac   : > { %v5901_v23 = vpop.f32.mrf.mxu1  ;;  %v16314_v15 = vpop.f32.mrf.mxu3 }
 0x6ad   : > { %v8316_v16 = vmax.f32 %v8188_v25, 0.0  ;;  %v16311_v12 = vadd.f32 %v5901_v23, %v14060_v57  ;;  %v6517_v2 = vadd.f32 %v16194_v51, %v6188_v22  ;;  %v7930_v25 = vmul.f32 %v7309_v6, %v18892_v55  ;;  %v9552_v23 = vld [vmem:[%s18518_s1 + $0x2f0] sm:$0xf0]  ;;  %v18893_v6 = vld [vmem:[#allocation134_spill] sm:$0xff] }
 0x6ae   : > { %v6848_v43 = vpop.f32.mrf.mxu0 }
 0x6af   : > { %8700 = vst [vmem:[#allocation3 + $0x10] sm:$0xff] %v8316_v16  ;;  %v6846_v34 = vadd.f32 %v6845_v29, %v6517_v2  ;;  %5940 = vmatmul.bf16.gmra.mxu1 %v9775_v61  ;;  %6229 = vmatmul.bf16.gmra.mxu2 %v9523_v20  ;;  %v9806_v29 = vld [vmem:[%s18518_s1 + $0x4d0] sm:$0xf]  ;;  %v9622_v61 = vld [vmem:[%s18518_s1 + $0x358] sm:$0xf] }
 0x6b0   : > { %v11395_v20 = vld [vmem:[%s18518_s1 + $0x2d4] sm:$0xf]  ;;  %v11396_v2 = vld [vmem:[%s18518_s1 + $0x2dc] sm:$0xf] }
 0x6b1   : > { %6887 = vmatmul.bf16.gmra.mxu0 %v9531_v41  ;;  %v8057_v3 = vsub.f32 %v7929_v53, %v6846_v34 }
 0x6b2   : > { %v6190_v32 = vpop.f32.mrf.mxu2 }
 0x6b3   : > { %v8189_v56 = vadd.f32 %v16239_v40, %v8057_v3  ;;  %v6191_v57 = vadd.f32 %v6190_v32, %v15973_v10  ;;  %v9555_v3 = vor.u32 %v11395_v20, %v9552_v23 }
 0x6b4   : > { %v5903_v37 = vpop.f32.mrf.mxu1  ;;  %v16323_v24 = vpop.f32.mrf.mxu3 }
 0x6b5   : > { %v8317_v51 = vmax.f32 %v8189_v56, 0.0  ;;  %v16320_v18 = vadd.f32 %v5903_v37, %v14092_v13  ;;  %v6520_v31 = vadd.f32 %v16227_v7, %v6191_v57  ;;  %v11416_v13 = vld [vmem:[%s18518_s1 + $0x374] sm:$0xf0]  ;;  %v11463_v7 = vld [vmem:[%s18518_s1 + $0x4ec] sm:$0xf0] }
 0x6b6   : > { %v6850_v47 = vpop.f32.mrf.mxu0  ;;  %v9623_v41 = vor.u32 %v11416_v13, %v9622_v61  ;;  %v9807_v34 = vor.u32 %v11463_v7, %v9806_v29 }
 0x6b7   : > { %v11825_v22 = vpack.c.bf16 %v8317_v51, %v8316_v16  ;;  %8701 = vst [vmem:[#allocation3 + $0x18] sm:$0xff] %v8317_v51  ;;  %v6849_v10 = vadd.f32 %v6848_v43, %v6520_v31  ;;  %v9560_v43 = vld [vmem:[%s18518_s1 + $0x2f8] sm:$0xf0] }
 0x6b8   : > { %v9563_v56 = vor.u32 %v11396_v2, %v9560_v43 }
 0x6b9   : > { %12137 = vst [vmem:[#allocation2 + $0x8] sm:$0xff] %v11825_v22   ;;  %v8058_v16 = vsub.f32 %v7930_v25, %v6849_v10  ;;  %6573 = vmatmul.bf16.gmra.mxu3 %v9623_v41  ;;  %v7314_v25 = vpop.permute.xlu2 %7313  ;;  %v18894_v22 = vld [vmem:[#allocation26_spill] sm:$0xff] }
 0x6ba   : > { %v6192_v33 = vpop.f32.mrf.mxu2  ;;  %v7931_v10 = vmul.f32 %v7314_v25, %v18894_v22  ;;  %v9592_v25 = vld [vmem:[%s18518_s1 + $0x338] sm:$0xf0] }
 0x6bb   : > { %v8190_v44 = vadd.f32 %v16239_v40, %v8058_v16  ;;  %v6193_v53 = vadd.f32 %v6192_v33, %v15982_v46  ;;  %v9838_v33 = vld [vmem:[%s18518_s1 + $0x510] sm:$0xf] }
 0x6bc   : > { %v5906_v32 = vpop.f32.mrf.mxu1  ;;  %v16356_v55 = vpop.f32.mrf.mxu3 }
 0x6bd   : > { %v8318_v57 = vmax.f32 %v8190_v44, 0.0  ;;  %v16353_v37 = vadd.f32 %v5906_v32, %v18893_v6  ;;  %v6522_v51 = vadd.f32 %v16236_v0, %v6193_v53  ;;  %v18895_v0 = vld [vmem:[#allocation135_spill] sm:$0xff]  ;;  %v18896_v44 = vld [vmem:[#allocation30_spill] sm:$0xff]  ;;  %v11471_v32 = vld [vmem:[%s18518_s1 + $0x52c] sm:$0xf0] }
 0x6be   : > { %v6853_v31 = vpop.f32.mrf.mxu0 }
 0x6bf   : > { %8702 = vst [vmem:[#allocation3 + $0x20] sm:$0xff] %v8318_v57  ;;  %v6851_v61 = vadd.f32 %v6850_v47, %v6522_v51  ;;  %5945 = vmatmul.bf16.gmra.mxu1 %v9807_v34  ;;  %6234 = vmatmul.bf16.gmra.mxu2 %v9555_v3  ;;  %v7319_v47 = vpop.permute.xlu0 %7318  ;;  %v9654_v3 = vld [vmem:[%s18518_s1 + $0x398] sm:$0xf] }
 0x6c0   : > { %v7932_v53 = vmul.f32 %v7319_v47, %v18896_v44 }
 0x6c1   : > { %6892 = vmatmul.bf16.gmra.mxu0 %v9563_v56  ;;  %v8059_v46 = vsub.f32 %v7931_v10, %v6851_v61  ;;  %v11403_v56 = vld [vmem:[%s18518_s1 + $0x314] sm:$0xf] }
 0x6c2   : > { %v6195_v29 = vpop.f32.mrf.mxu2 }
 0x6c3   : > { %v8191_v13 = vadd.f32 %v16239_v40, %v8059_v46  ;;  %v6196_v7 = vadd.f32 %v6195_v29, %v16015_v28  ;;  %v9839_v46 = vor.u32 %v11471_v32, %v9838_v33 }
 0x6c4   : > { %v5908_v20 = vpop.f32.mrf.mxu1  ;;  %v16365_v43 = vpop.f32.mrf.mxu3 }
 0x6c5   : > { %v8319_v23 = vmax.f32 %v8191_v13, 0.0  ;;  %v16362_v41 = vadd.f32 %v5908_v20, %v18895_v0  ;;  %v6525_v16 = vadd.f32 %v16272_v36, %v6196_v7  ;;  %v11424_v36 = vld [vmem:[%s18518_s1 + $0x3b4] sm:$0xf0] }
 0x6c6   : > { %v6855_v2 = vpop.f32.mrf.mxu0  ;;  %v9655_v6 = vor.u32 %v11424_v36, %v9654_v3 }
 0x6c7   : > { %v11830_v34 = vpack.c.bf16 %v8319_v23, %v8318_v57  ;;  %8703 = vst [vmem:[#allocation3 + $0x28] sm:$0xff] %v8319_v23  ;;  %v6854_v28 = vadd.f32 %v6853_v31, %v6525_v16  ;;  %v9584_v57 = vld [vmem:[%s18518_s1 + $0x330] sm:$0xf0]  ;;  %v11404_v31 = vld [vmem:[%s18518_s1 + $0x31c] sm:$0xf] }
 0x6c8   : > { %v9587_v29 = vor.u32 %v11403_v56, %v9584_v57  ;;  %v9595_v7 = vor.u32 %v11404_v31, %v9592_v25  ;;  %v18897_v23 = vld [vmem:[#allocation136_spill] sm:$0xff] }
 0x6c9   : > { %12138 = vst [vmem:[#allocation2 + $0x10] sm:$0xff] %v11830_v34   ;;  %v8060_v51 = vsub.f32 %v7932_v53, %v6854_v28  ;;  %6578 = vmatmul.bf16.gmra.mxu3 %v9655_v6  ;;  %v7324_v53 = vpop.permute.xlu1 %7323  ;;  %v18898_v34 = vld [vmem:[#allocation34_spill] sm:$0xff] }
 0x6ca   : > { %v6197_v22 = vpop.f32.mrf.mxu2  ;;  %v7933_v28 = vmul.f32 %v7324_v53, %v18898_v34  ;;  %v9624_v53 = vld [vmem:[%s18518_s1 + $0x378] sm:$0xf0] }
 0x6cb   : > { %v8192_v10 = vadd.f32 %v16239_v40, %v8060_v51  ;;  %v6198_v61 = vadd.f32 %v6197_v22, %v16024_v11  ;;  %v9870_v22 = vld [vmem:[%s18518_s1 + $0x550] sm:$0xf] }
 0x6cc   : > { %v5911_v13 = vpop.f32.mrf.mxu1  ;;  %v16398_v44 = vpop.f32.mrf.mxu3 }
 0x6cd   : > { %v8320_v20 = vmax.f32 %v8192_v10, 0.0  ;;  %v16395_v0 = vadd.f32 %v5911_v13, %v18897_v23  ;;  %v6527_v16 = vadd.f32 %v16281_v42, %v6198_v61  ;;  %v18899_v42 = vld [vmem:[#allocation137_spill] sm:$0xff]  ;;  %v18900_v10 = vld [vmem:[#allocation38_spill] sm:$0xff]  ;;  %v11479_v13 = vld [vmem:[%s18518_s1 + $0x56c] sm:$0xf0] }
 0x6ce   : > { %v6858_v47 = vpop.f32.mrf.mxu0 }
 0x6cf   : > { %8704 = vst [vmem:[#allocation3 + $0x30] sm:$0xff] %v8320_v20  ;;  %v6856_v3 = vadd.f32 %v6855_v2, %v6527_v16  ;;  %5950 = vmatmul.bf16.gmra.mxu1 %v9839_v46  ;;  %6239 = vmatmul.bf16.gmra.mxu2 %v9587_v29  ;;  %v7329_v2 = vpop.permute.xlu2 %7328  ;;  %v9686_v29 = vld [vmem:[%s18518_s1 + $0x3d8] sm:$0xf] }
 0x6d0   : > { %v7934_v61 = vmul.f32 %v7329_v2, %v18900_v10 }
 0x6d1   : > { %6897 = vmatmul.bf16.gmra.mxu0 %v9595_v7  ;;  %v8061_v11 = vsub.f32 %v7933_v28, %v6856_v3  ;;  %v11411_v7 = vld [vmem:[%s18518_s1 + $0x354] sm:$0xf] }
 0x6d2   : > { %v6200_v33 = vpop.f32.mrf.mxu2 }
 0x6d3   : > { %v8193_v36 = vadd.f32 %v16239_v40, %v8061_v11  ;;  %v6201_v32 = vadd.f32 %v6200_v33, %v16057_v62  ;;  %v9871_v11 = vor.u32 %v11479_v13, %v9870_v22 }
 0x6d4   : > { %v5913_v56 = vpop.f32.mrf.mxu1  ;;  %v16407_v25 = vpop.f32.mrf.mxu3 }
 0x6d5   : > { %v8321_v57 = vmax.f32 %v8193_v36, 0.0  ;;  %v16404_v6 = vadd.f32 %v5913_v56, %v18899_v42  ;;  %v6530_v51 = vadd.f32 %v16314_v15, %v6201_v32  ;;  %v11432_v15 = vld [vmem:[%s18518_s1 + $0x3f4] sm:$0xf0] }
 0x6d6   : > { %v6860_v31 = vpop.f32.mrf.mxu0  ;;  %v9687_v23 = vor.u32 %v11432_v15, %v9686_v29 }
 0x6d7   : > { %v11835_v46 = vpack.c.bf16 %v8321_v57, %v8320_v20  ;;  %8705 = vst [vmem:[#allocation3 + $0x38] sm:$0xff] %v8321_v57  ;;  %v6859_v62 = vadd.f32 %v6858_v47, %v6530_v51  ;;  %v9616_v20 = vld [vmem:[%s18518_s1 + $0x370] sm:$0xf0]  ;;  %v11412_v47 = vld [vmem:[%s18518_s1 + $0x35c] sm:$0xf]  ;;  %v18901_v57 = vld [vmem:[#allocation138_spill] sm:$0xff] }
 0x6d8   : > { %v9619_v33 = vor.u32 %v11411_v7, %v9616_v20  ;;  %v9627_v32 = vor.u32 %v11412_v47, %v9624_v53 }
 0x6d9   : > { %12139 = vst [vmem:[#allocation2 + $0x18] sm:$0xff] %v11835_v46   ;;  %v8062_v16 = vsub.f32 %v7934_v61, %v6859_v62  ;;  %6583 = vmatmul.bf16.gmra.mxu3 %v9687_v23  ;;  %v7334_v61 = vpop.permute.xlu0 %7333  ;;  %v18902_v46 = vld [vmem:[#allocation42_spill] sm:$0xff] }
 0x6da   : > { %v6202_v34 = vpop.f32.mrf.mxu2  ;;  %v7935_v62 = vmul.f32 %v7334_v61, %v18902_v46  ;;  %v9656_v61 = vld [vmem:[%s18518_s1 + $0x3b8] sm:$0xf0] }
 0x6db   : > { %v8194_v28 = vadd.f32 %v16239_v40, %v8062_v16  ;;  %v6203_v3 = vadd.f32 %v6202_v34, %v16066_v30  ;;  %v9902_v34 = vld [vmem:[%s18518_s1 + $0x590] sm:$0xf] }
 0x6dc   : > { %v5916_v36 = vpop.f32.mrf.mxu1  ;;  %v16440_v10 = vpop.f32.mrf.mxu3 }
 0x6dd   : > { %v8322_v56 = vmax.f32 %v8194_v28, 0.0  ;;  %v16437_v42 = vadd.f32 %v5916_v36, %v18901_v57  ;;  %v6532_v51 = vadd.f32 %v16323_v24, %v6203_v3  ;;  %v18903_v24 = vld [vmem:[#allocation139_spill] sm:$0xff]  ;;  %v18904_v28 = vld [vmem:[#allocation46_spill] sm:$0xff]  ;;  %v11487_v36 = vld [vmem:[%s18518_s1 + $0x5ac] sm:$0xf0] }
 0x6de   : > { %v6863_v2 = vpop.f32.mrf.mxu0 }
 0x6df   : > { %8706 = vst [vmem:[#allocation3 + $0x40] sm:$0xff] %v8322_v56  ;;  %v6861_v29 = vadd.f32 %v6860_v31, %v6532_v51  ;;  %5955 = vmatmul.bf16.gmra.mxu1 %v9871_v11  ;;  %6244 = vmatmul.bf16.gmra.mxu2 %v9619_v33  ;;  %v7339_v31 = vpop.permute.xlu1 %7338  ;;  %v9718_v33 = vld [vmem:[%s18518_s1 + $0x418] sm:$0xf] }
 0x6e0   : > { %v7936_v3 = vmul.f32 %v7339_v31, %v18904_v28 }
 0x6e1   : > { %6902 = vmatmul.bf16.gmra.mxu0 %v9627_v32  ;;  %v8063_v30 = vsub.f32 %v7935_v62, %v6861_v29  ;;  %v11419_v32 = vld [vmem:[%s18518_s1 + $0x394] sm:$0xf] }
 0x6e2   : > { %v6205_v22 = vpop.f32.mrf.mxu2 }
 0x6e3   : > { %v8195_v15 = vadd.f32 %v16239_v40, %v8063_v30  ;;  %v6206_v13 = vadd.f32 %v6205_v22, %v16099_v27  ;;  %v9903_v30 = vor.u32 %v11487_v36, %v9902_v34 }
 0x6e4   : > { %v5918_v7 = vpop.f32.mrf.mxu1  ;;  %v16449_v53 = vpop.f32.mrf.mxu3 }
 0x6e5   : > { %v8323_v20 = vmax.f32 %v8195_v15, 0.0  ;;  %v16446_v23 = vadd.f32 %v5918_v7, %v18903_v24  ;;  %v6535_v16 = vadd.f32 %v16356_v55, %v6206_v13  ;;  %v11440_v55 = vld [vmem:[%s18518_s1 + $0x434] sm:$0xf0] }
 0x6e6   : > { %v6865_v47 = vpop.f32.mrf.mxu0  ;;  %v9719_v57 = vor.u32 %v11440_v55, %v9718_v33 }
 0x6e7   : > { %v11840_v11 = vpack.c.bf16 %v8323_v20, %v8322_v56  ;;  %8707 = vst [vmem:[#allocation3 + $0x48] sm:$0xff] %v8323_v20  ;;  %v6864_v27 = vadd.f32 %v6863_v2, %v6535_v16  ;;  %v9648_v56 = vld [vmem:[%s18518_s1 + $0x3b0] sm:$0xf0]  ;;  %v11420_v2 = vld [vmem:[%s18518_s1 + $0x39c] sm:$0xf] }
 0x6e8   : > { %v9651_v22 = vor.u32 %v11419_v32, %v9648_v56  ;;  %v9659_v13 = vor.u32 %v11420_v2, %v9656_v61  ;;  %v18905_v20 = vld [vmem:[#allocation140_spill] sm:$0xff] }
 0x6e9   : > { %12140 = vst [vmem:[#allocation2 + $0x20] sm:$0xff] %v11840_v11   ;;  %v8064_v51 = vsub.f32 %v7936_v3, %v6864_v27  ;;  %6588 = vmatmul.bf16.gmra.mxu3 %v9719_v57  ;;  %v7344_v3 = vpop.permute.xlu2 %7343  ;;  %v18906_v11 = vld [vmem:[#allocation50_spill] sm:$0xff] }
 0x6ea   : > { %v6207_v46 = vpop.f32.mrf.mxu2  ;;  %v7937_v27 = vmul.f32 %v7344_v3, %v18906_v11  ;;  %v9688_v3 = vld [vmem:[%s18518_s1 + $0x3f8] sm:$0xf0] }
 0x6eb   : > { %v8196_v62 = vadd.f32 %v16239_v40, %v8064_v51  ;;  %v6208_v29 = vadd.f32 %v6207_v46, %v16108_v14  ;;  %v9934_v46 = vld [vmem:[%s18518_s1 + $0x5d0] sm:$0xf] }
 0x6ec   : > { %v5921_v15 = vpop.f32.mrf.mxu1  ;;  %v16482_v28 = vpop.f32.mrf.mxu3 }
 0x6ed   : > { %v8324_v7 = vmax.f32 %v8196_v62, 0.0  ;;  %v16479_v24 = vadd.f32 %v5921_v15, %v18905_v20  ;;  %v6537_v16 = vadd.f32 %v16365_v43, %v6208_v29  ;;  %v18907_v43 = vld [vmem:[#allocation141_spill] sm:$0xff]  ;;  %v18908_v62 = vld [vmem:[#allocation54_spill] sm:$0xff]  ;;  %v11495_v15 = vld [vmem:[%s18518_s1 + $0x5ec] sm:$0xf0] }
 0x6ee   : > { %v6868_v31 = vpop.f32.mrf.mxu0 }
 0x6ef   : > { %8708 = vst [vmem:[#allocation3 + $0x50] sm:$0xff] %v8324_v7  ;;  %v6866_v33 = vadd.f32 %v6865_v47, %v6537_v16  ;;  %5960 = vmatmul.bf16.gmra.mxu1 %v9903_v30  ;;  %6249 = vmatmul.bf16.gmra.mxu2 %v9651_v22  ;;  %v7349_v47 = vpop.permute.xlu0 %7348  ;;  %v9750_v22 = vld [vmem:[%s18518_s1 + $0x458] sm:$0xf] }
 0x6f0   : > { %v7938_v29 = vmul.f32 %v7349_v47, %v18908_v62 }
 0x6f1   : > { %6907 = vmatmul.bf16.gmra.mxu0 %v9659_v13  ;;  %v8065_v14 = vsub.f32 %v7937_v27, %v6866_v33  ;;  %v11427_v13 = vld [vmem:[%s18518_s1 + $0x3d4] sm:$0xf] }
 0x6f2   : > { %v6210_v34 = vpop.f32.mrf.mxu2 }
 0x6f3   : > { %v8197_v55 = vadd.f32 %v16239_v40, %v8065_v14  ;;  %v6211_v36 = vadd.f32 %v6210_v34, %v16141_v54  ;;  %v9935_v14 = vor.u32 %v11495_v15, %v9934_v46 }
 0x6f4   : > { %v5923_v32 = vpop.f32.mrf.mxu1  ;;  %v16491_v61 = vpop.f32.mrf.mxu3 }
 0x6f5   : > { %v8325_v56 = vmax.f32 %v8197_v55, 0.0  ;;  %v16488_v57 = vadd.f32 %v5923_v32, %v18907_v43  ;;  %v6540_v51 = vadd.f32 %v16398_v44, %v6211_v36  ;;  %v11448_v44 = vld [vmem:[%s18518_s1 + $0x474] sm:$0xf0] }
 0x6f6   : > { %v6870_v2 = vpop.f32.mrf.mxu0  ;;  %v9751_v20 = vor.u32 %v11448_v44, %v9750_v22 }
 0x6f7   : > { %v11845_v30 = vpack.c.bf16 %v8325_v56, %v8324_v7  ;;  %8709 = vst [vmem:[#allocation3 + $0x58] sm:$0xff] %v8325_v56  ;;  %v6869_v54 = vadd.f32 %v6868_v31, %v6540_v51  ;;  %v9680_v7 = vld [vmem:[%s18518_s1 + $0x3f0] sm:$0xf0]  ;;  %v11428_v31 = vld [vmem:[%s18518_s1 + $0x3dc] sm:$0xf]  ;;  %v18909_v56 = vld [vmem:[#allocation142_spill] sm:$0xff] }
 0x6f8   : > { %v9683_v34 = vor.u32 %v11427_v13, %v9680_v7  ;;  %v9691_v36 = vor.u32 %v11428_v31, %v9688_v3 }
 0x6f9   : > { %12141 = vst [vmem:[#allocation2 + $0x28] sm:$0xff] %v11845_v30   ;;  %v8066_v16 = vsub.f32 %v7938_v29, %v6869_v54  ;;  %6593 = vmatmul.bf16.gmra.mxu3 %v9751_v20  ;;  %v7354_v29 = vpop.permute.xlu1 %7353  ;;  %v18910_v30 = vld [vmem:[#allocation58_spill] sm:$0xff] }
 0x6fa   : > { %v6212_v11 = vpop.f32.mrf.mxu2  ;;  %v7939_v54 = vmul.f32 %v7354_v29, %v18910_v30  ;;  %v9720_v29 = vld [vmem:[%s18518_s1 + $0x438] sm:$0xf0] }
 0x6fb   : > { %v8198_v27 = vadd.f32 %v16239_v40, %v8066_v16  ;;  %v6213_v33 = vadd.f32 %v6212_v11, %v16150_v52  ;;  %v9966_v11 = vld [vmem:[%s18518_s1 + $0x610] sm:$0xf] }
 0x6fc   : > { %v5926_v55 = vpop.f32.mrf.mxu1  ;;  %v16524_v62 = vpop.f32.mrf.mxu3 }
 0x6fd   : > { %v8326_v32 = vmax.f32 %v8198_v27, 0.0  ;;  %v16521_v43 = vadd.f32 %v5926_v55, %v18909_v56  ;;  %v6542_v51 = vadd.f32 %v16407_v25, %v6213_v33  ;;  %v18911_v25 = vld [vmem:[#allocation143_spill] sm:$0xff]  ;;  %v18912_v27 = vld [vmem:[#allocation62_spill] sm:$0xff]  ;;  %v11503_v55 = vld [vmem:[%s18518_s1 + $0x62c] sm:$0xf0] }
 0x6fe   : > { %v6873_v47 = vpop.f32.mrf.mxu0 }
 0x6ff   : > { %8710 = vst [vmem:[#allocation3 + $0x60] sm:$0xff] %v8326_v32  ;;  %v6871_v22 = vadd.f32 %v6870_v2, %v6542_v51  ;;  %5965 = vmatmul.bf16.gmra.mxu1 %v9935_v14  ;;  %6254 = vmatmul.bf16.gmra.mxu2 %v9683_v34  ;;  %v7359_v2 = vpop.permute.xlu2 %7358  ;;  %v9782_v34 = vld [vmem:[%s18518_s1 + $0x498] sm:$0xf] }
 0x700   : > { %v7940_v33 = vmul.f32 %v7359_v2, %v18912_v27 }
 0x701   : > { %6912 = vmatmul.bf16.gmra.mxu0 %v9691_v36  ;;  %v8067_v52 = vsub.f32 %v7939_v54, %v6871_v22  ;;  %v11435_v36 = vld [vmem:[%s18518_s1 + $0x414] sm:$0xf] }
 0x702   : > { %v6215_v46 = vpop.f32.mrf.mxu2 }
 0x703   : > { %v8199_v44 = vadd.f32 %v16239_v40, %v8067_v52  ;;  %v6216_v15 = vadd.f32 %v6215_v46, %v16183_v45  ;;  %v9967_v52 = vor.u32 %v11503_v55, %v9966_v11 }
 0x704   : > { %v5928_v13 = vpop.f32.mrf.mxu1  ;;  %v16533_v3 = vpop.f32.mrf.mxu3 }
 0x705   : > { %v8327_v7 = vmax.f32 %v8199_v44, 0.0  ;;  %v16530_v20 = vadd.f32 %v5928_v13, %v18911_v25  ;;  %v6545_v16 = vadd.f32 %v16440_v10, %v6216_v15  ;;  %v11456_v10 = vld [vmem:[%s18518_s1 + $0x4b4] sm:$0xf0] }
 0x706   : > { %v6875_v31 = vpop.f32.mrf.mxu0  ;;  %v9783_v56 = vor.u32 %v11456_v10, %v9782_v34 }
 0x707   : > { %v11850_v14 = vpack.c.bf16 %v8327_v7, %v8326_v32  ;;  %8711 = vst [vmem:[#allocation3 + $0x68] sm:$0xff] %v8327_v7  ;;  %v6874_v45 = vadd.f32 %v6873_v47, %v6545_v16  ;;  %v9712_v32 = vld [vmem:[%s18518_s1 + $0x430] sm:$0xf0]  ;;  %v11436_v47 = vld [vmem:[%s18518_s1 + $0x41c] sm:$0xf] }
 0x708   : > { %v9715_v46 = vor.u32 %v11435_v36, %v9712_v32  ;;  %v9723_v15 = vor.u32 %v11436_v47, %v9720_v29  ;;  %v18913_v7 = vld [vmem:[#allocation144_spill] sm:$0xff] }
 0x709   : > { %12142 = vst [vmem:[#allocation2 + $0x30] sm:$0xff] %v11850_v14   ;;  %v8068_v51 = vsub.f32 %v7940_v33, %v6874_v45  ;;  %6598 = vmatmul.bf16.gmra.mxu3 %v9783_v56  ;;  %v7364_v33 = vpop.permute.xlu0 %7363  ;;  %v18914_v14 = vld [vmem:[#allocation66_spill] sm:$0xff] }
 0x70a   : > { %v6217_v30 = vpop.f32.mrf.mxu2  ;;  %v7941_v45 = vmul.f32 %v7364_v33, %v18914_v14  ;;  %v9752_v33 = vld [vmem:[%s18518_s1 + $0x478] sm:$0xf0] }
 0x70b   : > { %v8200_v54 = vadd.f32 %v16239_v40, %v8068_v51  ;;  %v6218_v22 = vadd.f32 %v6217_v30, %v16192_v58  ;;  %v9998_v30 = vld [vmem:[%s18518_s1 + $0x650] sm:$0xf] }
 0x70c   : > { %v5931_v44 = vpop.f32.mrf.mxu1  ;;  %v16566_v27 = vpop.f32.mrf.mxu3 }
 0x70d   : > { %v8328_v13 = vmax.f32 %v8200_v54, 0.0  ;;  %v16563_v25 = vadd.f32 %v5931_v44, %v18913_v7  ;;  %v6547_v16 = vadd.f32 %v16449_v53, %v6218_v22  ;;  %v18915_v53 = vld [vmem:[#allocation145_spill] sm:$0xff]  ;;  %v18916_v54 = vld [vmem:[#allocation70_spill] sm:$0xff]  ;;  %v11511_v44 = vld [vmem:[%s18518_s1 + $0x66c] sm:$0xf0] }
 0x70e   : > { %v6878_v2 = vpop.f32.mrf.mxu0 }
 0x70f   : > { %8712 = vst [vmem:[#allocation3 + $0x70] sm:$0xff] %v8328_v13  ;;  %v6876_v34 = vadd.f32 %v6875_v31, %v6547_v16  ;;  %5970 = vmatmul.bf16.gmra.mxu1 %v9967_v52  ;;  %6259 = vmatmul.bf16.gmra.mxu2 %v9715_v46  ;;  %v7369_v31 = vpop.permute.xlu1 %7368  ;;  %v9814_v46 = vld [vmem:[%s18518_s1 + $0x4d8] sm:$0xf] }
 0x710   : > { %v7942_v22 = vmul.f32 %v7369_v31, %v18916_v54 }
 0x711   : > { %6917 = vmatmul.bf16.gmra.mxu0 %v9723_v15  ;;  %v8069_v58 = vsub.f32 %v7941_v45, %v6876_v34  ;;  %v11443_v15 = vld [vmem:[%s18518_s1 + $0x454] sm:$0xf] }
 0x712   : > { %v6220_v11 = vpop.f32.mrf.mxu2 }
 0x713   : > { %v8201_v10 = vadd.f32 %v16239_v40, %v8069_v58  ;;  %v6221_v55 = vadd.f32 %v6220_v11, %v16225_v4  ;;  %v9999_v58 = vor.u32 %v11511_v44, %v9998_v30 }
 0x714   : > { %v5933_v36 = vpop.f32.mrf.mxu1  ;;  %v16575_v29 = vpop.f32.mrf.mxu3 }
 0x715   : > { %v8329_v32 = vmax.f32 %v8201_v10, 0.0  ;;  %v16572_v56 = vadd.f32 %v5933_v36, %v18915_v53  ;;  %v6550_v51 = vadd.f32 %v16482_v28, %v6221_v55  ;;  %v11464_v28 = vld [vmem:[%s18518_s1 + $0x4f4] sm:$0xf0] }
 0x716   : > { %v6880_v47 = vpop.f32.mrf.mxu0  ;;  %v9815_v7 = vor.u32 %v11464_v28, %v9814_v46 }
 0x717   : > { %v11855_v52 = vpack.c.bf16 %v8329_v32, %v8328_v13  ;;  %8713 = vst [vmem:[#allocation3 + $0x78] sm:$0xff] %v8329_v32  ;;  %v6879_v4 = vadd.f32 %v6878_v2, %v6550_v51  ;;  %v9744_v13 = vld [vmem:[%s18518_s1 + $0x470] sm:$0xf0]  ;;  %v11444_v2 = vld [vmem:[%s18518_s1 + $0x45c] sm:$0xf]  ;;  %v18917_v32 = vld [vmem:[#allocation146_spill] sm:$0xff] }
 0x718   : > { %v9747_v11 = vor.u32 %v11443_v15, %v9744_v13  ;;  %v9755_v55 = vor.u32 %v11444_v2, %v9752_v33 }
 0x719   : > { %12143 = vst [vmem:[#allocation2 + $0x38] sm:$0xff] %v11855_v52   ;;  %v8070_v16 = vsub.f32 %v7942_v22, %v6879_v4  ;;  %6603 = vmatmul.bf16.gmra.mxu3 %v9815_v7  ;;  %v7374_v22 = vpop.permute.xlu2 %7373  ;;  %v18918_v52 = vld [vmem:[#allocation74_spill] sm:$0xff] }
 0x71a   : > { %v6222_v14 = vpop.f32.mrf.mxu2  ;;  %v7943_v4 = vmul.f32 %v7374_v22, %v18918_v52  ;;  %v9784_v22 = vld [vmem:[%s18518_s1 + $0x4b8] sm:$0xf0] }
 0x71b   : > { %v8202_v45 = vadd.f32 %v16239_v40, %v8070_v16  ;;  %v6223_v34 = vadd.f32 %v6222_v14, %v16233_v26  ;;  %v10030_v14 = vld [vmem:[%s18518_s1 + $0x690] sm:$0xf] }
 0x71c   : > { %v5936_v10 = vpop.f32.mrf.mxu1  ;;  %v16608_v54 = vpop.f32.mrf.mxu3 }
 0x71d   : > { %v8330_v36 = vmax.f32 %v8202_v45, 0.0  ;;  %v16605_v53 = vadd.f32 %v5936_v10, %v18917_v32  ;;  %v6552_v51 = vadd.f32 %v16491_v61, %v6223_v34  ;;  %v18919_v61 = vld [vmem:[#allocation147_spill] sm:$0xff]  ;;  %v18920_v45 = vld [vmem:[#allocation78_spill] sm:$0xff]  ;;  %v11519_v10 = vld [vmem:[%s18518_s1 + $0x6ac] sm:$0xf0] }
 0x71e   : > { %v6883_v31 = vpop.f32.mrf.mxu0 }
 0x71f   : > { %8714 = vst [vmem:[#allocation3 + $0x80] sm:$0xff] %v8330_v36  ;;  %v6881_v46 = vadd.f32 %v6880_v47, %v6552_v51  ;;  %5975 = vmatmul.bf16.gmra.mxu1 %v9999_v58  ;;  %6264 = vmatmul.bf16.gmra.mxu2 %v9747_v11  ;;  %v7379_v47 = vpop.permute.xlu0 %7378  ;;  %v9846_v11 = vld [vmem:[%s18518_s1 + $0x518] sm:$0xf] }
 0x720   : > { %v7944_v34 = vmul.f32 %v7379_v47, %v18920_v45 }
 0x721   : > { %6922 = vmatmul.bf16.gmra.mxu0 %v9755_v55  ;;  %v8071_v26 = vsub.f32 %v7943_v4, %v6881_v46  ;;  %v11451_v55 = vld [vmem:[%s18518_s1 + $0x494] sm:$0xf] }
 0x722   : > { %v6225_v30 = vpop.f32.mrf.mxu2 }
 0x723   : > { %v8203_v28 = vadd.f32 %v16239_v40, %v8071_v26  ;;  %v6226_v44 = vadd.f32 %v6225_v30, %v16269_v38  ;;  %v10031_v26 = vor.u32 %v11519_v10, %v10030_v14 }
 0x724   : > { %v5938_v15 = vpop.f32.mrf.mxu1  ;;  %v16617_v33 = vpop.f32.mrf.mxu3 }
 0x725   : > { %v8331_v13 = vmax.f32 %v8203_v28, 0.0  ;;  %v16614_v7 = vadd.f32 %v5938_v15, %v18919_v61  ;;  %v6555_v16 = vadd.f32 %v16524_v62, %v6226_v44  ;;  %v11472_v62 = vld [vmem:[%s18518_s1 + $0x534] sm:$0xf0] }
 0x726   : > { %v6885_v2 = vpop.f32.mrf.mxu0  ;;  %v9847_v32 = vor.u32 %v11472_v62, %v9846_v11 }
 0x727   : > { %v11860_v58 = vpack.c.bf16 %v8331_v13, %v8330_v36  ;;  %8715 = vst [vmem:[#allocation3 + $0x88] sm:$0xff] %v8331_v13  ;;  %v6884_v38 = vadd.f32 %v6883_v31, %v6555_v16  ;;  %v9776_v36 = vld [vmem:[%s18518_s1 + $0x4b0] sm:$0xf0]  ;;  %v11452_v31 = vld [vmem:[%s18518_s1 + $0x49c] sm:$0xf] }
 0x728   : > { %v9779_v30 = vor.u32 %v11451_v55, %v9776_v36  ;;  %v9787_v44 = vor.u32 %v11452_v31, %v9784_v22  ;;  %v18921_v13 = vld [vmem:[#allocation148_spill] sm:$0xff] }
 0x729   : > { %12144 = vst [vmem:[#allocation2 + $0x40] sm:$0xff] %v11860_v58   ;;  %v8072_v51 = vsub.f32 %v7944_v34, %v6884_v38  ;;  %6608 = vmatmul.bf16.gmra.mxu3 %v9847_v32  ;;  %v7384_v34 = vpop.permute.xlu1 %7383  ;;  %v18922_v58 = vld [vmem:[#allocation82_spill] sm:$0xff] }
 0x72a   : > { %v6227_v52 = vpop.f32.mrf.mxu2  ;;  %v7945_v38 = vmul.f32 %v7384_v34, %v18922_v58  ;;  %v9816_v34 = vld [vmem:[%s18518_s1 + $0x4f8] sm:$0xf0] }
 0x72b   : > { %v8204_v4 = vadd.f32 %v16239_v40, %v8072_v51  ;;  %v6228_v46 = vadd.f32 %v6227_v52, %v16278_v48  ;;  %v10062_v52 = vld [vmem:[%s18518_s1 + $0x6d0] sm:$0xf] }
 0x72c   : > { %v5941_v28 = vpop.f32.mrf.mxu1  ;;  %v16650_v45 = vpop.f32.mrf.mxu3 }
 0x72d   : > { %v8332_v15 = vmax.f32 %v8204_v4, 0.0  ;;  %v16647_v61 = vadd.f32 %v5941_v28, %v18921_v13  ;;  %v6557_v16 = vadd.f32 %v16533_v3, %v6228_v46  ;;  %v18923_v3 = vld [vmem:[#allocation149_spill] sm:$0xff]  ;;  %v18924_v4 = vld [vmem:[#allocation86_spill] sm:$0xff]  ;;  %v11527_v28 = vld [vmem:[%s18518_s1 + $0x6ec] sm:$0xf0] }
 0x72e   : > { %v6888_v47 = vpop.f32.mrf.mxu0 }
 0x72f   : > { %8716 = vst [vmem:[#allocation3 + $0x90] sm:$0xff] %v8332_v15  ;;  %v6886_v11 = vadd.f32 %v6885_v2, %v6557_v16  ;;  %5980 = vmatmul.bf16.gmra.mxu1 %v10031_v26  ;;  %6269 = vmatmul.bf16.gmra.mxu2 %v9779_v30  ;;  %v7389_v2 = vpop.permute.xlu2 %7388  ;;  %v9878_v30 = vld [vmem:[%s18518_s1 + $0x558] sm:$0xf] }
 0x730   : > { %v7946_v46 = vmul.f32 %v7389_v2, %v18924_v4 }
 0x731   : > { %6927 = vmatmul.bf16.gmra.mxu0 %v9787_v44  ;;  %v8073_v48 = vsub.f32 %v7945_v38, %v6886_v11  ;;  %v11459_v44 = vld [vmem:[%s18518_s1 + $0x4d4] sm:$0xf] }
 0x732   : > { %v6230_v14 = vpop.f32.mrf.mxu2 }
 0x733   : > { %v8205_v62 = vadd.f32 %v16239_v40, %v8073_v48  ;;  %v6231_v10 = vadd.f32 %v6230_v14, %v16311_v12  ;;  %v10063_v48 = vor.u32 %v11527_v28, %v10062_v52 }
 0x734   : > { %v5943_v55 = vpop.f32.mrf.mxu1  ;;  %v16659_v22 = vpop.f32.mrf.mxu3 }
 0x735   : > { %v8333_v36 = vmax.f32 %v8205_v62, 0.0  ;;  %v16656_v32 = vadd.f32 %v5943_v55, %v18923_v3  ;;  %v6560_v51 = vadd.f32 %v16566_v27, %v6231_v10  ;;  %v11480_v27 = vld [vmem:[%s18518_s1 + $0x574] sm:$0xf0] }
 0x736   : > { %v6890_v31 = vpop.f32.mrf.mxu0  ;;  %v9879_v13 = vor.u32 %v11480_v27, %v9878_v30 }
 0x737   : > { %v11865_v26 = vpack.c.bf16 %v8333_v36, %v8332_v15  ;;  %8717 = vst [vmem:[#allocation3 + $0x98] sm:$0xff] %v8333_v36  ;;  %v6889_v12 = vadd.f32 %v6888_v47, %v6560_v51  ;;  %v9808_v15 = vld [vmem:[%s18518_s1 + $0x4f0] sm:$0xf0]  ;;  %v11460_v47 = vld [vmem:[%s18518_s1 + $0x4dc] sm:$0xf]  ;;  %v18925_v36 = vld [vmem:[#allocation150_spill] sm:$0xff] }
 0x738   : > { %v9811_v14 = vor.u32 %v11459_v44, %v9808_v15  ;;  %v9819_v10 = vor.u32 %v11460_v47, %v9816_v34 }
 0x739   : > { %12145 = vst [vmem:[#allocation2 + $0x48] sm:$0xff] %v11865_v26   ;;  %v8074_v16 = vsub.f32 %v7946_v46, %v6889_v12  ;;  %6613 = vmatmul.bf16.gmra.mxu3 %v9879_v13  ;;  %v7394_v46 = vpop.permute.xlu0 %7393  ;;  %v18926_v26 = vld [vmem:[#allocation90_spill] sm:$0xff] }
 0x73a   : > { %v6232_v58 = vpop.f32.mrf.mxu2  ;;  %v7947_v12 = vmul.f32 %v7394_v46, %v18926_v26  ;;  %v16729_v26 = vld [vmem:[%s12340_s24] ss:$0 sm:$0xff] }
 0x73b   : > { %v8206_v38 = vadd.f32 %v16239_v40, %v8074_v16  ;;  %v6233_v11 = vadd.f32 %v6232_v58, %v16320_v18  ;;  %v10094_v58 = vld [vmem:[%s18518_s1 + $0x710] sm:$0xf] }
 0x73c   : > { %v5946_v62 = vpop.f32.mrf.mxu1  ;;  %v16692_v4 = vpop.f32.mrf.mxu3 }
 0x73d   : > { %v8334_v55 = vmax.f32 %v8206_v38, 0.0  ;;  %v16689_v3 = vadd.f32 %v5946_v62, %v18925_v36  ;;  %v6562_v51 = vadd.f32 %v16575_v29, %v6233_v11  ;;  %v18927_v29 = vld [vmem:[#allocation151_spill] sm:$0xff]  ;;  %v18928_v38 = vld [vmem:[#allocation94_spill] sm:$0xff]  ;;  %v11467_v62 = vld [vmem:[%s18518_s1 + $0x514] sm:$0xf] }
 0x73e   : > { %v6893_v2 = vpop.f32.mrf.mxu0 }
 0x73f   : > { %8718 = vst [vmem:[#allocation3 + $0xa0] sm:$0xff] %v8334_v55  ;;  %v6891_v30 = vadd.f32 %v6890_v31, %v6562_v51  ;;  %5985 = vmatmul.bf16.gmra.mxu1 %v10063_v48  ;;  %6274 = vmatmul.bf16.gmra.mxu2 %v9811_v14  ;;  %v7399_v31 = vpop.permute.xlu1 %7398  ;;  %v9910_v48 = vld [vmem:[%s18518_s1 + $0x598] sm:$0xf]  ;;  %v11535_v14 = vld [vmem:[%s18518_s1 + $0x72c] sm:$0xf0] }
 0x740   : > { %v7948_v11 = vmul.f32 %v7399_v31, %v18928_v38  ;;  %v11468_v51 = vld [vmem:[%s18518_s1 + $0x51c] sm:$0xf] }
 0x741   : > { %6932 = vmatmul.bf16.gmra.mxu0 %v9819_v10  ;;  %v8075_v18 = vsub.f32 %v7947_v12, %v6891_v30  ;;  %v9840_v10 = vld [vmem:[%s18518_s1 + $0x530] sm:$0xf0] }
 0x742   : > { %v6235_v52 = vpop.f32.mrf.mxu2 }
 0x743   : > { %v8207_v27 = vadd.f32 %v16239_v40, %v8075_v18  ;;  %v6236_v28 = vadd.f32 %v6235_v52, %v16353_v37  ;;  %v10095_v18 = vor.u32 %v11535_v14, %v10094_v58  ;;  %v9843_v52 = vor.u32 %v11467_v62, %v9840_v10 }
 0x744   : > { %v5948_v44 = vpop.f32.mrf.mxu1  ;;  %v16701_v34 = vpop.f32.mrf.mxu3 }
 0x745   : > { %v8335_v15 = vmax.f32 %v8207_v27, 0.0  ;;  %v16698_v13 = vadd.f32 %v5948_v44, %v18927_v29  ;;  %v6565_v16 = vadd.f32 %v16608_v54, %v6236_v28  ;;  %v11488_v54 = vld [vmem:[%s18518_s1 + $0x5b4] sm:$0xf0] }
 0x746   : > { %v6895_v47 = vpop.f32.mrf.mxu0 }
 0x747   : > { %v11870_v40 = vpack.c.bf16 %v8335_v15, %v8334_v55  ;;  %8719 = vst [vmem:[#allocation3 + $0xa8] sm:$0xff] %v8335_v15  ;;  %v6894_v37 = vadd.f32 %v6893_v2, %v6565_v16  ;;  %v9911_v55 = vor.u32 %v11488_v54, %v9910_v48  ;;  %v9848_v2 = vld [vmem:[%s18518_s1 + $0x538] sm:$0xf0]  ;;  %v18929_v15 = vld [vmem:[#allocation152_spill] sm:$0xff] }
 0x748   : > { %v9851_v28 = vor.u32 %v11468_v51, %v9848_v2 }
 0x749   : > { %12146 = vst [vmem:[#allocation2 + $0x50] sm:$0xff] %v11870_v40   ;;  %v8076_v36 = vsub.f32 %v7948_v11, %v6894_v37  ;;  %6618 = vmatmul.bf16.gmra.mxu3 %v9911_v55  ;;  %v7404_v11 = vpop.permute.xlu2 %7403  ;;  %v18930_v40 = vld [vmem:[#allocation98_spill] sm:$0xff] }
 0x74a   : > { %v6237_v46 = vpop.f32.mrf.mxu2  ;;  %v7949_v37 = vmul.f32 %v7404_v11, %v18930_v40  ;;  %v9880_v11 = vld [vmem:[%s18518_s1 + $0x578] sm:$0xf0] }
 0x74b   : > { %v8208_v12 = vadd.f32 %v16729_v26, %v8076_v36  ;;  %v6238_v30 = vadd.f32 %v6237_v46, %v16362_v41  ;;  %v10126_v46 = vld [vmem:[%s18518_s1 + $0x750] sm:$0xf] }
 0x74c   : > { %v5951_v27 = vpop.f32.mrf.mxu1  ;;  %v16737_v38 = vpop.f32.mrf.mxu3 }
 0x74d   : > { %v8336_v44 = vmax.f32 %v8208_v12, 0.0  ;;  %v16734_v29 = vadd.f32 %v5951_v27, %v18929_v15  ;;  %v6567_v16 = vadd.f32 %v16617_v33, %v6238_v30  ;;  %v18931_v33 = vld [vmem:[#allocation153_spill] sm:$0xff]  ;;  %v18932_v12 = vld [vmem:[#allocation100_spill] sm:$0xff] }
 0x74e   : > { %v6898_v31 = vpop.f32.mrf.mxu0  ;;  %v11543_v27 = vld [vmem:[%s18518_s1 + $0x76c] sm:$0xf0] }
 0x74f   : > { %8720 = vst [vmem:[#allocation3 + $0xb0] sm:$0xff] %v8336_v44  ;;  %v6896_v48 = vadd.f32 %v6895_v47, %v6567_v16  ;;  %5990 = vmatmul.bf16.gmra.mxu1 %v10095_v18  ;;  %6279 = vmatmul.bf16.gmra.mxu2 %v9843_v52  ;;  %v7409_v47 = vpop.permute.xlu0 %7408  ;;  %v9942_v52 = vld [vmem:[%s18518_s1 + $0x5d8] sm:$0xf] }
 0x750   : > { %v7950_v30 = vmul.f32 %v7409_v47, %v18932_v12 }
 0x751   : > { %6937 = vmatmul.bf16.gmra.mxu0 %v9851_v28  ;;  %v8077_v41 = vsub.f32 %v7949_v37, %v6896_v48  ;;  %v11475_v28 = vld [vmem:[%s18518_s1 + $0x554] sm:$0xf] }
 0x752   : > { %v6240_v58 = vpop.f32.mrf.mxu2 }
 0x753   : > { %v8209_v54 = vadd.f32 %v16729_v26, %v8077_v41  ;;  %v6241_v14 = vadd.f32 %v6240_v58, %v16395_v0  ;;  %v10127_v41 = vor.u32 %v11543_v27, %v10126_v46 }
 0x754   : > { %v5953_v62 = vpop.f32.mrf.mxu1  ;;  %v16746_v2 = vpop.f32.mrf.mxu3 }
 0x755   : > { %v8337_v10 = vmax.f32 %v8209_v54, 0.0  ;;  %v16743_v55 = vadd.f32 %v5953_v62, %v18931_v33  ;;  %v6570_v36 = vadd.f32 %v16650_v45, %v6241_v14  ;;  %v11496_v45 = vld [vmem:[%s18518_s1 + $0x5f4] sm:$0xf0] }
 0x756   : > { %v6900_v51 = vpop.f32.mrf.mxu0  ;;  %v9943_v15 = vor.u32 %v11496_v45, %v9942_v52 }
 0x757   : > { %v11875_v18 = vpack.c.bf16 %v8337_v10, %v8336_v44  ;;  %8721 = vst [vmem:[#allocation3 + $0xb8] sm:$0xff] %v8337_v10  ;;  %v6899_v0 = vadd.f32 %v6898_v31, %v6570_v36  ;;  %v9872_v44 = vld [vmem:[%s18518_s1 + $0x570] sm:$0xf0]  ;;  %v11476_v31 = vld [vmem:[%s18518_s1 + $0x55c] sm:$0xf]  ;;  %v18933_v10 = vld [vmem:[#allocation154_spill] sm:$0xff] }
 0x758   : > { %v9875_v58 = vor.u32 %v11475_v28, %v9872_v44  ;;  %v9883_v14 = vor.u32 %v11476_v31, %v9880_v11 }
 0x759   : > { %12147 = vst [vmem:[#allocation2 + $0x58] sm:$0xff] %v11875_v18   ;;  %v8078_v16 = vsub.f32 %v7950_v30, %v6899_v0  ;;  %6623 = vmatmul.bf16.gmra.mxu3 %v9943_v15  ;;  %v7414_v30 = vpop.permute.xlu1 %7413  ;;  %v18934_v18 = vld [vmem:[#allocation104_spill] sm:$0xff] }
 0x75a   : > { %v6242_v40 = vpop.f32.mrf.mxu2  ;;  %v7951_v0 = vmul.f32 %v7414_v30, %v18934_v18  ;;  %v9912_v30 = vld [vmem:[%s18518_s1 + $0x5b8] sm:$0xf0] }
 0x75b   : > { %v8210_v37 = vadd.f32 %v16729_v26, %v8078_v16  ;;  %v6243_v48 = vadd.f32 %v6242_v40, %v16404_v6  ;;  %v10158_v40 = vld [vmem:[%s18518_s1 + $0x790] sm:$0xf] }
 0x75c   : > { %v5956_v54 = vpop.f32.mrf.mxu1  ;;  %v16779_v12 = vpop.f32.mrf.mxu3 }
 0x75d   : > { %v8338_v62 = vmax.f32 %v8210_v37, 0.0  ;;  %v16776_v33 = vadd.f32 %v5956_v54, %v18933_v10  ;;  %v6572_v36 = vadd.f32 %v16659_v22, %v6243_v48  ;;  %v18935_v22 = vld [vmem:[#allocation155_spill] sm:$0xff]  ;;  %v18936_v37 = vld [vmem:[#allocation108_spill] sm:$0xff] }
 0x75e   : > { %v6903_v47 = vpop.f32.mrf.mxu0  ;;  %v11551_v54 = vld [vmem:[%s18518_s1 + $0x7ac] sm:$0xf0] }
 0x75f   : > { %8722 = vst [vmem:[#allocation3 + $0xc0] sm:$0xff] %v8338_v62  ;;  %v6901_v52 = vadd.f32 %v6900_v51, %v6572_v36  ;;  %5995 = vmatmul.bf16.gmra.mxu1 %v10127_v41  ;;  %6284 = vmatmul.bf16.gmra.mxu2 %v9875_v58  ;;  %v7419_v51 = vpop.permute.xlu2 %7418  ;;  %v9974_v58 = vld [vmem:[%s18518_s1 + $0x618] sm:$0xf] }
 0x760   : > { %v7952_v48 = vmul.f32 %v7419_v51, %v18936_v37 }
 0x761   : > { %6942 = vmatmul.bf16.gmra.mxu0 %v9883_v14  ;;  %v8079_v6 = vsub.f32 %v7951_v0, %v6901_v52  ;;  %v11483_v14 = vld [vmem:[%s18518_s1 + $0x594] sm:$0xf] }
 0x762   : > { %v6245_v46 = vpop.f32.mrf.mxu2 }
 0x763   : > { %v8211_v45 = vadd.f32 %v16729_v26, %v8079_v6  ;;  %v6246_v27 = vadd.f32 %v6245_v46, %v16437_v42  ;;  %v10159_v6 = vor.u32 %v11551_v54, %v10158_v40 }
 0x764   : > { %v5958_v28 = vpop.f32.mrf.mxu1  ;;  %v16788_v11 = vpop.f32.mrf.mxu3 }
 0x765   : > { %v8339_v44 = vmax.f32 %v8211_v45, 0.0  ;;  %v16785_v15 = vadd.f32 %v5958_v28, %v18935_v22  ;;  %v6575_v16 = vadd.f32 %v16692_v4, %v6246_v27  ;;  %v11504_v4 = vld [vmem:[%s18518_s1 + $0x634] sm:$0xf0] }
 0x766   : > { %v6905_v31 = vpop.f32.mrf.mxu0  ;;  %v9975_v10 = vor.u32 %v11504_v4, %v9974_v58 }
 0x767   : > { %v11880_v41 = vpack.c.bf16 %v8339_v44, %v8338_v62  ;;  %8723 = vst [vmem:[#allocation3 + $0xc8] sm:$0xff] %v8339_v44  ;;  %v6904_v42 = vadd.f32 %v6903_v47, %v6575_v16  ;;  %v9904_v62 = vld [vmem:[%s18518_s1 + $0x5b0] sm:$0xf0]  ;;  %v11484_v47 = vld [vmem:[%s18518_s1 + $0x59c] sm:$0xf] }
 0x768   : > { %v9907_v46 = vor.u32 %v11483_v14, %v9904_v62  ;;  %v9915_v27 = vor.u32 %v11484_v47, %v9912_v30  ;;  %v18937_v44 = vld [vmem:[#allocation156_spill] sm:$0xff] }
 0x769   : > { %12148 = vst [vmem:[#allocation2 + $0x60] sm:$0xff] %v11880_v41   ;;  %v8080_v36 = vsub.f32 %v7952_v48, %v6904_v42  ;;  %6628 = vmatmul.bf16.gmra.mxu3 %v9975_v10  ;;  %v7424_v48 = vpop.permute.xlu0 %7423  ;;  %v18938_v41 = vld [vmem:[#allocation112_spill] sm:$0xff] }
 0x76a   : > { %v6247_v18 = vpop.f32.mrf.mxu2  ;;  %v7953_v42 = vmul.f32 %v7424_v48, %v18938_v41  ;;  %v9944_v48 = vld [vmem:[%s18518_s1 + $0x5f8] sm:$0xf0] }
 0x76b   : > { %v8212_v0 = vadd.f32 %v16729_v26, %v8080_v36  ;;  %v6248_v52 = vadd.f32 %v6247_v18, %v16446_v23  ;;  %v10190_v18 = vld [vmem:[%s18518_s1 + $0x7d0] sm:$0xf] }
 0x76c   : > { %v5961_v45 = vpop.f32.mrf.mxu1  ;;  %v16821_v37 = vpop.f32.mrf.mxu3 }
 0x76d   : > { %v8340_v28 = vmax.f32 %v8212_v0, 0.0  ;;  %v16818_v22 = vadd.f32 %v5961_v45, %v18937_v44  ;;  %v6577_v16 = vadd.f32 %v16701_v34, %v6248_v52  ;;  %v18939_v34 = vld [vmem:[#allocation157_spill] sm:$0xff]  ;;  %v18940_v0 = vld [vmem:[#allocation116_spill] sm:$0xff] }
 0x76e   : > { %v6908_v51 = vpop.f32.mrf.mxu0  ;;  %v11559_v45 = vld [vmem:[%s18518_s1 + $0x7ec] sm:$0xf0] }
 0x76f   : > { %8724 = vst [vmem:[#allocation3 + $0xd0] sm:$0xff] %v8340_v28  ;;  %v6906_v58 = vadd.f32 %v6905_v31, %v6577_v16  ;;  %6000 = vmatmul.bf16.gmra.mxu1 %v10159_v6  ;;  %6289 = vmatmul.bf16.gmra.mxu2 %v9907_v46  ;;  %v7429_v31 = vpop.permute.xlu1 %7428  ;;  %v10006_v46 = vld [vmem:[%s18518_s1 + $0x658] sm:$0xf] }
 0x770   : > { %v7954_v52 = vmul.f32 %v7429_v31, %v18940_v0 }
 0x771   : > { %6947 = vmatmul.bf16.gmra.mxu0 %v9915_v27  ;;  %v8081_v23 = vsub.f32 %v7953_v42, %v6906_v58  ;;  %v11491_v27 = vld [vmem:[%s18518_s1 + $0x5d4] sm:$0xf] }
 0x772   : > { %v6250_v40 = vpop.f32.mrf.mxu2 }
 0x773   : > { %v8213_v4 = vadd.f32 %v16729_v26, %v8081_v23  ;;  %v6251_v54 = vadd.f32 %v6250_v40, %v16479_v24  ;;  %v10191_v23 = vor.u32 %v11559_v45, %v10190_v18 }
 0x774   : > { %v5963_v14 = vpop.f32.mrf.mxu1  ;;  %v16830_v30 = vpop.f32.mrf.mxu3 }
 0x775   : > { %v8341_v62 = vmax.f32 %v8213_v4, 0.0  ;;  %v16827_v10 = vadd.f32 %v5963_v14, %v18939_v34  ;;  %v6580_v36 = vadd.f32 %v16737_v38, %v6251_v54  ;;  %v11512_v38 = vld [vmem:[%s18518_s1 + $0x674] sm:$0xf0] }
 0x776   : > { %v6910_v47 = vpop.f32.mrf.mxu0  ;;  %v10007_v44 = vor.u32 %v11512_v38, %v10006_v46 }
 0x777   : > { %v11885_v6 = vpack.c.bf16 %v8341_v62, %v8340_v28  ;;  %8725 = vst [vmem:[#allocation3 + $0xd8] sm:$0xff] %v8341_v62  ;;  %v6909_v24 = vadd.f32 %v6908_v51, %v6580_v36  ;;  %v9936_v28 = vld [vmem:[%s18518_s1 + $0x5f0] sm:$0xf0]  ;;  %v11492_v51 = vld [vmem:[%s18518_s1 + $0x5dc] sm:$0xf]  ;;  %v18941_v62 = vld [vmem:[#allocation158_spill] sm:$0xff] }
 0x778   : > { %v9939_v40 = vor.u32 %v11491_v27, %v9936_v28  ;;  %v9947_v54 = vor.u32 %v11492_v51, %v9944_v48 }
 0x779   : > { %12149 = vst [vmem:[#allocation2 + $0x68] sm:$0xff] %v11885_v6   ;;  %v8082_v16 = vsub.f32 %v7954_v52, %v6909_v24  ;;  %6633 = vmatmul.bf16.gmra.mxu3 %v10007_v44  ;;  %v7434_v52 = vpop.permute.xlu2 %7433  ;;  %v18942_v6 = vld [vmem:[#allocation118_spill] sm:$0xff] }
 0x77a   : > { %v6252_v41 = vpop.f32.mrf.mxu2  ;;  %v7955_v24 = vmul.f32 %v7434_v52, %v18942_v6  ;;  %v9976_v52 = vld [vmem:[%s18518_s1 + $0x638] sm:$0xf0] }
 0x77b   : > { %v8214_v42 = vadd.f32 %v16729_v26, %v8082_v16  ;;  %v6253_v58 = vadd.f32 %v6252_v41, %v16488_v57  ;;  %v10222_v41 = vld [vmem:[%s18518_s1 + $0x810] sm:$0xf] }
 0x77c   : > { %v5966_v4 = vpop.f32.mrf.mxu1  ;;  %v16863_v0 = vpop.f32.mrf.mxu3 }
 0x77d   : > { %v8342_v14 = vmax.f32 %v8214_v42, 0.0  ;;  %v16860_v34 = vadd.f32 %v5966_v4, %v18941_v62  ;;  %v6582_v36 = vadd.f32 %v16746_v2, %v6253_v58  ;;  %v18943_v2 = vld [vmem:[#allocation159_spill] sm:$0xff]  ;;  %v18944_v42 = vld [vmem:[#allocation122_spill] sm:$0xff]  ;;  %v11567_v4 = vld [vmem:[%s18518_s1 + $0x82c] sm:$0xf0] }
 0x77e   : > { %v6913_v31 = vpop.f32.mrf.mxu0 }
 0x77f   : > { %8726 = vst [vmem:[#allocation3 + $0xe0] sm:$0xff] %v8342_v14  ;;  %v6911_v46 = vadd.f32 %v6910_v47, %v6582_v36  ;;  %6005 = vmatmul.bf16.gmra.mxu1 %v10191_v23  ;;  %6294 = vmatmul.bf16.gmra.mxu2 %v9939_v40  ;;  %v7439_v47 = vpop.permute.xlu0 %7438  ;;  %v10038_v40 = vld [vmem:[%s18518_s1 + $0x698] sm:$0xf] }
 0x780   : > { %v7956_v58 = vmul.f32 %v7439_v47, %v18944_v42 }
 0x781   : > { %6952 = vmatmul.bf16.gmra.mxu0 %v9947_v54  ;;  %v8083_v57 = vsub.f32 %v7955_v24, %v6911_v46  ;;  %v11499_v54 = vld [vmem:[%s18518_s1 + $0x614] sm:$0xf] }
 0x782   : > { %v6255_v18 = vpop.f32.mrf.mxu2 }
 0x783   : > { %v8215_v38 = vadd.f32 %v16729_v26, %v8083_v57  ;;  %v6256_v45 = vadd.f32 %v6255_v18, %v16521_v43  ;;  %v10223_v57 = vor.u32 %v11567_v4, %v10222_v41 }
 0x784   : > { %v5968_v27 = vpop.f32.mrf.mxu1  ;;  %v16872_v48 = vpop.f32.mrf.mxu3 }
 0x785   : > { %v8343_v28 = vmax.f32 %v8215_v38, 0.0  ;;  %v16869_v44 = vadd.f32 %v5968_v27, %v18943_v2  ;;  %v6585_v16 = vadd.f32 %v16779_v12, %v6256_v45  ;;  %v11520_v12 = vld [vmem:[%s18518_s1 + $0x6b4] sm:$0xf0] }
 0x786   : > { %v6915_v51 = vpop.f32.mrf.mxu0  ;;  %v10039_v62 = vor.u32 %v11520_v12, %v10038_v40 }
 0x787   : > { %v11890_v23 = vpack.c.bf16 %v8343_v28, %v8342_v14  ;;  %8727 = vst [vmem:[#allocation3 + $0xe8] sm:$0xff] %v8343_v28  ;;  %v6914_v43 = vadd.f32 %v6913_v31, %v6585_v16  ;;  %v9968_v14 = vld [vmem:[%s18518_s1 + $0x630] sm:$0xf0]  ;;  %v11500_v31 = vld [vmem:[%s18518_s1 + $0x61c] sm:$0xf] }
 0x788   : > { %v9971_v18 = vor.u32 %v11499_v54, %v9968_v14  ;;  %v9979_v45 = vor.u32 %v11500_v31, %v9976_v52  ;;  %v18945_v28 = vld [vmem:[#allocation160_spill] sm:$0xff]  ;;  %v7449_v54 = vpop.permute.xlu2 %7448 }
 0x789   : > { %12150 = vst [vmem:[#allocation2 + $0x70] sm:$0xff] %v11890_v23   ;;  %v8084_v36 = vsub.f32 %v7956_v58, %v6914_v43  ;;  %6638 = vmatmul.bf16.gmra.mxu3 %v10039_v62  ;;  %v7444_v58 = vpop.permute.xlu1 %7443  ;;  %v18946_v23 = vld [vmem:[#allocation126_spill] sm:$0xff]  ;;  %v18947_v62 = vld [vmem:[#allocation161_spill] sm:$0xff] }
 0x78a   : > { %v6257_v6 = vpop.f32.mrf.mxu2  ;;  %v7957_v43 = vmul.f32 %v7444_v58, %v18946_v23  ;;  %v10008_v58 = vld [vmem:[%s18518_s1 + $0x678] sm:$0xf0] }
 0x78b   : > { %v8216_v24 = vadd.f32 %v16729_v26, %v8084_v36  ;;  %v6258_v46 = vadd.f32 %v6257_v6, %v16530_v20 }
 0x78c   : > { %v5971_v38 = vpop.f32.mrf.mxu1  ;;  %v16905_v42 = vpop.f32.mrf.mxu3 }
 0x78d   : > { %v8344_v27 = vmax.f32 %v8216_v24, 0.0  ;;  %v16902_v2 = vadd.f32 %v5971_v38, %v18945_v28  ;;  %v6587_v16 = vadd.f32 %v16788_v11, %v6258_v46  ;;  %v18948_v24 = vld [vmem:[#allocation7_spill] sm:$0xff]  ;;  %v11575_v38 = vld [vmem:[%s18518_s1 + $0x86c] sm:$0xf0] }
 0x78e   : > { %v6918_v47 = vpop.f32.mrf.mxu0  ;;  %v7958_v46 = vmul.f32 %v7449_v54, %v18948_v24 }
 0x78f   : > { %8728 = vst [vmem:[#allocation3 + $0xf0] sm:$0xff] %v8344_v27  ;;  %v6916_v40 = vadd.f32 %v6915_v51, %v6587_v16  ;;  %6010 = vmatmul.bf16.gmra.mxu1 %v10223_v57  ;;  %6299 = vmatmul.bf16.gmra.mxu2 %v9971_v18  ;;  %v10254_v51 = vld [vmem:[%s18518_s1 + $0x850] sm:$0xf]  ;;  %v10070_v18 = vld [vmem:[%s18518_s1 + $0x6d8] sm:$0xf] }
 0x791   : > { %6957 = vmatmul.bf16.gmra.mxu0 %v9979_v45  ;;  %v8085_v20 = vsub.f32 %v7957_v43, %v6916_v40  ;;  %v11507_v45 = vld [vmem:[%s18518_s1 + $0x654] sm:$0xf] }
 0x792   : > { %v6260_v41 = vpop.f32.mrf.mxu2 }
 0x793   : > { %v8217_v12 = vadd.f32 %v16729_v26, %v8085_v20  ;;  %v6261_v4 = vadd.f32 %v6260_v41, %v16563_v25  ;;  %v10255_v20 = vor.u32 %v11575_v38, %v10254_v51 }
 0x794   : > { %v5973_v14 = vpop.f32.mrf.mxu1  ;;  %v16914_v6 = vpop.f32.mrf.mxu3 }
 0x795   : > { %v8345_v11 = vmax.f32 %v8217_v12, 0.0  ;;  %v16911_v36 = vadd.f32 %v5973_v14, %v18947_v62  ;;  %v6590_v31 = vadd.f32 %v16821_v37, %v6261_v4  ;;  %v11528_v37 = vld [vmem:[%s18518_s1 + $0x6f4] sm:$0xf0]  ;;  %v7454_v12 = vpop.permute.xlu0 %7453 }
 0x796   : > { %v6920_v52 = vpop.f32.mrf.mxu0  ;;  %v10071_v28 = vor.u32 %v11528_v37, %v10070_v18 }
 0x797   : > { %v11895_v57 = vpack.c.bf16 %v8345_v11, %v8344_v27  ;;  %8729 = vst [vmem:[#allocation3 + $0xf8] sm:$0xff] %v8345_v11  ;;  %v6919_v25 = vadd.f32 %v6918_v47, %v6590_v31  ;;  %v10000_v27 = vld [vmem:[%s18518_s1 + $0x670] sm:$0xf0]  ;;  %v11508_v47 = vld [vmem:[%s18518_s1 + $0x65c] sm:$0xf]  ;;  %v18949_v11 = vld [vmem:[#allocation162_spill] sm:$0xff] }
 0x798   : > { %v10003_v41 = vor.u32 %v11507_v45, %v10000_v27  ;;  %v10011_v54 = vor.u32 %v11508_v47, %v10008_v58  ;;  %v7459_v45 = vpop.permute.xlu1 %7458 }
 0x799   : > { %12151 = vst [vmem:[#allocation2 + $0x78] sm:$0xff] %v11895_v57   ;;  %v8086_v16 = vsub.f32 %v7958_v46, %v6919_v25  ;;  %6643 = vmatmul.bf16.gmra.mxu3 %v10071_v28  ;;  %v18950_v57 = vld [vmem:[#allocation11_spill] sm:$0xff] }
 0x79a   : > { %v6262_v23 = vpop.f32.mrf.mxu2  ;;  %v7959_v25 = vmul.f32 %v7454_v12, %v18950_v57  ;;  %v11583_v12 = vld [vmem:[%s18518_s1 + $0x8ac] sm:$0xf0] }
 0x79b   : > { %v8218_v43 = vadd.f32 %v16729_v26, %v8086_v16  ;;  %v6263_v40 = vadd.f32 %v6262_v23, %v16572_v56 }
 0x79c   : > { %v5976_v4 = vpop.f32.mrf.mxu1  ;;  %v16947_v46 = vpop.f32.mrf.mxu3 }
 0x79d   : > { %v8346_v14 = vmax.f32 %v8218_v43, 0.0  ;;  %v16944_v62 = vadd.f32 %v5976_v4, %v18949_v11  ;;  %v6592_v31 = vadd.f32 %v16830_v30, %v6263_v40  ;;  %v18951_v30 = vld [vmem:[#allocation163_spill] sm:$0xff]  ;;  %v11515_v4 = vld [vmem:[%s18518_s1 + $0x694] sm:$0xf] }
 0x79e   : > { %v6923_v24 = vpop.f32.mrf.mxu0  ;;  %v18952_v43 = vld [vmem:[#allocation15_spill] sm:$0xff] }
 0x79f   : > { %8730 = vst [vmem:[#allocation3 + $0x100] sm:$0xff] %v8346_v14  ;;  %v6921_v18 = vadd.f32 %v6920_v52, %v6592_v31  ;;  %6015 = vmatmul.bf16.gmra.mxu1 %v10255_v20  ;;  %6304 = vmatmul.bf16.gmra.mxu2 %v10003_v41  ;;  %v10286_v52 = vld [vmem:[%s18518_s1 + $0x890] sm:$0xf]  ;;  %v7960_v40 = vmul.f32 %v7459_v45, %v18952_v43  ;;  %v10102_v41 = vld [vmem:[%s18518_s1 + $0x718] sm:$0xf] }
 0x7a0   : > { %v11516_v31 = vld [vmem:[%s18518_s1 + $0x69c] sm:$0xf] }
 0x7a1   : > { %6962 = vmatmul.bf16.gmra.mxu0 %v10011_v54  ;;  %v8087_v56 = vsub.f32 %v7959_v25, %v6921_v18  ;;  %v10032_v54 = vld [vmem:[%s18518_s1 + $0x6b0] sm:$0xf0] }
 0x7a2   : > { %v6265_v51 = vpop.f32.mrf.mxu2 }
 0x7a3   : > { %v8219_v37 = vadd.f32 %v16729_v26, %v8087_v56  ;;  %v6266_v38 = vadd.f32 %v6265_v51, %v16605_v53  ;;  %v10287_v56 = vor.u32 %v11583_v12, %v10286_v52  ;;  %v10035_v51 = vor.u32 %v11515_v4, %v10032_v54  ;;  %v7469_v4 = vpop.permute.xlu0 %7468 }
 0x7a4   : > { %v5978_v27 = vpop.f32.mrf.mxu1  ;;  %v16956_v23 = vpop.f32.mrf.mxu3 }
 0x7a5   : > { %v8347_v28 = vmax.f32 %v8219_v37, 0.0  ;;  %v16953_v16 = vadd.f32 %v5978_v27, %v18951_v30  ;;  %v6595_v47 = vadd.f32 %v16863_v0, %v6266_v38  ;;  %v11536_v0 = vld [vmem:[%s18518_s1 + $0x734] sm:$0xf0]  ;;  %v18953_v27 = vld [vmem:[#allocation164_spill] sm:$0xff] }
 0x7a6   : > { %v6925_v58 = vpop.f32.mrf.mxu0 }
 0x7a7   : > { %v11900_v20 = vpack.c.bf16 %v8347_v28, %v8346_v14  ;;  %8731 = vst [vmem:[#allocation3 + $0x108] sm:$0xff] %v8347_v28  ;;  %v6924_v53 = vadd.f32 %v6923_v24, %v6595_v47  ;;  %v10103_v14 = vor.u32 %v11536_v0, %v10102_v41  ;;  %v10040_v24 = vld [vmem:[%s18518_s1 + $0x6b8] sm:$0xf0] }
 0x7a8   : > { %v10043_v38 = vor.u32 %v11516_v31, %v10040_v24 }
 0x7a9   : > { %12152 = vst [vmem:[#allocation2 + $0x80] sm:$0xff] %v11900_v20   ;;  %v8088_v11 = vsub.f32 %v7960_v40, %v6924_v53  ;;  %6648 = vmatmul.bf16.gmra.mxu3 %v10103_v14  ;;  %v7464_v40 = vpop.permute.xlu2 %7463  ;;  %v18954_v20 = vld [vmem:[#allocation19_spill] sm:$0xff]  ;;  %v18955_v14 = vld [vmem:[#allocation165_spill] sm:$0xff] }
 0x7aa   : > { %v6267_v57 = vpop.f32.mrf.mxu2  ;;  %v7961_v53 = vmul.f32 %v7464_v40, %v18954_v20  ;;  %v10072_v40 = vld [vmem:[%s18518_s1 + $0x6f8] sm:$0xf0] }
 0x7ab   : > { %v8220_v25 = vadd.f32 %v16729_v26, %v8088_v11  ;;  %v6268_v18 = vadd.f32 %v6267_v57, %v16614_v7 }
 0x7ac   : > { %v5981_v37 = vpop.f32.mrf.mxu1  ;;  %v16989_v43 = vpop.f32.mrf.mxu3 }
 0x7ad   : > { %v8348_v45 = vmax.f32 %v8220_v25, 0.0  ;;  %v16986_v28 = vadd.f32 %v5981_v37, %v18953_v27  ;;  %v6597_v30 = vadd.f32 %v16872_v48, %v6268_v18  ;;  %v18956_v25 = vld [vmem:[#allocation23_spill] sm:$0xff]  ;;  %v11591_v37 = vld [vmem:[%s18518_s1 + $0x8ec] sm:$0xf0] }
 0x7ae   : > { %v6928_v47 = vpop.f32.mrf.mxu0  ;;  %v7962_v18 = vmul.f32 %v7469_v4, %v18956_v25 }
 0x7af   : > { %8732 = vst [vmem:[#allocation3 + $0x110] sm:$0xff] %v8348_v45  ;;  %v6926_v41 = vadd.f32 %v6925_v58, %v6597_v30  ;;  %6020 = vmatmul.bf16.gmra.mxu1 %v10287_v56  ;;  %6309 = vmatmul.bf16.gmra.mxu2 %v10035_v51  ;;  %v10318_v58 = vld [vmem:[%s18518_s1 + $0x8d0] sm:$0xf]  ;;  %v10134_v51 = vld [vmem:[%s18518_s1 + $0x758] sm:$0xf] }
 0x7b1   : > { %6967 = vmatmul.bf16.gmra.mxu0 %v10043_v38  ;;  %v8089_v7 = vsub.f32 %v7961_v53, %v6926_v41  ;;  %v11523_v38 = vld [vmem:[%s18518_s1 + $0x6d4] sm:$0xf] }
 0x7b2   : > { %v6270_v52 = vpop.f32.mrf.mxu2 }
 0x7b3   : > { %v8221_v0 = vadd.f32 %v16729_v26, %v8089_v7  ;;  %v6271_v12 = vadd.f32 %v6270_v52, %v16647_v61  ;;  %v10319_v7 = vor.u32 %v11591_v37, %v10318_v58 }
 0x7b4   : > { %v5983_v54 = vpop.f32.mrf.mxu1  ;;  %v16998_v57 = vpop.f32.mrf.mxu3 }
 0x7b5   : > { %v8349_v48 = vmax.f32 %v8221_v0, 0.0  ;;  %v16995_v11 = vadd.f32 %v5983_v54, %v18955_v14  ;;  %v6600_v31 = vadd.f32 %v16905_v42, %v6271_v12  ;;  %v11544_v42 = vld [vmem:[%s18518_s1 + $0x774] sm:$0xf0]  ;;  %v7474_v0 = vpop.permute.xlu1 %7473 }
 0x7b6   : > { %v6930_v24 = vpop.f32.mrf.mxu0  ;;  %v10135_v27 = vor.u32 %v11544_v42, %v10134_v51 }
 0x7b7   : > { %v11905_v56 = vpack.c.bf16 %v8349_v48, %v8348_v45  ;;  %8733 = vst [vmem:[#allocation3 + $0x118] sm:$0xff] %v8349_v48  ;;  %v6929_v61 = vadd.f32 %v6928_v47, %v6600_v31  ;;  %v10064_v45 = vld [vmem:[%s18518_s1 + $0x6f0] sm:$0xf0]  ;;  %v11524_v47 = vld [vmem:[%s18518_s1 + $0x6dc] sm:$0xf]  ;;  %v18957_v48 = vld [vmem:[#allocation166_spill] sm:$0xff] }
 0x7b8   : > { %v10067_v52 = vor.u32 %v11523_v38, %v10064_v45  ;;  %v10075_v4 = vor.u32 %v11524_v47, %v10072_v40 }
 0x7b9   : > { %12153 = vst [vmem:[#allocation2 + $0x88] sm:$0xff] %v11905_v56   ;;  %v8090_v30 = vsub.f32 %v7962_v18, %v6929_v61  ;;  %6653 = vmatmul.bf16.gmra.mxu3 %v10135_v27  ;;  %v18958_v56 = vld [vmem:[#allocation27_spill] sm:$0xff] }
 0x7ba   : > { %v6272_v20 = vpop.f32.mrf.mxu2  ;;  %v7963_v61 = vmul.f32 %v7474_v0, %v18958_v56  ;;  %v18959_v27 = vld [vmem:[#allocation167_spill] sm:$0xff]  ;;  %v11599_v0 = vld [vmem:[%s18518_s1 + $0x92c] sm:$0xf0] }
 0x7bb   : > { %v8222_v53 = vadd.f32 %v16729_v26, %v8090_v30  ;;  %v6273_v41 = vadd.f32 %v6272_v20, %v16656_v32  ;;  %v10350_v20 = vld [vmem:[%s18518_s1 + $0x910] sm:$0xf] }
 0x7bc   : > { %v5986_v12 = vpop.f32.mrf.mxu1  ;;  %v17031_v18 = vpop.f32.mrf.mxu3 }
 0x7bd   : > { %v8350_v54 = vmax.f32 %v8222_v53, 0.0  ;;  %v17028_v14 = vadd.f32 %v5986_v12, %v18957_v48  ;;  %v6602_v31 = vadd.f32 %v16914_v6, %v6273_v41  ;;  %v18960_v53 = vld [vmem:[#allocation31_spill] sm:$0xff]  ;;  %v11531_v12 = vld [vmem:[%s18518_s1 + $0x714] sm:$0xf] }
 0x7be   : > { %v6933_v25 = vpop.f32.mrf.mxu0 }
 0x7bf   : > { %8734 = vst [vmem:[#allocation3 + $0x120] sm:$0xff] %v8350_v54  ;;  %v6931_v51 = vadd.f32 %v6930_v24, %v6602_v31  ;;  %6025 = vmatmul.bf16.gmra.mxu1 %v10319_v7  ;;  %6314 = vmatmul.bf16.gmra.mxu2 %v10067_v52  ;;  %v7479_v24 = vpop.permute.xlu2 %7478  ;;  %v10166_v52 = vld [vmem:[%s18518_s1 + $0x798] sm:$0xf]  ;;  %v11532_v31 = vld [vmem:[%s18518_s1 + $0x71c] sm:$0xf] }
 0x7c0   : > { %v7964_v41 = vmul.f32 %v7479_v24, %v18960_v53 }
 0x7c1   : > { %6972 = vmatmul.bf16.gmra.mxu0 %v10075_v4  ;;  %v8091_v32 = vsub.f32 %v7963_v61, %v6931_v51  ;;  %v10096_v4 = vld [vmem:[%s18518_s1 + $0x730] sm:$0xf0] }
 0x7c2   : > { %v6275_v58 = vpop.f32.mrf.mxu2 }
 0x7c3   : > { %v8223_v42 = vadd.f32 %v16729_v26, %v8091_v32  ;;  %v6276_v37 = vadd.f32 %v6275_v58, %v16689_v3  ;;  %v10351_v32 = vor.u32 %v11599_v0, %v10350_v20  ;;  %v10099_v58 = vor.u32 %v11531_v12, %v10096_v4 }
 0x7c4   : > { %v5988_v38 = vpop.f32.mrf.mxu1  ;;  %v17040_v40 = vpop.f32.mrf.mxu3 }
 0x7c5   : > { %v8351_v45 = vmax.f32 %v8223_v42, 0.0  ;;  %v17037_v6 = vadd.f32 %v5988_v38, %v18959_v27  ;;  %v6605_v30 = vadd.f32 %v16947_v46, %v6276_v37  ;;  %v11552_v46 = vld [vmem:[%s18518_s1 + $0x7b4] sm:$0xf0]  ;;  %v7484_v42 = vpop.permute.xlu0 %7483  ;;  %v18961_v27 = vld [vmem:[#allocation168_spill] sm:$0xff] }
 0x7c6   : > { %v6935_v47 = vpop.f32.mrf.mxu0 }
 0x7c7   : > { %v11910_v7 = vpack.c.bf16 %v8351_v45, %v8350_v54  ;;  %8735 = vst [vmem:[#allocation3 + $0x128] sm:$0xff] %v8351_v45  ;;  %v6934_v3 = vadd.f32 %v6933_v25, %v6605_v30  ;;  %v10167_v54 = vor.u32 %v11552_v46, %v10166_v52  ;;  %v10104_v25 = vld [vmem:[%s18518_s1 + $0x738] sm:$0xf0] }
 0x7c8   : > { %v10107_v38 = vor.u32 %v11532_v31, %v10104_v25 }
 0x7c9   : > { %12154 = vst [vmem:[#allocation2 + $0x90] sm:$0xff] %v11910_v7   ;;  %v8092_v48 = vsub.f32 %v7964_v41, %v6934_v3  ;;  %6658 = vmatmul.bf16.gmra.mxu3 %v10167_v54  ;;  %v18962_v7 = vld [vmem:[#allocation35_spill] sm:$0xff]  ;;  %v18963_v54 = vld [vmem:[#allocation169_spill] sm:$0xff] }
 0x7ca   : > { %v6277_v56 = vpop.f32.mrf.mxu2  ;;  %v7965_v3 = vmul.f32 %v7484_v42, %v18962_v7  ;;  %v11607_v42 = vld [vmem:[%s18518_s1 + $0x96c] sm:$0xf0] }
 0x7cb   : > { %v8224_v61 = vadd.f32 %v16729_v26, %v8092_v48  ;;  %v6278_v51 = vadd.f32 %v6277_v56, %v16698_v13  ;;  %v10382_v56 = vld [vmem:[%s18518_s1 + $0x950] sm:$0xf] }
 0x7cc   : > { %v5991_v37 = vpop.f32.mrf.mxu1  ;;  %v17073_v41 = vpop.f32.mrf.mxu3 }
 0x7cd   : > { %v8352_v45 = vmax.f32 %v8224_v61, 0.0  ;;  %v17070_v30 = vadd.f32 %v5991_v37, %v18961_v27  ;;  %v6607_v24 = vadd.f32 %v16956_v23, %v6278_v51  ;;  %v18964_v61 = vld [vmem:[#allocation39_spill] sm:$0xff]  ;;  %v11539_v37 = vld [vmem:[%s18518_s1 + $0x754] sm:$0xf] }
 0x7ce   : > { %v6938_v53 = vpop.f32.mrf.mxu0 }
 0x7cf   : > { %8736 = vst [vmem:[#allocation3 + $0x130] sm:$0xff] %v8352_v45  ;;  %v6936_v52 = vadd.f32 %v6935_v47, %v6607_v24  ;;  %6030 = vmatmul.bf16.gmra.mxu1 %v10351_v32  ;;  %6319 = vmatmul.bf16.gmra.mxu2 %v10099_v58  ;;  %v7489_v47 = vpop.permute.xlu1 %7488  ;;  %v10198_v58 = vld [vmem:[%s18518_s1 + $0x7d8] sm:$0xf]  ;;  %v11540_v24 = vld [vmem:[%s18518_s1 + $0x75c] sm:$0xf] }
 0x7d0   : > { %v7966_v51 = vmul.f32 %v7489_v47, %v18964_v61 }
 0x7d1   : > { %6977 = vmatmul.bf16.gmra.mxu0 %v10107_v38  ;;  %v8093_v13 = vsub.f32 %v7965_v3, %v6936_v52  ;;  %v10128_v38 = vld [vmem:[%s18518_s1 + $0x770] sm:$0xf0] }
 0x7d2   : > { %v6280_v20 = vpop.f32.mrf.mxu2 }
 0x7d3   : > { %v8225_v46 = vadd.f32 %v16729_v26, %v8093_v13  ;;  %v6281_v0 = vadd.f32 %v6280_v20, %v16734_v29  ;;  %v10383_v13 = vor.u32 %v11607_v42, %v10382_v56  ;;  %v10131_v20 = vor.u32 %v11539_v37, %v10128_v38 }
 0x7d4   : > { %v5993_v12 = vpop.f32.mrf.mxu1  ;;  %v17082_v25 = vpop.f32.mrf.mxu3 }
 0x7d5   : > { %v8353_v4 = vmax.f32 %v8225_v46, 0.0  ;;  %v17079_v23 = vadd.f32 %v5993_v12, %v18963_v54  ;;  %v6610_v48 = vadd.f32 %v16989_v43, %v6281_v0  ;;  %v11560_v43 = vld [vmem:[%s18518_s1 + $0x7f4] sm:$0xf0] }
 0x7d6   : > { %v6940_v31 = vpop.f32.mrf.mxu0 }
 0x7d7   : > { %v11915_v32 = vpack.c.bf16 %v8353_v4, %v8352_v45  ;;  %8737 = vst [vmem:[#allocation3 + $0x138] sm:$0xff] %v8353_v4  ;;  %v6939_v29 = vadd.f32 %v6938_v53, %v6610_v48  ;;  %v10199_v45 = vor.u32 %v11560_v43, %v10198_v58  ;;  %v10136_v53 = vld [vmem:[%s18518_s1 + $0x778] sm:$0xf0]  ;;  %v18965_v4 = vld [vmem:[#allocation170_spill] sm:$0xff] }
 0x7d8   : > { %v10139_v0 = vor.u32 %v11540_v24, %v10136_v53 }
 0x7d9   : > { %12155 = vst [vmem:[#allocation2 + $0x98] sm:$0xff] %v11915_v32   ;;  %v8094_v27 = vsub.f32 %v7966_v51, %v6939_v29  ;;  %6663 = vmatmul.bf16.gmra.mxu3 %v10199_v45  ;;  %v7494_v51 = vpop.permute.xlu2 %7493  ;;  %v18966_v32 = vld [vmem:[#allocation43_spill] sm:$0xff] }
 0x7da   : > { %v6282_v7 = vpop.f32.mrf.mxu2  ;;  %v7967_v29 = vmul.f32 %v7494_v51, %v18966_v32  ;;  %v10168_v51 = vld [vmem:[%s18518_s1 + $0x7b8] sm:$0xf0] }
 0x7db   : > { %v8226_v3 = vadd.f32 %v16729_v26, %v8094_v27  ;;  %v6283_v52 = vadd.f32 %v6282_v7, %v16743_v55  ;;  %v10414_v7 = vld [vmem:[%s18518_s1 + $0x990] sm:$0xf] }
 0x7dc   : > { %v5996_v46 = vpop.f32.mrf.mxu1  ;;  %v17115_v61 = vpop.f32.mrf.mxu3 }
 0x7dd   : > { %v8354_v12 = vmax.f32 %v8226_v3, 0.0  ;;  %v17112_v54 = vadd.f32 %v5996_v46, %v18965_v4  ;;  %v6612_v48 = vadd.f32 %v16998_v57, %v6283_v52  ;;  %v18967_v57 = vld [vmem:[#allocation171_spill] sm:$0xff]  ;;  %v11615_v46 = vld [vmem:[%s18518_s1 + $0x9ac] sm:$0xf0] }
 0x7de   : > { %v6943_v47 = vpop.f32.mrf.mxu0  ;;  %v18968_v3 = vld [vmem:[#allocation47_spill] sm:$0xff] }
 0x7df   : > { %8738 = vst [vmem:[#allocation3 + $0x140] sm:$0xff] %v8354_v12  ;;  %v6941_v58 = vadd.f32 %v6940_v31, %v6612_v48  ;;  %6035 = vmatmul.bf16.gmra.mxu1 %v10383_v13  ;;  %6324 = vmatmul.bf16.gmra.mxu2 %v10131_v20  ;;  %v7499_v31 = vpop.permute.xlu0 %7498  ;;  %v10230_v20 = vld [vmem:[%s18518_s1 + $0x818] sm:$0xf] }
 0x7e0   : > { %v7968_v52 = vmul.f32 %v7499_v31, %v18968_v3 }
 0x7e1   : > { %6982 = vmatmul.bf16.gmra.mxu0 %v10139_v0  ;;  %v8095_v55 = vsub.f32 %v7967_v29, %v6941_v58  ;;  %v11547_v0 = vld [vmem:[%s18518_s1 + $0x794] sm:$0xf] }
 0x7e2   : > { %v6285_v56 = vpop.f32.mrf.mxu2 }
 0x7e3   : > { %v8227_v43 = vadd.f32 %v16729_v26, %v8095_v55  ;;  %v6286_v42 = vadd.f32 %v6285_v56, %v16776_v33  ;;  %v10415_v55 = vor.u32 %v11615_v46, %v10414_v7 }
 0x7e4   : > { %v5998_v37 = vpop.f32.mrf.mxu1  ;;  %v17124_v53 = vpop.f32.mrf.mxu3 }
 0x7e5   : > { %v8355_v38 = vmax.f32 %v8227_v43, 0.0  ;;  %v17121_v45 = vadd.f32 %v5998_v37, %v18967_v57  ;;  %v6615_v27 = vadd.f32 %v17031_v18, %v6286_v42  ;;  %v11568_v18 = vld [vmem:[%s18518_s1 + $0x834] sm:$0xf0] }
 0x7e6   : > { %v6945_v24 = vpop.f32.mrf.mxu0  ;;  %v10231_v4 = vor.u32 %v11568_v18, %v10230_v20 }
 0x7e7   : > { %v11920_v13 = vpack.c.bf16 %v8355_v38, %v8354_v12  ;;  %8739 = vst [vmem:[#allocation3 + $0x148] sm:$0xff] %v8355_v38  ;;  %v6944_v33 = vadd.f32 %v6943_v47, %v6615_v27  ;;  %v10160_v12 = vld [vmem:[%s18518_s1 + $0x7b0] sm:$0xf0]  ;;  %v11548_v47 = vld [vmem:[%s18518_s1 + $0x79c] sm:$0xf] }
 0x7e8   : > { %v10163_v56 = vor.u32 %v11547_v0, %v10160_v12  ;;  %v10171_v42 = vor.u32 %v11548_v47, %v10168_v51  ;;  %v18969_v38 = vld [vmem:[#allocation172_spill] sm:$0xff] }
 0x7e9   : > { %12156 = vst [vmem:[#allocation2 + $0xa0] sm:$0xff] %v11920_v13   ;;  %v8096_v48 = vsub.f32 %v7968_v52, %v6944_v33  ;;  %6668 = vmatmul.bf16.gmra.mxu3 %v10231_v4  ;;  %v7504_v52 = vpop.permute.xlu1 %7503  ;;  %v18970_v13 = vld [vmem:[#allocation51_spill] sm:$0xff] }
 0x7ea   : > { %v6287_v32 = vpop.f32.mrf.mxu2  ;;  %v7969_v33 = vmul.f32 %v7504_v52, %v18970_v13  ;;  %v10200_v52 = vld [vmem:[%s18518_s1 + $0x7f8] sm:$0xf0] }
 0x7eb   : > { %v8228_v29 = vadd.f32 %v16729_v26, %v8096_v48  ;;  %v6288_v58 = vadd.f32 %v6287_v32, %v16785_v15  ;;  %v10446_v32 = vld [vmem:[%s18518_s1 + $0x9d0] sm:$0xf] }
 0x7ec   : > { %v6001_v43 = vpop.f32.mrf.mxu1  ;;  %v17157_v3 = vpop.f32.mrf.mxu3 }
 0x7ed   : > { %v8356_v37 = vmax.f32 %v8228_v29, 0.0  ;;  %v17154_v57 = vadd.f32 %v6001_v43, %v18969_v38  ;;  %v6617_v27 = vadd.f32 %v17040_v40, %v6288_v58  ;;  %v18971_v40 = vld [vmem:[#allocation173_spill] sm:$0xff]  ;;  %v18972_v29 = vld [vmem:[#allocation55_spill] sm:$0xff]  ;;  %v11623_v43 = vld [vmem:[%s18518_s1 + $0x9ec] sm:$0xf0] }
 0x7ee   : > { %v6948_v31 = vpop.f32.mrf.mxu0 }
 0x7ef   : > { %8740 = vst [vmem:[#allocation3 + $0x150] sm:$0xff] %v8356_v37  ;;  %v6946_v20 = vadd.f32 %v6945_v24, %v6617_v27  ;;  %6040 = vmatmul.bf16.gmra.mxu1 %v10415_v55  ;;  %6329 = vmatmul.bf16.gmra.mxu2 %v10163_v56  ;;  %v7509_v24 = vpop.permute.xlu2 %7508  ;;  %v10262_v56 = vld [vmem:[%s18518_s1 + $0x858] sm:$0xf] }
 0x7f0   : > { %v7970_v58 = vmul.f32 %v7509_v24, %v18972_v29 }
 0x7f1   : > { %6987 = vmatmul.bf16.gmra.mxu0 %v10171_v42  ;;  %v8097_v15 = vsub.f32 %v7969_v33, %v6946_v20  ;;  %v11555_v42 = vld [vmem:[%s18518_s1 + $0x7d4] sm:$0xf] }
 0x7f2   : > { %v6290_v7 = vpop.f32.mrf.mxu2 }
 0x7f3   : > { %v8229_v18 = vadd.f32 %v16729_v26, %v8097_v15  ;;  %v6291_v46 = vadd.f32 %v6290_v7, %v16818_v22  ;;  %v10447_v15 = vor.u32 %v11623_v43, %v10446_v32 }
 0x7f4   : > { %v6003_v0 = vpop.f32.mrf.mxu1  ;;  %v17166_v51 = vpop.f32.mrf.mxu3 }
 0x7f5   : > { %v8357_v12 = vmax.f32 %v8229_v18, 0.0  ;;  %v17163_v4 = vadd.f32 %v6003_v0, %v18971_v40  ;;  %v6620_v48 = vadd.f32 %v17073_v41, %v6291_v46  ;;  %v11576_v41 = vld [vmem:[%s18518_s1 + $0x874] sm:$0xf0] }
 0x7f6   : > { %v6950_v47 = vpop.f32.mrf.mxu0  ;;  %v10263_v38 = vor.u32 %v11576_v41, %v10262_v56  ;;  %v17203_v56 = vld [vmem:[%s12340_s24] ss:$0 sm:$0xff] }
 0x7f7   : > { %v11925_v55 = vpack.c.bf16 %v8357_v12, %v8356_v37  ;;  %8741 = vst [vmem:[#allocation3 + $0x158] sm:$0xff] %v8357_v12  ;;  %v6949_v22 = vadd.f32 %v6948_v31, %v6620_v48  ;;  %v10192_v37 = vld [vmem:[%s18518_s1 + $0x7f0] sm:$0xf0]  ;;  %v11556_v31 = vld [vmem:[%s18518_s1 + $0x7dc] sm:$0xf]  ;;  %v18973_v12 = vld [vmem:[#allocation174_spill] sm:$0xff] }
 0x7f8   : > { %v10195_v7 = vor.u32 %v11555_v42, %v10192_v37  ;;  %v10203_v46 = vor.u32 %v11556_v31, %v10200_v52  ;;  %v18975_v37 = vld [vmem:[#allocation175_spill] sm:$0xff]  ;;  %v7519_v52 = vpop.permute.xlu1 %7518 }
 0x7f9   : > { %12157 = vst [vmem:[#allocation2 + $0xa8] sm:$0xff] %v11925_v55   ;;  %v8098_v27 = vsub.f32 %v7970_v58, %v6949_v22  ;;  %6673 = vmatmul.bf16.gmra.mxu3 %v10263_v38  ;;  %v7514_v58 = vpop.permute.xlu0 %7513  ;;  %v18974_v55 = vld [vmem:[#allocation59_spill] sm:$0xff] }
 0x7fa   : > { %v6292_v13 = vpop.f32.mrf.mxu2  ;;  %v7971_v22 = vmul.f32 %v7514_v58, %v18974_v55  ;;  %v10232_v58 = vld [vmem:[%s18518_s1 + $0x838] sm:$0xf0] }
 0x7fb   : > { %v8230_v33 = vadd.f32 %v16729_v26, %v8098_v27  ;;  %v6293_v20 = vadd.f32 %v6292_v13, %v16827_v10  ;;  %v10478_v13 = vld [vmem:[%s18518_s1 + $0xa10] sm:$0xf] }
 0x7fc   : > { %v6006_v18 = vpop.f32.mrf.mxu1  ;;  %v17199_v29 = vpop.f32.mrf.mxu3 }
 0x7fd   : > { %v8358_v0 = vmax.f32 %v8230_v33, 0.0  ;;  %v17196_v40 = vadd.f32 %v6006_v18, %v18973_v12  ;;  %v6622_v48 = vadd.f32 %v17082_v25, %v6293_v20  ;;  %v18976_v33 = vld [vmem:[#allocation63_spill] sm:$0xff]  ;;  %v11631_v18 = vld [vmem:[%s18518_s1 + $0xa2c] sm:$0xf0] }
 0x7fe   : > { %v6953_v24 = vpop.f32.mrf.mxu0  ;;  %v7972_v20 = vmul.f32 %v7519_v52, %v18976_v33 }
 0x7ff   : > { %8742 = vst [vmem:[#allocation3 + $0x160] sm:$0xff] %v8358_v0  ;;  %v6951_v26 = vadd.f32 %v6950_v47, %v6622_v48  ;;  %6045 = vmatmul.bf16.gmra.mxu1 %v10447_v15  ;;  %6334 = vmatmul.bf16.gmra.mxu2 %v10195_v7  ;;  %v10294_v7 = vld [vmem:[%s18518_s1 + $0x898] sm:$0xf] }
 0x801   : > { %6992 = vmatmul.bf16.gmra.mxu0 %v10203_v46  ;;  %v8099_v10 = vsub.f32 %v7971_v22, %v6951_v26  ;;  %v11563_v46 = vld [vmem:[%s18518_s1 + $0x814] sm:$0xf] }
 0x802   : > { %v6295_v32 = vpop.f32.mrf.mxu2 }
 0x803   : > { %v8231_v41 = vadd.f32 %v17203_v56, %v8099_v10  ;;  %v6296_v43 = vadd.f32 %v6295_v32, %v16860_v34  ;;  %v10479_v10 = vor.u32 %v11631_v18, %v10478_v13 }
 0x804   : > { %v6008_v25 = vpop.f32.mrf.mxu1  ;;  %v17211_v47 = vpop.f32.mrf.mxu3 }
 0x805   : > { %v8359_v42 = vmax.f32 %v8231_v41, 0.0  ;;  %v17208_v38 = vadd.f32 %v6008_v25, %v18975_v37  ;;  %v6625_v27 = vadd.f32 %v17115_v61, %v6296_v43  ;;  %v11584_v61 = vld [vmem:[%s18518_s1 + $0x8b4] sm:$0xf0] }
 0x806   : > { %v6955_v31 = vpop.f32.mrf.mxu0  ;;  %v10295_v12 = vor.u32 %v11584_v61, %v10294_v7 }
 0x807   : > { %v11930_v15 = vpack.c.bf16 %v8359_v42, %v8358_v0  ;;  %8743 = vst [vmem:[#allocation3 + $0x168] sm:$0xff] %v8359_v42  ;;  %v6954_v34 = vadd.f32 %v6953_v24, %v6625_v27  ;;  %v10224_v0 = vld [vmem:[%s18518_s1 + $0x830] sm:$0xf0]  ;;  %v11564_v24 = vld [vmem:[%s18518_s1 + $0x81c] sm:$0xf] }
 0x808   : > { %v10227_v32 = vor.u32 %v11563_v46, %v10224_v0  ;;  %v10235_v43 = vor.u32 %v11564_v24, %v10232_v58  ;;  %v18977_v42 = vld [vmem:[#allocation176_spill] sm:$0xff] }
 0x809   : > { %12158 = vst [vmem:[#allocation2 + $0xb0] sm:$0xff] %v11930_v15   ;;  %v8100_v48 = vsub.f32 %v7972_v20, %v6954_v34  ;;  %6678 = vmatmul.bf16.gmra.mxu3 %v10295_v12  ;;  %v7524_v20 = vpop.permute.xlu2 %7523  ;;  %v18978_v15 = vld [vmem:[#allocation67_spill] sm:$0xff] }
 0x80a   : > { %v6297_v55 = vpop.f32.mrf.mxu2  ;;  %v7973_v34 = vmul.f32 %v7524_v20, %v18978_v15  ;;  %v10264_v20 = vld [vmem:[%s18518_s1 + $0x878] sm:$0xf0] }
 0x80b   : > { %v8232_v22 = vadd.f32 %v17203_v56, %v8100_v48  ;;  %v6298_v26 = vadd.f32 %v6297_v55, %v16869_v44  ;;  %v10510_v55 = vld [vmem:[%s18518_s1 + $0xa50] sm:$0xf] }
 0x80c   : > { %v6011_v41 = vpop.f32.mrf.mxu1  ;;  %v17244_v33 = vpop.f32.mrf.mxu3 }
 0x80d   : > { %v8360_v25 = vmax.f32 %v8232_v22, 0.0  ;;  %v17241_v37 = vadd.f32 %v6011_v41, %v18977_v42  ;;  %v6627_v27 = vadd.f32 %v17124_v53, %v6298_v26  ;;  %v18979_v53 = vld [vmem:[#allocation177_spill] sm:$0xff]  ;;  %v18980_v22 = vld [vmem:[#allocation71_spill] sm:$0xff]  ;;  %v11639_v41 = vld [vmem:[%s18518_s1 + $0xa6c] sm:$0xf0] }
 0x80e   : > { %v6958_v52 = vpop.f32.mrf.mxu0 }
 0x80f   : > { %8744 = vst [vmem:[#allocation3 + $0x170] sm:$0xff] %v8360_v25  ;;  %v6956_v7 = vadd.f32 %v6955_v31, %v6627_v27  ;;  %6050 = vmatmul.bf16.gmra.mxu1 %v10479_v10  ;;  %6339 = vmatmul.bf16.gmra.mxu2 %v10227_v32  ;;  %v7529_v31 = vpop.permute.xlu0 %7528  ;;  %v10326_v32 = vld [vmem:[%s18518_s1 + $0x8d8] sm:$0xf] }
 0x810   : > { %v7974_v26 = vmul.f32 %v7529_v31, %v18980_v22 }
 0x811   : > { %6997 = vmatmul.bf16.gmra.mxu0 %v10235_v43  ;;  %v8101_v44 = vsub.f32 %v7973_v34, %v6956_v7  ;;  %v11571_v43 = vld [vmem:[%s18518_s1 + $0x854] sm:$0xf] }
 0x812   : > { %v6300_v13 = vpop.f32.mrf.mxu2 }
 0x813   : > { %v8233_v61 = vadd.f32 %v17203_v56, %v8101_v44  ;;  %v6301_v18 = vadd.f32 %v6300_v13, %v16902_v2  ;;  %v10511_v44 = vor.u32 %v11639_v41, %v10510_v55 }
 0x814   : > { %v6013_v46 = vpop.f32.mrf.mxu1  ;;  %v17253_v58 = vpop.f32.mrf.mxu3 }
 0x815   : > { %v8361_v0 = vmax.f32 %v8233_v61, 0.0  ;;  %v17250_v12 = vadd.f32 %v6013_v46, %v18979_v53  ;;  %v6630_v48 = vadd.f32 %v17157_v3, %v6301_v18  ;;  %v11592_v3 = vld [vmem:[%s18518_s1 + $0x8f4] sm:$0xf0] }
 0x816   : > { %v6960_v24 = vpop.f32.mrf.mxu0  ;;  %v10327_v42 = vor.u32 %v11592_v3, %v10326_v32 }
 0x817   : > { %v11935_v10 = vpack.c.bf16 %v8361_v0, %v8360_v25  ;;  %8745 = vst [vmem:[#allocation3 + $0x178] sm:$0xff] %v8361_v0  ;;  %v6959_v2 = vadd.f32 %v6958_v52, %v6630_v48  ;;  %v10256_v25 = vld [vmem:[%s18518_s1 + $0x870] sm:$0xf0]  ;;  %v11572_v52 = vld [vmem:[%s18518_s1 + $0x85c] sm:$0xf]  ;;  %v18981_v0 = vld [vmem:[#allocation178_spill] sm:$0xff] }
 0x818   : > { %v10259_v13 = vor.u32 %v11571_v43, %v10256_v25  ;;  %v10267_v18 = vor.u32 %v11572_v52, %v10264_v20 }
 0x819   : > { %12159 = vst [vmem:[#allocation2 + $0xb8] sm:$0xff] %v11935_v10   ;;  %v8102_v27 = vsub.f32 %v7974_v26, %v6959_v2  ;;  %6683 = vmatmul.bf16.gmra.mxu3 %v10327_v42  ;;  %v7534_v26 = vpop.permute.xlu1 %7533  ;;  %v18982_v10 = vld [vmem:[#allocation75_spill] sm:$0xff] }
 0x81a   : > { %v6302_v15 = vpop.f32.mrf.mxu2  ;;  %v7975_v2 = vmul.f32 %v7534_v26, %v18982_v10  ;;  %v10296_v26 = vld [vmem:[%s18518_s1 + $0x8b8] sm:$0xf0] }
 0x81b   : > { %v8234_v34 = vadd.f32 %v17203_v56, %v8102_v27  ;;  %v6303_v7 = vadd.f32 %v6302_v15, %v16911_v36  ;;  %v10542_v15 = vld [vmem:[%s18518_s1 + $0xa90] sm:$0xf] }
 0x81c   : > { %v6016_v61 = vpop.f32.mrf.mxu1  ;;  %v17286_v22 = vpop.f32.mrf.mxu3 }
 0x81d   : > { %v8362_v46 = vmax.f32 %v8234_v34, 0.0  ;;  %v17283_v53 = vadd.f32 %v6016_v61, %v18981_v0  ;;  %v6632_v48 = vadd.f32 %v17166_v51, %v6303_v7  ;;  %v18983_v51 = vld [vmem:[#allocation179_spill] sm:$0xff]  ;;  %v11647_v61 = vld [vmem:[%s18518_s1 + $0xaac] sm:$0xf0] }
 0x81e   : > { %v6963_v31 = vpop.f32.mrf.mxu0  ;;  %v18984_v34 = vld [vmem:[#allocation79_spill] sm:$0xff] }
 0x81f   : > { %8746 = vst [vmem:[#allocation3 + $0x180] sm:$0xff] %v8362_v46  ;;  %v6961_v32 = vadd.f32 %v6960_v24, %v6632_v48  ;;  %6055 = vmatmul.bf16.gmra.mxu1 %v10511_v44  ;;  %6344 = vmatmul.bf16.gmra.mxu2 %v10259_v13  ;;  %v7539_v24 = vpop.permute.xlu2 %7538  ;;  %v10358_v13 = vld [vmem:[%s18518_s1 + $0x918] sm:$0xf] }
 0x820   : > { %v7976_v7 = vmul.f32 %v7539_v24, %v18984_v34 }
 0x821   : > { %7002 = vmatmul.bf16.gmra.mxu0 %v10267_v18  ;;  %v8103_v36 = vsub.f32 %v7975_v2, %v6961_v32  ;;  %v11579_v18 = vld [vmem:[%s18518_s1 + $0x894] sm:$0xf] }
 0x822   : > { %v6305_v55 = vpop.f32.mrf.mxu2 }
 0x823   : > { %v8235_v3 = vadd.f32 %v17203_v56, %v8103_v36  ;;  %v6306_v41 = vadd.f32 %v6305_v55, %v16944_v62  ;;  %v10543_v36 = vor.u32 %v11647_v61, %v10542_v15 }
 0x824   : > { %v6018_v43 = vpop.f32.mrf.mxu1  ;;  %v17295_v20 = vpop.f32.mrf.mxu3 }
 0x825   : > { %v8363_v25 = vmax.f32 %v8235_v3, 0.0  ;;  %v17292_v42 = vadd.f32 %v6018_v43, %v18983_v51  ;;  %v6635_v27 = vadd.f32 %v17199_v29, %v6306_v41  ;;  %v11600_v29 = vld [vmem:[%s18518_s1 + $0x934] sm:$0xf0] }
 0x826   : > { %v6965_v52 = vpop.f32.mrf.mxu0  ;;  %v10359_v0 = vor.u32 %v11600_v29, %v10358_v13 }
 0x827   : > { %v11940_v44 = vpack.c.bf16 %v8363_v25, %v8362_v46  ;;  %8747 = vst [vmem:[#allocation3 + $0x188] sm:$0xff] %v8363_v25  ;;  %v6964_v62 = vadd.f32 %v6963_v31, %v6635_v27  ;;  %v10288_v46 = vld [vmem:[%s18518_s1 + $0x8b0] sm:$0xf0]  ;;  %v11580_v31 = vld [vmem:[%s18518_s1 + $0x89c] sm:$0xf] }
 0x828   : > { %v10291_v55 = vor.u32 %v11579_v18, %v10288_v46  ;;  %v10299_v41 = vor.u32 %v11580_v31, %v10296_v26  ;;  %v18985_v25 = vld [vmem:[#allocation180_spill] sm:$0xff] }
 0x829   : > { %12160 = vst [vmem:[#allocation2 + $0xc0] sm:$0xff] %v11940_v44   ;;  %v8104_v48 = vsub.f32 %v7976_v7, %v6964_v62  ;;  %6688 = vmatmul.bf16.gmra.mxu3 %v10359_v0  ;;  %v7544_v7 = vpop.permute.xlu0 %7543  ;;  %v18986_v44 = vld [vmem:[#allocation83_spill] sm:$0xff] }
 0x82a   : > { %v6307_v10 = vpop.f32.mrf.mxu2  ;;  %v7977_v62 = vmul.f32 %v7544_v7, %v18986_v44  ;;  %v10328_v7 = vld [vmem:[%s18518_s1 + $0x8f8] sm:$0xf0] }
 0x82b   : > { %v8236_v2 = vadd.f32 %v17203_v56, %v8104_v48  ;;  %v6308_v32 = vadd.f32 %v6307_v10, %v16953_v16  ;;  %v10574_v10 = vld [vmem:[%s18518_s1 + $0xad0] sm:$0xf] }
 0x82c   : > { %v6021_v3 = vpop.f32.mrf.mxu1  ;;  %v17328_v34 = vpop.f32.mrf.mxu3 }
 0x82d   : > { %v8364_v43 = vmax.f32 %v8236_v2, 0.0  ;;  %v17325_v51 = vadd.f32 %v6021_v3, %v18985_v25  ;;  %v6637_v27 = vadd.f32 %v17211_v47, %v6308_v32  ;;  %v18987_v47 = vld [vmem:[#allocation181_spill] sm:$0xff]  ;;  %v18988_v2 = vld [vmem:[#allocation87_spill] sm:$0xff]  ;;  %v11655_v3 = vld [vmem:[%s18518_s1 + $0xaec] sm:$0xf0] }
 0x82e   : > { %v6968_v24 = vpop.f32.mrf.mxu0 }
 0x82f   : > { %8748 = vst [vmem:[#allocation3 + $0x190] sm:$0xff] %v8364_v43  ;;  %v6966_v13 = vadd.f32 %v6965_v52, %v6637_v27  ;;  %6060 = vmatmul.bf16.gmra.mxu1 %v10543_v36  ;;  %6349 = vmatmul.bf16.gmra.mxu2 %v10291_v55  ;;  %v7549_v52 = vpop.permute.xlu1 %7548  ;;  %v10390_v55 = vld [vmem:[%s18518_s1 + $0x958] sm:$0xf] }
 0x830   : > { %v7978_v32 = vmul.f32 %v7549_v52, %v18988_v2 }
 0x831   : > { %7007 = vmatmul.bf16.gmra.mxu0 %v10299_v41  ;;  %v8105_v16 = vsub.f32 %v7977_v62, %v6966_v13  ;;  %v11587_v41 = vld [vmem:[%s18518_s1 + $0x8d4] sm:$0xf] }
 0x832   : > { %v6310_v15 = vpop.f32.mrf.mxu2 }
 0x833   : > { %v8237_v29 = vadd.f32 %v17203_v56, %v8105_v16  ;;  %v6311_v61 = vadd.f32 %v6310_v15, %v16986_v28  ;;  %v10575_v16 = vor.u32 %v11655_v3, %v10574_v10 }
 0x834   : > { %v6023_v18 = vpop.f32.mrf.mxu1  ;;  %v17337_v26 = vpop.f32.mrf.mxu3 }
 0x835   : > { %v8365_v46 = vmax.f32 %v8237_v29, 0.0  ;;  %v17334_v0 = vadd.f32 %v6023_v18, %v18987_v47  ;;  %v6640_v48 = vadd.f32 %v17244_v33, %v6311_v61  ;;  %v11608_v33 = vld [vmem:[%s18518_s1 + $0x974] sm:$0xf0] }
 0x836   : > { %v6970_v31 = vpop.f32.mrf.mxu0  ;;  %v10391_v25 = vor.u32 %v11608_v33, %v10390_v55 }
 0x837   : > { %v11945_v36 = vpack.c.bf16 %v8365_v46, %v8364_v43  ;;  %8749 = vst [vmem:[#allocation3 + $0x198] sm:$0xff] %v8365_v46  ;;  %v6969_v28 = vadd.f32 %v6968_v24, %v6640_v48  ;;  %v10320_v43 = vld [vmem:[%s18518_s1 + $0x8f0] sm:$0xf0]  ;;  %v11588_v24 = vld [vmem:[%s18518_s1 + $0x8dc] sm:$0xf]  ;;  %v18989_v46 = vld [vmem:[#allocation182_spill] sm:$0xff] }
 0x838   : > { %v10323_v15 = vor.u32 %v11587_v41, %v10320_v43  ;;  %v10331_v61 = vor.u32 %v11588_v24, %v10328_v7 }
 0x839   : > { %12161 = vst [vmem:[#allocation2 + $0xc8] sm:$0xff] %v11945_v36   ;;  %v8106_v27 = vsub.f32 %v7978_v32, %v6969_v28  ;;  %6693 = vmatmul.bf16.gmra.mxu3 %v10391_v25  ;;  %v7554_v32 = vpop.permute.xlu2 %7553  ;;  %v18990_v36 = vld [vmem:[#allocation91_spill] sm:$0xff] }
 0x83a   : > { %v6312_v44 = vpop.f32.mrf.mxu2  ;;  %v7979_v28 = vmul.f32 %v7554_v32, %v18990_v36  ;;  %v10360_v32 = vld [vmem:[%s18518_s1 + $0x938] sm:$0xf0] }
 0x83b   : > { %v8238_v62 = vadd.f32 %v17203_v56, %v8106_v27  ;;  %v6313_v13 = vadd.f32 %v6312_v44, %v16995_v11  ;;  %v10606_v44 = vld [vmem:[%s18518_s1 + $0xb10] sm:$0xf] }
 0x83c   : > { %v6026_v29 = vpop.f32.mrf.mxu1  ;;  %v17370_v2 = vpop.f32.mrf.mxu3 }
 0x83d   : > { %v8366_v18 = vmax.f32 %v8238_v62, 0.0  ;;  %v17367_v47 = vadd.f32 %v6026_v29, %v18989_v46  ;;  %v6642_v48 = vadd.f32 %v17253_v58, %v6313_v13  ;;  %v18991_v58 = vld [vmem:[#allocation183_spill] sm:$0xff]  ;;  %v11663_v29 = vld [vmem:[%s18518_s1 + $0xb2c] sm:$0xf0] }
 0x83e   : > { %v6973_v52 = vpop.f32.mrf.mxu0  ;;  %v18992_v62 = vld [vmem:[#allocation95_spill] sm:$0xff] }
 0x83f   : > { %8750 = vst [vmem:[#allocation3 + $0x1a0] sm:$0xff] %v8366_v18  ;;  %v6971_v55 = vadd.f32 %v6970_v31, %v6642_v48  ;;  %6065 = vmatmul.bf16.gmra.mxu1 %v10575_v16  ;;  %6354 = vmatmul.bf16.gmra.mxu2 %v10323_v15  ;;  %v7559_v31 = vpop.permute.xlu0 %7558  ;;  %v10422_v15 = vld [vmem:[%s18518_s1 + $0x998] sm:$0xf] }
 0x840   : > { %v7980_v13 = vmul.f32 %v7559_v31, %v18992_v62 }
 0x841   : > { %7012 = vmatmul.bf16.gmra.mxu0 %v10331_v61  ;;  %v8107_v11 = vsub.f32 %v7979_v28, %v6971_v55  ;;  %v11595_v61 = vld [vmem:[%s18518_s1 + $0x914] sm:$0xf] }
 0x842   : > { %v6315_v10 = vpop.f32.mrf.mxu2 }
 0x843   : > { %v8239_v33 = vadd.f32 %v17203_v56, %v8107_v11  ;;  %v6316_v3 = vadd.f32 %v6315_v10, %v17028_v14  ;;  %v10607_v11 = vor.u32 %v11663_v29, %v10606_v44 }
 0x844   : > { %v6028_v41 = vpop.f32.mrf.mxu1  ;;  %v17379_v7 = vpop.f32.mrf.mxu3 }
 0x845   : > { %v8367_v43 = vmax.f32 %v8239_v33, 0.0  ;;  %v17376_v25 = vadd.f32 %v6028_v41, %v18991_v58  ;;  %v6645_v27 = vadd.f32 %v17286_v22, %v6316_v3  ;;  %v11616_v22 = vld [vmem:[%s18518_s1 + $0x9b4] sm:$0xf0] }
 0x846   : > { %v6975_v24 = vpop.f32.mrf.mxu0  ;;  %v10423_v46 = vor.u32 %v11616_v22, %v10422_v15 }
 0x847   : > { %v11950_v16 = vpack.c.bf16 %v8367_v43, %v8366_v18  ;;  %8751 = vst [vmem:[#allocation3 + $0x1a8] sm:$0xff] %v8367_v43  ;;  %v6974_v14 = vadd.f32 %v6973_v52, %v6645_v27  ;;  %v10352_v18 = vld [vmem:[%s18518_s1 + $0x930] sm:$0xf0]  ;;  %v11596_v52 = vld [vmem:[%s18518_s1 + $0x91c] sm:$0xf] }
 0x848   : > { %v10355_v10 = vor.u32 %v11595_v61, %v10352_v18  ;;  %v10363_v3 = vor.u32 %v11596_v52, %v10360_v32  ;;  %v18993_v43 = vld [vmem:[#allocation184_spill] sm:$0xff] }
 0x849   : > { %12162 = vst [vmem:[#allocation2 + $0xd0] sm:$0xff] %v11950_v16   ;;  %v8108_v48 = vsub.f32 %v7980_v13, %v6974_v14  ;;  %6698 = vmatmul.bf16.gmra.mxu3 %v10423_v46  ;;  %v7564_v13 = vpop.permute.xlu1 %7563  ;;  %v18994_v16 = vld [vmem:[#allocation99_spill] sm:$0xff] }
 0x84a   : > { %v6317_v36 = vpop.f32.mrf.mxu2  ;;  %v7981_v14 = vmul.f32 %v7564_v13, %v18994_v16  ;;  %v10392_v13 = vld [vmem:[%s18518_s1 + $0x978] sm:$0xf0] }
 0x84b   : > { %v8240_v28 = vadd.f32 %v17203_v56, %v8108_v48  ;;  %v6318_v55 = vadd.f32 %v6317_v36, %v17037_v6  ;;  %v10638_v36 = vld [vmem:[%s18518_s1 + $0xb50] sm:$0xf] }
 0x84c   : > { %v6031_v33 = vpop.f32.mrf.mxu1  ;;  %v17412_v62 = vpop.f32.mrf.mxu3 }
 0x84d   : > { %v8368_v41 = vmax.f32 %v8240_v28, 0.0  ;;  %v17409_v58 = vadd.f32 %v6031_v33, %v18993_v43  ;;  %v6647_v27 = vadd.f32 %v17295_v20, %v6318_v55  ;;  %v18995_v20 = vld [vmem:[#allocation185_spill] sm:$0xff]  ;;  %v11671_v33 = vld [vmem:[%s18518_s1 + $0xb6c] sm:$0xf0] }
 0x84e   : > { %v6978_v31 = vpop.f32.mrf.mxu0  ;;  %v18996_v28 = vld [vmem:[#allocation101_spill] sm:$0xff] }
 0x84f   : > { %8752 = vst [vmem:[#allocation3 + $0x1b0] sm:$0xff] %v8368_v41  ;;  %v6976_v15 = vadd.f32 %v6975_v24, %v6647_v27  ;;  %6070 = vmatmul.bf16.gmra.mxu1 %v10607_v11  ;;  %6359 = vmatmul.bf16.gmra.mxu2 %v10355_v10  ;;  %v7569_v24 = vpop.permute.xlu2 %7568  ;;  %v10454_v10 = vld [vmem:[%s18518_s1 + $0x9d8] sm:$0xf] }
 0x850   : > { %v7982_v55 = vmul.f32 %v7569_v24, %v18996_v28 }
 0x851   : > { %7017 = vmatmul.bf16.gmra.mxu0 %v10363_v3  ;;  %v8109_v6 = vsub.f32 %v7981_v14, %v6976_v15  ;;  %v11603_v3 = vld [vmem:[%s18518_s1 + $0x954] sm:$0xf] }
 0x852   : > { %v6320_v44 = vpop.f32.mrf.mxu2 }
 0x853   : > { %v8241_v22 = vadd.f32 %v17203_v56, %v8109_v6  ;;  %v6321_v29 = vadd.f32 %v6320_v44, %v17070_v30  ;;  %v10639_v6 = vor.u32 %v11671_v33, %v10638_v36 }
 0x854   : > { %v6033_v61 = vpop.f32.mrf.mxu1  ;;  %v17421_v32 = vpop.f32.mrf.mxu3 }
 0x855   : > { %v8369_v18 = vmax.f32 %v8241_v22, 0.0  ;;  %v17418_v46 = vadd.f32 %v6033_v61, %v18995_v20  ;;  %v6650_v48 = vadd.f32 %v17328_v34, %v6321_v29  ;;  %v11624_v34 = vld [vmem:[%s18518_s1 + $0x9f4] sm:$0xf0] }
 0x856   : > { %v6980_v52 = vpop.f32.mrf.mxu0  ;;  %v10455_v43 = vor.u32 %v11624_v34, %v10454_v10 }
 0x857   : > { %v11955_v11 = vpack.c.bf16 %v8369_v18, %v8368_v41  ;;  %8753 = vst [vmem:[#allocation3 + $0x1b8] sm:$0xff] %v8369_v18  ;;  %v6979_v30 = vadd.f32 %v6978_v31, %v6650_v48  ;;  %v10384_v41 = vld [vmem:[%s18518_s1 + $0x970] sm:$0xf0]  ;;  %v11604_v31 = vld [vmem:[%s18518_s1 + $0x95c] sm:$0xf]  ;;  %v18997_v18 = vld [vmem:[#allocation186_spill] sm:$0xff] }
 0x858   : > { %v10387_v44 = vor.u32 %v11603_v3, %v10384_v41  ;;  %v10395_v29 = vor.u32 %v11604_v31, %v10392_v13 }
 0x859   : > { %12163 = vst [vmem:[#allocation2 + $0xd8] sm:$0xff] %v11955_v11   ;;  %v8110_v27 = vsub.f32 %v7982_v55, %v6979_v30  ;;  %6703 = vmatmul.bf16.gmra.mxu3 %v10455_v43  ;;  %v7574_v55 = vpop.permute.xlu0 %7573  ;;  %v18998_v11 = vld [vmem:[#allocation105_spill] sm:$0xff] }
 0x85a   : > { %v6322_v16 = vpop.f32.mrf.mxu2  ;;  %v7983_v30 = vmul.f32 %v7574_v55, %v18998_v11  ;;  %v10424_v55 = vld [vmem:[%s18518_s1 + $0x9b8] sm:$0xf0] }
 0x85b   : > { %v8242_v14 = vadd.f32 %v17203_v56, %v8110_v27  ;;  %v6323_v15 = vadd.f32 %v6322_v16, %v17079_v23  ;;  %v10670_v16 = vld [vmem:[%s18518_s1 + $0xb90] sm:$0xf] }
 0x85c   : > { %v6036_v22 = vpop.f32.mrf.mxu1  ;;  %v17454_v28 = vpop.f32.mrf.mxu3 }
 0x85d   : > { %v8370_v61 = vmax.f32 %v8242_v14, 0.0  ;;  %v17451_v20 = vadd.f32 %v6036_v22, %v18997_v18  ;;  %v6652_v48 = vadd.f32 %v17337_v26, %v6323_v15  ;;  %v18999_v26 = vld [vmem:[#allocation187_spill] sm:$0xff]  ;;  %v19000_v14 = vld [vmem:[#allocation109_spill] sm:$0xff]  ;;  %v11679_v22 = vld [vmem:[%s18518_s1 + $0xbac] sm:$0xf0] }
 0x85e   : > { %v6983_v24 = vpop.f32.mrf.mxu0 }
 0x85f   : > { %8754 = vst [vmem:[#allocation3 + $0x1c0] sm:$0xff] %v8370_v61  ;;  %v6981_v10 = vadd.f32 %v6980_v52, %v6652_v48  ;;  %6075 = vmatmul.bf16.gmra.mxu1 %v10639_v6  ;;  %6364 = vmatmul.bf16.gmra.mxu2 %v10387_v44  ;;  %v7579_v52 = vpop.permute.xlu1 %7578  ;;  %v10486_v44 = vld [vmem:[%s18518_s1 + $0xa18] sm:$0xf] }
 0x860   : > { %v7984_v15 = vmul.f32 %v7579_v52, %v19000_v14 }
 0x861   : > { %7022 = vmatmul.bf16.gmra.mxu0 %v10395_v29  ;;  %v8111_v23 = vsub.f32 %v7983_v30, %v6981_v10  ;;  %v11611_v29 = vld [vmem:[%s18518_s1 + $0x994] sm:$0xf] }
 0x862   : > { %v6325_v36 = vpop.f32.mrf.mxu2 }
 0x863   : > { %v8243_v34 = vadd.f32 %v17203_v56, %v8111_v23  ;;  %v6326_v33 = vadd.f32 %v6325_v36, %v17112_v54  ;;  %v10671_v23 = vor.u32 %v11679_v22, %v10670_v16 }
 0x864   : > { %v6038_v3 = vpop.f32.mrf.mxu1  ;;  %v17463_v13 = vpop.f32.mrf.mxu3 }
 0x865   : > { %v8371_v41 = vmax.f32 %v8243_v34, 0.0  ;;  %v17460_v43 = vadd.f32 %v6038_v3, %v18999_v26  ;;  %v6655_v27 = vadd.f32 %v17370_v2, %v6326_v33  ;;  %v11632_v2 = vld [vmem:[%s18518_s1 + $0xa34] sm:$0xf0] }
 0x866   : > { %v6985_v31 = vpop.f32.mrf.mxu0  ;;  %v10487_v18 = vor.u32 %v11632_v2, %v10486_v44 }
 0x867   : > { %v11960_v6 = vpack.c.bf16 %v8371_v41, %v8370_v61  ;;  %8755 = vst [vmem:[#allocation3 + $0x1c8] sm:$0xff] %v8371_v41  ;;  %v6984_v54 = vadd.f32 %v6983_v24, %v6655_v27  ;;  %v10416_v61 = vld [vmem:[%s18518_s1 + $0x9b0] sm:$0xf0]  ;;  %v11612_v24 = vld [vmem:[%s18518_s1 + $0x99c] sm:$0xf] }
 0x868   : > { %v10419_v36 = vor.u32 %v11611_v29, %v10416_v61  ;;  %v10427_v33 = vor.u32 %v11612_v24, %v10424_v55  ;;  %v19001_v41 = vld [vmem:[#allocation188_spill] sm:$0xff] }
 0x869   : > { %12164 = vst [vmem:[#allocation2 + $0xe0] sm:$0xff] %v11960_v6   ;;  %v8112_v48 = vsub.f32 %v7984_v15, %v6984_v54  ;;  %6708 = vmatmul.bf16.gmra.mxu3 %v10487_v18  ;;  %v7584_v15 = vpop.permute.xlu2 %7583  ;;  %v19002_v6 = vld [vmem:[#allocation113_spill] sm:$0xff] }
 0x86a   : > { %v6327_v11 = vpop.f32.mrf.mxu2  ;;  %v7985_v54 = vmul.f32 %v7584_v15, %v19002_v6  ;;  %v10456_v15 = vld [vmem:[%s18518_s1 + $0x9f8] sm:$0xf0] }
 0x86b   : > { %v8244_v30 = vadd.f32 %v17203_v56, %v8112_v48  ;;  %v6328_v10 = vadd.f32 %v6327_v11, %v17121_v45  ;;  %v10702_v11 = vld [vmem:[%s18518_s1 + $0xbd0] sm:$0xf] }
 0x86c   : > { %v6041_v34 = vpop.f32.mrf.mxu1  ;;  %v17496_v14 = vpop.f32.mrf.mxu3 }
 0x86d   : > { %v8372_v3 = vmax.f32 %v8244_v30, 0.0  ;;  %v17493_v26 = vadd.f32 %v6041_v34, %v19001_v41  ;;  %v6657_v27 = vadd.f32 %v17379_v7, %v6328_v10  ;;  %v19003_v7 = vld [vmem:[#allocation189_spill] sm:$0xff]  ;;  %v11687_v34 = vld [vmem:[%s18518_s1 + $0xbec] sm:$0xf0] }
 0x86e   : > { %v6988_v52 = vpop.f32.mrf.mxu0  ;;  %v19004_v30 = vld [vmem:[#allocation117_spill] sm:$0xff] }
 0x86f   : > { %8756 = vst [vmem:[#allocation3 + $0x1d0] sm:$0xff] %v8372_v3  ;;  %v6986_v44 = vadd.f32 %v6985_v31, %v6657_v27  ;;  %6080 = vmatmul.bf16.gmra.mxu1 %v10671_v23  ;;  %6369 = vmatmul.bf16.gmra.mxu2 %v10419_v36  ;;  %v7589_v31 = vpop.permute.xlu0 %7588  ;;  %v10518_v36 = vld [vmem:[%s18518_s1 + $0xa58] sm:$0xf] }
 0x870   : > { %v7986_v10 = vmul.f32 %v7589_v31, %v19004_v30 }
 0x871   : > { %7027 = vmatmul.bf16.gmra.mxu0 %v10427_v33  ;;  %v8113_v45 = vsub.f32 %v7985_v54, %v6986_v44  ;;  %v11619_v33 = vld [vmem:[%s18518_s1 + $0x9d4] sm:$0xf] }
 0x872   : > { %v6330_v16 = vpop.f32.mrf.mxu2 }
 0x873   : > { %v8245_v2 = vadd.f32 %v17203_v56, %v8113_v45  ;;  %v6331_v22 = vadd.f32 %v6330_v16, %v17154_v57  ;;  %v10703_v45 = vor.u32 %v11687_v34, %v10702_v11 }
 0x874   : > { %v6043_v29 = vpop.f32.mrf.mxu1  ;;  %v17505_v55 = vpop.f32.mrf.mxu3 }
 0x875   : > { %v8373_v61 = vmax.f32 %v8245_v2, 0.0  ;;  %v17502_v18 = vadd.f32 %v6043_v29, %v19003_v7  ;;  %v6660_v48 = vadd.f32 %v17412_v62, %v6331_v22  ;;  %v11640_v62 = vld [vmem:[%s18518_s1 + $0xa74] sm:$0xf0] }
 0x876   : > { %v6990_v24 = vpop.f32.mrf.mxu0  ;;  %v10519_v41 = vor.u32 %v11640_v62, %v10518_v36 }
 0x877   : > { %v11965_v23 = vpack.c.bf16 %v8373_v61, %v8372_v3  ;;  %8757 = vst [vmem:[#allocation3 + $0x1d8] sm:$0xff] %v8373_v61  ;;  %v6989_v57 = vadd.f32 %v6988_v52, %v6660_v48  ;;  %v10448_v3 = vld [vmem:[%s18518_s1 + $0x9f0] sm:$0xf0]  ;;  %v11620_v52 = vld [vmem:[%s18518_s1 + $0x9dc] sm:$0xf]  ;;  %v19005_v61 = vld [vmem:[#allocation190_spill] sm:$0xff] }
 0x878   : > { %v10451_v16 = vor.u32 %v11619_v33, %v10448_v3  ;;  %v10459_v22 = vor.u32 %v11620_v52, %v10456_v15 }
 0x879   : > { %12165 = vst [vmem:[#allocation2 + $0xe8] sm:$0xff] %v11965_v23   ;;  %v8114_v27 = vsub.f32 %v7986_v10, %v6989_v57  ;;  %6713 = vmatmul.bf16.gmra.mxu3 %v10519_v41  ;;  %v7594_v10 = vpop.permute.xlu1 %7593  ;;  %v19006_v23 = vld [vmem:[#allocation119_spill] sm:$0xff] }
 0x87a   : > { %v6332_v6 = vpop.f32.mrf.mxu2  ;;  %v7987_v57 = vmul.f32 %v7594_v10, %v19006_v23  ;;  %v10488_v10 = vld [vmem:[%s18518_s1 + $0xa38] sm:$0xf0] }
 0x87b   : > { %v8246_v54 = vadd.f32 %v17203_v56, %v8114_v27  ;;  %v6333_v44 = vadd.f32 %v6332_v6, %v17163_v4  ;;  %v10734_v6 = vld [vmem:[%s18518_s1 + $0xc10] sm:$0xf] }
 0x87c   : > { %v6046_v2 = vpop.f32.mrf.mxu1  ;;  %v17538_v30 = vpop.f32.mrf.mxu3 }
 0x87d   : > { %v8374_v29 = vmax.f32 %v8246_v54, 0.0  ;;  %v17535_v7 = vadd.f32 %v6046_v2, %v19005_v61  ;;  %v6662_v48 = vadd.f32 %v17421_v32, %v6333_v44  ;;  %v19007_v32 = vld [vmem:[#allocation191_spill] sm:$0xff]  ;;  %v11695_v2 = vld [vmem:[%s18518_s1 + $0xc2c] sm:$0xf0] }
 0x87e   : > { %v6993_v31 = vpop.f32.mrf.mxu0  ;;  %v19008_v54 = vld [vmem:[#allocation123_spill] sm:$0xff] }
 0x87f   : > { %8758 = vst [vmem:[#allocation3 + $0x1e0] sm:$0xff] %v8374_v29  ;;  %v6991_v36 = vadd.f32 %v6990_v24, %v6662_v48  ;;  %6085 = vmatmul.bf16.gmra.mxu1 %v10703_v45  ;;  %6374 = vmatmul.bf16.gmra.mxu2 %v10451_v16  ;;  %v7599_v24 = vpop.permute.xlu2 %7598  ;;  %v10550_v16 = vld [vmem:[%s18518_s1 + $0xa98] sm:$0xf] }
 0x880   : > { %v7988_v44 = vmul.f32 %v7599_v24, %v19008_v54 }
 0x881   : > { %7032 = vmatmul.bf16.gmra.mxu0 %v10459_v22  ;;  %v8115_v4 = vsub.f32 %v7987_v57, %v6991_v36  ;;  %v11627_v22 = vld [vmem:[%s18518_s1 + $0xa14] sm:$0xf] }
 0x882   : > { %v6335_v11 = vpop.f32.mrf.mxu2 }
 0x883   : > { %v8247_v62 = vadd.f32 %v17203_v56, %v8115_v4  ;;  %v6336_v34 = vadd.f32 %v6335_v11, %v17196_v40  ;;  %v10735_v4 = vor.u32 %v11695_v2, %v10734_v6 }
 0x884   : > { %v6048_v33 = vpop.f32.mrf.mxu1  ;;  %v17547_v15 = vpop.f32.mrf.mxu3 }
 0x885   : > { %v8375_v3 = vmax.f32 %v8247_v62, 0.0  ;;  %v17544_v41 = vadd.f32 %v6048_v33, %v19007_v32  ;;  %v6665_v27 = vadd.f32 %v17454_v28, %v6336_v34  ;;  %v11648_v28 = vld [vmem:[%s18518_s1 + $0xab4] sm:$0xf0] }
 0x886   : > { %v6995_v52 = vpop.f32.mrf.mxu0  ;;  %v10551_v61 = vor.u32 %v11648_v28, %v10550_v16 }
 0x887   : > { %v11970_v45 = vpack.c.bf16 %v8375_v3, %v8374_v29  ;;  %8759 = vst [vmem:[#allocation3 + $0x1e8] sm:$0xff] %v8375_v3  ;;  %v6994_v40 = vadd.f32 %v6993_v31, %v6665_v27  ;;  %v10480_v29 = vld [vmem:[%s18518_s1 + $0xa30] sm:$0xf0]  ;;  %v11628_v31 = vld [vmem:[%s18518_s1 + $0xa1c] sm:$0xf] }
 0x888   : > { %v10483_v11 = vor.u32 %v11627_v22, %v10480_v29  ;;  %v10491_v34 = vor.u32 %v11628_v31, %v10488_v10  ;;  %v19009_v3 = vld [vmem:[#allocation192_spill] sm:$0xff] }
 0x889   : > { %12166 = vst [vmem:[#allocation2 + $0xf0] sm:$0xff] %v11970_v45   ;;  %v8116_v48 = vsub.f32 %v7988_v44, %v6994_v40  ;;  %6718 = vmatmul.bf16.gmra.mxu3 %v10551_v61  ;;  %v7604_v44 = vpop.permute.xlu0 %7603  ;;  %v19010_v45 = vld [vmem:[#allocation127_spill] sm:$0xff] }
 0x88a   : > { %v6337_v23 = vpop.f32.mrf.mxu2  ;;  %v7989_v40 = vmul.f32 %v7604_v44, %v19010_v45  ;;  %v10520_v44 = vld [vmem:[%s18518_s1 + $0xa78] sm:$0xf0] }
 0x88b   : > { %v8248_v57 = vadd.f32 %v17203_v56, %v8116_v48  ;;  %v6338_v36 = vadd.f32 %v6337_v23, %v17208_v38  ;;  %v10766_v23 = vld [vmem:[%s18518_s1 + $0xc50] sm:$0xf] }
 0x88c   : > { %v6051_v62 = vpop.f32.mrf.mxu1  ;;  %v17580_v54 = vpop.f32.mrf.mxu3 }
 0x88d   : > { %v8376_v33 = vmax.f32 %v8248_v57, 0.0  ;;  %v17577_v32 = vadd.f32 %v6051_v62, %v19009_v3  ;;  %v6667_v27 = vadd.f32 %v17463_v13, %v6338_v36  ;;  %v19011_v13 = vld [vmem:[#allocation193_spill] sm:$0xff]  ;;  %v19012_v57 = vld [vmem:[#allocation8_spill] sm:$0xff] }
 0x88e   : > { %v6998_v24 = vpop.f32.mrf.mxu0  ;;  %v11703_v62 = vld [vmem:[%s18518_s1 + $0xc6c] sm:$0xf0] }
 0x88f   : > { %8760 = vst [vmem:[#allocation3 + $0x1f0] sm:$0xff] %v8376_v33  ;;  %v6996_v16 = vadd.f32 %v6995_v52, %v6667_v27  ;;  %6090 = vmatmul.bf16.gmra.mxu1 %v10735_v4  ;;  %6379 = vmatmul.bf16.gmra.mxu2 %v10483_v11  ;;  %v7609_v52 = vpop.permute.xlu1 %7608  ;;  %v10582_v11 = vld [vmem:[%s18518_s1 + $0xad8] sm:$0xf] }
 0x890   : > { %v7990_v36 = vmul.f32 %v7609_v52, %v19012_v57 }
 0x891   : > { %7037 = vmatmul.bf16.gmra.mxu0 %v10491_v34  ;;  %v8117_v38 = vsub.f32 %v7989_v40, %v6996_v16  ;;  %v11635_v34 = vld [vmem:[%s18518_s1 + $0xa54] sm:$0xf] }
 0x892   : > { %v6340_v6 = vpop.f32.mrf.mxu2 }
 0x893   : > { %v8249_v28 = vadd.f32 %v17203_v56, %v8117_v38  ;;  %v6341_v2 = vadd.f32 %v6340_v6, %v17241_v37  ;;  %v10767_v38 = vor.u32 %v11703_v62, %v10766_v23 }
 0x894   : > { %v6053_v22 = vpop.f32.mrf.mxu1  ;;  %v17589_v10 = vpop.f32.mrf.mxu3 }
 0x895   : > { %v8377_v29 = vmax.f32 %v8249_v28, 0.0  ;;  %v17586_v61 = vadd.f32 %v6053_v22, %v19011_v13  ;;  %v6670_v48 = vadd.f32 %v17496_v14, %v6341_v2  ;;  %v11656_v14 = vld [vmem:[%s18518_s1 + $0xaf4] sm:$0xf0] }
 0x896   : > { %v7000_v31 = vpop.f32.mrf.mxu0  ;;  %v10583_v3 = vor.u32 %v11656_v14, %v10582_v11 }
 0x897   : > { %v11975_v4 = vpack.c.bf16 %v8377_v29, %v8376_v33  ;;  %8761 = vst [vmem:[#allocation3 + $0x1f8] sm:$0xff] %v8377_v29  ;;  %v6999_v37 = vadd.f32 %v6998_v24, %v6670_v48  ;;  %v10512_v33 = vld [vmem:[%s18518_s1 + $0xa70] sm:$0xf0]  ;;  %v11636_v24 = vld [vmem:[%s18518_s1 + $0xa5c] sm:$0xf]  ;;  %v19013_v29 = vld [vmem:[#allocation194_spill] sm:$0xff] }
 0x898   : > { %v10515_v6 = vor.u32 %v11635_v34, %v10512_v33  ;;  %v10523_v2 = vor.u32 %v11636_v24, %v10520_v44 }
 0x899   : > { %12167 = vst [vmem:[#allocation2 + $0xf8] sm:$0xff] %v11975_v4   ;;  %v8118_v27 = vsub.f32 %v7990_v36, %v6999_v37  ;;  %6723 = vmatmul.bf16.gmra.mxu3 %v10583_v3  ;;  %v7614_v36 = vpop.permute.xlu2 %7613  ;;  %v19014_v4 = vld [vmem:[#allocation12_spill] sm:$0xff] }
 0x89a   : > { %v6342_v45 = vpop.f32.mrf.mxu2  ;;  %v7991_v37 = vmul.f32 %v7614_v36, %v19014_v4  ;;  %v10552_v36 = vld [vmem:[%s18518_s1 + $0xab8] sm:$0xf0] }
 0x89b   : > { %v8250_v40 = vadd.f32 %v17203_v56, %v8118_v27  ;;  %v6343_v16 = vadd.f32 %v6342_v45, %v17250_v12  ;;  %v10798_v45 = vld [vmem:[%s18518_s1 + $0xc90] sm:$0xf] }
 0x89c   : > { %v6056_v28 = vpop.f32.mrf.mxu1  ;;  %v17622_v57 = vpop.f32.mrf.mxu3 }
 0x89d   : > { %v8378_v22 = vmax.f32 %v8250_v40, 0.0  ;;  %v17619_v13 = vadd.f32 %v6056_v28, %v19013_v29  ;;  %v6672_v48 = vadd.f32 %v17505_v55, %v6343_v16  ;;  %v19015_v55 = vld [vmem:[#allocation195_spill] sm:$0xff]  ;;  %v19016_v40 = vld [vmem:[#allocation16_spill] sm:$0xff] }
 0x89e   : > { %v7003_v52 = vpop.f32.mrf.mxu0  ;;  %v11711_v28 = vld [vmem:[%s18518_s1 + $0xcac] sm:$0xf0] }
 0x89f   : > { %8762 = vst [vmem:[#allocation3 + $0x200] sm:$0xff] %v8378_v22  ;;  %v7001_v11 = vadd.f32 %v7000_v31, %v6672_v48  ;;  %6095 = vmatmul.bf16.gmra.mxu1 %v10767_v38  ;;  %6384 = vmatmul.bf16.gmra.mxu2 %v10515_v6  ;;  %v7619_v31 = vpop.permute.xlu0 %7618  ;;  %v10614_v6 = vld [vmem:[%s18518_s1 + $0xb18] sm:$0xf] }
 0x8a0   : > { %v7992_v16 = vmul.f32 %v7619_v31, %v19016_v40 }
 0x8a1   : > { %7042 = vmatmul.bf16.gmra.mxu0 %v10523_v2  ;;  %v8119_v12 = vsub.f32 %v7991_v37, %v7001_v11  ;;  %v11643_v2 = vld [vmem:[%s18518_s1 + $0xa94] sm:$0xf] }
 0x8a2   : > { %v6345_v23 = vpop.f32.mrf.mxu2 }
 0x8a3   : > { %v8251_v14 = vadd.f32 %v17203_v56, %v8119_v12  ;;  %v6346_v62 = vadd.f32 %v6345_v23, %v17283_v53  ;;  %v10799_v12 = vor.u32 %v11711_v28, %v10798_v45 }
 0x8a4   : > { %v6058_v34 = vpop.f32.mrf.mxu1  ;;  %v17631_v44 = vpop.f32.mrf.mxu3 }
 0x8a5   : > { %v8379_v33 = vmax.f32 %v8251_v14, 0.0  ;;  %v17628_v3 = vadd.f32 %v6058_v34, %v19015_v55  ;;  %v6675_v27 = vadd.f32 %v17538_v30, %v6346_v62  ;;  %v11664_v30 = vld [vmem:[%s18518_s1 + $0xb34] sm:$0xf0] }
 0x8a6   : > { %v7005_v24 = vpop.f32.mrf.mxu0  ;;  %v10615_v29 = vor.u32 %v11664_v30, %v10614_v6 }
 0x8a7   : > { %v11980_v38 = vpack.c.bf16 %v8379_v33, %v8378_v22  ;;  %8763 = vst [vmem:[#allocation3 + $0x208] sm:$0xff] %v8379_v33  ;;  %v7004_v53 = vadd.f32 %v7003_v52, %v6675_v27  ;;  %v10544_v22 = vld [vmem:[%s18518_s1 + $0xab0] sm:$0xf0]  ;;  %v11644_v52 = vld [vmem:[%s18518_s1 + $0xa9c] sm:$0xf] }
 0x8a8   : > { %v10547_v23 = vor.u32 %v11643_v2, %v10544_v22  ;;  %v10555_v62 = vor.u32 %v11644_v52, %v10552_v36  ;;  %v19017_v33 = vld [vmem:[#allocation196_spill] sm:$0xff] }
 0x8a9   : > { %12168 = vst [vmem:[#allocation2 + $0x100] sm:$0xff] %v11980_v38   ;;  %v8120_v48 = vsub.f32 %v7992_v16, %v7004_v53  ;;  %6728 = vmatmul.bf16.gmra.mxu3 %v10615_v29  ;;  %v7624_v16 = vpop.permute.xlu1 %7623  ;;  %v19018_v38 = vld [vmem:[#allocation20_spill] sm:$0xff] }
 0x8aa   : > { %v6347_v4 = vpop.f32.mrf.mxu2  ;;  %v7993_v53 = vmul.f32 %v7624_v16, %v19018_v38  ;;  %v17701_v38 = vld [vmem:[%s12340_s24] ss:$0 sm:$0xff] }
 0x8ab   : > { %v8252_v37 = vadd.f32 %v17203_v56, %v8120_v48  ;;  %v6348_v11 = vadd.f32 %v6347_v4, %v17292_v42  ;;  %v10830_v4 = vld [vmem:[%s18518_s1 + $0xcd0] sm:$0xf] }
 0x8ac   : > { %v6061_v14 = vpop.f32.mrf.mxu1  ;;  %v17664_v40 = vpop.f32.mrf.mxu3 }
 0x8ad   : > { %v8380_v34 = vmax.f32 %v8252_v37, 0.0  ;;  %v17661_v55 = vadd.f32 %v6061_v14, %v19017_v33  ;;  %v6677_v27 = vadd.f32 %v17547_v15, %v6348_v11  ;;  %v19019_v15 = vld [vmem:[#allocation197_spill] sm:$0xff]  ;;  %v19020_v37 = vld [vmem:[#allocation24_spill] sm:$0xff] }
 0x8ae   : > { %v7008_v31 = vpop.f32.mrf.mxu0  ;;  %v11651_v14 = vld [vmem:[%s18518_s1 + $0xad4] sm:$0xf] }
 0x8af   : > { %8764 = vst [vmem:[#allocation3 + $0x210] sm:$0xff] %v8380_v34  ;;  %v7006_v6 = vadd.f32 %v7005_v24, %v6677_v27  ;;  %6100 = vmatmul.bf16.gmra.mxu1 %v10799_v12  ;;  %6389 = vmatmul.bf16.gmra.mxu2 %v10547_v23  ;;  %v7629_v24 = vpop.permute.xlu2 %7628  ;;  %v10646_v12 = vld [vmem:[%s18518_s1 + $0xb58] sm:$0xf]  ;;  %v11719_v23 = vld [vmem:[%s18518_s1 + $0xcec] sm:$0xf0] }
 0x8b0   : > { %v7994_v11 = vmul.f32 %v7629_v24, %v19020_v37  ;;  %v11652_v27 = vld [vmem:[%s18518_s1 + $0xadc] sm:$0xf] }
 0x8b1   : > { %7047 = vmatmul.bf16.gmra.mxu0 %v10555_v62  ;;  %v8121_v42 = vsub.f32 %v7993_v53, %v7006_v6  ;;  %v10576_v62 = vld [vmem:[%s18518_s1 + $0xaf0] sm:$0xf0] }
 0x8b2   : > { %v6350_v45 = vpop.f32.mrf.mxu2 }
 0x8b3   : > { %v8253_v30 = vadd.f32 %v17203_v56, %v8121_v42  ;;  %v6351_v28 = vadd.f32 %v6350_v45, %v17325_v51  ;;  %v10831_v42 = vor.u32 %v11719_v23, %v10830_v4  ;;  %v10579_v45 = vor.u32 %v11651_v14, %v10576_v62 }
 0x8b4   : > { %v6063_v2 = vpop.f32.mrf.mxu1  ;;  %v17673_v36 = vpop.f32.mrf.mxu3 }
 0x8b5   : > { %v8381_v22 = vmax.f32 %v8253_v30, 0.0  ;;  %v17670_v29 = vadd.f32 %v6063_v2, %v19019_v15  ;;  %v6680_v48 = vadd.f32 %v17580_v54, %v6351_v28  ;;  %v11672_v54 = vld [vmem:[%s18518_s1 + $0xb74] sm:$0xf0] }
 0x8b6   : > { %v7010_v52 = vpop.f32.mrf.mxu0 }
 0x8b7   : > { %v11985_v56 = vpack.c.bf16 %v8381_v22, %v8380_v34  ;;  %8765 = vst [vmem:[#allocation3 + $0x218] sm:$0xff] %v8381_v22  ;;  %v7009_v51 = vadd.f32 %v7008_v31, %v6680_v48  ;;  %v10647_v34 = vor.u32 %v11672_v54, %v10646_v12  ;;  %v10584_v31 = vld [vmem:[%s18518_s1 + $0xaf8] sm:$0xf0]  ;;  %v19021_v22 = vld [vmem:[#allocation198_spill] sm:$0xff] }
 0x8b8   : > { %v10587_v28 = vor.u32 %v11652_v27, %v10584_v31 }
 0x8b9   : > { %12169 = vst [vmem:[#allocation2 + $0x108] sm:$0xff] %v11985_v56   ;;  %v8122_v33 = vsub.f32 %v7994_v11, %v7009_v51  ;;  %6733 = vmatmul.bf16.gmra.mxu3 %v10647_v34  ;;  %v7634_v11 = vpop.permute.xlu0 %7633  ;;  %v19022_v56 = vld [vmem:[#allocation28_spill] sm:$0xff] }
 0x8ba   : > { %v6352_v16 = vpop.f32.mrf.mxu2  ;;  %v7995_v51 = vmul.f32 %v7634_v11, %v19022_v56  ;;  %v10616_v11 = vld [vmem:[%s18518_s1 + $0xb38] sm:$0xf0] }
 0x8bb   : > { %v8254_v53 = vadd.f32 %v17701_v38, %v8122_v33  ;;  %v6353_v6 = vadd.f32 %v6352_v16, %v17334_v0  ;;  %v10862_v16 = vld [vmem:[%s18518_s1 + $0xd10] sm:$0xf] }
 0x8bc   : > { %v6066_v30 = vpop.f32.mrf.mxu1  ;;  %v17709_v37 = vpop.f32.mrf.mxu3 }
 0x8bd   : > { %v8382_v2 = vmax.f32 %v8254_v53, 0.0  ;;  %v17706_v15 = vadd.f32 %v6066_v30, %v19021_v22  ;;  %v6682_v48 = vadd.f32 %v17589_v10, %v6353_v6  ;;  %v19023_v10 = vld [vmem:[#allocation199_spill] sm:$0xff]  ;;  %v19024_v53 = vld [vmem:[#allocation32_spill] sm:$0xff] }
 0x8be   : > { %v7013_v24 = vpop.f32.mrf.mxu0  ;;  %v11727_v30 = vld [vmem:[%s18518_s1 + $0xd2c] sm:$0xf0] }
 0x8bf   : > { %8766 = vst [vmem:[#allocation3 + $0x220] sm:$0xff] %v8382_v2  ;;  %v7011_v12 = vadd.f32 %v7010_v52, %v6682_v48  ;;  %6105 = vmatmul.bf16.gmra.mxu1 %v10831_v42  ;;  %6394 = vmatmul.bf16.gmra.mxu2 %v10579_v45  ;;  %v7639_v52 = vpop.permute.xlu1 %7638  ;;  %v10678_v45 = vld [vmem:[%s18518_s1 + $0xb98] sm:$0xf] }
 0x8c0   : > { %v7996_v6 = vmul.f32 %v7639_v52, %v19024_v53 }
 0x8c1   : > { %7052 = vmatmul.bf16.gmra.mxu0 %v10587_v28  ;;  %v8123_v0 = vsub.f32 %v7995_v51, %v7011_v12  ;;  %v11659_v28 = vld [vmem:[%s18518_s1 + $0xb14] sm:$0xf] }
 0x8c2   : > { %v6355_v4 = vpop.f32.mrf.mxu2 }
 0x8c3   : > { %v8255_v54 = vadd.f32 %v17701_v38, %v8123_v0  ;;  %v6356_v23 = vadd.f32 %v6355_v4, %v17367_v47  ;;  %v10863_v0 = vor.u32 %v11727_v30, %v10862_v16 }
 0x8c4   : > { %v6068_v14 = vpop.f32.mrf.mxu1  ;;  %v17718_v31 = vpop.f32.mrf.mxu3 }
 0x8c5   : > { %v8383_v62 = vmax.f32 %v8255_v54, 0.0  ;;  %v17715_v34 = vadd.f32 %v6068_v14, %v19023_v10  ;;  %v6685_v33 = vadd.f32 %v17622_v57, %v6356_v23  ;;  %v11680_v57 = vld [vmem:[%s18518_s1 + $0xbb4] sm:$0xf0] }
 0x8c6   : > { %v7015_v27 = vpop.f32.mrf.mxu0  ;;  %v10679_v22 = vor.u32 %v11680_v57, %v10678_v45 }
 0x8c7   : > { %v11990_v42 = vpack.c.bf16 %v8383_v62, %v8382_v2  ;;  %8767 = vst [vmem:[#allocation3 + $0x228] sm:$0xff] %v8383_v62  ;;  %v7014_v47 = vadd.f32 %v7013_v24, %v6685_v33  ;;  %v10608_v2 = vld [vmem:[%s18518_s1 + $0xb30] sm:$0xf0]  ;;  %v11660_v24 = vld [vmem:[%s18518_s1 + $0xb1c] sm:$0xf] }
 0x8c8   : > { %v10611_v4 = vor.u32 %v11659_v28, %v10608_v2  ;;  %v10619_v23 = vor.u32 %v11660_v24, %v10616_v11  ;;  %v19025_v62 = vld [vmem:[#allocation200_spill] sm:$0xff] }
 0x8c9   : > { %12170 = vst [vmem:[#allocation2 + $0x110] sm:$0xff] %v11990_v42   ;;  %v8124_v48 = vsub.f32 %v7996_v6, %v7014_v47  ;;  %6738 = vmatmul.bf16.gmra.mxu3 %v10679_v22  ;;  %v7644_v6 = vpop.permute.xlu2 %7643  ;;  %v19026_v42 = vld [vmem:[#allocation36_spill] sm:$0xff] }
 0x8ca   : > { %v6357_v56 = vpop.f32.mrf.mxu2  ;;  %v7997_v47 = vmul.f32 %v7644_v6, %v19026_v42  ;;  %v10648_v6 = vld [vmem:[%s18518_s1 + $0xb78] sm:$0xf0] }
 0x8cb   : > { %v8256_v51 = vadd.f32 %v17701_v38, %v8124_v48  ;;  %v6358_v12 = vadd.f32 %v6357_v56, %v17376_v25  ;;  %v10894_v56 = vld [vmem:[%s18518_s1 + $0xd50] sm:$0xf] }
 0x8cc   : > { %v6071_v54 = vpop.f32.mrf.mxu1  ;;  %v17751_v53 = vpop.f32.mrf.mxu3 }
 0x8cd   : > { %v8384_v14 = vmax.f32 %v8256_v51, 0.0  ;;  %v17748_v10 = vadd.f32 %v6071_v54, %v19025_v62  ;;  %v6687_v33 = vadd.f32 %v17631_v44, %v6358_v12  ;;  %v19027_v44 = vld [vmem:[#allocation201_spill] sm:$0xff]  ;;  %v19028_v51 = vld [vmem:[#allocation40_spill] sm:$0xff] }
 0x8ce   : > { %v7018_v52 = vpop.f32.mrf.mxu0  ;;  %v11735_v54 = vld [vmem:[%s18518_s1 + $0xd6c] sm:$0xf0] }
 0x8cf   : > { %8768 = vst [vmem:[#allocation3 + $0x230] sm:$0xff] %v8384_v14  ;;  %v7016_v45 = vadd.f32 %v7015_v27, %v6687_v33  ;;  %6110 = vmatmul.bf16.gmra.mxu1 %v10863_v0  ;;  %6399 = vmatmul.bf16.gmra.mxu2 %v10611_v4  ;;  %v7649_v27 = vpop.permute.xlu0 %7648  ;;  %v10710_v4 = vld [vmem:[%s18518_s1 + $0xbd8] sm:$0xf] }
 0x8d0   : > { %v7998_v12 = vmul.f32 %v7649_v27, %v19028_v51 }
 0x8d1   : > { %7057 = vmatmul.bf16.gmra.mxu0 %v10619_v23  ;;  %v8125_v25 = vsub.f32 %v7997_v47, %v7016_v45  ;;  %v11667_v23 = vld [vmem:[%s18518_s1 + $0xb54] sm:$0xf] }
 0x8d2   : > { %v6360_v16 = vpop.f32.mrf.mxu2 }
 0x8d3   : > { %v8257_v57 = vadd.f32 %v17701_v38, %v8125_v25  ;;  %v6361_v30 = vadd.f32 %v6360_v16, %v17409_v58  ;;  %v10895_v25 = vor.u32 %v11735_v54, %v10894_v56 }
 0x8d4   : > { %v6073_v28 = vpop.f32.mrf.mxu1  ;;  %v17760_v11 = vpop.f32.mrf.mxu3 }
 0x8d5   : > { %v8385_v2 = vmax.f32 %v8257_v57, 0.0  ;;  %v17757_v22 = vadd.f32 %v6073_v28, %v19027_v44  ;;  %v6690_v48 = vadd.f32 %v17664_v40, %v6361_v30  ;;  %v11688_v40 = vld [vmem:[%s18518_s1 + $0xbf4] sm:$0xf0] }
 0x8d6   : > { %v7020_v24 = vpop.f32.mrf.mxu0  ;;  %v10711_v62 = vor.u32 %v11688_v40, %v10710_v4 }
 0x8d7   : > { %v11995_v0 = vpack.c.bf16 %v8385_v2, %v8384_v14  ;;  %8769 = vst [vmem:[#allocation3 + $0x238] sm:$0xff] %v8385_v2  ;;  %v7019_v58 = vadd.f32 %v7018_v52, %v6690_v48  ;;  %v10640_v14 = vld [vmem:[%s18518_s1 + $0xb70] sm:$0xf0]  ;;  %v11668_v52 = vld [vmem:[%s18518_s1 + $0xb5c] sm:$0xf]  ;;  %v19029_v2 = vld [vmem:[#allocation202_spill] sm:$0xff] }
 0x8d8   : > { %v10643_v16 = vor.u32 %v11667_v23, %v10640_v14  ;;  %v10651_v30 = vor.u32 %v11668_v52, %v10648_v6 }
 0x8d9   : > { %12171 = vst [vmem:[#allocation2 + $0x118] sm:$0xff] %v11995_v0   ;;  %v8126_v33 = vsub.f32 %v7998_v12, %v7019_v58  ;;  %6743 = vmatmul.bf16.gmra.mxu3 %v10711_v62  ;;  %v7654_v12 = vpop.permute.xlu1 %7653  ;;  %v19030_v0 = vld [vmem:[#allocation44_spill] sm:$0xff] }
 0x8da   : > { %v6362_v42 = vpop.f32.mrf.mxu2  ;;  %v7999_v58 = vmul.f32 %v7654_v12, %v19030_v0  ;;  %v10680_v12 = vld [vmem:[%s18518_s1 + $0xbb8] sm:$0xf0] }
 0x8db   : > { %v8258_v47 = vadd.f32 %v17701_v38, %v8126_v33  ;;  %v6363_v45 = vadd.f32 %v6362_v42, %v17418_v46  ;;  %v10926_v42 = vld [vmem:[%s18518_s1 + $0xd90] sm:$0xf] }
 0x8dc   : > { %v6076_v57 = vpop.f32.mrf.mxu1  ;;  %v17793_v51 = vpop.f32.mrf.mxu3 }
 0x8dd   : > { %v8386_v28 = vmax.f32 %v8258_v47, 0.0  ;;  %v17790_v44 = vadd.f32 %v6076_v57, %v19029_v2  ;;  %v6692_v48 = vadd.f32 %v17673_v36, %v6363_v45  ;;  %v19031_v36 = vld [vmem:[#allocation203_spill] sm:$0xff]  ;;  %v19032_v47 = vld [vmem:[#allocation48_spill] sm:$0xff] }
 0x8de   : > { %v7023_v27 = vpop.f32.mrf.mxu0  ;;  %v11743_v57 = vld [vmem:[%s18518_s1 + $0xdac] sm:$0xf0] }
 0x8df   : > { %8770 = vst [vmem:[#allocation3 + $0x240] sm:$0xff] %v8386_v28  ;;  %v7021_v4 = vadd.f32 %v7020_v24, %v6692_v48  ;;  %6115 = vmatmul.bf16.gmra.mxu1 %v10895_v25  ;;  %6404 = vmatmul.bf16.gmra.mxu2 %v10643_v16  ;;  %v7659_v24 = vpop.permute.xlu2 %7658  ;;  %v10742_v16 = vld [vmem:[%s18518_s1 + $0xc18] sm:$0xf] }
 0x8e0   : > { %v8000_v45 = vmul.f32 %v7659_v24, %v19032_v47 }
 0x8e1   : > { %7062 = vmatmul.bf16.gmra.mxu0 %v10651_v30  ;;  %v8127_v46 = vsub.f32 %v7999_v58, %v7021_v4  ;;  %v11675_v30 = vld [vmem:[%s18518_s1 + $0xb94] sm:$0xf] }
 0x8e2   : > { %v6365_v56 = vpop.f32.mrf.mxu2 }
 0x8e3   : > { %v8259_v40 = vadd.f32 %v17701_v38, %v8127_v46  ;;  %v6366_v54 = vadd.f32 %v6365_v56, %v17451_v20  ;;  %v10927_v46 = vor.u32 %v11743_v57, %v10926_v42 }
 0x8e4   : > { %v6078_v23 = vpop.f32.mrf.mxu1  ;;  %v17802_v6 = vpop.f32.mrf.mxu3 }
 0x8e5   : > { %v8387_v14 = vmax.f32 %v8259_v40, 0.0  ;;  %v17799_v62 = vadd.f32 %v6078_v23, %v19031_v36  ;;  %v6695_v33 = vadd.f32 %v17709_v37, %v6366_v54  ;;  %v11696_v37 = vld [vmem:[%s18518_s1 + $0xc34] sm:$0xf0] }
 0x8e6   : > { %v7025_v52 = vpop.f32.mrf.mxu0  ;;  %v10743_v2 = vor.u32 %v11696_v37, %v10742_v16 }
 0x8e7   : > { %v12000_v25 = vpack.c.bf16 %v8387_v14, %v8386_v28  ;;  %8771 = vst [vmem:[#allocation3 + $0x248] sm:$0xff] %v8387_v14  ;;  %v7024_v20 = vadd.f32 %v7023_v27, %v6695_v33  ;;  %v10672_v28 = vld [vmem:[%s18518_s1 + $0xbb0] sm:$0xf0]  ;;  %v11676_v27 = vld [vmem:[%s18518_s1 + $0xb9c] sm:$0xf] }
 0x8e8   : > { %v10675_v56 = vor.u32 %v11675_v30, %v10672_v28  ;;  %v10683_v54 = vor.u32 %v11676_v27, %v10680_v12  ;;  %v19033_v14 = vld [vmem:[#allocation204_spill] sm:$0xff] }
 0x8e9   : > { %12172 = vst [vmem:[#allocation2 + $0x120] sm:$0xff] %v12000_v25   ;;  %v8128_v48 = vsub.f32 %v8000_v45, %v7024_v20  ;;  %6748 = vmatmul.bf16.gmra.mxu3 %v10743_v2  ;;  %v7664_v45 = vpop.permute.xlu0 %7663  ;;  %v19034_v25 = vld [vmem:[#allocation52_spill] sm:$0xff] }
 0x8ea   : > { %v6367_v0 = vpop.f32.mrf.mxu2  ;;  %v8001_v20 = vmul.f32 %v7664_v45, %v19034_v25  ;;  %v10712_v45 = vld [vmem:[%s18518_s1 + $0xbf8] sm:$0xf0] }
 0x8eb   : > { %v8260_v58 = vadd.f32 %v17701_v38, %v8128_v48  ;;  %v6368_v4 = vadd.f32 %v6367_v0, %v17460_v43  ;;  %v10958_v0 = vld [vmem:[%s18518_s1 + $0xdd0] sm:$0xf] }
 0x8ec   : > { %v6081_v40 = vpop.f32.mrf.mxu1  ;;  %v17835_v47 = vpop.f32.mrf.mxu3 }
 0x8ed   : > { %v8388_v23 = vmax.f32 %v8260_v58, 0.0  ;;  %v17832_v36 = vadd.f32 %v6081_v40, %v19033_v14  ;;  %v6697_v33 = vadd.f32 %v17718_v31, %v6368_v4  ;;  %v19035_v31 = vld [vmem:[#allocation205_spill] sm:$0xff]  ;;  %v19036_v58 = vld [vmem:[#allocation56_spill] sm:$0xff] }
 0x8ee   : > { %v7028_v24 = vpop.f32.mrf.mxu0  ;;  %v11751_v40 = vld [vmem:[%s18518_s1 + $0xdec] sm:$0xf0] }
 0x8ef   : > { %8772 = vst [vmem:[#allocation3 + $0x250] sm:$0xff] %v8388_v23  ;;  %v7026_v16 = vadd.f32 %v7025_v52, %v6697_v33  ;;  %6120 = vmatmul.bf16.gmra.mxu1 %v10927_v46  ;;  %6409 = vmatmul.bf16.gmra.mxu2 %v10675_v56  ;;  %v7669_v52 = vpop.permute.xlu1 %7668  ;;  %v10774_v56 = vld [vmem:[%s18518_s1 + $0xc58] sm:$0xf] }
 0x8f0   : > { %v8002_v4 = vmul.f32 %v7669_v52, %v19036_v58 }
 0x8f1   : > { %7067 = vmatmul.bf16.gmra.mxu0 %v10683_v54  ;;  %v8129_v43 = vsub.f32 %v8001_v20, %v7026_v16  ;;  %v11683_v54 = vld [vmem:[%s18518_s1 + $0xbd4] sm:$0xf] }
 0x8f2   : > { %v6370_v42 = vpop.f32.mrf.mxu2 }
 0x8f3   : > { %v8261_v37 = vadd.f32 %v17701_v38, %v8129_v43  ;;  %v6371_v57 = vadd.f32 %v6370_v42, %v17493_v26  ;;  %v10959_v43 = vor.u32 %v11751_v40, %v10958_v0 }
 0x8f4   : > { %v6083_v30 = vpop.f32.mrf.mxu1  ;;  %v17844_v12 = vpop.f32.mrf.mxu3 }
 0x8f5   : > { %v8389_v28 = vmax.f32 %v8261_v37, 0.0  ;;  %v17841_v2 = vadd.f32 %v6083_v30, %v19035_v31  ;;  %v6700_v48 = vadd.f32 %v17751_v53, %v6371_v57  ;;  %v11704_v53 = vld [vmem:[%s18518_s1 + $0xc74] sm:$0xf0] }
 0x8f6   : > { %v7030_v27 = vpop.f32.mrf.mxu0  ;;  %v10775_v14 = vor.u32 %v11704_v53, %v10774_v56 }
 0x8f7   : > { %v12005_v46 = vpack.c.bf16 %v8389_v28, %v8388_v23  ;;  %8773 = vst [vmem:[#allocation3 + $0x258] sm:$0xff] %v8389_v28  ;;  %v7029_v26 = vadd.f32 %v7028_v24, %v6700_v48  ;;  %v10704_v23 = vld [vmem:[%s18518_s1 + $0xbf0] sm:$0xf0]  ;;  %v11684_v24 = vld [vmem:[%s18518_s1 + $0xbdc] sm:$0xf]  ;;  %v19037_v28 = vld [vmem:[#allocation206_spill] sm:$0xff] }
 0x8f8   : > { %v10707_v42 = vor.u32 %v11683_v54, %v10704_v23  ;;  %v10715_v57 = vor.u32 %v11684_v24, %v10712_v45 }
 0x8f9   : > { %12173 = vst [vmem:[#allocation2 + $0x128] sm:$0xff] %v12005_v46   ;;  %v8130_v33 = vsub.f32 %v8002_v4, %v7029_v26  ;;  %6753 = vmatmul.bf16.gmra.mxu3 %v10775_v14  ;;  %v7674_v4 = vpop.permute.xlu2 %7673  ;;  %v19038_v46 = vld [vmem:[#allocation60_spill] sm:$0xff] }
 0x8fa   : > { %v6372_v25 = vpop.f32.mrf.mxu2  ;;  %v8003_v26 = vmul.f32 %v7674_v4, %v19038_v46  ;;  %v10744_v4 = vld [vmem:[%s18518_s1 + $0xc38] sm:$0xf0] }
 0x8fb   : > { %v8262_v20 = vadd.f32 %v17701_v38, %v8130_v33  ;;  %v6373_v16 = vadd.f32 %v6372_v25, %v17502_v18  ;;  %v10990_v25 = vld [vmem:[%s18518_s1 + $0xe10] sm:$0xf] }
 0x8fc   : > { %v6086_v37 = vpop.f32.mrf.mxu1  ;;  %v17877_v58 = vpop.f32.mrf.mxu3 }
 0x8fd   : > { %v8390_v30 = vmax.f32 %v8262_v20, 0.0  ;;  %v17874_v31 = vadd.f32 %v6086_v37, %v19037_v28  ;;  %v6702_v48 = vadd.f32 %v17760_v11, %v6373_v16  ;;  %v19039_v11 = vld [vmem:[#allocation207_spill] sm:$0xff]  ;;  %v19040_v20 = vld [vmem:[#allocation64_spill] sm:$0xff] }
 0x8fe   : > { %v7033_v52 = vpop.f32.mrf.mxu0  ;;  %v11759_v37 = vld [vmem:[%s18518_s1 + $0xe2c] sm:$0xf0] }
 0x8ff   : > { %8774 = vst [vmem:[#allocation3 + $0x260] sm:$0xff] %v8390_v30  ;;  %v7031_v56 = vadd.f32 %v7030_v27, %v6702_v48  ;;  %6125 = vmatmul.bf16.gmra.mxu1 %v10959_v43  ;;  %6414 = vmatmul.bf16.gmra.mxu2 %v10707_v42  ;;  %v7679_v27 = vpop.permute.xlu0 %7678  ;;  %v10806_v42 = vld [vmem:[%s18518_s1 + $0xc98] sm:$0xf] }
 0x900   : > { %v8004_v16 = vmul.f32 %v7679_v27, %v19040_v20 }
 0x901   : > { %7072 = vmatmul.bf16.gmra.mxu0 %v10715_v57  ;;  %v8131_v18 = vsub.f32 %v8003_v26, %v7031_v56  ;;  %v11691_v57 = vld [vmem:[%s18518_s1 + $0xc14] sm:$0xf] }
 0x902   : > { %v6375_v0 = vpop.f32.mrf.mxu2 }
 0x903   : > { %v8263_v53 = vadd.f32 %v17701_v38, %v8131_v18  ;;  %v6376_v40 = vadd.f32 %v6375_v0, %v17535_v7  ;;  %v10991_v18 = vor.u32 %v11759_v37, %v10990_v25 }
 0x904   : > { %v6088_v54 = vpop.f32.mrf.mxu1  ;;  %v17886_v45 = vpop.f32.mrf.mxu3 }
 0x905   : > { %v8391_v23 = vmax.f32 %v8263_v53, 0.0  ;;  %v17883_v14 = vadd.f32 %v6088_v54, %v19039_v11  ;;  %v6705_v33 = vadd.f32 %v17793_v51, %v6376_v40  ;;  %v11712_v51 = vld [vmem:[%s18518_s1 + $0xcb4] sm:$0xf0] }
 0x906   : > { %v7035_v24 = vpop.f32.mrf.mxu0  ;;  %v10807_v28 = vor.u32 %v11712_v51, %v10806_v42 }
 0x907   : > { %v12010_v43 = vpack.c.bf16 %v8391_v23, %v8390_v30  ;;  %8775 = vst [vmem:[#allocation3 + $0x268] sm:$0xff] %v8391_v23  ;;  %v7034_v7 = vadd.f32 %v7033_v52, %v6705_v33  ;;  %v10736_v30 = vld [vmem:[%s18518_s1 + $0xc30] sm:$0xf0]  ;;  %v11692_v52 = vld [vmem:[%s18518_s1 + $0xc1c] sm:$0xf] }
 0x908   : > { %v10739_v0 = vor.u32 %v11691_v57, %v10736_v30  ;;  %v10747_v40 = vor.u32 %v11692_v52, %v10744_v4  ;;  %v19041_v23 = vld [vmem:[#allocation208_spill] sm:$0xff] }
 0x909   : > { %12174 = vst [vmem:[#allocation2 + $0x130] sm:$0xff] %v12010_v43   ;;  %v8132_v48 = vsub.f32 %v8004_v16, %v7034_v7  ;;  %6758 = vmatmul.bf16.gmra.mxu3 %v10807_v28  ;;  %v7684_v16 = vpop.permute.xlu1 %7683  ;;  %v19042_v43 = vld [vmem:[#allocation68_spill] sm:$0xff] }
 0x90a   : > { %v6377_v46 = vpop.f32.mrf.mxu2  ;;  %v8005_v7 = vmul.f32 %v7684_v16, %v19042_v43  ;;  %v10776_v16 = vld [vmem:[%s18518_s1 + $0xc78] sm:$0xf0] }
 0x90b   : > { %v8264_v26 = vadd.f32 %v17701_v38, %v8132_v48  ;;  %v6378_v56 = vadd.f32 %v6377_v46, %v17544_v41  ;;  %v11022_v46 = vld [vmem:[%s18518_s1 + $0xe50] sm:$0xf] }
 0x90c   : > { %v6091_v53 = vpop.f32.mrf.mxu1  ;;  %v17919_v20 = vpop.f32.mrf.mxu3 }
 0x90d   : > { %v8392_v54 = vmax.f32 %v8264_v26, 0.0  ;;  %v17916_v11 = vadd.f32 %v6091_v53, %v19041_v23  ;;  %v6707_v33 = vadd.f32 %v17802_v6, %v6378_v56  ;;  %v19043_v6 = vld [vmem:[#allocation209_spill] sm:$0xff]  ;;  %v19044_v26 = vld [vmem:[#allocation72_spill] sm:$0xff] }
 0x90e   : > { %v7038_v27 = vpop.f32.mrf.mxu0  ;;  %v11767_v53 = vld [vmem:[%s18518_s1 + $0xe6c] sm:$0xf0] }
 0x90f   : > { %8776 = vst [vmem:[#allocation3 + $0x270] sm:$0xff] %v8392_v54  ;;  %v7036_v42 = vadd.f32 %v7035_v24, %v6707_v33  ;;  %6130 = vmatmul.bf16.gmra.mxu1 %v10991_v18  ;;  %6419 = vmatmul.bf16.gmra.mxu2 %v10739_v0  ;;  %v7689_v24 = vpop.permute.xlu2 %7688  ;;  %v10838_v0 = vld [vmem:[%s18518_s1 + $0xcd8] sm:$0xf] }
 0x910   : > { %v8006_v56 = vmul.f32 %v7689_v24, %v19044_v26 }
 0x911   : > { %7077 = vmatmul.bf16.gmra.mxu0 %v10747_v40  ;;  %v8133_v41 = vsub.f32 %v8005_v7, %v7036_v42  ;;  %v11699_v40 = vld [vmem:[%s18518_s1 + $0xc54] sm:$0xf] }
 0x912   : > { %v6380_v25 = vpop.f32.mrf.mxu2 }
 0x913   : > { %v8265_v51 = vadd.f32 %v17701_v38, %v8133_v41  ;;  %v6381_v37 = vadd.f32 %v6380_v25, %v17577_v32  ;;  %v11023_v41 = vor.u32 %v11767_v53, %v11022_v46 }
 0x914   : > { %v6093_v57 = vpop.f32.mrf.mxu1  ;;  %v17928_v4 = vpop.f32.mrf.mxu3 }
 0x915   : > { %v8393_v30 = vmax.f32 %v8265_v51, 0.0  ;;  %v17925_v28 = vadd.f32 %v6093_v57, %v19043_v6  ;;  %v6710_v48 = vadd.f32 %v17835_v47, %v6381_v37  ;;  %v11720_v47 = vld [vmem:[%s18518_s1 + $0xcf4] sm:$0xf0] }
 0x916   : > { %v7040_v52 = vpop.f32.mrf.mxu0  ;;  %v10839_v23 = vor.u32 %v11720_v47, %v10838_v0 }
 0x917   : > { %v12015_v18 = vpack.c.bf16 %v8393_v30, %v8392_v54  ;;  %8777 = vst [vmem:[#allocation3 + $0x278] sm:$0xff] %v8393_v30  ;;  %v7039_v32 = vadd.f32 %v7038_v27, %v6710_v48  ;;  %v10768_v54 = vld [vmem:[%s18518_s1 + $0xc70] sm:$0xf0]  ;;  %v11700_v27 = vld [vmem:[%s18518_s1 + $0xc5c] sm:$0xf]  ;;  %v19045_v30 = vld [vmem:[#allocation210_spill] sm:$0xff] }
 0x918   : > { %v10771_v25 = vor.u32 %v11699_v40, %v10768_v54  ;;  %v10779_v37 = vor.u32 %v11700_v27, %v10776_v16 }
 0x919   : > { %12175 = vst [vmem:[#allocation2 + $0x138] sm:$0xff] %v12015_v18   ;;  %v8134_v33 = vsub.f32 %v8006_v56, %v7039_v32  ;;  %6763 = vmatmul.bf16.gmra.mxu3 %v10839_v23  ;;  %v7694_v56 = vpop.permute.xlu0 %7693  ;;  %v19046_v18 = vld [vmem:[#allocation76_spill] sm:$0xff] }
 0x91a   : > { %v6382_v43 = vpop.f32.mrf.mxu2  ;;  %v8007_v32 = vmul.f32 %v7694_v56, %v19046_v18  ;;  %v10808_v56 = vld [vmem:[%s18518_s1 + $0xcb8] sm:$0xf0] }
 0x91b   : > { %v8266_v7 = vadd.f32 %v17701_v38, %v8134_v33  ;;  %v6383_v42 = vadd.f32 %v6382_v43, %v17586_v61  ;;  %v11054_v43 = vld [vmem:[%s18518_s1 + $0xe90] sm:$0xf] }
 0x91c   : > { %v6096_v51 = vpop.f32.mrf.mxu1  ;;  %v17961_v26 = vpop.f32.mrf.mxu3 }
 0x91d   : > { %v8394_v57 = vmax.f32 %v8266_v7, 0.0  ;;  %v17958_v6 = vadd.f32 %v6096_v51, %v19045_v30  ;;  %v6712_v48 = vadd.f32 %v17844_v12, %v6383_v42  ;;  %v19047_v12 = vld [vmem:[#allocation211_spill] sm:$0xff]  ;;  %v19048_v7 = vld [vmem:[#allocation80_spill] sm:$0xff] }
 0x91e   : > { %v7043_v24 = vpop.f32.mrf.mxu0  ;;  %v11775_v51 = vld [vmem:[%s18518_s1 + $0xeac] sm:$0xf0] }
 0x91f   : > { %8778 = vst [vmem:[#allocation3 + $0x280] sm:$0xff] %v8394_v57  ;;  %v7041_v0 = vadd.f32 %v7040_v52, %v6712_v48  ;;  %6135 = vmatmul.bf16.gmra.mxu1 %v11023_v41  ;;  %6424 = vmatmul.bf16.gmra.mxu2 %v10771_v25  ;;  %v7699_v52 = vpop.permute.xlu1 %7698  ;;  %v10870_v25 = vld [vmem:[%s18518_s1 + $0xd18] sm:$0xf] }
 0x920   : > { %v8008_v42 = vmul.f32 %v7699_v52, %v19048_v7 }
 0x921   : > { %7082 = vmatmul.bf16.gmra.mxu0 %v10779_v37  ;;  %v8135_v61 = vsub.f32 %v8007_v32, %v7041_v0  ;;  %v11707_v37 = vld [vmem:[%s18518_s1 + $0xc94] sm:$0xf] }
 0x922   : > { %v6385_v46 = vpop.f32.mrf.mxu2 }
 0x923   : > { %v8267_v47 = vadd.f32 %v17701_v38, %v8135_v61  ;;  %v6386_v53 = vadd.f32 %v6385_v46, %v17619_v13  ;;  %v11055_v61 = vor.u32 %v11775_v51, %v11054_v43 }
 0x924   : > { %v6098_v40 = vpop.f32.mrf.mxu1  ;;  %v17970_v16 = vpop.f32.mrf.mxu3 }
 0x925   : > { %v8395_v54 = vmax.f32 %v8267_v47, 0.0  ;;  %v17967_v23 = vadd.f32 %v6098_v40, %v19047_v12  ;;  %v6715_v33 = vadd.f32 %v17877_v58, %v6386_v53  ;;  %v11728_v58 = vld [vmem:[%s18518_s1 + $0xd34] sm:$0xf0] }
 0x926   : > { %v7045_v27 = vpop.f32.mrf.mxu0  ;;  %v10871_v30 = vor.u32 %v11728_v58, %v10870_v25 }
 0x927   : > { %v12020_v41 = vpack.c.bf16 %v8395_v54, %v8394_v57  ;;  %8779 = vst [vmem:[#allocation3 + $0x288] sm:$0xff] %v8395_v54  ;;  %v7044_v13 = vadd.f32 %v7043_v24, %v6715_v33  ;;  %v10800_v57 = vld [vmem:[%s18518_s1 + $0xcb0] sm:$0xf0]  ;;  %v11708_v24 = vld [vmem:[%s18518_s1 + $0xc9c] sm:$0xf] }
 0x928   : > { %v10803_v46 = vor.u32 %v11707_v37, %v10800_v57  ;;  %v10811_v53 = vor.u32 %v11708_v24, %v10808_v56  ;;  %v19049_v54 = vld [vmem:[#allocation212_spill] sm:$0xff] }
 0x929   : > { %12176 = vst [vmem:[#allocation2 + $0x140] sm:$0xff] %v12020_v41   ;;  %v8136_v48 = vsub.f32 %v8008_v42, %v7044_v13  ;;  %6768 = vmatmul.bf16.gmra.mxu3 %v10871_v30  ;;  %v7704_v42 = vpop.permute.xlu2 %7703  ;;  %v19050_v41 = vld [vmem:[#allocation84_spill] sm:$0xff] }
 0x92a   : > { %v6387_v18 = vpop.f32.mrf.mxu2  ;;  %v8009_v13 = vmul.f32 %v7704_v42, %v19050_v41  ;;  %v10840_v42 = vld [vmem:[%s18518_s1 + $0xcf8] sm:$0xf0] }
 0x92b   : > { %v8268_v32 = vadd.f32 %v17701_v38, %v8136_v48  ;;  %v6388_v0 = vadd.f32 %v6387_v18, %v17628_v3  ;;  %v11086_v18 = vld [vmem:[%s18518_s1 + $0xed0] sm:$0xf] }
 0x92c   : > { %v6101_v47 = vpop.f32.mrf.mxu1  ;;  %v18003_v7 = vpop.f32.mrf.mxu3 }
 0x92d   : > { %v8396_v40 = vmax.f32 %v8268_v32, 0.0  ;;  %v18000_v12 = vadd.f32 %v6101_v47, %v19049_v54  ;;  %v6717_v33 = vadd.f32 %v17886_v45, %v6388_v0  ;;  %v19051_v45 = vld [vmem:[#allocation213_spill] sm:$0xff]  ;;  %v19052_v32 = vld [vmem:[#allocation88_spill] sm:$0xff] }
 0x92e   : > { %v7048_v52 = vpop.f32.mrf.mxu0  ;;  %v11783_v47 = vld [vmem:[%s18518_s1 + $0xeec] sm:$0xf0] }
 0x92f   : > { %8780 = vst [vmem:[#allocation3 + $0x290] sm:$0xff] %v8396_v40  ;;  %v7046_v25 = vadd.f32 %v7045_v27, %v6717_v33  ;;  %6140 = vmatmul.bf16.gmra.mxu1 %v11055_v61  ;;  %6429 = vmatmul.bf16.gmra.mxu2 %v10803_v46  ;;  %v7709_v27 = vpop.permute.xlu0 %7708  ;;  %v10902_v46 = vld [vmem:[%s18518_s1 + $0xd58] sm:$0xf] }
 0x930   : > { %v8010_v0 = vmul.f32 %v7709_v27, %v19052_v32 }
 0x931   : > { %7087 = vmatmul.bf16.gmra.mxu0 %v10811_v53  ;;  %v8137_v3 = vsub.f32 %v8009_v13, %v7046_v25  ;;  %v11715_v53 = vld [vmem:[%s18518_s1 + $0xcd4] sm:$0xf] }
 0x932   : > { %v6390_v43 = vpop.f32.mrf.mxu2 }
 0x933   : > { %v8269_v58 = vadd.f32 %v17701_v38, %v8137_v3  ;;  %v6391_v51 = vadd.f32 %v6390_v43, %v17661_v55  ;;  %v11087_v3 = vor.u32 %v11783_v47, %v11086_v18 }
 0x934   : > { %v6103_v37 = vpop.f32.mrf.mxu1  ;;  %v18012_v56 = vpop.f32.mrf.mxu3 }
 0x935   : > { %v8397_v57 = vmax.f32 %v8269_v58, 0.0  ;;  %v18009_v30 = vadd.f32 %v6103_v37, %v19051_v45  ;;  %v6720_v48 = vadd.f32 %v17919_v20, %v6391_v51  ;;  %v11736_v20 = vld [vmem:[%s18518_s1 + $0xd74] sm:$0xf0] }
 0x936   : > { %v7050_v24 = vpop.f32.mrf.mxu0  ;;  %v10903_v54 = vor.u32 %v11736_v20, %v10902_v46 }
 0x937   : > { %v12025_v61 = vpack.c.bf16 %v8397_v57, %v8396_v40  ;;  %8781 = vst [vmem:[#allocation3 + $0x298] sm:$0xff] %v8397_v57  ;;  %v7049_v55 = vadd.f32 %v7048_v52, %v6720_v48  ;;  %v10832_v40 = vld [vmem:[%s18518_s1 + $0xcf0] sm:$0xf0]  ;;  %v11716_v52 = vld [vmem:[%s18518_s1 + $0xcdc] sm:$0xf]  ;;  %v19053_v57 = vld [vmem:[#allocation214_spill] sm:$0xff] }
 0x938   : > { %v10835_v43 = vor.u32 %v11715_v53, %v10832_v40  ;;  %v10843_v51 = vor.u32 %v11716_v52, %v10840_v42 }
 0x939   : > { %12177 = vst [vmem:[#allocation2 + $0x148] sm:$0xff] %v12025_v61   ;;  %v8138_v33 = vsub.f32 %v8010_v0, %v7049_v55  ;;  %6773 = vmatmul.bf16.gmra.mxu3 %v10903_v54  ;;  %v7714_v0 = vpop.permute.xlu1 %7713  ;;  %v19054_v61 = vld [vmem:[#allocation92_spill] sm:$0xff] }
 0x93a   : > { %v6392_v41 = vpop.f32.mrf.mxu2  ;;  %v8011_v55 = vmul.f32 %v7714_v0, %v19054_v61  ;;  %v10872_v0 = vld [vmem:[%s18518_s1 + $0xd38] sm:$0xf0] }
 0x93b   : > { %v8270_v13 = vadd.f32 %v17701_v38, %v8138_v33  ;;  %v6393_v25 = vadd.f32 %v6392_v41, %v17670_v29  ;;  %v11118_v41 = vld [vmem:[%s18518_s1 + $0xf10] sm:$0xf] }
 0x93c   : > { %v6106_v58 = vpop.f32.mrf.mxu1  ;;  %v18045_v32 = vpop.f32.mrf.mxu3 }
 0x93d   : > { %v8398_v37 = vmax.f32 %v8270_v13, 0.0  ;;  %v18042_v45 = vadd.f32 %v6106_v58, %v19053_v57  ;;  %v6722_v48 = vadd.f32 %v17928_v4, %v6393_v25  ;;  %v19055_v4 = vld [vmem:[#allocation215_spill] sm:$0xff]  ;;  %v19056_v13 = vld [vmem:[#allocation96_spill] sm:$0xff] }
 0x93e   : > { %v7053_v27 = vpop.f32.mrf.mxu0  ;;  %v11791_v58 = vld [vmem:[%s18518_s1 + $0xf2c] sm:$0xf0] }
 0x93f   : > { %8782 = vst [vmem:[#allocation3 + $0x2a0] sm:$0xff] %v8398_v37  ;;  %v7051_v46 = vadd.f32 %v7050_v24, %v6722_v48  ;;  %6145 = vmatmul.bf16.gmra.mxu1 %v11087_v3  ;;  %6434 = vmatmul.bf16.gmra.mxu2 %v10835_v43  ;;  %v7719_v24 = vpop.permute.xlu2 %7718  ;;  %v10934_v43 = vld [vmem:[%s18518_s1 + $0xd98] sm:$0xf] }
 0x940   : > { %v8012_v25 = vmul.f32 %v7719_v24, %v19056_v13  ;;  %v19057_v24 = vld [vmem:[#allocation102_spill] sm:$0xff] }
 0x941   : > { %7092 = vmatmul.bf16.gmra.mxu0 %v10843_v51  ;;  %v8139_v29 = vsub.f32 %v8011_v55, %v7051_v46  ;;  %v11723_v51 = vld [vmem:[%s18518_s1 + $0xd14] sm:$0xf] }
 0x942   : > { %v6395_v18 = vpop.f32.mrf.mxu2 }
 0x943   : > { %v8271_v20 = vadd.f32 %v17701_v38, %v8139_v29  ;;  %v6396_v47 = vadd.f32 %v6395_v18, %v17706_v15  ;;  %v11119_v29 = vor.u32 %v11791_v58, %v11118_v41 }
 0x944   : > { %v6108_v53 = vpop.f32.mrf.mxu1  ;;  %v18054_v42 = vpop.f32.mrf.mxu3 }
 0x945   : > { %v8399_v40 = vmax.f32 %v8271_v20, 0.0  ;;  %v18051_v54 = vadd.f32 %v6108_v53, %v19055_v4  ;;  %v6725_v33 = vadd.f32 %v17961_v26, %v6396_v47  ;;  %v11744_v26 = vld [vmem:[%s18518_s1 + $0xdb4] sm:$0xf0] }
 0x946   : > { %v7055_v52 = vpop.f32.mrf.mxu0  ;;  %v10935_v57 = vor.u32 %v11744_v26, %v10934_v43 }
 0x947   : > { %v12030_v3 = vpack.c.bf16 %v8399_v40, %v8398_v37  ;;  %8783 = vst [vmem:[#allocation3 + $0x2a8] sm:$0xff] %v8399_v40  ;;  %v7054_v15 = vadd.f32 %v7053_v27, %v6725_v33  ;;  %v10864_v37 = vld [vmem:[%s18518_s1 + $0xd30] sm:$0xf0]  ;;  %v11724_v27 = vld [vmem:[%s18518_s1 + $0xd1c] sm:$0xf]  ;;  %v7724_v33 = vpop.permute.xlu0 %7723 }
 0x948   : > { %v10867_v18 = vor.u32 %v11723_v51, %v10864_v37  ;;  %v10875_v20 = vor.u32 %v11724_v27, %v10872_v0  ;;  %v8013_v13 = vmul.f32 %v7724_v33, %v19057_v24  ;;  %v7729_v51 = vpop.permute.xlu1 %7728  ;;  %v19058_v37 = vld [vmem:[#allocation106_spill] sm:$0xff]  ;;  %v11799_v0 = vld [vmem:[%s18518_s1 + $0xf6c] sm:$0xf0] }
 0x949   : > { %12178 = vst [vmem:[#allocation2 + $0x150] sm:$0xff] %v12030_v3   ;;  %v8140_v48 = vsub.f32 %v8012_v25, %v7054_v15  ;;  %6778 = vmatmul.bf16.gmra.mxu3 %v10935_v57  ;;  %v8014_v57 = vmul.f32 %v7729_v51, %v19058_v37 }
 0x94a   : > { %v6397_v61 = vpop.f32.mrf.mxu2 }
 0x94b   : > { %v8272_v55 = vadd.f32 %v17701_v38, %v8140_v48  ;;  %v6398_v46 = vadd.f32 %v6397_v61, %v17715_v34  ;;  %v11731_v61 = vld [vmem:[%s18518_s1 + $0xd54] sm:$0xf] }
 0x94c   : > { %v18084_v4 = vpop.f32.mrf.mxu3 }
 0x94d   : > { %v8400_v47 = vmax.f32 %v8272_v55, 0.0  ;;  %v6727_v53 = vadd.f32 %v17970_v16, %v6398_v46  ;;  %v10896_v55 = vld [vmem:[%s18518_s1 + $0xd70] sm:$0xf0] }
 0x94e   : > { %v7058_v40 = vpop.f32.mrf.mxu0  ;;  %v10899_v24 = vor.u32 %v11731_v61, %v10896_v55 }
 0x94f   : > { %8784 = vst [vmem:[#allocation3 + $0x2b0] sm:$0xff] %v8400_v47  ;;  %v7056_v25 = vadd.f32 %v7055_v52, %v6727_v53  ;;  %6150 = vmatmul.bf16.gmra.mxu1 %v11119_v29  ;;  %6439 = vmatmul.bf16.gmra.mxu2 %v10867_v18  ;;  %v11150_v52 = vld [vmem:[%s18518_s1 + $0xf50] sm:$0xf]  ;;  %v11732_v18 = vld [vmem:[%s18518_s1 + $0xd5c] sm:$0xf] }
 0x950   : > { %v11151_v33 = vor.u32 %v11799_v0, %v11150_v52  ;;  %v19060_v0 = vld [vmem:[#allocation114_spill] sm:$0xff] }
 0x951   : > { %7097 = vmatmul.bf16.gmra.mxu0 %v10875_v20  ;;  %v8141_v3 = vsub.f32 %v8013_v13, %v7056_v25  ;;  %v10904_v20 = vld [vmem:[%s18518_s1 + $0xd78] sm:$0xf0] }
 0x952   : > { %v6400_v15 = vpop.f32.mrf.mxu2  ;;  %v10907_v13 = vor.u32 %v11732_v18, %v10904_v20  ;;  %v11739_v18 = vld [vmem:[%s18518_s1 + $0xd94] sm:$0xf] }
 0x953   : > { %v8273_v34 = vadd.f32 %v17701_v38, %v8141_v3  ;;  %v6401_v41 = vadd.f32 %v6400_v15, %v17748_v10  ;;  %v10966_v10 = vld [vmem:[%s18518_s1 + $0xdd8] sm:$0xf]  ;;  %v10928_v20 = vld [vmem:[%s18518_s1 + $0xdb0] sm:$0xf0] }
 0x954   : > { %v18090_v58 = vpop.f32.mrf.mxu3 }
 0x955   : > { %v8401_v43 = vmax.f32 %v8273_v34, 0.0  ;;  %v6730_v16 = vadd.f32 %v18003_v7, %v6401_v41  ;;  %v11752_v7 = vld [vmem:[%s18518_s1 + $0xdf4] sm:$0xf0]  ;;  %v7734_v41 = vpop.permute.xlu2 %7733 }
 0x956   : > { %v7060_v26 = vpop.f32.mrf.mxu0  ;;  %v10967_v46 = vor.u32 %v11752_v7, %v10966_v10  ;;  %v7739_v7 = vpop.permute.xlu0 %7738 }
 0x957   : > { %v12035_v48 = vpack.c.bf16 %v8401_v43, %v8400_v47  ;;  %8785 = vst [vmem:[#allocation3 + $0x2b8] sm:$0xff] %v8401_v43  ;;  %v7059_v27 = vadd.f32 %v7058_v40, %v6730_v16  ;;  %v19059_v43 = vld [vmem:[#allocation110_spill] sm:$0xff]  ;;  %v8016_v61 = vmul.f32 %v7739_v7, %v19060_v0 }
 0x958   : > { %v8015_v16 = vmul.f32 %v7734_v41, %v19059_v43 }
 0x959   : > { %12179 = vst [vmem:[#allocation2 + $0x158] sm:$0xff] %v12035_v48   ;;  %v8142_v29 = vsub.f32 %v8014_v57, %v7059_v27  ;;  %6783 = vmatmul.bf16.gmra.mxu3 %v10967_v46 }
 0x95a   : > { %v6402_v47 = vpop.f32.mrf.mxu2 }
 0x95b   : > { %v8274_v53 = vadd.f32 %v17701_v38, %v8142_v29  ;;  %v6403_v40 = vadd.f32 %v6402_v47, %v17757_v22  ;;  %v11807_v29 = vld [vmem:[%s18518_s1 + $0xfac] sm:$0xf0] }
 0x95c   : > { %v18120_v34 = vpop.f32.mrf.mxu3 }
 0x95d   : > { %v8402_v25 = vmax.f32 %v8274_v53, 0.0  ;;  %v6732_v3 = vadd.f32 %v18012_v56, %v6403_v40  ;;  %v11740_v40 = vld [vmem:[%s18518_s1 + $0xd9c] sm:$0xf] }
 0x95e   : > { %v7063_v15 = vpop.f32.mrf.mxu0 }
 0x95f   : > { %8786 = vst [vmem:[#allocation3 + $0x2c0] sm:$0xff] %v8402_v25  ;;  %v7061_v51 = vadd.f32 %v7060_v26, %v6732_v3  ;;  %6155 = vmatmul.bf16.gmra.mxu1 %v11151_v33  ;;  %6444 = vmatmul.bf16.gmra.mxu2 %v10899_v24  ;;  %v11182_v26 = vld [vmem:[%s18518_s1 + $0xf90] sm:$0xf]  ;;  %v10936_v33 = vld [vmem:[%s18518_s1 + $0xdb8] sm:$0xf0] }
 0x960   : > { %v11183_v3 = vor.u32 %v11807_v29, %v11182_v26  ;;  %v10939_v41 = vor.u32 %v11740_v40, %v10936_v33 }
 0x961   : > { %7102 = vmatmul.bf16.gmra.mxu0 %v10907_v13  ;;  %v8143_v37 = vsub.f32 %v8015_v16, %v7061_v51 }
 0x962   : > { %v6405_v57 = vpop.f32.mrf.mxu2 }
 0x963   : > { %v8275_v22 = vadd.f32 %v17701_v38, %v8143_v37  ;;  %v6406_v52 = vadd.f32 %v6405_v57, %v17790_v44  ;;  %v10998_v44 = vld [vmem:[%s18518_s1 + $0xe18] sm:$0xf]  ;;  %v7744_v57 = vpop.permute.xlu1 %7743 }
 0x964   : > { %v18126_v10 = vpop.f32.mrf.mxu3 }
 0x965   : > { %v8403_v48 = vmax.f32 %v8275_v22, 0.0  ;;  %v6735_v56 = vadd.f32 %v18045_v32, %v6406_v52  ;;  %v11760_v32 = vld [vmem:[%s18518_s1 + $0xe34] sm:$0xf0]  ;;  %v19061_v22 = vld [vmem:[#allocation120_spill] sm:$0xff] }
 0x966   : > { %v7065_v27 = vpop.f32.mrf.mxu0  ;;  %v10999_v47 = vor.u32 %v11760_v32, %v10998_v44  ;;  %v8017_v52 = vmul.f32 %v7744_v57, %v19061_v22  ;;  %v19062_v44 = vld [vmem:[#allocation124_spill] sm:$0xff] }
 0x967   : > { %v12040_v55 = vpack.c.bf16 %v8403_v48, %v8402_v25  ;;  %8787 = vst [vmem:[#allocation3 + $0x2c8] sm:$0xff] %v8403_v48  ;;  %v7064_v46 = vadd.f32 %v7063_v15, %v6735_v56  ;;  %v10931_v15 = vor.u32 %v11739_v18, %v10928_v20  ;;  %v18160_v56 = vld [vmem:[%s12340_s24] ss:$0 sm:$0xff]  ;;  %v11815_v20 = vld [vmem:[%s18518_s1 + $0xfec] sm:$0xf0] }
 0x969   : > { %12180 = vst [vmem:[#allocation2 + $0x160] sm:$0xff] %v12040_v55   ;;  %v8144_v53 = vsub.f32 %v8016_v61, %v7064_v46  ;;  %6788 = vmatmul.bf16.gmra.mxu3 %v10999_v47  ;;  %v7749_v46 = vpop.permute.xlu2 %7748  ;;  %v11747_v47 = vld [vmem:[%s18518_s1 + $0xdd4] sm:$0xf] }
 0x96a   : > { %v6407_v24 = vpop.f32.mrf.mxu2  ;;  %v8018_v32 = vmul.f32 %v7749_v46, %v19062_v44 }
 0x96b   : > { %v8276_v13 = vadd.f32 %v17701_v38, %v8144_v53  ;;  %v6408_v25 = vadd.f32 %v6407_v24, %v17799_v62  ;;  %v10960_v53 = vld [vmem:[%s18518_s1 + $0xdf0] sm:$0xf0]  ;;  %v11748_v24 = vld [vmem:[%s18518_s1 + $0xddc] sm:$0xf] }
 0x96c   : > { %v18156_v37 = vpop.f32.mrf.mxu3 }
 0x96d   : > { %v8404_v43 = vmax.f32 %v8276_v13, 0.0  ;;  %v6737_v16 = vadd.f32 %v18054_v42, %v6408_v25  ;;  %v10968_v13 = vld [vmem:[%s18518_s1 + $0xdf8] sm:$0xf0] }
 0x96e   : > { %v7068_v51 = vpop.f32.mrf.mxu0 }
 0x96f   : > { %8788 = vst [vmem:[#allocation3 + $0x2d0] sm:$0xff] %v8404_v43  ;;  %v7066_v48 = vadd.f32 %v7065_v27, %v6737_v16  ;;  %6160 = vmatmul.bf16.gmra.mxu1 %v11183_v3  ;;  %6449 = vmatmul.bf16.gmra.mxu2 %v10931_v15  ;;  %v11214_v27 = vld [vmem:[%s18518_s1 + $0xfd0] sm:$0xf]  ;;  %v10971_v16 = vor.u32 %v11748_v24, %v10968_v13 }
 0x971   : > { %7107 = vmatmul.bf16.gmra.mxu0 %v10939_v41  ;;  %v8145_v38 = vsub.f32 %v8017_v52, %v7066_v48  ;;  %v11215_v41 = vor.u32 %v11815_v20, %v11214_v27  ;;  %v7754_v48 = vpop.permute.xlu0 %7753  ;;  %v10992_v20 = vld [vmem:[%s18518_s1 + $0xe30] sm:$0xf0] }
 0x972   : > { %v6410_v62 = vpop.f32.mrf.mxu2 }
 0x973   : > { %v8277_v7 = vadd.f32 %v18160_v56, %v8145_v38  ;;  %v6411_v26 = vadd.f32 %v6410_v62, %v17832_v36  ;;  %v11030_v36 = vld [vmem:[%s18518_s1 + $0xe58] sm:$0xf]  ;;  %v19063_v38 = vld [vmem:[#allocation128_spill] sm:$0xff] }
 0x974   : > { %v18165_v55 = vpop.f32.mrf.mxu3  ;;  %v8019_v62 = vmul.f32 %v7754_v48, %v19063_v38 }
 0x975   : > { %v8405_v42 = vmax.f32 %v8277_v7, 0.0  ;;  %v6740_v0 = vadd.f32 %v18084_v4, %v6411_v26  ;;  %v11768_v4 = vld [vmem:[%s18518_s1 + $0xe74] sm:$0xf0] }
 0x976   : > { %v7070_v61 = vpop.f32.mrf.mxu0  ;;  %v11031_v40 = vor.u32 %v11768_v4, %v11030_v36  ;;  %v11062_v4 = vld [vmem:[%s18518_s1 + $0xe98] sm:$0xf] }
 0x977   : > { %v12045_v29 = vpack.c.bf16 %v8405_v42, %v8404_v43  ;;  %8789 = vst [vmem:[#allocation3 + $0x2d8] sm:$0xff] %v8405_v42  ;;  %v7069_v18 = vadd.f32 %v7068_v51, %v6740_v0  ;;  %v10963_v43 = vor.u32 %v11747_v47, %v10960_v53 }
 0x979   : > { %12181 = vst [vmem:[#allocation2 + $0x168] sm:$0xff] %v12045_v29   ;;  %v8146_v33 = vsub.f32 %v8018_v32, %v7069_v18  ;;  %6793 = vmatmul.bf16.gmra.mxu3 %v11031_v40  ;;  %v7759_v32 = vpop.permute.xlu1 %7758  ;;  %v19064_v29 = vld [vmem:[#allocation130_spill] sm:$0xff]  ;;  %v11756_v40 = vld [vmem:[%s18518_s1 + $0xe1c] sm:$0xf] }
 0x97a   : > { %v6412_v25 = vpop.f32.mrf.mxu2  ;;  %v8020_v18 = vmul.f32 %v7759_v32, %v19064_v29 }
 0x97b   : > { %v8278_v3 = vadd.f32 %v18160_v56, %v8146_v33  ;;  %v6413_v15 = vadd.f32 %v6412_v25, %v17841_v2  ;;  %v11000_v33 = vld [vmem:[%s18518_s1 + $0xe38] sm:$0xf0] }
 0x97c   : > { %v18195_v52 = vpop.f32.mrf.mxu3 }
 0x97d   : > { %v8406_v51 = vmax.f32 %v8278_v3, 0.0  ;;  %v6742_v57 = vadd.f32 %v18090_v58, %v6413_v15  ;;  %v11003_v15 = vor.u32 %v11756_v40, %v11000_v33 }
 0x97e   : > { %v7073_v22 = vpop.f32.mrf.mxu0 }
 0x97f   : > { %8790 = vst [vmem:[#allocation3 + $0x2e0] sm:$0xff] %v8406_v51  ;;  %v7071_v7 = vadd.f32 %v7070_v61, %v6742_v57  ;;  %6165 = vmatmul.bf16.gmra.mxu1 %v11215_v41  ;;  %6454 = vmatmul.bf16.gmra.mxu2 %v10963_v43  ;;  %v7764_v57 = vpop.permute.xlu2 %7763 }
 0x981   : > { %7112 = vmatmul.bf16.gmra.mxu0 %v10971_v16  ;;  %v8147_v26 = vsub.f32 %v8019_v62, %v7071_v7  ;;  %v7774_v33 = vpop.permute.xlu1 %7773 }
 0x982   : > { %v6415_v42 = vpop.f32.mrf.mxu2 }
 0x983   : > { %v8279_v2 = vadd.f32 %v18160_v56, %v8147_v26  ;;  %v6416_v0 = vadd.f32 %v6415_v42, %v17874_v31  ;;  %v11776_v31 = vld [vmem:[%s18518_s1 + $0xeb4] sm:$0xf0]  ;;  %v7769_v42 = vpop.permute.xlu0 %7768 }
 0x984   : > { %v18201_v44 = vpop.f32.mrf.mxu3  ;;  %v11063_v47 = vor.u32 %v11776_v31, %v11062_v4  ;;  %v11764_v31 = vld [vmem:[%s18518_s1 + $0xe5c] sm:$0xf] }
 0x985   : > { %v8407_v46 = vmax.f32 %v8279_v2, 0.0  ;;  %v6745_v58 = vadd.f32 %v18120_v34, %v6416_v0  ;;  %v11755_v34 = vld [vmem:[%s18518_s1 + $0xe14] sm:$0xf] }
 0x986   : > { %v7075_v27 = vpop.f32.mrf.mxu0  ;;  %v10995_v3 = vor.u32 %v11755_v34, %v10992_v20  ;;  %v11032_v34 = vld [vmem:[%s18518_s1 + $0xe78] sm:$0xf0] }
 0x987   : > { %v12050_v36 = vpack.c.bf16 %v8407_v46, %v8406_v51  ;;  %8791 = vst [vmem:[#allocation3 + $0x2e8] sm:$0xff] %v8407_v46  ;;  %v7074_v61 = vadd.f32 %v7073_v22, %v6745_v58  ;;  %v19065_v22 = vld [vmem:[#allocation132_spill] sm:$0xff]  ;;  %v19066_v58 = vld [vmem:[#allocation9_spill] sm:$0xff] }
 0x988   : > { %v8021_v48 = vmul.f32 %v7764_v57, %v19065_v22  ;;  %v8022_v32 = vmul.f32 %v7769_v42, %v19066_v58  ;;  %v18258_v57 = vpop.f32.mrf.mxu1  ;;  %v19068_v42 = vld [vmem:[#allocation17_spill] sm:$0xff] }
 0x989   : > { %12182 = vst [vmem:[#allocation2 + $0x170] sm:$0xff] %v12050_v36   ;;  %v8148_v53 = vsub.f32 %v8020_v18, %v7074_v61  ;;  %6798 = vmatmul.bf16.gmra.mxu3 %v11063_v47  ;;  %v11094_v18 = vld [vmem:[%s18518_s1 + $0xed8] sm:$0xf]  ;;  %v11024_v36 = vld [vmem:[%s18518_s1 + $0xe70] sm:$0xf0] }
 0x98a   : > { %v6417_v24 = vpop.f32.mrf.mxu2  ;;  %v11126_v58 = vld [vmem:[%s18518_s1 + $0xf18] sm:$0xf] }
 0x98b   : > { %v8280_v13 = vadd.f32 %v18160_v56, %v8148_v53  ;;  %v6418_v25 = vadd.f32 %v6417_v24, %v17883_v14  ;;  %v11035_v24 = vor.u32 %v11764_v31, %v11032_v34  ;;  %v7784_v34 = vpop.permute.xlu0 %7783 }
 0x98c   : > { %v18225_v51 = vpop.f32.mrf.mxu3 }
 0x98d   : > { %v8408_v41 = vmax.f32 %v8280_v13, 0.0  ;;  %v6747_v43 = vadd.f32 %v18126_v10, %v6418_v25 }
 0x98e   : > { %v7078_v16 = vpop.f32.mrf.mxu0 }
 0x98f   : > { %8792 = vst [vmem:[#allocation3 + $0x2f0] sm:$0xff] %v8408_v41  ;;  %v7076_v38 = vadd.f32 %v7075_v27, %v6747_v43  ;;  %6459 = vmatmul.bf16.gmra.mxu2 %v10995_v3 }
 0x991   : > { %7117 = vmatmul.bf16.gmra.mxu0 %v11003_v15  ;;  %v8149_v62 = vsub.f32 %v8021_v48, %v7076_v38 }
 0x992   : > { %v6420_v7 = vpop.f32.mrf.mxu2 }
 0x993   : > { %v8281_v26 = vadd.f32 %v18160_v56, %v8149_v62  ;;  %v6421_v14 = vadd.f32 %v6420_v7, %v17916_v11  ;;  %v11784_v11 = vld [vmem:[%s18518_s1 + $0xef4] sm:$0xf0]  ;;  %v7779_v62 = vpop.permute.xlu2 %7778 }
 0x994   : > { %v18231_v46 = vpop.f32.mrf.mxu3  ;;  %v11095_v61 = vor.u32 %v11784_v11, %v11094_v18  ;;  %v11772_v18 = vld [vmem:[%s18518_s1 + $0xe9c] sm:$0xf] }
 0x995   : > { %v8409_v2 = vmax.f32 %v8281_v26, 0.0  ;;  %v6750_v10 = vadd.f32 %v18156_v37, %v6421_v14  ;;  %v11763_v37 = vld [vmem:[%s18518_s1 + $0xe54] sm:$0xf]  ;;  %v11064_v11 = vld [vmem:[%s18518_s1 + $0xeb8] sm:$0xf0] }
 0x996   : > { %v7080_v0 = vpop.f32.mrf.mxu0  ;;  %v11027_v40 = vor.u32 %v11763_v37, %v11024_v36  ;;  %v18284_v37 = vpop.f32.mrf.mxu1 }
 0x997   : > { %v12055_v29 = vpack.c.bf16 %v8409_v2, %v8408_v41  ;;  %8793 = vst [vmem:[#allocation3 + $0x2f8] sm:$0xff] %v8409_v2  ;;  %v7079_v27 = vadd.f32 %v7078_v16, %v6750_v10  ;;  %v19067_v41 = vld [vmem:[#allocation13_spill] sm:$0xff]  ;;  %v8024_v2 = vmul.f32 %v7779_v62, %v19068_v42 }
 0x998   : > { %v8023_v43 = vmul.f32 %v7774_v33, %v19067_v41  ;;  %v19070_v62 = vld [vmem:[#allocation25_spill] sm:$0xff] }
 0x999   : > { %12183 = vst [vmem:[#allocation2 + $0x178] sm:$0xff] %v12055_v29   ;;  %v8150_v4 = vsub.f32 %v8022_v32, %v7079_v27  ;;  %6803 = vmatmul.bf16.gmra.mxu3 %v11095_v61  ;;  %v11056_v32 = vld [vmem:[%s18518_s1 + $0xeb0] sm:$0xf0]  ;;  %v11158_v42 = vld [vmem:[%s18518_s1 + $0xf58] sm:$0xf] }
 0x99a   : > { %v6422_v20 = vpop.f32.mrf.mxu2 }
 0x99b   : > { %v8282_v47 = vadd.f32 %v18160_v56, %v8150_v4  ;;  %v6423_v53 = vadd.f32 %v6422_v20, %v17925_v28  ;;  %v11067_v20 = vor.u32 %v11772_v18, %v11064_v11  ;;  %v7794_v18 = vpop.permute.xlu2 %7793 }
 0x99c   : > { %v18255_v15 = vpop.f32.mrf.mxu3 }
 0x99d   : > { %v8410_v13 = vmax.f32 %v8282_v47, 0.0  ;;  %v6752_v25 = vadd.f32 %v18165_v55, %v6423_v53 }
 0x99e   : > { %v7083_v3 = vpop.f32.mrf.mxu0 }
 0x99f   : > { %8794 = vst [vmem:[#allocation3 + $0x300] sm:$0xff] %v8410_v13  ;;  %v7081_v16 = vadd.f32 %v7080_v0, %v6752_v25  ;;  %6464 = vmatmul.bf16.gmra.mxu2 %v11027_v40 }
 0x9a1   : > { %7122 = vmatmul.bf16.gmra.mxu0 %v11035_v24  ;;  %v8151_v22 = vsub.f32 %v8023_v43, %v7081_v16  ;;  %v19069_v24 = vld [vmem:[#allocation21_spill] sm:$0xff]  ;;  %v7789_v16 = vpop.permute.xlu1 %7788 }
 0x9a2   : > { %v6425_v48 = vpop.f32.mrf.mxu2 }
 0x9a3   : > { %v8283_v28 = vadd.f32 %v18160_v56, %v8151_v22  ;;  %v6426_v38 = vadd.f32 %v6425_v48, %v17958_v6  ;;  %v11792_v6 = vld [vmem:[%s18518_s1 + $0xf34] sm:$0xf0]  ;;  %v18294_v22 = vpop.f32.mrf.mxu1 }
 0x9a4   : > { %v18263_v14 = vpop.f32.mrf.mxu3  ;;  %v11127_v29 = vor.u32 %v11792_v6, %v11126_v58  ;;  %v11780_v58 = vld [vmem:[%s18518_s1 + $0xedc] sm:$0xf] }
 0x9a5   : > { %v8411_v7 = vmax.f32 %v8283_v28, 0.0  ;;  %v6755_v55 = vadd.f32 %v18195_v52, %v6426_v38  ;;  %v11771_v52 = vld [vmem:[%s18518_s1 + $0xe94] sm:$0xf]  ;;  %v11096_v6 = vld [vmem:[%s18518_s1 + $0xef8] sm:$0xf0] }
 0x9a6   : > { %v7085_v26 = vpop.f32.mrf.mxu0  ;;  %v11059_v31 = vor.u32 %v11771_v52, %v11056_v32  ;;  %v11099_v11 = vor.u32 %v11780_v58, %v11096_v6 }
 0x9a7   : > { %v12060_v10 = vpack.c.bf16 %v8411_v7, %v8410_v13  ;;  %8795 = vst [vmem:[#allocation3 + $0x308] sm:$0xff] %v8411_v7  ;;  %v7084_v0 = vadd.f32 %v7083_v3, %v6755_v55  ;;  %v8025_v13 = vmul.f32 %v7784_v34, %v19069_v24  ;;  %v8026_v7 = vmul.f32 %v7789_v16, %v19070_v62 }
 0x9a9   : > { %12184 = vst [vmem:[#allocation2 + $0x180] sm:$0xff] %v12060_v10   ;;  %v8152_v27 = vsub.f32 %v8024_v2, %v7084_v0  ;;  %6808 = vmatmul.bf16.gmra.mxu3 %v11127_v29  ;;  %v11088_v2 = vld [vmem:[%s18518_s1 + $0xef0] sm:$0xf0]  ;;  %v7804_v58 = vpop.permute.xlu1 %7803 }
 0x9aa   : > { %v6427_v36 = vpop.f32.mrf.mxu2 }
 0x9ab   : > { %v8284_v61 = vadd.f32 %v18160_v56, %v8152_v27  ;;  %v6428_v4 = vadd.f32 %v6427_v36, %v17967_v23  ;;  %v18323_v34 = vpop.f32.mrf.mxu1 }
 0x9ac   : > { %v18289_v33 = vpop.f32.mrf.mxu3 }
 0x9ad   : > { %v8412_v47 = vmax.f32 %v8284_v61, 0.0  ;;  %v6757_v53 = vadd.f32 %v18201_v44, %v6428_v4 }
 0x9ae   : > { %v7088_v40 = vpop.f32.mrf.mxu0 }
 0x9af   : > { %8796 = vst [vmem:[#allocation3 + $0x310] sm:$0xff] %v8412_v47  ;;  %v7086_v25 = vadd.f32 %v7085_v26, %v6757_v53  ;;  %6469 = vmatmul.bf16.gmra.mxu2 %v11059_v31 }
 0x9b1   : > { %7127 = vmatmul.bf16.gmra.mxu0 %v11067_v20  ;;  %v8153_v3 = vsub.f32 %v8025_v13, %v7086_v25  ;;  %v19071_v20 = vld [vmem:[#allocation29_spill] sm:$0xff]  ;;  %v7799_v25 = vpop.permute.xlu0 %7798 }
 0x9b2   : > { %v6430_v41 = vpop.f32.mrf.mxu2 }
 0x9b3   : > { %v8285_v43 = vadd.f32 %v18160_v56, %v8153_v3  ;;  %v6431_v23 = vadd.f32 %v6430_v41, %v18000_v12  ;;  %v11800_v12 = vld [vmem:[%s18518_s1 + $0xf74] sm:$0xf0]  ;;  %v18338_v62 = vpop.f32.mrf.mxu1 }
 0x9b4   : > { %v18297_v38 = vpop.f32.mrf.mxu3  ;;  %v11159_v10 = vor.u32 %v11800_v12, %v11158_v42  ;;  %v11788_v42 = vld [vmem:[%s18518_s1 + $0xf1c] sm:$0xf] }
 0x9b5   : > { %v8413_v48 = vmax.f32 %v8285_v43, 0.0  ;;  %v6760_v44 = vadd.f32 %v18225_v51, %v6431_v23  ;;  %v11779_v51 = vld [vmem:[%s18518_s1 + $0xed4] sm:$0xf]  ;;  %v19072_v23 = vld [vmem:[#allocation33_spill] sm:$0xff] }
 0x9b6   : > { %v7090_v28 = vpop.f32.mrf.mxu0  ;;  %v11091_v27 = vor.u32 %v11779_v51, %v11088_v2  ;;  %v8028_v16 = vmul.f32 %v7799_v25, %v19072_v23  ;;  %v11128_v12 = vld [vmem:[%s18518_s1 + $0xf38] sm:$0xf0]  ;;  %v11816_v23 = vld [vmem:[%s18518_s1 + $0xff4] sm:$0xf0] }
 0x9b7   : > { %v12065_v55 = vpack.c.bf16 %v8413_v48, %v8412_v47  ;;  %8797 = vst [vmem:[#allocation3 + $0x318] sm:$0xff] %v8413_v48  ;;  %v7089_v26 = vadd.f32 %v7088_v40, %v6760_v44  ;;  %v8027_v47 = vmul.f32 %v7794_v18, %v19071_v20  ;;  %v11131_v6 = vor.u32 %v11788_v42, %v11128_v12  ;;  %v19073_v18 = vld [vmem:[#allocation37_spill] sm:$0xff] }
 0x9b8   : > { %v19075_v25 = vld [vmem:[#allocation41_spill] sm:$0xff] }
 0x9b9   : > { %12185 = vst [vmem:[#allocation2 + $0x188] sm:$0xff] %v12065_v55   ;;  %v8154_v0 = vsub.f32 %v8026_v7, %v7089_v26  ;;  %6813 = vmatmul.bf16.gmra.mxu3 %v11159_v10  ;;  %v11120_v7 = vld [vmem:[%s18518_s1 + $0xf30] sm:$0xf0] }
 0x9ba   : > { %v6432_v52 = vpop.f32.mrf.mxu2 }
 0x9bb   : > { %v8286_v32 = vadd.f32 %v18160_v56, %v8154_v0  ;;  %v6433_v29 = vadd.f32 %v6432_v52, %v18009_v30 }
 0x9bc   : > { %v18321_v31 = vpop.f32.mrf.mxu3 }
 0x9bd   : > { %v8414_v36 = vmax.f32 %v8286_v32, 0.0  ;;  %v6762_v61 = vadd.f32 %v18231_v46, %v6433_v29 }
 0x9be   : > { %v7093_v4 = vpop.f32.mrf.mxu0 }
 0x9bf   : > { %8798 = vst [vmem:[#allocation3 + $0x320] sm:$0xff] %v8414_v36  ;;  %v7091_v53 = vadd.f32 %v7090_v28, %v6762_v61  ;;  %6474 = vmatmul.bf16.gmra.mxu2 %v11091_v27  ;;  %v11190_v28 = vld [vmem:[%s18518_s1 + $0xf98] sm:$0xf]  ;;  %v19074_v61 = vld [vmem:[#allocation216_spill] sm:$0xff] }
 0x9c1   : > { %7132 = vmatmul.bf16.gmra.mxu0 %v11099_v11  ;;  %v8155_v40 = vsub.f32 %v8027_v47, %v7091_v53  ;;  %v8029_v11 = vmul.f32 %v7804_v58, %v19073_v18  ;;  %v19078_v18 = vld [vmem:[#allocation218_spill] sm:$0xff] }
 0x9c2   : > { %v6435_v24 = vpop.f32.mrf.mxu2 }
 0x9c3   : > { %v8287_v30 = vadd.f32 %v18160_v56, %v8155_v40  ;;  %v6436_v13 = vadd.f32 %v6435_v24, %v18042_v45  ;;  %v11808_v45 = vld [vmem:[%s18518_s1 + $0xfb4] sm:$0xf0] }
 0x9c4   : > { %v18329_v43 = vpop.f32.mrf.mxu3  ;;  %v11191_v55 = vor.u32 %v11808_v45, %v11190_v28  ;;  %v19076_v28 = vld [vmem:[#allocation217_spill] sm:$0xff] }
 0x9c5   : > { %v8415_v3 = vmax.f32 %v8287_v30, 0.0  ;;  %v6765_v46 = vadd.f32 %v18255_v15, %v6436_v13  ;;  %v11787_v15 = vld [vmem:[%s18518_s1 + $0xf14] sm:$0xf]  ;;  %v6114_v45 = vadd.f32 %v18284_v37, %v19076_v28 }
 0x9c6   : > { %v7095_v41 = vpop.f32.mrf.mxu0  ;;  %v11123_v0 = vor.u32 %v11787_v15, %v11120_v7  ;;  %v11796_v7 = vld [vmem:[%s18518_s1 + $0xf5c] sm:$0xf] }
 0x9c7   : > { %v12070_v48 = vpack.c.bf16 %v8415_v3, %v8414_v36  ;;  %8799 = vst [vmem:[#allocation3 + $0x328] sm:$0xff] %v8415_v3  ;;  %v7094_v44 = vadd.f32 %v7093_v4, %v6765_v46  ;;  %v6112_v4 = vadd.f32 %v18258_v57, %v19074_v61  ;;  %v11222_v57 = vld [vmem:[%s18518_s1 + $0xfd8] sm:$0xf] }
 0x9c9   : > { %12186 = vst [vmem:[#allocation2 + $0x190] sm:$0xff] %v12070_v48   ;;  %v8156_v26 = vsub.f32 %v8028_v16, %v7094_v44  ;;  %6818 = vmatmul.bf16.gmra.mxu3 %v11191_v55  ;;  %v11795_v16 = vld [vmem:[%s18518_s1 + $0xf54] sm:$0xf]  ;;  %v11223_v44 = vor.u32 %v11816_v23, %v11222_v57  ;;  %v11160_v55 = vld [vmem:[%s18518_s1 + $0xf78] sm:$0xf0] }
 0x9ca   : > { %v6437_v51 = vpop.f32.mrf.mxu2  ;;  %v11163_v37 = vor.u32 %v11796_v7, %v11160_v55  ;;  %v11804_v23 = vld [vmem:[%s18518_s1 + $0xf9c] sm:$0xf] }
 0x9cb   : > { %v8288_v2 = vadd.f32 %v18160_v56, %v8156_v26  ;;  %v6438_v10 = vadd.f32 %v6437_v51, %v18051_v54  ;;  %v18360_v54 = vpop.f32.mrf.mxu1 }
 0x9cc   : > { %v18355_v27 = vpop.f32.mrf.mxu3 }
 0x9cd   : > { %v8416_v52 = vmax.f32 %v8288_v2, 0.0  ;;  %v6767_v32 = vadd.f32 %v18263_v14, %v6438_v10  ;;  %v7809_v14 = vpop.permute.xlu2 %7808  ;;  %v7814_v2 = vpop.permute.xlu0 %7813 }
 0x9ce   : > { %v7098_v29 = vpop.f32.mrf.mxu0  ;;  %v8030_v3 = vmul.f32 %v7809_v14, %v19075_v25 }
 0x9cf   : > { %8800 = vst [vmem:[#allocation3 + $0x330] sm:$0xff] %v8416_v52  ;;  %v7096_v36 = vadd.f32 %v7095_v41, %v6767_v32  ;;  %6479 = vmatmul.bf16.gmra.mxu2 %v11123_v0 }
 0x9d1   : > { %7137 = vmatmul.bf16.gmra.mxu0 %v11131_v6  ;;  %v8157_v20 = vsub.f32 %v8029_v11, %v7096_v36  ;;  %v6117_v11 = vadd.f32 %v18294_v22, %v19078_v18  ;;  %v11803_v22 = vld [vmem:[%s18518_s1 + $0xf94] sm:$0xf] }
 0x9d2   : > { %v6440_v47 = vpop.f32.mrf.mxu2 }
 0x9d3   : > { %v8289_v53 = vadd.f32 %v18160_v56, %v8157_v20  ;;  %v6441_v40 = vadd.f32 %v6440_v47, %v6112_v4  ;;  %v18388_v10 = vpop.f32.mrf.mxu1 }
 0x9d4   : > { %v18377_v48 = vpop.f32.mrf.mxu3 }
 0x9d5   : > { %v8417_v24 = vmax.f32 %v8289_v53, 0.0  ;;  %v6770_v30 = vadd.f32 %v18289_v33, %v6441_v40  ;;  %v11152_v33 = vld [vmem:[%s18518_s1 + $0xf70] sm:$0xf0]  ;;  %v7819_v53 = vpop.permute.xlu1 %7818  ;;  %v7829_v18 = vpop.permute.xlu0 %7828 }
 0x9d6   : > { %v7100_v13 = vpop.f32.mrf.mxu0  ;;  %v11155_v51 = vor.u32 %v11795_v16, %v11152_v33  ;;  %v11192_v16 = vld [vmem:[%s18518_s1 + $0xfb8] sm:$0xf0] }
 0x9d7   : > { %v12075_v46 = vpack.c.bf16 %v8417_v24, %v8416_v52  ;;  %8801 = vst [vmem:[#allocation3 + $0x338] sm:$0xff] %v8417_v24  ;;  %v7099_v41 = vadd.f32 %v7098_v29, %v6770_v30  ;;  %v19077_v52 = vld [vmem:[#allocation45_spill] sm:$0xff]  ;;  %v11195_v7 = vor.u32 %v11804_v23, %v11192_v16 }
 0x9d8   : > { %v8031_v32 = vmul.f32 %v7814_v2, %v19077_v52  ;;  %v19079_v30 = vld [vmem:[#allocation49_spill] sm:$0xff] }
 0x9d9   : > { %12187 = vst [vmem:[#allocation2 + $0x198] sm:$0xff] %v12075_v46   ;;  %v8158_v15 = vsub.f32 %v8030_v3, %v7099_v41  ;;  %6823 = vmatmul.bf16.gmra.mxu3 %v11223_v44  ;;  %v11184_v46 = vld [vmem:[%s18518_s1 + $0xfb0] sm:$0xf0]  ;;  %v19080_v41 = vld [vmem:[#allocation219_spill] sm:$0xff]  ;;  %v19084_v16 = vld [vmem:[#allocation61_spill] sm:$0xff] }
 0x9da   : > { %v6442_v26 = vpop.f32.mrf.mxu2  ;;  %v6119_v57 = vadd.f32 %v18323_v34, %v19080_v41 }
 0x9db   : > { %v8290_v42 = vadd.f32 %v18160_v56, %v8158_v15  ;;  %v6443_v12 = vadd.f32 %v6442_v26, %v6114_v45  ;;  %v18398_v24 = vpop.f32.mrf.mxu1  ;;  %v11187_v45 = vor.u32 %v11803_v22, %v11184_v46  ;;  %v7824_v15 = vpop.permute.xlu2 %7823 }
 0x9dc   : > { %v18394_v4 = vpop.f32.mrf.mxu3 }
 0x9dd   : > { %v8418_v0 = vmax.f32 %v8290_v42, 0.0  ;;  %v6772_v58 = vadd.f32 %v18297_v38, %v6443_v12  ;;  %v19081_v12 = vld [vmem:[#allocation53_spill] sm:$0xff] }
 0x9de   : > { %v7103_v6 = vpop.f32.mrf.mxu0 }
 0x9df   : > { %8802 = vst [vmem:[#allocation3 + $0x340] sm:$0xff] %v8418_v0  ;;  %v7101_v29 = vadd.f32 %v7100_v13, %v6772_v58  ;;  %6484 = vmatmul.bf16.gmra.mxu2 %v11155_v51  ;;  %v8032_v13 = vmul.f32 %v7819_v53, %v19079_v30  ;;  %v8033_v51 = vmul.f32 %v7824_v15, %v19081_v12  ;;  %v11812_v30 = vld [vmem:[%s18518_s1 + $0xfdc] sm:$0xf] }
 0x9e1   : > { %7142 = vmatmul.bf16.gmra.mxu0 %v11163_v37  ;;  %v8159_v36 = vsub.f32 %v8031_v32, %v7101_v29 }
 0x9e2   : > { %v6445_v61 = vpop.f32.mrf.mxu2 }
 0x9e3   : > { %v8291_v20 = vadd.f32 %v18160_v56, %v8159_v36  ;;  %v6446_v47 = vadd.f32 %v6445_v61, %v6117_v11  ;;  %v18420_v37 = vpop.f32.mrf.mxu1  ;;  %v7839_v12 = vpop.permute.xlu2 %7838 }
 0x9e4   : > { %v18416_v55 = vpop.f32.mrf.mxu3 }
 0x9e5   : > { %v8419_v40 = vmax.f32 %v8291_v20, 0.0  ;;  %v6775_v38 = vadd.f32 %v18321_v31, %v6446_v47  ;;  %v19083_v20 = vld [vmem:[#allocation57_spill] sm:$0xff] }
 0x9e6   : > { %v7105_v14 = vpop.f32.mrf.mxu0  ;;  %v8034_v47 = vmul.f32 %v7829_v18, %v19083_v20  ;;  %v7844_v20 = vpop.permute.xlu0 %7843 }
 0x9e7   : > { %v12080_v25 = vpack.c.bf16 %v8419_v40, %v8418_v0  ;;  %8803 = vst [vmem:[#allocation3 + $0x348] sm:$0xff] %v8419_v40  ;;  %v7104_v3 = vadd.f32 %v7103_v6, %v6775_v38  ;;  %v19082_v0 = vld [vmem:[#allocation220_spill] sm:$0xff] }
 0x9e8   : > { %v6122_v58 = vadd.f32 %v18338_v62, %v19082_v0  ;;  %v11811_v62 = vld [vmem:[%s18518_s1 + $0xfd4] sm:$0xf] }
 0x9e9   : > { %12188 = vst [vmem:[#allocation2 + $0x1a0] sm:$0xff] %v12080_v25   ;;  %v8160_v31 = vsub.f32 %v8032_v13, %v7104_v3  ;;  %v11216_v38 = vld [vmem:[%s18518_s1 + $0xff0] sm:$0xf0]  ;;  %v11224_v13 = vld [vmem:[%s18518_s1 + $0xff8] sm:$0xf0] }
 0x9ea   : > { %v6447_v33 = vpop.f32.mrf.mxu2  ;;  %v11219_v41 = vor.u32 %v11811_v62, %v11216_v38  ;;  %v19087_v62 = vld [vmem:[#allocation69_spill] sm:$0xff] }
 0x9eb   : > { %v8292_v44 = vadd.f32 %v18160_v56, %v8160_v31  ;;  %v6448_v28 = vadd.f32 %v6447_v33, %v6119_v57  ;;  %v6133_v25 = vpop.f32.mrf.mxu1  ;;  %v7834_v57 = vpop.permute.xlu1 %7833  ;;  %v11227_v31 = vor.u32 %v11812_v30, %v11224_v13  ;;  %v8037_v38 = vmul.f32 %v7844_v20, %v19087_v62 }
 0x9ec   : > { %v18426_v61 = vpop.f32.mrf.mxu3  ;;  %v8035_v33 = vmul.f32 %v7834_v57, %v19084_v16  ;;  %v19088_v57 = vld [vmem:[#allocation73_spill] sm:$0xff]  ;;  %v6134_v16 = vadd.f32 %v6133_v25, %v15935_v39 }
 0x9ed   : > { %v8420_v34 = vmax.f32 %v8292_v44, 0.0  ;;  %v6777_v26 = vadd.f32 %v18329_v43, %v6448_v28 }
 0x9ee   : > { %v7108_v42 = vpop.f32.mrf.mxu0 }
 0x9ef   : > { %8804 = vst [vmem:[#allocation3 + $0x350] sm:$0xff] %v8420_v34  ;;  %v7106_v2 = vadd.f32 %v7105_v14, %v6777_v26  ;;  %6489 = vmatmul.bf16.gmra.mxu2 %v11187_v45  ;;  %v6124_v14 = vadd.f32 %v18360_v54, %v15852_v5  ;;  %v19085_v45 = vld [vmem:[#allocation221_spill] sm:$0xff] }
 0x9f0   : > { %v6127_v15 = vadd.f32 %v18388_v10, %v19085_v45  ;;  %v7854_v45 = vpop.permute.xlu2 %7853 }
 0x9f1   : > { %7147 = vmatmul.bf16.gmra.mxu0 %v11195_v7  ;;  %v8161_v6 = vsub.f32 %v8033_v51, %v7106_v2 }
 0x9f2   : > { %v6450_v52 = vpop.f32.mrf.mxu2 }
 0x9f3   : > { %v8293_v32 = vadd.f32 %v18160_v56, %v8161_v6  ;;  %v6451_v29 = vadd.f32 %v6450_v52, %v6122_v58  ;;  %v6136_v51 = vpop.f32.mrf.mxu1  ;;  %v19086_v58 = vld [vmem:[#allocation65_spill] sm:$0xff] }
 0x9f4   : > { %v6791_v28 = vpop.f32.mrf.mxu3  ;;  %v8036_v6 = vmul.f32 %v7839_v12, %v19086_v58 }
 0x9f5   : > { %v8421_v11 = vmax.f32 %v8293_v32, 0.0  ;;  %v6780_v43 = vadd.f32 %v18355_v27, %v6451_v29  ;;  %v6129_v29 = vadd.f32 %v18398_v24, %v15893_v1  ;;  %v6132_v1 = vadd.f32 %v18420_v37, %v15902_v35 }
 0x9f6   : > { %v7110_v36 = vpop.f32.mrf.mxu0 }
 0x9f7   : > { %v12085_v53 = vpack.c.bf16 %v8421_v11, %v8420_v34  ;;  %8805 = vst [vmem:[#allocation3 + $0x358] sm:$0xff] %v8421_v11  ;;  %v7109_v40 = vadd.f32 %v7108_v42, %v6780_v43 }
 0x9f9   : > { %12189 = vst [vmem:[#allocation2 + $0x1a8] sm:$0xff] %v12085_v53   ;;  %v8162_v27 = vsub.f32 %v8034_v47, %v7109_v40 }
 0x9fa   : > { %v6452_v3 = vpop.f32.mrf.mxu2 }
 0x9fb   : > { %v8294_v22 = vadd.f32 %v18160_v56, %v8162_v27  ;;  %v6453_v46 = vadd.f32 %v6452_v3, %v6124_v14  ;;  %v6138_v40 = vpop.f32.mrf.mxu1  ;;  %v7849_v3 = vpop.permute.xlu1 %7848 }
 0x9fc   : > { %v6794_v11 = vpop.f32.mrf.mxu3  ;;  %v6139_v20 = vadd.f32 %v6138_v40, %v15977_v21 }
 0x9fd   : > { %v8422_v23 = vmax.f32 %v8294_v22, 0.0  ;;  %v6782_v5 = vadd.f32 %v18377_v48, %v6453_v46 }
 0x9fe   : > { %v7113_v54 = vpop.f32.mrf.mxu0 }
 0x9ff   : > { %8806 = vst [vmem:[#allocation3 + $0x360] sm:$0xff] %v8422_v23  ;;  %v7111_v44 = vadd.f32 %v7110_v36, %v6782_v5  ;;  %6494 = vmatmul.bf16.gmra.mxu2 %v11219_v41 }
 0xa01   : > { %7152 = vmatmul.bf16.gmra.mxu0 %v11227_v31  ;;  %v8163_v7 = vsub.f32 %v8035_v33, %v7111_v44  ;;  %v8038_v31 = vmul.f32 %v7849_v3, %v19088_v57 }
 0xa02   : > { %v6455_v34 = vpop.f32.mrf.mxu2 }
 0xa03   : > { %v8295_v26 = vadd.f32 %v18160_v56, %v8163_v7  ;;  %v6456_v42 = vadd.f32 %v6455_v34, %v6127_v15 }
 0xa04   : > { %v6796_v22 = vpop.f32.mrf.mxu3 }
 0xa05   : > { %v8423_v2 = vmax.f32 %v8295_v26, 0.0  ;;  %v6785_v48 = vadd.f32 %v18394_v4, %v6456_v42  ;;  %v19089_v26 = vld [vmem:[#allocation77_spill] sm:$0xff] }
 0xa06   : > { %v7115_v0 = vpop.f32.mrf.mxu0  ;;  %v8039_v42 = vmul.f32 %v7854_v45, %v19089_v26  ;;  %v19093_v26 = vld [vmem:[#allocation93_spill] sm:$0xff] }
 0xa07   : > { %v12090_v52 = vpack.c.bf16 %v8423_v2, %v8422_v23  ;;  %8807 = vst [vmem:[#allocation3 + $0x368] sm:$0xff] %v8423_v2  ;;  %v7114_v32 = vadd.f32 %v7113_v54, %v6785_v48  ;;  %v6141_v54 = vpop.f32.mrf.mxu1  ;;  %v6137_v2 = vadd.f32 %v6136_v51, %v15944_v49 }
 0xa09   : > { %12190 = vst [vmem:[#allocation2 + $0x1b0] sm:$0xff] %v12090_v52   ;;  %v8164_v10 = vsub.f32 %v8036_v6, %v7114_v32  ;;  %v7859_v6 = vpop.permute.xlu0 %7858 }
 0xa0a   : > { %v6457_v18 = vpop.f32.mrf.mxu2 }
 0xa0b   : > { %v8296_v43 = vadd.f32 %v18160_v56, %v8164_v10  ;;  %v6458_v36 = vadd.f32 %v6457_v18, %v6129_v29  ;;  %v19090_v10 = vld [vmem:[#allocation81_spill] sm:$0xff] }
 0xa0d   : > { %v8424_v47 = vmax.f32 %v8296_v43, 0.0  ;;  %v6787_v4 = vadd.f32 %v18416_v55, %v6458_v36 }
 0xa0e   : > { %v7118_v53 = vpop.f32.mrf.mxu0 }
 0xa0f   : > { %8808 = vst [vmem:[#allocation3 + $0x370] sm:$0xff] %v8424_v47  ;;  %v7116_v14 = vadd.f32 %v7115_v0, %v6787_v4  ;;  %v6143_v0 = vpop.f32.mrf.mxu1 }
 0xa11   : > { %v8165_v24 = vsub.f32 %v8037_v38, %v7116_v14  ;;  %v7874_v45 = vpop.permute.xlu0 %7873 }
 0xa12   : > { %v6460_v27 = vpop.f32.mrf.mxu2 }
 0xa13   : > { %v8297_v30 = vadd.f32 %v18160_v56, %v8165_v24  ;;  %v6461_v13 = vadd.f32 %v6460_v27, %v6132_v1  ;;  %v19091_v1 = vld [vmem:[#allocation85_spill] sm:$0xff] }
 0xa15   : > { %v8425_v46 = vmax.f32 %v8297_v30, 0.0  ;;  %v6790_v41 = vadd.f32 %v18426_v61, %v6461_v13  ;;  %v6799_v61 = vpop.f32.mrf.mxu3  ;;  %v6142_v30 = vadd.f32 %v6141_v54, %v15986_v59 }
 0xa16   : > { %v7120_v55 = vpop.f32.mrf.mxu0 }
 0xa17   : > { %v12095_v23 = vpack.c.bf16 %v8425_v46, %v8424_v47  ;;  %8809 = vst [vmem:[#allocation3 + $0x378] sm:$0xff] %v8425_v46  ;;  %v7119_v5 = vadd.f32 %v7118_v53, %v6790_v41  ;;  %v7864_v53 = vpop.permute.xlu1 %7863  ;;  %v6146_v62 = vpop.f32.mrf.mxu1 }
 0xa18   : > { %v8041_v24 = vmul.f32 %v7864_v53, %v19091_v1  ;;  %v7869_v41 = vpop.permute.xlu2 %7868 }
 0xa19   : > { %12191 = vst [vmem:[#allocation2 + $0x1b8] sm:$0xff] %v12095_v23   ;;  %v8166_v35 = vsub.f32 %v8038_v31, %v7119_v5  ;;  %v19092_v5 = vld [vmem:[#allocation89_spill] sm:$0xff] }
 0xa1a   : > { %v6462_v37 = vpop.f32.mrf.mxu2 }
 0xa1b   : > { %v8298_v33 = vadd.f32 %v18160_v56, %v8166_v35  ;;  %v6463_v44 = vadd.f32 %v6462_v37, %v6134_v16  ;;  %v6144_v37 = vadd.f32 %v6143_v0, %v16019_v8 }
 0xa1d   : > { %v8426_v15 = vmax.f32 %v8298_v33, 0.0  ;;  %v6792_v7 = vadd.f32 %v6791_v28, %v6463_v44  ;;  %v8040_v28 = vmul.f32 %v7859_v6, %v19090_v10  ;;  %v6801_v36 = vpop.f32.mrf.mxu3  ;;  %v19094_v10 = vld [vmem:[#allocation97_spill] sm:$0xff] }
 0xa1e   : > { %v7123_v34 = vpop.f32.mrf.mxu0 }
 0xa1f   : > { %8810 = vst [vmem:[#allocation3 + $0x380] sm:$0xff] %v8426_v15  ;;  %v7121_v12 = vadd.f32 %v7120_v55, %v6792_v7  ;;  %v6148_v23 = vpop.f32.mrf.mxu1 }
 0xa21   : > { %v8167_v48 = vsub.f32 %v8039_v42, %v7121_v12  ;;  %v8043_v42 = vmul.f32 %v7874_v45, %v19093_v26 }
 0xa22   : > { %v6465_v39 = vpop.f32.mrf.mxu2 }
 0xa23   : > { %v8299_v25 = vadd.f32 %v18160_v56, %v8167_v48  ;;  %v6466_v58 = vadd.f32 %v6465_v39, %v6137_v2  ;;  %v6147_v48 = vadd.f32 %v6146_v62, %v16028_v63 }
 0xa25   : > { %v8427_v52 = vmax.f32 %v8299_v25, 0.0  ;;  %v6795_v32 = vadd.f32 %v6794_v11, %v6466_v58  ;;  %v6804_v21 = vpop.f32.mrf.mxu3  ;;  %v7879_v58 = vpop.permute.xlu1 %7878 }
 0xa26   : > { %v7125_v29 = vpop.f32.mrf.mxu0 }
 0xa27   : > { %v12100_v18 = vpack.c.bf16 %v8427_v52, %v8426_v15  ;;  %8811 = vst [vmem:[#allocation3 + $0x388] sm:$0xff] %v8427_v52  ;;  %v7124_v43 = vadd.f32 %v7123_v34, %v6795_v32  ;;  %v6151_v2 = vpop.f32.mrf.mxu1 }
 0xa29   : > { %12192 = vst [vmem:[#allocation2 + $0x1c0] sm:$0xff] %v12100_v18   ;;  %v8168_v49 = vsub.f32 %v8040_v28, %v7124_v43  ;;  %v8044_v28 = vmul.f32 %v7879_v58, %v19094_v10  ;;  %v19098_v58 = vld [vmem:[#allocation115_spill] sm:$0xff] }
 0xa2a   : > { %v6467_v51 = vpop.f32.mrf.mxu2 }
 0xa2b   : > { %v8300_v47 = vadd.f32 %v18160_v56, %v8168_v49  ;;  %v6468_v4 = vadd.f32 %v6467_v51, %v6139_v20 }
 0xa2d   : > { %v8428_v38 = vmax.f32 %v8300_v47, 0.0  ;;  %v6797_v14 = vadd.f32 %v6796_v22, %v6468_v4  ;;  %v8042_v22 = vmul.f32 %v7869_v41, %v19092_v5  ;;  %v6806_v15 = vpop.f32.mrf.mxu3  ;;  %v7884_v4 = vpop.permute.xlu2 %7883 }
 0xa2e   : > { %v7128_v11 = vpop.f32.mrf.mxu0 }
 0xa2f   : > { %8812 = vst [vmem:[#allocation3 + $0x390] sm:$0xff] %v8428_v38  ;;  %v7126_v27 = vadd.f32 %v7125_v29, %v6797_v14  ;;  %v6153_v63 = vpop.f32.mrf.mxu1  ;;  %v19095_v14 = vld [vmem:[#allocation103_spill] sm:$0xff] }
 0xa31   : > { %v8169_v13 = vsub.f32 %v8041_v24, %v7126_v27  ;;  %v6152_v27 = vadd.f32 %v6151_v2, %v16070_v17 }
 0xa32   : > { %v6470_v3 = vpop.f32.mrf.mxu2 }
 0xa33   : > { %v8301_v40 = vadd.f32 %v18160_v56, %v8169_v13  ;;  %v6471_v46 = vadd.f32 %v6470_v3, %v6142_v30 }
 0xa35   : > { %v8429_v55 = vmax.f32 %v8301_v40, 0.0  ;;  %v6800_v57 = vadd.f32 %v6799_v61, %v6471_v46  ;;  %v6809_v29 = vpop.f32.mrf.mxu3 }
 0xa36   : > { %v7130_v31 = vpop.f32.mrf.mxu0 }
 0xa37   : > { %v12105_v16 = vpack.c.bf16 %v8429_v55, %v8428_v38  ;;  %8813 = vst [vmem:[#allocation3 + $0x398] sm:$0xff] %v8429_v55  ;;  %v7129_v35 = vadd.f32 %v7128_v11, %v6800_v57  ;;  %v8045_v11 = vmul.f32 %v7884_v4, %v19095_v14  ;;  %v6156_v40 = vpop.f32.mrf.mxu1  ;;  %v19096_v57 = vld [vmem:[#allocation107_spill] sm:$0xff] }
 0xa39   : > { %12193 = vst [vmem:[#allocation2 + $0x1c8] sm:$0xff] %v12105_v16   ;;  %v8170_v59 = vsub.f32 %v8042_v22, %v7129_v35  ;;  %v6154_v22 = vadd.f32 %v6153_v63, %v16103_v9  ;;  %v6157_v9 = vadd.f32 %v6156_v40, %v16112_v50 }
 0xa3a   : > { %v6472_v54 = vpop.f32.mrf.mxu2 }
 0xa3b   : > { %v8302_v33 = vadd.f32 %v18160_v56, %v8170_v59  ;;  %v6473_v44 = vadd.f32 %v6472_v54, %v6144_v37  ;;  %v18487_v37 = vld [vmem:[%s12340_s24] ss:$0 sm:$0xff]  ;;  %v7894_v54 = vpop.permute.xlu1 %7893  ;;  %s12292_s24 = smov [#allocation3]  }
 0xa3c   : > { %s8831_s23 = sshll.u32 %s12292_s24, 4  ;;  %s8832_s23 = int_to_ptr.vmem [resolvable:$true] %s8831_s23 }
 0xa3d   : > { %v8430_v7 = vmax.f32 %v8302_v33, 0.0  ;;  %v6802_v34 = vadd.f32 %v6801_v36, %v6473_v44  ;;  %v6149_v36 = vadd.f32 %v6148_v23, %v16061_v19  ;;  %v6811_v24 = vpop.f32.mrf.mxu3 }
 0xa3e   : > { %v7133_v61 = vpop.f32.mrf.mxu0 }
 0xa3f   : > { %8814 = vst [vmem:[#allocation3 + $0x3a0] sm:$0xff] %v8430_v7  ;;  %v7131_v12 = vadd.f32 %v7130_v31, %v6802_v34 }
 0xa41   : > { %v8171_v39 = vsub.f32 %v8043_v42, %v7131_v12 }
 0xa42   : > { %v6475_v8 = vpop.f32.mrf.mxu2 }
 0xa43   : > { %v8303_v0 = vadd.f32 %v18160_v56, %v8171_v39  ;;  %v6476_v25 = vadd.f32 %v6475_v8, %v6147_v48  ;;  %v7899_v48 = vpop.permute.xlu2 %7898 }
 0xa45   : > { %v8431_v6 = vmax.f32 %v8303_v0, 0.0  ;;  %v6805_v52 = vadd.f32 %v6804_v21, %v6476_v25  ;;  %v7889_v21 = vpop.permute.xlu0 %7888  ;;  %v6814_v35 = vpop.f32.mrf.mxu3 }
 0xa46   : > { %v7135_v32 = vpop.f32.mrf.mxu0  ;;  %v8046_v31 = vmul.f32 %v7889_v21, %v19096_v57 }
 0xa47   : > { %v12110_v18 = vpack.c.bf16 %v8431_v6, %v8430_v7  ;;  %8815 = vst [vmem:[#allocation3 + $0x3a8] sm:$0xff] %v8431_v6  ;;  %v7134_v43 = vadd.f32 %v7133_v61, %v6805_v52  ;;  %v19097_v7 = vld [vmem:[#allocation111_spill] sm:$0xff]  ;;  %v8048_v6 = vmul.f32 %v7899_v48, %v19098_v58  ;;  %v19106_v58 = vld [vmem:[#allocation225_spill] sm:$0xff] }
 0xa48   : > { %v8047_v34 = vmul.f32 %v7894_v54, %v19097_v7 }
 0xa49   : > { %12194 = vst [vmem:[#allocation2 + $0x1d0] sm:$0xff] %v12110_v18   ;;  %v8172_v20 = vsub.f32 %v8044_v28, %v7134_v43 }
 0xa4a   : > { %v6477_v49 = vpop.f32.mrf.mxu2 }
 0xa4b   : > { %v8304_v51 = vadd.f32 %v18160_v56, %v8172_v20  ;;  %v6478_v47 = vadd.f32 %v6477_v49, %v6149_v36 }
 0xa4d   : > { %v8432_v53 = vmax.f32 %v8304_v51, 0.0  ;;  %v6807_v62 = vadd.f32 %v6806_v15, %v6478_v47  ;;  %v6158_v15 = vpop.f32.mrf.mxu1  ;;  %v6816_v39 = vpop.f32.mrf.mxu3  ;;  %v19099_v51 = vld [vmem:[#allocation121_spill] sm:$0xff] }
 0xa4e   : > { %v7138_v38 = vpop.f32.mrf.mxu0  ;;  %v6159_v10 = vadd.f32 %v6158_v15, %v16145_v60  ;;  %v7904_v36 = vpop.permute.xlu0 %7903 }
 0xa4f   : > { %8816 = vst [vmem:[#allocation3 + $0x3b0] sm:$0xff] %v8432_v53  ;;  %v7136_v1 = vadd.f32 %v7135_v32, %v6807_v62  ;;  %v8049_v47 = vmul.f32 %v7904_v36, %v19099_v51  ;;  %v19100_v62 = vld [vmem:[#allocation222_spill] sm:$0xff] }
 0xa51   : > { %v8173_v30 = vsub.f32 %v8045_v11, %v7136_v1 }
 0xa52   : > { %v6480_v19 = vpop.f32.mrf.mxu2 }
 0xa53   : > { %v8305_v13 = vadd.f32 %v18160_v56, %v8173_v30  ;;  %v6481_v3 = vadd.f32 %v6480_v19, %v6152_v27  ;;  %v7909_v27 = vpop.permute.xlu1 %7908 }
 0xa55   : > { %v8433_v46 = vmax.f32 %v8305_v13, 0.0  ;;  %v6810_v41 = vadd.f32 %v6809_v29, %v6481_v3  ;;  %v6161_v29 = vpop.f32.mrf.mxu1  ;;  %v6819_v49 = vpop.f32.mrf.mxu3  ;;  %v19101_v13 = vld [vmem:[#allocation125_spill] sm:$0xff] }
 0xa56   : > { %v7140_v55 = vpop.f32.mrf.mxu0  ;;  %v8050_v3 = vmul.f32 %v7909_v27, %v19101_v13 }
 0xa57   : > { %v12115_v23 = vpack.c.bf16 %v8433_v46, %v8432_v53  ;;  %8817 = vst [vmem:[#allocation3 + $0x3b8] sm:$0xff] %v8433_v46  ;;  %v7139_v5 = vadd.f32 %v7138_v38, %v6810_v41  ;;  %v6162_v38 = vadd.f32 %v6161_v29, %v19100_v62  ;;  %v19102_v41 = vld [vmem:[#allocation223_spill] sm:$0xff] }
 0xa59   : > { %12195 = vst [vmem:[#allocation2 + $0x1d8] sm:$0xff] %v12115_v23   ;;  %v8174_v17 = vsub.f32 %v8046_v31, %v7139_v5 }
 0xa5a   : > { %v6482_v16 = vpop.f32.mrf.mxu2 }
 0xa5b   : > { %v8306_v56 = vadd.f32 %v18487_v37, %v8174_v17  ;;  %v6483_v59 = vadd.f32 %v6482_v16, %v6154_v22  ;;  %v7914_v17 = vpop.permute.xlu2 %7913 }
 0xa5d   : > { %v8434_v33 = vmax.f32 %v8306_v56, 0.0  ;;  %v6812_v44 = vadd.f32 %v6811_v24, %v6483_v59  ;;  %v6163_v11 = vpop.f32.mrf.mxu1  ;;  %v6821_v46 = vpop.f32.mrf.mxu3  ;;  %v19103_v59 = vld [vmem:[#allocation129_spill] sm:$0xff] }
 0xa5e   : > { %v7143_v45 = vpop.f32.mrf.mxu0  ;;  %v8051_v54 = vmul.f32 %v7914_v17, %v19103_v59 }
 0xa5f   : > { %8818 = vst [vmem:[#allocation3 + $0x3c0] sm:$0xff] %v8434_v33  ;;  %v7141_v61 = vadd.f32 %v7140_v55, %v6812_v44  ;;  %v6164_v55 = vadd.f32 %v6163_v11, %v19102_v41  ;;  %v19104_v44 = vld [vmem:[#allocation224_spill] sm:$0xff] }
 0xa61   : > { %v8175_v26 = vsub.f32 %v8047_v34, %v7141_v61 }
 0xa62   : > { %v6485_v42 = vpop.f32.mrf.mxu2 }
 0xa63   : > { %v8307_v12 = vadd.f32 %v18487_v37, %v8175_v26  ;;  %v6486_v2 = vadd.f32 %v6485_v42, %v6157_v9  ;;  %v7919_v26 = vpop.permute.xlu0 %7918 }
 0xa65   : > { %v8435_v8 = vmax.f32 %v8307_v12, 0.0  ;;  %v6815_v0 = vadd.f32 %v6814_v35, %v6486_v2  ;;  %v6166_v16 = vpop.f32.mrf.mxu1  ;;  %v6824_v34 = vpop.f32.mrf.mxu3 }
 0xa66   : > { %v7145_v25 = vpop.f32.mrf.mxu0 }
 0xa67   : > { %v12120_v52 = vpack.c.bf16 %v8435_v8, %v8434_v33  ;;  %8819 = vst [vmem:[#allocation3 + $0x3c8] sm:$0xff] %v8435_v8  ;;  %v7144_v32 = vadd.f32 %v7143_v45, %v6815_v0  ;;  %v6167_v45 = vadd.f32 %v6166_v16, %v19104_v44 }
 0xa69   : > { %12196 = vst [vmem:[#allocation2 + $0x1e0] sm:$0xff] %v12120_v52   ;;  %v8176_v50 = vsub.f32 %v8048_v6, %v7144_v32 }
 0xa6a   : > { %v6487_v28 = vpop.f32.mrf.mxu2 }
 0xa6b   : > { %v8308_v18 = vadd.f32 %v18487_v37, %v8176_v50  ;;  %v6488_v43 = vadd.f32 %v6487_v28, %v6159_v10  ;;  %v7924_v50 = vpop.permute.xlu1 %7923 }
 0xa6d   : > { %v8436_v20 = vmax.f32 %v8308_v18, 0.0  ;;  %v6817_v63 = vadd.f32 %v6816_v39, %v6488_v43  ;;  %v6168_v48 = vpop.f32.mrf.mxu1  ;;  %v19105_v39 = vld [vmem:[#allocation131_spill] sm:$0xff]  ;;  %v6826_v28 = vpop.f32.mrf.mxu3 }
 0xa6e   : > { %v7148_v53 = vpop.f32.mrf.mxu0  ;;  %v8052_v8 = vmul.f32 %v7919_v26, %v19105_v39  ;;  %v6169_v6 = vadd.f32 %v6168_v48, %v19106_v58 }
 0xa6f   : > { %8820 = vst [vmem:[#allocation3 + $0x3d0] sm:$0xff] %v8436_v20  ;;  %v7146_v4 = vadd.f32 %v7145_v25, %v6817_v63 }
 0xa71   : > { %v8177_v14 = vsub.f32 %v8049_v47, %v7146_v4 }
 0xa72   : > { %v6490_v60 = vpop.f32.mrf.mxu2 }
 0xa73   : > { %v8309_v1 = vadd.f32 %v18487_v37, %v8177_v14  ;;  %v6491_v24 = vadd.f32 %v6490_v60, %v6162_v38 }
 0xa75   : > { %v8437_v30 = vmax.f32 %v8309_v1, 0.0  ;;  %v6820_v19 = vadd.f32 %v6819_v49, %v6491_v24 }
 0xa76   : > { %v7150_v23 = vpop.f32.mrf.mxu0 }
 0xa77   : > { %v12125_v21 = vpack.c.bf16 %v8437_v30, %v8436_v20  ;;  %8821 = vst [vmem:[#allocation3 + $0x3d8] sm:$0xff] %v8437_v30  ;;  %v7149_v40 = vadd.f32 %v7148_v53, %v6820_v19  ;;  %v19107_v20 = vld [vmem:[#allocation133_spill] sm:$0xff] }
 0xa78   : > { %v8053_v63 = vmul.f32 %v7924_v50, %v19107_v20 }
 0xa79   : > { %12197 = vst [vmem:[#allocation2 + $0x1e8] sm:$0xff] %v12125_v21   ;;  %v8178_v57 = vsub.f32 %v8050_v3, %v7149_v40 }
 0xa7a   : > { %v6492_v31 = vpop.f32.mrf.mxu2 }
 0xa7b   : > { %v8310_v5 = vadd.f32 %v18487_v37, %v8178_v57  ;;  %v6493_v22 = vadd.f32 %v6492_v31, %v6164_v55 }
 0xa7d   : > { %v8438_v35 = vmax.f32 %v8310_v5, 0.0  ;;  %v6822_v56 = vadd.f32 %v6821_v46, %v6493_v22 }
 0xa7e   : > { %v7153_v42 = vpop.f32.mrf.mxu0 }
 0xa7f   : > { %8822 = vst [vmem:[#allocation3 + $0x3e0] sm:$0xff] %v8438_v35  ;;  %v7151_v33 = vadd.f32 %v7150_v23, %v6822_v56 }
 0xa81   : > { %v8179_v15 = vsub.f32 %v8051_v54, %v7151_v33 }
 0xa82   : > { %v6495_v7 = vpop.f32.mrf.mxu2 }
 0xa83   : > { %v8311_v61 = vadd.f32 %v18487_v37, %v8179_v15  ;;  %v6496_v9 = vadd.f32 %v6495_v7, %v6167_v45 }
 0xa85   : > { %v8439_v12 = vmax.f32 %v8311_v61, 0.0  ;;  %v6825_v2 = vadd.f32 %v6824_v34, %v6496_v9 }
 0xa86   : > { %v7155_v36 = vpop.f32.mrf.mxu0 }
 0xa87   : > { %v12130_v0 = vpack.c.bf16 %v8439_v12, %v8438_v35  ;;  %8823 = vst [vmem:[#allocation3 + $0x3e8] sm:$0xff] %v8439_v12  ;;  %v7154_v25 = vadd.f32 %v7153_v42, %v6825_v2 }
 0xa89   : > { %12198 = vst [vmem:[#allocation2 + $0x1f0] sm:$0xff] %v12130_v0   ;;  %v8180_v52 = vsub.f32 %v8052_v8, %v7154_v25 }
 0xa8a   : > { %v6497_v32 = vpop.f32.mrf.mxu2 }
 0xa8b   : > { %v8312_v29 = vadd.f32 %v18487_v37, %v8180_v52  ;;  %v6498_v10 = vadd.f32 %v6497_v32, %v6169_v6 }
 0xa8d   : > { %v8440_v18 = vmax.f32 %v8312_v29, 0.0  ;;  %v6827_v43 = vadd.f32 %v6826_v28, %v6498_v10 }
 0xa8f   : > { %8824 = vst [vmem:[#allocation3 + $0x3f0] sm:$0xff] %v8440_v18  ;;  %v7156_v49 = vadd.f32 %v7155_v36, %v6827_v43 }
 0xa91   : > { %v8181_v51 = vsub.f32 %v8053_v63, %v7156_v49 }
 0xa93   : > { %v8313_v47 = vadd.f32 %v18487_v37, %v8181_v51 }
 0xa95   : > { %v8441_v4 = vmax.f32 %v8313_v47, 0.0 }
 0xa97   : > { %v12135_v53 = vpack.c.bf16 %v8441_v4, %v8440_v18  ;;  %8825 = vst [vmem:[#allocation3 + $0x3f8] sm:$0xff] %v8441_v4 }
 0xa98   : > { %12225 = dma.vmem_to_hbm [thread:$0]  (%p12228_p5), %s8832_s23, 16384, %s8834_s28, [#allocation4], %s12293_s29, %s12293_s29, %s12294_s30  }
 0xa99   : > { %12199 = vst [vmem:[#allocation2 + $0x1f8] sm:$0xff] %v12135_v53  }
 0xa9a   : > { %12284 = dma.done.wait (%p12228_p5), [#allocation4], 16384  }
 0xa9b   : > { %12286 = vsyncadd (%p12228_p5), [#allocation4], 4294950912 }
 0xa9c PF: > { %s16_s18 = sadd.s32 1, %s12289_s18  }
 0xa9d   : > { %p13_p6 = scmp.ge.s32.totalorder %s16_s18, 5  }
 0xa9f   :  { %15 = sbr.rel (!%p13_p6) target bundleno = 1 (0x1), region = 74 }
 0xaa4   :  { %8850 = vsyncpa [#allocation4], 1 }
 0xaa5   :  { %8852 = vsyncpa [#allocation4 + $0x1], 1 }

</bundles_post_ra>
